<compile_context>
chip_gen: v6e
topology: v6e:2x2x1
jax: 0.10.0
libtpu: 0.0.40
codegen_flags: <defaults>
</compile_context>

<pallas_src>
from functools import partial, lru_cache

import jax
import jax.numpy as jnp
from jax import lax
from jax.experimental import pallas as pl
from jax.experimental.pallas import tpu as pltpu

# VGG19 "features" configuration (torchvision cfg 'E', no batch-norm).
VGG19_CFG = [64, 64, "M", 128, 128, "M", 256, 256, 256, 256, "M",
             512, 512, 512, 512, "M", 512, 512, 512, 512, "M"]


def build_vgg19_feature_layers():
    layers = []
    cin = 3
    for v in VGG19_CFG:
        if v == "M":
            layers.append(("maxpool",))
        else:
            layers.append(("conv", cin, v))
            layers.append(("relu",))
            cin = v
    return layers


def truncate_layers(i, j):
    """Mirrors TruncatedVGG19.__init__ truncation logic exactly."""
    layers = build_vgg19_feature_layers()
    maxpool_counter = 0
    conv_counter = 0
    truncate_at = 0
    for layer in layers:
        truncate_at += 1
        if layer[0] == "conv":
            conv_counter += 1
        if layer[0] == "maxpool":
            maxpool_counter += 1
            conv_counter = 0
        if maxpool_counter == i - 1 and conv_counter == j:
            break
    return layers[: truncate_at + 1]


# ---------------------------------------------------------------------------
# Generation-aware sizing helpers
# ---------------------------------------------------------------------------

@lru_cache(maxsize=1)
def _tpu_defaults():
    """(vmem capacity bytes, preferred Cout tile).  Conservative defaults on failure."""
    vmem_cap = 64 * 1024 * 1024          # safe floor (v7x has 64 MiB per TensorCore)
    mxu_n = 256                          # v6e / v7x MXU is 2 x 256^2
    try:
        info = pltpu.get_tpu_info()
        vmem_cap = int(getattr(info, "vmem_capacity_bytes", vmem_cap))
        ver = str(getattr(info, "chip_version", "")).lower()
        if "5" in ver:                   # v5e / v5p: 4 x 128^2 MXU -> 128-wide tiles
            mxu_n = 128
    except Exception:
        pass
    return vmem_cap, mxu_n


def _largest_divisor_leq(n, cap):
    cap = max(1, min(n, int(cap)))
    for d in range(cap, 0, -1):
        if n % d == 0:
            return d
    return 1


def _pick_row_tile(H, W, Cin, Cout, tc, packed, vmem_cap):
    """Largest row tile whose per-step footprint (dbuf I/O + scratch + acc) fits."""
    budget = max(vmem_cap // 5, 4 * 1024 * 1024)
    # th-independent: double-buffered weights + bias + the two 1-row halos.
    fixed = 2 * 9 * Cin * tc * 2 + 2 * tc * 4 + 4 * W * Cin * 2
    scratch_c = 3 * Cin if packed else Cin
    # per image row: x dbuf, out dbuf, bf16 scratch row, f32 acc row, one f32 q temp row.
    per_row = W * (2 * Cin * 2 + 2 * tc * 2 + scratch_c * 2 + tc * 4 + tc * 4)
    cap = max(1, (budget - fixed) // max(1, per_row))
    return _largest_divisor_leq(H, cap)


# ---------------------------------------------------------------------------
# Conv 3x3 / stride 1 / pad 1 kernels (activations flattened to (N, H*W, C))
# ---------------------------------------------------------------------------

def _column_tap_epilogue(acc_ref, o_ref, b_ref, q_fn, m, W, apply_relu):
    """Shared epilogue: centre tap + bias, then the +/-1 column taps shifted on the
    output side (f32 row shift + iota border mask), ReLU, bf16 store."""
    tc = o_ref.shape[-1]
    col = lax.broadcasted_iota(jnp.int32, (m, 1), 0) % W
    zrow = jnp.zeros((1, tc), jnp.float32)

    # kx = 1 (centre column): no shift, accumulator initialised with bias (no zero-init).
    acc_ref[...] = q_fn(1) + b_ref[...]
    # kx = 0 (input col w-1): out[r] += q0[r-1], masked where w == 0.
    q0 = q_fn(0)
    acc_ref[...] += jnp.where(col != 0,
                              jnp.concatenate([zrow, q0[: m - 1]], axis=0), 0.0)
    # kx = 2 (input col w+1): out[r] += q2[r+1], masked where w == W-1.
    q2 = q_fn(2)
    acc_ref[...] += jnp.where(col != W - 1,
                              jnp.concatenate([q2[1:], zrow], axis=0), 0.0)

    out = acc_ref[...]
    if apply_relu:
        out = jnp.maximum(out, 0.0)
    o_ref[0] = out.astype(o_ref.dtype)


def _conv3x3_packed_kernel(top_ref, x_ref, bot_ref, w_ref, b_ref, o_ref,
                           pk_ref, acc_ref, *, W, apply_relu):
    # top/bot: (1, W, Cin) bf16 halo rows (clamped fetch, zeroed at the image border)
    # x_ref  : (1, TH*W, Cin) bf16;  w_ref: (3, 3*Cin, TC) bf16 (dy packed);  b: (1,TC) f32
    # pk_ref : VMEM (TH*W, 3*Cin) bf16 dy-packed tile;  acc_ref: VMEM (TH*W, TC) f32
    h_idx = pl.program_id(2)
    n_h = pl.num_programs(2)
    m = o_ref.shape[1]
    cin = pk_ref.shape[1] // 3

    x_flat = x_ref[0]
    top_row = jnp.where(h_idx > 0, top_ref[0], 0)
    bot_row = jnp.where(h_idx < n_h - 1, bot_ref[0], 0)

    # dy-packed assembly: pk[r, dy*Cin + c] = x[row(r) + dy - 1, col(r), c].
    # All stores are row-offset (multiples of W) / lane-offset (multiples of Cin, with
    # Cin % 128 == 0 on this path) aligned -- no padded copies, no f32 upcasts.
    pk_ref[:, cin:2 * cin] = x_flat
    pk_ref[0:W, 0:cin] = top_row
    pk_ref[m - W:m, 2 * cin:3 * cin] = bot_row
    if m > W:
        pk_ref[W:m, 0:cin] = x_flat[0:m - W]
        pk_ref[0:m - W, 2 * cin:3 * cin] = x_flat[W:m]

    pk = pk_ref[...]

    def q(d):  # one deep matmul (K = 3*Cin) per kernel column
        return jnp.dot(pk, w_ref[d], preferred_element_type=jnp.float32)

    _column_tap_epilogue(acc_ref, o_ref, b_ref, q, m, W, apply_relu)


def _conv3x3_kernel(top_ref, x_ref, bot_ref, w_ref, b_ref, o_ref,
                    hal_ref, acc_ref, *, W, apply_relu):
    # Shallow-Cin path (Cin % 128 != 0): haloed flat tile + 9 matmuls of K = Cin.
    # hal_ref: VMEM ((TH+2)*W, Cin) bf16;  w_ref: (9, Cin, TC) bf16 indexed [kx*3 + ky]
    h_idx = pl.program_id(2)
    n_h = pl.num_programs(2)
    m = o_ref.shape[1]

    top_row = jnp.where(h_idx > 0, top_ref[0], 0)
    bot_row = jnp.where(h_idx < n_h - 1, bot_ref[0], 0)
    hal_ref[0:W, :] = top_row
    hal_ref[W:W + m, :] = x_ref[0]
    hal_ref[W + m:W + m + W, :] = bot_row

    def q(d):  # sum over the three dy taps (aligned row-offset ref slices)
        r = jnp.dot(hal_ref[0:m, :], w_ref[d * 3 + 0],
                    preferred_element_type=jnp.float32)
        r = r + jnp.dot(hal_ref[W:W + m, :], w_ref[d * 3 + 1],
                        preferred_element_type=jnp.float32)
        r = r + jnp.dot(hal_ref[2 * W:2 * W + m, :], w_ref[d * 3 + 2],
                        preferred_element_type=jnp.float32)
        return r

    _column_tap_epilogue(acc_ref, o_ref, b_ref, q, m, W, apply_relu)


def conv3x3(x, w, b, apply_relu, row_tile=None, col_tile=None):
    """x: (N, H, W, Cin) bf16 NHWC.  w: (3, 3*Cin, Cout) (dy-packed) or (9, Cin, Cout)
    bf16.  b: (1, Cout) f32.  Returns (N, H, W, Cout) bf16."""
    N, H, W, Cin = x.shape
    Cout = w.shape[-1]
    packed = (w.shape[0] == 3)
    assert W % 8 == 0 or H == 1, "feature-map width must be a multiple of 8"

    vmem_cap, mxu_n = _tpu_defaults()
    tc = col_tile if col_tile is not None else min(Cout, mxu_n)
    th = row_tile if row_tile is not None else _pick_row_tile(
        H, W, Cin, Cout, tc, packed, vmem_cap)
    assert H % th == 0 and Cout % tc == 0
    assert tc == Cout or tc % 128 == 0, "Cout tile must be lane-aligned"
    n_co, n_h = Cout // tc, H // th
    m = th * W

    x2 = x.reshape(N, H * W, Cin)          # free: rows flattened, channels on lanes

    def top_map(n, c, h):                  # 1-row halo fetched straight from x (clamped)
        return (n, jnp.maximum(h * th - 1, 0), 0)

    def bot_map(n, c, h):
        return (n, jnp.minimum(h * th + th, H - 1), 0)

    kernel = partial(_conv3x3_packed_kernel if packed else _conv3x3_kernel,
                     W=W, apply_relu=apply_relu)
    scratch_shape = (m, 3 * Cin) if packed else (m + 2 * W, Cin)

    flops = 2 * N * H * W * Cin * Cout * 9
    bytes_accessed = (N * H * W * (Cin + Cout)) * 2 + N * w.size * 2 + Cout * 4

    out2 = pl.pallas_call(
        kernel,
        out_shape=jax.ShapeDtypeStruct((N, H * W, Cout), jnp.bfloat16),
        grid_spec=pltpu.PrefetchScalarGridSpec(
            num_scalar_prefetch=0,
            grid=(N, n_co, n_h),                       # rows innermost: weights reused
            in_specs=[
                pl.BlockSpec((1, W, Cin), top_map),                        # top halo row
                pl.BlockSpec((1, m, Cin), lambda n, c, h: (n, h, 0)),      # main rows
                pl.BlockSpec((1, W, Cin), bot_map),                        # bottom halo row
                pl.BlockSpec((w.shape[0], w.shape[1], tc),
                             lambda n, c, h: (0, 0, c)),                   # weights (bf16)
                pl.BlockSpec((1, tc), lambda n, c, h: (0, c)),             # bias (f32)
            ],
            out_specs=pl.BlockSpec((1, m, tc), lambda n, c, h: (n, h, c)),
            scratch_shapes=[
                pltpu.VMEM(scratch_shape, jnp.bfloat16),   # bf16 haloed / dy-packed tile
                pltpu.VMEM((m, tc), jnp.float32),          # f32 accumulator
            ],
        ),
        compiler_params=pltpu.CompilerParams(
            dimension_semantics=("parallel", "parallel", "parallel"),
            vmem_limit_bytes=vmem_cap // 2,
        ),
        cost_estimate=pl.CostEstimate(flops=flops, transcendentals=0,
                                      bytes_accessed=bytes_accessed),
    )(x2, x2, x2, w, b)
    return out2.reshape(N, H, W, Cout)


# ---------------------------------------------------------------------------
# MaxPool 2x2 / stride 2
# ---------------------------------------------------------------------------

def _maxpool2x2_kernel(x_ref, o_ref):
    # x_ref: (1, tho, 2, Wo, 2*C) bf16 (W pairs lane-folded by a free wrapper reshape)
    # o_ref: (1, tho, Wo, C)
    c = o_ref.shape[-1]
    x = x_ref[0]
    v = jnp.maximum(x[:, 0], x[:, 1])              # vertical pair max (bf16, no upcast)
    o_ref[0] = jnp.maximum(v[..., :c], v[..., c:])  # horizontal pair max


def maxpool2x2(x):
    # x: (N, H, W, C) NHWC -> (N, H//2, W//2, C), PyTorch floor semantics.
    N, H, W, C = x.shape
    Ho, Wo = H // 2, W // 2
    x = x[:, : Ho * 2, : Wo * 2, :]
    xr = x.reshape(N, Ho, 2, Wo, 2 * C)            # free row-major reshape
    vmem_cap, _ = _tpu_defaults()
    per_row = 2 * (2 * Wo * 2 * C * 2) + 2 * (Wo * C * 2)
    tho = _largest_divisor_leq(Ho, max(vmem_cap // 8, 2 * 1024 * 1024) // max(1, per_row))
    return pl.pallas_call(
        _maxpool2x2_kernel,
        out_shape=jax.ShapeDtypeStruct((N, Ho, Wo, C), x.dtype),
        grid_spec=pltpu.PrefetchScalarGridSpec(
            num_scalar_prefetch=0,
            grid=(N, Ho // tho),
            in_specs=[pl.BlockSpec((1, tho, 2, Wo, 2 * C),
                                   lambda n, h: (n, h, 0, 0, 0))],
            out_specs=pl.BlockSpec((1, tho, Wo, C), lambda n, h: (n, h, 0, 0)),
        ),
        compiler_params=pltpu.CompilerParams(
            dimension_semantics=("parallel", "parallel")),
    )(xr)


# ---------------------------------------------------------------------------
# Parameters / module
# ---------------------------------------------------------------------------

def _init_conv(key, cin, cout):
    kw, kb = jax.random.split(key)
    # PyTorch Conv2d shapes: weight (Cout, Cin, 3, 3), bias (Cout,)
    w = jax.random.normal(kw, (cout, cin, 3, 3), jnp.float32) * jnp.sqrt(2.0 / (9 * cin))
    b = jax.random.normal(kb, (cout,), jnp.float32) * 0.01
    wt = jnp.transpose(w, (3, 2, 1, 0))            # (kx, ky, Cin, Cout)
    if cin % 128 == 0:                             # dy-packed layout: (kx, ky*Cin+ci, co)
        wk = wt.reshape(3, 3 * cin, cout)
    else:                                          # unpacked layout: (kx*3+ky, ci, co)
        wk = wt.reshape(9, cin, cout)
    return wk.astype(jnp.bfloat16), b.reshape(1, cout)


def init_params(layers, key):
    params = []
    for layer in layers:
        if layer[0] == "conv":
            _, cin, cout = layer
            key, sub = jax.random.split(key)
            params.append(_init_conv(sub, cin, cout))
        else:
            params.append(None)
    return params


class TruncatedVGG19:
    def __init__(self, i, j, key):
        self.layers = truncate_layers(i, j)
        self.params = init_params(self.layers, key)

    def __call__(self, x_nchw):
        x = jnp.transpose(x_nchw, (0, 2, 3, 1)).astype(jnp.bfloat16)   # NCHW -> NHWC bf16
        idx, n_layers = 0, len(self.layers)
        while idx < n_layers:
            layer = self.layers[idx]
            if layer[0] == "conv":
                w, b = self.params[idx]
                fuse = (idx + 1 < n_layers and self.layers[idx + 1][0] == "relu")
                x = conv3x3(x, w, b, apply_relu=fuse)
                idx += 2 if fuse else 1
            elif layer[0] == "relu":
                # TODO(synk): never reached for VGG19 (every conv fuses its ReLU).
                x = jnp.maximum(x, 0)
                idx += 1
            else:  # maxpool
                x = maxpool2x2(x)
                idx += 1
        return jnp.transpose(x, (0, 3, 1, 2)).astype(jnp.float32)      # NHWC -> NCHW


# ---------------------------------------------------------------------------
# Pure-JAX reference (numerical validation of the kernels)
# ---------------------------------------------------------------------------

def _kernel_weight_to_hwio(wk):
    cin = wk.shape[1] // 3 if wk.shape[0] == 3 else wk.shape[1]
    cout = wk.shape[2]
    w4 = wk.reshape(3, 3, cin, cout)               # (kx, ky, ci, co) for both layouts
    return jnp.transpose(w4, (1, 0, 2, 3))         # HWIO = (ky, kx, ci, co)


def _ref_conv3x3(x_bf16, wk, b_f32, apply_relu):
    w_hwio = _kernel_weight_to_hwio(wk).astype(jnp.float32)
    y = lax.conv_general_dilated(x_bf16.astype(jnp.float32), w_hwio,
                                 window_strides=(1, 1), padding="SAME",
                                 dimension_numbers=("NHWC", "HWIO", "NHWC"))
    y = y + b_f32.reshape(1, 1, 1, -1)
    if apply_relu:
        y = jnp.maximum(y, 0.0)
    return y.astype(jnp.bfloat16)


def _ref_maxpool2x2(x):
    N, H, W, C = x.shape
    Ho, Wo = H // 2, W // 2
    return x[:, : Ho * 2, : Wo * 2, :].reshape(N, Ho, 2, Wo, 2, C).max(axis=(2, 4))


def _ref_forward(x_nchw, layers, params):
    x = jnp.transpose(x_nchw, (0, 2, 3, 1)).astype(jnp.bfloat16)
    idx, n_layers = 0, len(layers)
    while idx < n_layers:
        layer = layers[idx]
        if layer[0] == "conv":
            w, b = params[idx]
            fuse = (idx + 1 < n_layers and layers[idx + 1][0] == "relu")
            x = _ref_conv3x3(x, w, b, apply_relu=fuse)
            idx += 2 if fuse else 1
        elif layer[0] == "relu":
            x = jnp.maximum(x, 0)
            idx += 1
        else:
            x = _ref_maxpool2x2(x)
            idx += 1
    return jnp.transpose(x, (0, 3, 1, 2)).astype(jnp.float32)


if __name__ == "__main__":
    key = jax.random.PRNGKey(0)
    key, kx, kt = jax.random.split(key, 3)
    # PyTorch-convention input: NCHW, 3-channel image
    x = jax.random.normal(kx, (2, 3, 16, 16), jnp.float32)

    # Truncate at (i=2, j=2): conv1_1+relu, conv1_2+relu, maxpool,
    # conv2_1+relu, conv2_2+relu  -> output (N, 128, 8, 8).
    model = TruncatedVGG19(i=2, j=2, key=key)
    out = jax.block_until_ready(jax.jit(lambda inp: model(inp))(x))
    assert out.shape == (2, 128, 8, 8), out.shape
    assert bool(jnp.all(out >= 0.0))  # truncated net ends in a ReLU

    # Numerical parity with a pure-JAX (XLA conv) reference on the same bf16 params.
    ref = jax.block_until_ready(_ref_forward(x, model.layers, model.params))
    scale = float(jnp.max(jnp.abs(ref))) + 1e-6
    err = float(jnp.max(jnp.abs(out - ref)))
    assert err <= 5e-2 * scale + 1e-3, (err, scale)

    # Exercise the row-tile / Cout-tile / halo machinery of both conv paths.
    k1, k2, k3, k4 = jax.random.split(kt, 4)
    # (a) shallow-Cin (unpacked, K=Cin) path with 4 row tiles and 2 Cout tiles.
    xs = jax.random.normal(k1, (1, 16, 16, 8), jnp.float32).astype(jnp.bfloat16)
    wk_u, b_u = _init_conv(k2, 8, 256)
    got = jax.block_until_ready(
        conv3x3(xs, wk_u, b_u, apply_relu=True, row_tile=4, col_tile=128))
    want = _ref_conv3x3(xs, wk_u, b_u, apply_relu=True)
    s = float(jnp.max(jnp.abs(want.astype(jnp.float32)))) + 1e-6
    e = float(jnp.max(jnp.abs(got.astype(jnp.float32) - want.astype(jnp.float32))))
    assert e <= 3e-2 * s + 1e-3, (e, s)

    # (b) deep-Cin (dy-packed, K=3*Cin) path with 4 row tiles and 2 Cout tiles.
    xp = jax.random.normal(k3, (1, 16, 16, 128), jnp.float32).astype(jnp.bfloat16)
    wk_p, b_p = _init_conv(k4, 128, 256)
    got = jax.block_until_ready(
        conv3x3(xp, wk_p, b_p, apply_relu=True, row_tile=4, col_tile=128))
    want = _ref_conv3x3(xp, wk_p, b_p, apply_relu=True)
    s = float(jnp.max(jnp.abs(want.astype(jnp.float32)))) + 1e-6
    e = float(jnp.max(jnp.abs(got.astype(jnp.float32) - want.astype(jnp.float32))))
    assert e <= 3e-2 * s + 1e-3, (e, s)

    print("KERNEL_OK")
</pallas_src>

<mosaic_0001>
module attributes {stable_mosaic.version = 11 : i64} {
  func.func @_conv3x3_kernel(%arg0: i32, %arg1: i32, %arg2: i32, %arg3: memref<1x16x64xbf16, #tpu.memory_space<vmem>>, %arg4: memref<1x256x64xbf16, #tpu.memory_space<vmem>>, %arg5: memref<1x16x64xbf16, #tpu.memory_space<vmem>>, %arg6: memref<9x64x64xbf16, #tpu.memory_space<vmem>>, %arg7: memref<1x64xf32, #tpu.memory_space<vmem>>, %arg8: memref<1x256x64xbf16, #tpu.memory_space<vmem>>, %arg9: memref<288x64xbf16, #tpu.memory_space<vmem>>, %arg10: memref<256x64xf32, #tpu.memory_space<vmem>>) attributes {dimension_semantics = [#tpu.dimension_semantics<parallel>, #tpu.dimension_semantics<parallel>, #tpu.dimension_semantics<parallel>], iteration_bounds = array<i64: 2, 1, 1>, scalar_prefetch = 0 : i64, scratch_operands = 2 : i64, tpu.core_type = #tpu.core_type<tc>, window_params = [{transform_indices = @transform_0, window_bounds = array<i64: 1, 16, 64>}, {transform_indices = @transform_1, window_bounds = array<i64: 1, 256, 64>}, {transform_indices = @transform_2, window_bounds = array<i64: 1, 16, 64>}, {transform_indices = @transform_3, window_bounds = array<i64: 9, 64, 64>}, {transform_indices = @transform_4, window_bounds = array<i64: 1, 64>}, {transform_indices = @transform_5, window_bounds = array<i64: 1, 256, 64>}]} {
    %c0_i32 = arith.constant 0 : i32
    %0 = arith.cmpi sgt, %arg2, %c0_i32 : i32
    %c0 = arith.constant 0 : index
    %c0_0 = arith.constant 0 : index
    %c0_1 = arith.constant 0 : index
    %1 = vector.load %arg3[%c0, %c0_0, %c0_1] : memref<1x16x64xbf16, #tpu.memory_space<vmem>>, vector<1x16x64xbf16>
    %2 = vector.shape_cast %1 : vector<1x16x64xbf16> to vector<16x64xbf16>
    %c0_i32_2 = arith.constant 0 : i32
    %3 = arith.sitofp %c0_i32_2 : i32 to bf16
    %4 = vector.broadcast %3 : bf16 to vector<16x64xbf16>
    %5 = arith.select %0, %2, %4 : vector<16x64xbf16>
    %c0_i32_3 = arith.constant 0 : i32
    %6 = arith.cmpi slt, %arg2, %c0_i32_3 : i32
    %c0_4 = arith.constant 0 : index
    %c0_5 = arith.constant 0 : index
    %c0_6 = arith.constant 0 : index
    %7 = vector.load %arg5[%c0_4, %c0_5, %c0_6] : memref<1x16x64xbf16, #tpu.memory_space<vmem>>, vector<1x16x64xbf16>
    %8 = vector.shape_cast %7 : vector<1x16x64xbf16> to vector<16x64xbf16>
    %c0_i32_7 = arith.constant 0 : i32
    %9 = arith.sitofp %c0_i32_7 : i32 to bf16
    %10 = vector.broadcast %9 : bf16 to vector<16x64xbf16>
    %11 = arith.select %6, %8, %10 : vector<16x64xbf16>
    %c0_8 = arith.constant 0 : index
    %c0_9 = arith.constant 0 : index
    %12 = vector.load %arg9[%c0_8, %c0_9] : memref<288x64xbf16, #tpu.memory_space<vmem>>, vector<16x64xbf16>
    tpu.vector_store %arg9[%c0_8, %c0_9], %5 {strides = array<i32>} : memref<288x64xbf16, #tpu.memory_space<vmem>>, vector<16x64xbf16>,
    %c0_10 = arith.constant 0 : index
    %c0_11 = arith.constant 0 : index
    %c0_12 = arith.constant 0 : index
    %13 = vector.load %arg4[%c0_10, %c0_11, %c0_12] : memref<1x256x64xbf16, #tpu.memory_space<vmem>>, vector<1x256x64xbf16>
    %14 = vector.shape_cast %13 : vector<1x256x64xbf16> to vector<256x64xbf16>
    %c16 = arith.constant 16 : index
    %c0_13 = arith.constant 0 : index
    %15 = vector.load %arg9[%c16, %c0_13] : memref<288x64xbf16, #tpu.memory_space<vmem>>, vector<256x64xbf16>
    tpu.vector_store %arg9[%c16, %c0_13], %14 {strides = array<i32>} : memref<288x64xbf16, #tpu.memory_space<vmem>>, vector<256x64xbf16>,
    %c272 = arith.constant 272 : index
    %c0_14 = arith.constant 0 : index
    %16 = vector.load %arg9[%c272, %c0_14] : memref<288x64xbf16, #tpu.memory_space<vmem>>, vector<16x64xbf16>
    tpu.vector_store %arg9[%c272, %c0_14], %11 {strides = array<i32>} : memref<288x64xbf16, #tpu.memory_space<vmem>>, vector<16x64xbf16>,
    %17 = tpu.iota {dimensions = array<i32: 0>} : vector<256x1xi32>
    %c16_i32 = arith.constant 16 : i32
    %c0_i32_15 = arith.constant 0 : i32
    %18 = arith.cmpi eq, %c16_i32, %c0_i32_15 : i32
    %c1_i32 = arith.constant 1 : i32
    %19 = arith.select %18, %c1_i32, %c16_i32 : i32
    %20 = vector.broadcast %19 : i32 to vector<256x1xi32>
    %21 = arith.remsi %17, %20 : vector<256x1xi32>
    %c0_i32_16 = arith.constant 0 : i32
    %22 = vector.broadcast %c0_i32_16 : i32 to vector<256x1xi32>
    %23 = arith.cmpi ne, %21, %22 : vector<256x1xi32>
    %c0_i32_17 = arith.constant 0 : i32
    %24 = vector.broadcast %c0_i32_17 : i32 to vector<256x1xi32>
    %25 = arith.cmpi slt, %21, %24 : vector<256x1xi32>
    %c0_i32_18 = arith.constant 0 : i32
    %26 = arith.cmpi slt, %19, %c0_i32_18 : i32
    %27 = vector.broadcast %26 : i1 to vector<256x1xi1>
    %28 = vector.broadcast %27 : vector<256x1xi1> to vector<256x1xi1>
    %29 = arith.xori %25, %28 : vector<256x1xi1>
    %30 = arith.andi %29, %23 : vector<256x1xi1>
    %31 = vector.broadcast %19 : i32 to vector<256x1xi32>
    %32 = arith.addi %21, %31 : vector<256x1xi32>
    %33 = arith.select %30, %32, %21 : vector<256x1xi1>, vector<256x1xi32>
    %cst = arith.constant 0.000000e+00 : f32
    %34 = vector.broadcast %cst : f32 to vector<1x64xf32>
    %c0_19 = arith.constant 0 : index
    %c0_20 = arith.constant 0 : index
    %35 = vector.load %arg9[%c0_19, %c0_20] : memref<288x64xbf16, #tpu.memory_space<vmem>>, vector<256x64xbf16>
    %c3 = arith.constant 3 : index
    %c0_21 = arith.constant 0 : index
    %c0_22 = arith.constant 0 : index
    %36 = vector.load %arg6[%c3, %c0_21, %c0_22] : memref<9x64x64xbf16, #tpu.memory_space<vmem>>, vector<1x64x64xbf16>
    %37 = vector.shape_cast %36 : vector<1x64x64xbf16> to vector<64x64xbf16>
    %cst_23 = arith.constant dense<0.000000e+00> : vector<256x64xf32>
    %38 = tpu.matmul %35, %37, %cst_23 {dimension_numbers = #tpu.dot_dimension_numbers<[1], [0], [0], [1], [0, 0, 1, 1], [], []>} : vector<256x64xbf16>, vector<64x64xbf16>, vector<256x64xf32> -> vector<256x64xf32>
    %c16_24 = arith.constant 16 : index
    %c0_25 = arith.constant 0 : index
    %39 = vector.load %arg9[%c16_24, %c0_25] : memref<288x64xbf16, #tpu.memory_space<vmem>>, vector<256x64xbf16>
    %c4 = arith.constant 4 : index
    %c0_26 = arith.constant 0 : index
    %c0_27 = arith.constant 0 : index
    %40 = vector.load %arg6[%c4, %c0_26, %c0_27] : memref<9x64x64xbf16, #tpu.memory_space<vmem>>, vector<1x64x64xbf16>
    %41 = vector.shape_cast %40 : vector<1x64x64xbf16> to vector<64x64xbf16>
    %cst_28 = arith.constant dense<0.000000e+00> : vector<256x64xf32>
    %42 = tpu.matmul %39, %41, %cst_28 {dimension_numbers = #tpu.dot_dimension_numbers<[1], [0], [0], [1], [0, 0, 1, 1], [], []>} : vector<256x64xbf16>, vector<64x64xbf16>, vector<256x64xf32> -> vector<256x64xf32>
    %43 = arith.addf %38, %42 : vector<256x64xf32>
    %c32 = arith.constant 32 : index
    %c0_29 = arith.constant 0 : index
    %44 = vector.load %arg9[%c32, %c0_29] : memref<288x64xbf16, #tpu.memory_space<vmem>>, vector<256x64xbf16>
    %c5 = arith.constant 5 : index
    %c0_30 = arith.constant 0 : index
    %c0_31 = arith.constant 0 : index
    %45 = vector.load %arg6[%c5, %c0_30, %c0_31] : memref<9x64x64xbf16, #tpu.memory_space<vmem>>, vector<1x64x64xbf16>
    %46 = vector.shape_cast %45 : vector<1x64x64xbf16> to vector<64x64xbf16>
    %cst_32 = arith.constant dense<0.000000e+00> : vector<256x64xf32>
    %47 = tpu.matmul %44, %46, %cst_32 {dimension_numbers = #tpu.dot_dimension_numbers<[1], [0], [0], [1], [0, 0, 1, 1], [], []>} : vector<256x64xbf16>, vector<64x64xbf16>, vector<256x64xf32> -> vector<256x64xf32>
    %48 = arith.addf %43, %47 : vector<256x64xf32>
    %c0_33 = arith.constant 0 : index
    %c0_34 = arith.constant 0 : index
    %49 = vector.load %arg7[%c0_33, %c0_34] : memref<1x64xf32, #tpu.memory_space<vmem>>, vector<1x64xf32>
    %50 = vector.broadcast %49 : vector<1x64xf32> to vector<256x64xf32>
    %51 = arith.addf %48, %50 : vector<256x64xf32>
    %c0_35 = arith.constant 0 : index
    %c0_36 = arith.constant 0 : index
    %52 = vector.load %arg10[%c0_35, %c0_36] : memref<256x64xf32, #tpu.memory_space<vmem>>, vector<256x64xf32>
    tpu.vector_store %arg10[%c0_35, %c0_36], %51 {strides = array<i32>} : memref<256x64xf32, #tpu.memory_space<vmem>>, vector<256x64xf32>,
    %c0_37 = arith.constant 0 : index
    %c0_38 = arith.constant 0 : index
    %53 = vector.load %arg9[%c0_37, %c0_38] : memref<288x64xbf16, #tpu.memory_space<vmem>>, vector<256x64xbf16>
    %c0_39 = arith.constant 0 : index
    %c0_40 = arith.constant 0 : index
    %c0_41 = arith.constant 0 : index
    %54 = vector.load %arg6[%c0_39, %c0_40, %c0_41] : memref<9x64x64xbf16, #tpu.memory_space<vmem>>, vector<1x64x64xbf16>
    %55 = vector.shape_cast %54 : vector<1x64x64xbf16> to vector<64x64xbf16>
    %cst_42 = arith.constant dense<0.000000e+00> : vector<256x64xf32>
    %56 = tpu.matmul %53, %55, %cst_42 {dimension_numbers = #tpu.dot_dimension_numbers<[1], [0], [0], [1], [0, 0, 1, 1], [], []>} : vector<256x64xbf16>, vector<64x64xbf16>, vector<256x64xf32> -> vector<256x64xf32>
    %c16_43 = arith.constant 16 : index
    %c0_44 = arith.constant 0 : index
    %57 = vector.load %arg9[%c16_43, %c0_44] : memref<288x64xbf16, #tpu.memory_space<vmem>>, vector<256x64xbf16>
    %c1 = arith.constant 1 : index
    %c0_45 = arith.constant 0 : index
    %c0_46 = arith.constant 0 : index
    %58 = vector.load %arg6[%c1, %c0_45, %c0_46] : memref<9x64x64xbf16, #tpu.memory_space<vmem>>, vector<1x64x64xbf16>
    %59 = vector.shape_cast %58 : vector<1x64x64xbf16> to vector<64x64xbf16>
    %cst_47 = arith.constant dense<0.000000e+00> : vector<256x64xf32>
    %60 = tpu.matmul %57, %59, %cst_47 {dimension_numbers = #tpu.dot_dimension_numbers<[1], [0], [0], [1], [0, 0, 1, 1], [], []>} : vector<256x64xbf16>, vector<64x64xbf16>, vector<256x64xf32> -> vector<256x64xf32>
    %61 = arith.addf %56, %60 : vector<256x64xf32>
    %c32_48 = arith.constant 32 : index
    %c0_49 = arith.constant 0 : index
    %62 = vector.load %arg9[%c32_48, %c0_49] : memref<288x64xbf16, #tpu.memory_space<vmem>>, vector<256x64xbf16>
    %c2 = arith.constant 2 : index
    %c0_50 = arith.constant 0 : index
    %c0_51 = arith.constant 0 : index
    %63 = vector.load %arg6[%c2, %c0_50, %c0_51] : memref<9x64x64xbf16, #tpu.memory_space<vmem>>, vector<1x64x64xbf16>
    %64 = vector.shape_cast %63 : vector<1x64x64xbf16> to vector<64x64xbf16>
    %cst_52 = arith.constant dense<0.000000e+00> : vector<256x64xf32>
    %65 = tpu.matmul %62, %64, %cst_52 {dimension_numbers = #tpu.dot_dimension_numbers<[1], [0], [0], [1], [0, 0, 1, 1], [], []>} : vector<256x64xbf16>, vector<64x64xbf16>, vector<256x64xf32> -> vector<256x64xf32>
    %66 = arith.addf %61, %65 : vector<256x64xf32>
    %c0_53 = arith.constant 0 : index
    %c0_54 = arith.constant 0 : index
    %67 = vector.load %arg10[%c0_53, %c0_54] : memref<256x64xf32, #tpu.memory_space<vmem>>, vector<256x64xf32>
    %c0_i32_55 = arith.constant 0 : i32
    %68 = vector.broadcast %c0_i32_55 : i32 to vector<256x1xi32>
    %69 = arith.cmpi ne, %33, %68 : vector<256x1xi32>
    %70 = vector.extract_strided_slice %66 {offsets = [0, 0], sizes = [255, 64], strides = [1, 1]} : vector<256x64xf32> to vector<255x64xf32>
    %71 = tpu.concatenate %34, %70 in 0 : vector<1x64xf32>, vector<255x64xf32> -> vector<256x64xf32>
    %cst_56 = arith.constant 0.000000e+00 : f32
    %72 = vector.shape_cast %69 : vector<256x1xi1> to vector<256x1xi1>
    %73 = vector.broadcast %72 : vector<256x1xi1> to vector<256x64xi1>
    %74 = vector.broadcast %cst_56 : f32 to vector<256x64xf32>
    %75 = arith.select %73, %71, %74 : vector<256x64xi1>, vector<256x64xf32>
    %76 = arith.addf %67, %75 : vector<256x64xf32>
    %c0_57 = arith.constant 0 : index
    %c0_58 = arith.constant 0 : index
    %77 = vector.load %arg10[%c0_57, %c0_58] : memref<256x64xf32, #tpu.memory_space<vmem>>, vector<256x64xf32>
    tpu.vector_store %arg10[%c0_57, %c0_58], %76 {strides = array<i32>} : memref<256x64xf32, #tpu.memory_space<vmem>>, vector<256x64xf32>,
    %c0_59 = arith.constant 0 : index
    %c0_60 = arith.constant 0 : index
    %78 = vector.load %arg9[%c0_59, %c0_60] : memref<288x64xbf16, #tpu.memory_space<vmem>>, vector<256x64xbf16>
    %c6 = arith.constant 6 : index
    %c0_61 = arith.constant 0 : index
    %c0_62 = arith.constant 0 : index
    %79 = vector.load %arg6[%c6, %c0_61, %c0_62] : memref<9x64x64xbf16, #tpu.memory_space<vmem>>, vector<1x64x64xbf16>
    %80 = vector.shape_cast %79 : vector<1x64x64xbf16> to vector<64x64xbf16>
    %cst_63 = arith.constant dense<0.000000e+00> : vector<256x64xf32>
    %81 = tpu.matmul %78, %80, %cst_63 {dimension_numbers = #tpu.dot_dimension_numbers<[1], [0], [0], [1], [0, 0, 1, 1], [], []>} : vector<256x64xbf16>, vector<64x64xbf16>, vector<256x64xf32> -> vector<256x64xf32>
    %c16_64 = arith.constant 16 : index
    %c0_65 = arith.constant 0 : index
    %82 = vector.load %arg9[%c16_64, %c0_65] : memref<288x64xbf16, #tpu.memory_space<vmem>>, vector<256x64xbf16>
    %c7 = arith.constant 7 : index
    %c0_66 = arith.constant 0 : index
    %c0_67 = arith.constant 0 : index
    %83 = vector.load %arg6[%c7, %c0_66, %c0_67] : memref<9x64x64xbf16, #tpu.memory_space<vmem>>, vector<1x64x64xbf16>
    %84 = vector.shape_cast %83 : vector<1x64x64xbf16> to vector<64x64xbf16>
    %cst_68 = arith.constant dense<0.000000e+00> : vector<256x64xf32>
    %85 = tpu.matmul %82, %84, %cst_68 {dimension_numbers = #tpu.dot_dimension_numbers<[1], [0], [0], [1], [0, 0, 1, 1], [], []>} : vector<256x64xbf16>, vector<64x64xbf16>, vector<256x64xf32> -> vector<256x64xf32>
    %86 = arith.addf %81, %85 : vector<256x64xf32>
    %c32_69 = arith.constant 32 : index
    %c0_70 = arith.constant 0 : index
    %87 = vector.load %arg9[%c32_69, %c0_70] : memref<288x64xbf16, #tpu.memory_space<vmem>>, vector<256x64xbf16>
    %c8 = arith.constant 8 : index
    %c0_71 = arith.constant 0 : index
    %c0_72 = arith.constant 0 : index
    %88 = vector.load %arg6[%c8, %c0_71, %c0_72] : memref<9x64x64xbf16, #tpu.memory_space<vmem>>, vector<1x64x64xbf16>
    %89 = vector.shape_cast %88 : vector<1x64x64xbf16> to vector<64x64xbf16>
    %cst_73 = arith.constant dense<0.000000e+00> : vector<256x64xf32>
    %90 = tpu.matmul %87, %89, %cst_73 {dimension_numbers = #tpu.dot_dimension_numbers<[1], [0], [0], [1], [0, 0, 1, 1], [], []>} : vector<256x64xbf16>, vector<64x64xbf16>, vector<256x64xf32> -> vector<256x64xf32>
    %91 = arith.addf %86, %90 : vector<256x64xf32>
    %c0_74 = arith.constant 0 : index
    %c0_75 = arith.constant 0 : index
    %92 = vector.load %arg10[%c0_74, %c0_75] : memref<256x64xf32, #tpu.memory_space<vmem>>, vector<256x64xf32>
    %c15_i32 = arith.constant 15 : i32
    %93 = vector.broadcast %c15_i32 : i32 to vector<256x1xi32>
    %94 = arith.cmpi ne, %33, %93 : vector<256x1xi32>
    %95 = vector.extract_strided_slice %91 {offsets = [1, 0], sizes = [255, 64], strides = [1, 1]} : vector<256x64xf32> to vector<255x64xf32>
    %96 = tpu.concatenate %95, %34 in 0 : vector<255x64xf32>, vector<1x64xf32> -> vector<256x64xf32>
    %cst_76 = arith.constant 0.000000e+00 : f32
    %97 = vector.shape_cast %94 : vector<256x1xi1> to vector<256x1xi1>
    %98 = vector.broadcast %97 : vector<256x1xi1> to vector<256x64xi1>
    %99 = vector.broadcast %cst_76 : f32 to vector<256x64xf32>
    %100 = arith.select %98, %96, %99 : vector<256x64xi1>, vector<256x64xf32>
    %101 = arith.addf %92, %100 : vector<256x64xf32>
    %c0_77 = arith.constant 0 : index
    %c0_78 = arith.constant 0 : index
    %102 = vector.load %arg10[%c0_77, %c0_78] : memref<256x64xf32, #tpu.memory_space<vmem>>, vector<256x64xf32>
    tpu.vector_store %arg10[%c0_77, %c0_78], %101 {strides = array<i32>} : memref<256x64xf32, #tpu.memory_space<vmem>>, vector<256x64xf32>,
    %c0_79 = arith.constant 0 : index
    %c0_80 = arith.constant 0 : index
    %103 = vector.load %arg10[%c0_79, %c0_80] : memref<256x64xf32, #tpu.memory_space<vmem>>, vector<256x64xf32>
    %cst_81 = arith.constant 0.000000e+00 : f32
    %104 = vector.broadcast %cst_81 : f32 to vector<256x64xf32>
    %105 = arith.maximumf %103, %104 : vector<256x64xf32>
    %106 = arith.truncf %105 : vector<256x64xf32> to vector<256x64xbf16>
    %c0_82 = arith.constant 0 : index
    %c0_83 = arith.constant 0 : index
    %c0_84 = arith.constant 0 : index
    %107 = vector.load %arg8[%c0_82, %c0_83, %c0_84] : memref<1x256x64xbf16, #tpu.memory_space<vmem>>, vector<1x256x64xbf16>
    %108 = vector.shape_cast %107 : vector<1x256x64xbf16> to vector<256x64xbf16>
    %109 = vector.shape_cast %106 : vector<256x64xbf16> to vector<1x256x64xbf16>
    tpu.vector_store %arg8[%c0_82, %c0_83, %c0_84], %109 {strides = array<i32>} : memref<1x256x64xbf16, #tpu.memory_space<vmem>>, vector<1x256x64xbf16>,
    return
  }
  func.func @transform_0(%arg0: i32, %arg1: i32, %arg2: i32) -> (i32, i32, i32) {
    %c16_i32 = arith.constant 16 : i32
    %0 = arith.muli %arg2, %c16_i32 : i32
    %c1_i32 = arith.constant 1 : i32
    %1 = arith.subi %0, %c1_i32 : i32
    %c0_i32 = arith.constant 0 : i32
    %2 = arith.maxsi %1, %c0_i32 : i32
    %c0_i32_0 = arith.constant 0 : i32
    %c0_i32_1 = arith.constant 0 : i32
    return %arg0, %2, %c0_i32_0 : i32, i32, i32
  }
  func.func @transform_1(%arg0: i32, %arg1: i32, %arg2: i32) -> (i32, i32, i32) {
    %c0_i32 = arith.constant 0 : i32
    %c0_i32_0 = arith.constant 0 : i32
    return %arg0, %arg2, %c0_i32 : i32, i32, i32
  }
  func.func @transform_2(%arg0: i32, %arg1: i32, %arg2: i32) -> (i32, i32, i32) {
    %c16_i32 = arith.constant 16 : i32
    %0 = arith.muli %arg2, %c16_i32 : i32
    %c16_i32_0 = arith.constant 16 : i32
    %1 = arith.addi %0, %c16_i32_0 : i32
    %c15_i32 = arith.constant 15 : i32
    %2 = arith.minsi %1, %c15_i32 : i32
    %c0_i32 = arith.constant 0 : i32
    %c0_i32_1 = arith.constant 0 : i32
    return %arg0, %2, %c0_i32 : i32, i32, i32
  }
  func.func @transform_3(%arg0: i32, %arg1: i32, %arg2: i32) -> (i32, i32, i32) {
    %c0_i32 = arith.constant 0 : i32
    %c0_i32_0 = arith.constant 0 : i32
    %c0_i32_1 = arith.constant 0 : i32
    return %c0_i32, %c0_i32_0, %arg1 : i32, i32, i32
  }
  func.func @transform_4(%arg0: i32, %arg1: i32, %arg2: i32) -> (i32, i32) {
    %c0_i32 = arith.constant 0 : i32
    %c0_i32_0 = arith.constant 0 : i32
    return %c0_i32, %arg1 : i32, i32
  }
  func.func @transform_5(%arg0: i32, %arg1: i32, %arg2: i32) -> (i32, i32, i32) {
    %c0_i32 = arith.constant 0 : i32
    return %arg0, %arg2, %arg1 : i32, i32, i32
  }
}

module attributes {stable_mosaic.version = 11 : i64} {
  func.func @_conv3x3_kernel(%arg0: i32, %arg1: i32, %arg2: i32, %arg3: memref<1x16x3xbf16, #tpu.memory_space<vmem>>, %arg4: memref<1x256x3xbf16, #tpu.memory_space<vmem>>, %arg5: memref<1x16x3xbf16, #tpu.memory_space<vmem>>, %arg6: memref<9x3x64xbf16, #tpu.memory_space<vmem>>, %arg7: memref<1x64xf32, #tpu.memory_space<vmem>>, %arg8: memref<1x256x64xbf16, #tpu.memory_space<vmem>>, %arg9: memref<288x3xbf16, #tpu.memory_space<vmem>>, %arg10: memref<256x64xf32, #tpu.memory_space<vmem>>) attributes {dimension_semantics = [#tpu.dimension_semantics<parallel>, #tpu.dimension_semantics<parallel>, #tpu.dimension_semantics<parallel>], iteration_bounds = array<i64: 2, 1, 1>, scalar_prefetch = 0 : i64, scratch_operands = 2 : i64, tpu.core_type = #tpu.core_type<tc>, window_params = [{transform_indices = @transform_0, window_bounds = array<i64: 1, 16, 3>}, {transform_indices = @transform_1, window_bounds = array<i64: 1, 256, 3>}, {transform_indices = @transform_2, window_bounds = array<i64: 1, 16, 3>}, {transform_indices = @transform_3, window_bounds = array<i64: 9, 3, 64>}, {transform_indices = @transform_4, window_bounds = array<i64: 1, 64>}, {transform_indices = @transform_5, window_bounds = array<i64: 1, 256, 64>}]} {
    %c0_i32 = arith.constant 0 : i32
    %0 = arith.cmpi sgt, %arg2, %c0_i32 : i32
    %c0 = arith.constant 0 : index
    %c0_0 = arith.constant 0 : index
    %c0_1 = arith.constant 0 : index
    %1 = vector.load %arg3[%c0, %c0_0, %c0_1] : memref<1x16x3xbf16, #tpu.memory_space<vmem>>, vector<1x16x3xbf16>
    %2 = vector.shape_cast %1 : vector<1x16x3xbf16> to vector<16x3xbf16>
    %c0_i32_2 = arith.constant 0 : i32
    %3 = arith.sitofp %c0_i32_2 : i32 to bf16
    %4 = vector.broadcast %3 : bf16 to vector<16x3xbf16>
    %5 = arith.select %0, %2, %4 : vector<16x3xbf16>
    %c0_i32_3 = arith.constant 0 : i32
    %6 = arith.cmpi slt, %arg2, %c0_i32_3 : i32
    %c0_4 = arith.constant 0 : index
    %c0_5 = arith.constant 0 : index
    %c0_6 = arith.constant 0 : index
    %7 = vector.load %arg5[%c0_4, %c0_5, %c0_6] : memref<1x16x3xbf16, #tpu.memory_space<vmem>>, vector<1x16x3xbf16>
    %8 = vector.shape_cast %7 : vector<1x16x3xbf16> to vector<16x3xbf16>
    %c0_i32_7 = arith.constant 0 : i32
    %9 = arith.sitofp %c0_i32_7 : i32 to bf16
    %10 = vector.broadcast %9 : bf16 to vector<16x3xbf16>
    %11 = arith.select %6, %8, %10 : vector<16x3xbf16>
    %c0_8 = arith.constant 0 : index
    %c0_9 = arith.constant 0 : index
    %12 = vector.load %arg9[%c0_8, %c0_9] : memref<288x3xbf16, #tpu.memory_space<vmem>>, vector<16x3xbf16>
    tpu.vector_store %arg9[%c0_8, %c0_9], %5 {strides = array<i32>} : memref<288x3xbf16, #tpu.memory_space<vmem>>, vector<16x3xbf16>,
    %c0_10 = arith.constant 0 : index
    %c0_11 = arith.constant 0 : index
    %c0_12 = arith.constant 0 : index
    %13 = vector.load %arg4[%c0_10, %c0_11, %c0_12] : memref<1x256x3xbf16, #tpu.memory_space<vmem>>, vector<1x256x3xbf16>
    %14 = vector.shape_cast %13 : vector<1x256x3xbf16> to vector<256x3xbf16>
    %c16 = arith.constant 16 : index
    %c0_13 = arith.constant 0 : index
    %15 = vector.load %arg9[%c16, %c0_13] : memref<288x3xbf16, #tpu.memory_space<vmem>>, vector<256x3xbf16>
    tpu.vector_store %arg9[%c16, %c0_13], %14 {strides = array<i32>} : memref<288x3xbf16, #tpu.memory_space<vmem>>, vector<256x3xbf16>,
    %c272 = arith.constant 272 : index
    %c0_14 = arith.constant 0 : index
    %16 = vector.load %arg9[%c272, %c0_14] : memref<288x3xbf16, #tpu.memory_space<vmem>>, vector<16x3xbf16>
    tpu.vector_store %arg9[%c272, %c0_14], %11 {strides = array<i32>} : memref<288x3xbf16, #tpu.memory_space<vmem>>, vector<16x3xbf16>,
    %17 = tpu.iota {dimensions = array<i32: 0>} : vector<256x1xi32>
    %c16_i32 = arith.constant 16 : i32
    %c0_i32_15 = arith.constant 0 : i32
    %18 = arith.cmpi eq, %c16_i32, %c0_i32_15 : i32
    %c1_i32 = arith.constant 1 : i32
    %19 = arith.select %18, %c1_i32, %c16_i32 : i32
    %20 = vector.broadcast %19 : i32 to vector<256x1xi32>
    %21 = arith.remsi %17, %20 : vector<256x1xi32>
    %c0_i32_16 = arith.constant 0 : i32
    %22 = vector.broadcast %c0_i32_16 : i32 to vector<256x1xi32>
    %23 = arith.cmpi ne, %21, %22 : vector<256x1xi32>
    %c0_i32_17 = arith.constant 0 : i32
    %24 = vector.broadcast %c0_i32_17 : i32 to vector<256x1xi32>
    %25 = arith.cmpi slt, %21, %24 : vector<256x1xi32>
    %c0_i32_18 = arith.constant 0 : i32
    %26 = arith.cmpi slt, %19, %c0_i32_18 : i32
    %27 = vector.broadcast %26 : i1 to vector<256x1xi1>
    %28 = vector.broadcast %27 : vector<256x1xi1> to vector<256x1xi1>
    %29 = arith.xori %25, %28 : vector<256x1xi1>
    %30 = arith.andi %29, %23 : vector<256x1xi1>
    %31 = vector.broadcast %19 : i32 to vector<256x1xi32>
    %32 = arith.addi %21, %31 : vector<256x1xi32>
    %33 = arith.select %30, %32, %21 : vector<256x1xi1>, vector<256x1xi32>
    %cst = arith.constant 0.000000e+00 : f32
    %34 = vector.broadcast %cst : f32 to vector<1x64xf32>
    %c0_19 = arith.constant 0 : index
    %c0_20 = arith.constant 0 : index
    %35 = vector.load %arg9[%c0_19, %c0_20] : memref<288x3xbf16, #tpu.memory_space<vmem>>, vector<256x3xbf16>
    %c3 = arith.constant 3 : index
    %c0_21 = arith.constant 0 : index
    %c0_22 = arith.constant 0 : index
    %36 = vector.load %arg6[%c3, %c0_21, %c0_22] : memref<9x3x64xbf16, #tpu.memory_space<vmem>>, vector<1x3x64xbf16>
    %37 = vector.shape_cast %36 : vector<1x3x64xbf16> to vector<3x64xbf16>
    %cst_23 = arith.constant dense<0.000000e+00> : vector<256x64xf32>
    %38 = tpu.matmul %35, %37, %cst_23 {dimension_numbers = #tpu.dot_dimension_numbers<[1], [0], [0], [1], [0, 0, 1, 1], [], []>} : vector<256x3xbf16>, vector<3x64xbf16>, vector<256x64xf32> -> vector<256x64xf32>
    %c16_24 = arith.constant 16 : index
    %c0_25 = arith.constant 0 : index
    %39 = vector.load %arg9[%c16_24, %c0_25] : memref<288x3xbf16, #tpu.memory_space<vmem>>, vector<256x3xbf16>
    %c4 = arith.constant 4 : index
    %c0_26 = arith.constant 0 : index
    %c0_27 = arith.constant 0 : index
    %40 = vector.load %arg6[%c4, %c0_26, %c0_27] : memref<9x3x64xbf16, #tpu.memory_space<vmem>>, vector<1x3x64xbf16>
    %41 = vector.shape_cast %40 : vector<1x3x64xbf16> to vector<3x64xbf16>
    %cst_28 = arith.constant dense<0.000000e+00> : vector<256x64xf32>
    %42 = tpu.matmul %39, %41, %cst_28 {dimension_numbers = #tpu.dot_dimension_numbers<[1], [0], [0], [1], [0, 0, 1, 1], [], []>} : vector<256x3xbf16>, vector<3x64xbf16>, vector<256x64xf32> -> vector<256x64xf32>
    %43 = arith.addf %38, %42 : vector<256x64xf32>
    %c32 = arith.constant 32 : index
    %c0_29 = arith.constant 0 : index
    %44 = vector.load %arg9[%c32, %c0_29] : memref<288x3xbf16, #tpu.memory_space<vmem>>, vector<256x3xbf16>
    %c5 = arith.constant 5 : index
    %c0_30 = arith.constant 0 : index
    %c0_31 = arith.constant 0 : index
    %45 = vector.load %arg6[%c5, %c0_30, %c0_31] : memref<9x3x64xbf16, #tpu.memory_space<vmem>>, vector<1x3x64xbf16>
    %46 = vector.shape_cast %45 : vector<1x3x64xbf16> to vector<3x64xbf16>
    %cst_32 = arith.constant dense<0.000000e+00> : vector<256x64xf32>
    %47 = tpu.matmul %44, %46, %cst_32 {dimension_numbers = #tpu.dot_dimension_numbers<[1], [0], [0], [1], [0, 0, 1, 1], [], []>} : vector<256x3xbf16>, vector<3x64xbf16>, vector<256x64xf32> -> vector<256x64xf32>
    %48 = arith.addf %43, %47 : vector<256x64xf32>
    %c0_33 = arith.constant 0 : index
    %c0_34 = arith.constant 0 : index
    %49 = vector.load %arg7[%c0_33, %c0_34] : memref<1x64xf32, #tpu.memory_space<vmem>>, vector<1x64xf32>
    %50 = vector.broadcast %49 : vector<1x64xf32> to vector<256x64xf32>
    %51 = arith.addf %48, %50 : vector<256x64xf32>
    %c0_35 = arith.constant 0 : index
    %c0_36 = arith.constant 0 : index
    %52 = vector.load %arg10[%c0_35, %c0_36] : memref<256x64xf32, #tpu.memory_space<vmem>>, vector<256x64xf32>
    tpu.vector_store %arg10[%c0_35, %c0_36], %51 {strides = array<i32>} : memref<256x64xf32, #tpu.memory_space<vmem>>, vector<256x64xf32>,
    %c0_37 = arith.constant 0 : index
    %c0_38 = arith.constant 0 : index
    %53 = vector.load %arg9[%c0_37, %c0_38] : memref<288x3xbf16, #tpu.memory_space<vmem>>, vector<256x3xbf16>
    %c0_39 = arith.constant 0 : index
    %c0_40 = arith.constant 0 : index
    %c0_41 = arith.constant 0 : index
    %54 = vector.load %arg6[%c0_39, %c0_40, %c0_41] : memref<9x3x64xbf16, #tpu.memory_space<vmem>>, vector<1x3x64xbf16>
    %55 = vector.shape_cast %54 : vector<1x3x64xbf16> to vector<3x64xbf16>
    %cst_42 = arith.constant dense<0.000000e+00> : vector<256x64xf32>
    %56 = tpu.matmul %53, %55, %cst_42 {dimension_numbers = #tpu.dot_dimension_numbers<[1], [0], [0], [1], [0, 0, 1, 1], [], []>} : vector<256x3xbf16>, vector<3x64xbf16>, vector<256x64xf32> -> vector<256x64xf32>
    %c16_43 = arith.constant 16 : index
    %c0_44 = arith.constant 0 : index
    %57 = vector.load %arg9[%c16_43, %c0_44] : memref<288x3xbf16, #tpu.memory_space<vmem>>, vector<256x3xbf16>
    %c1 = arith.constant 1 : index
    %c0_45 = arith.constant 0 : index
    %c0_46 = arith.constant 0 : index
    %58 = vector.load %arg6[%c1, %c0_45, %c0_46] : memref<9x3x64xbf16, #tpu.memory_space<vmem>>, vector<1x3x64xbf16>
    %59 = vector.shape_cast %58 : vector<1x3x64xbf16> to vector<3x64xbf16>
    %cst_47 = arith.constant dense<0.000000e+00> : vector<256x64xf32>
    %60 = tpu.matmul %57, %59, %cst_47 {dimension_numbers = #tpu.dot_dimension_numbers<[1], [0], [0], [1], [0, 0, 1, 1], [], []>} : vector<256x3xbf16>, vector<3x64xbf16>, vector<256x64xf32> -> vector<256x64xf32>
    %61 = arith.addf %56, %60 : vector<256x64xf32>
    %c32_48 = arith.constant 32 : index
    %c0_49 = arith.constant 0 : index
    %62 = vector.load %arg9[%c32_48, %c0_49] : memref<288x3xbf16, #tpu.memory_space<vmem>>, vector<256x3xbf16>
    %c2 = arith.constant 2 : index
    %c0_50 = arith.constant 0 : index
    %c0_51 = arith.constant 0 : index
    %63 = vector.load %arg6[%c2, %c0_50, %c0_51] : memref<9x3x64xbf16, #tpu.memory_space<vmem>>, vector<1x3x64xbf16>
    %64 = vector.shape_cast %63 : vector<1x3x64xbf16> to vector<3x64xbf16>
    %cst_52 = arith.constant dense<0.000000e+00> : vector<256x64xf32>
    %65 = tpu.matmul %62, %64, %cst_52 {dimension_numbers = #tpu.dot_dimension_numbers<[1], [0], [0], [1], [0, 0, 1, 1], [], []>} : vector<256x3xbf16>, vector<3x64xbf16>, vector<256x64xf32> -> vector<256x64xf32>
    %66 = arith.addf %61, %65 : vector<256x64xf32>
    %c0_53 = arith.constant 0 : index
    %c0_54 = arith.constant 0 : index
    %67 = vector.load %arg10[%c0_53, %c0_54] : memref<256x64xf32, #tpu.memory_space<vmem>>, vector<256x64xf32>
    %c0_i32_55 = arith.constant 0 : i32
    %68 = vector.broadcast %c0_i32_55 : i32 to vector<256x1xi32>
    %69 = arith.cmpi ne, %33, %68 : vector<256x1xi32>
    %70 = vector.extract_strided_slice %66 {offsets = [0, 0], sizes = [255, 64], strides = [1, 1]} : vector<256x64xf32> to vector<255x64xf32>
    %71 = tpu.concatenate %34, %70 in 0 : vector<1x64xf32>, vector<255x64xf32> -> vector<256x64xf32>
    %cst_56 = arith.constant 0.000000e+00 : f32
    %72 = vector.shape_cast %69 : vector<256x1xi1> to vector<256x1xi1>
    %73 = vector.broadcast %72 : vector<256x1xi1> to vector<256x64xi1>
    %74 = vector.broadcast %cst_56 : f32 to vector<256x64xf32>
    %75 = arith.select %73, %71, %74 : vector<256x64xi1>, vector<256x64xf32>
    %76 = arith.addf %67, %75 : vector<256x64xf32>
    %c0_57 = arith.constant 0 : index
    %c0_58 = arith.constant 0 : index
    %77 = vector.load %arg10[%c0_57, %c0_58] : memref<256x64xf32, #tpu.memory_space<vmem>>, vector<256x64xf32>
    tpu.vector_store %arg10[%c0_57, %c0_58], %76 {strides = array<i32>} : memref<256x64xf32, #tpu.memory_space<vmem>>, vector<256x64xf32>,
    %c0_59 = arith.constant 0 : index
    %c0_60 = arith.constant 0 : index
    %78 = vector.load %arg9[%c0_59, %c0_60] : memref<288x3xbf16, #tpu.memory_space<vmem>>, vector<256x3xbf16>
    %c6 = arith.constant 6 : index
    %c0_61 = arith.constant 0 : index
    %c0_62 = arith.constant 0 : index
    %79 = vector.load %arg6[%c6, %c0_61, %c0_62] : memref<9x3x64xbf16, #tpu.memory_space<vmem>>, vector<1x3x64xbf16>
    %80 = vector.shape_cast %79 : vector<1x3x64xbf16> to vector<3x64xbf16>
    %cst_63 = arith.constant dense<0.000000e+00> : vector<256x64xf32>
    %81 = tpu.matmul %78, %80, %cst_63 {dimension_numbers = #tpu.dot_dimension_numbers<[1], [0], [0], [1], [0, 0, 1, 1], [], []>} : vector<256x3xbf16>, vector<3x64xbf16>, vector<256x64xf32> -> vector<256x64xf32>
    %c16_64 = arith.constant 16 : index
    %c0_65 = arith.constant 0 : index
    %82 = vector.load %arg9[%c16_64, %c0_65] : memref<288x3xbf16, #tpu.memory_space<vmem>>, vector<256x3xbf16>
    %c7 = arith.constant 7 : index
    %c0_66 = arith.constant 0 : index
    %c0_67 = arith.constant 0 : index
    %83 = vector.load %arg6[%c7, %c0_66, %c0_67] : memref<9x3x64xbf16, #tpu.memory_space<vmem>>, vector<1x3x64xbf16>
    %84 = vector.shape_cast %83 : vector<1x3x64xbf16> to vector<3x64xbf16>
    %cst_68 = arith.constant dense<0.000000e+00> : vector<256x64xf32>
    %85 = tpu.matmul %82, %84, %cst_68 {dimension_numbers = #tpu.dot_dimension_numbers<[1], [0], [0], [1], [0, 0, 1, 1], [], []>} : vector<256x3xbf16>, vector<3x64xbf16>, vector<256x64xf32> -> vector<256x64xf32>
    %86 = arith.addf %81, %85 : vector<256x64xf32>
    %c32_69 = arith.constant 32 : index
    %c0_70 = arith.constant 0 : index
    %87 = vector.load %arg9[%c32_69, %c0_70] : memref<288x3xbf16, #tpu.memory_space<vmem>>, vector<256x3xbf16>
    %c8 = arith.constant 8 : index
    %c0_71 = arith.constant 0 : index
    %c0_72 = arith.constant 0 : index
    %88 = vector.load %arg6[%c8, %c0_71, %c0_72] : memref<9x3x64xbf16, #tpu.memory_space<vmem>>, vector<1x3x64xbf16>
    %89 = vector.shape_cast %88 : vector<1x3x64xbf16> to vector<3x64xbf16>
    %cst_73 = arith.constant dense<0.000000e+00> : vector<256x64xf32>
    %90 = tpu.matmul %87, %89, %cst_73 {dimension_numbers = #tpu.dot_dimension_numbers<[1], [0], [0], [1], [0, 0, 1, 1], [], []>} : vector<256x3xbf16>, vector<3x64xbf16>, vector<256x64xf32> -> vector<256x64xf32>
    %91 = arith.addf %86, %90 : vector<256x64xf32>
    %c0_74 = arith.constant 0 : index
    %c0_75 = arith.constant 0 : index
    %92 = vector.load %arg10[%c0_74, %c0_75] : memref<256x64xf32, #tpu.memory_space<vmem>>, vector<256x64xf32>
    %c15_i32 = arith.constant 15 : i32
    %93 = vector.broadcast %c15_i32 : i32 to vector<256x1xi32>
    %94 = arith.cmpi ne, %33, %93 : vector<256x1xi32>
    %95 = vector.extract_strided_slice %91 {offsets = [1, 0], sizes = [255, 64], strides = [1, 1]} : vector<256x64xf32> to vector<255x64xf32>
    %96 = tpu.concatenate %95, %34 in 0 : vector<255x64xf32>, vector<1x64xf32> -> vector<256x64xf32>
    %cst_76 = arith.constant 0.000000e+00 : f32
    %97 = vector.shape_cast %94 : vector<256x1xi1> to vector<256x1xi1>
    %98 = vector.broadcast %97 : vector<256x1xi1> to vector<256x64xi1>
    %99 = vector.broadcast %cst_76 : f32 to vector<256x64xf32>
    %100 = arith.select %98, %96, %99 : vector<256x64xi1>, vector<256x64xf32>
    %101 = arith.addf %92, %100 : vector<256x64xf32>
    %c0_77 = arith.constant 0 : index
    %c0_78 = arith.constant 0 : index
    %102 = vector.load %arg10[%c0_77, %c0_78] : memref<256x64xf32, #tpu.memory_space<vmem>>, vector<256x64xf32>
    tpu.vector_store %arg10[%c0_77, %c0_78], %101 {strides = array<i32>} : memref<256x64xf32, #tpu.memory_space<vmem>>, vector<256x64xf32>,
    %c0_79 = arith.constant 0 : index
    %c0_80 = arith.constant 0 : index
    %103 = vector.load %arg10[%c0_79, %c0_80] : memref<256x64xf32, #tpu.memory_space<vmem>>, vector<256x64xf32>
    %cst_81 = arith.constant 0.000000e+00 : f32
    %104 = vector.broadcast %cst_81 : f32 to vector<256x64xf32>
    %105 = arith.maximumf %103, %104 : vector<256x64xf32>
    %106 = arith.truncf %105 : vector<256x64xf32> to vector<256x64xbf16>
    %c0_82 = arith.constant 0 : index
    %c0_83 = arith.constant 0 : index
    %c0_84 = arith.constant 0 : index
    %107 = vector.load %arg8[%c0_82, %c0_83, %c0_84] : memref<1x256x64xbf16, #tpu.memory_space<vmem>>, vector<1x256x64xbf16>
    %108 = vector.shape_cast %107 : vector<1x256x64xbf16> to vector<256x64xbf16>
    %109 = vector.shape_cast %106 : vector<256x64xbf16> to vector<1x256x64xbf16>
    tpu.vector_store %arg8[%c0_82, %c0_83, %c0_84], %109 {strides = array<i32>} : memref<1x256x64xbf16, #tpu.memory_space<vmem>>, vector<1x256x64xbf16>,
    return
  }
  func.func @transform_0(%arg0: i32, %arg1: i32, %arg2: i32) -> (i32, i32, i32) {
    %c16_i32 = arith.constant 16 : i32
    %0 = arith.muli %arg2, %c16_i32 : i32
    %c1_i32 = arith.constant 1 : i32
    %1 = arith.subi %0, %c1_i32 : i32
    %c0_i32 = arith.constant 0 : i32
    %2 = arith.maxsi %1, %c0_i32 : i32
    %c0_i32_0 = arith.constant 0 : i32
    %c0_i32_1 = arith.constant 0 : i32
    return %arg0, %2, %c0_i32_0 : i32, i32, i32
  }
  func.func @transform_1(%arg0: i32, %arg1: i32, %arg2: i32) -> (i32, i32, i32) {
    %c0_i32 = arith.constant 0 : i32
    %c0_i32_0 = arith.constant 0 : i32
    return %arg0, %arg2, %c0_i32 : i32, i32, i32
  }
  func.func @transform_2(%arg0: i32, %arg1: i32, %arg2: i32) -> (i32, i32, i32) {
    %c16_i32 = arith.constant 16 : i32
    %0 = arith.muli %arg2, %c16_i32 : i32
    %c16_i32_0 = arith.constant 16 : i32
    %1 = arith.addi %0, %c16_i32_0 : i32
    %c15_i32 = arith.constant 15 : i32
    %2 = arith.minsi %1, %c15_i32 : i32
    %c0_i32 = arith.constant 0 : i32
    %c0_i32_1 = arith.constant 0 : i32
    return %arg0, %2, %c0_i32 : i32, i32, i32
  }
  func.func @transform_3(%arg0: i32, %arg1: i32, %arg2: i32) -> (i32, i32, i32) {
    %c0_i32 = arith.constant 0 : i32
    %c0_i32_0 = arith.constant 0 : i32
    %c0_i32_1 = arith.constant 0 : i32
    return %c0_i32, %c0_i32_0, %arg1 : i32, i32, i32
  }
  func.func @transform_4(%arg0: i32, %arg1: i32, %arg2: i32) -> (i32, i32) {
    %c0_i32 = arith.constant 0 : i32
    %c0_i32_0 = arith.constant 0 : i32
    return %c0_i32, %arg1 : i32, i32
  }
  func.func @transform_5(%arg0: i32, %arg1: i32, %arg2: i32) -> (i32, i32, i32) {
    %c0_i32 = arith.constant 0 : i32
    return %arg0, %arg2, %arg1 : i32, i32, i32
  }
}

module attributes {stable_mosaic.version = 11 : i64} {
  func.func @_maxpool2x2_kernel(%arg0: i32, %arg1: i32, %arg2: memref<1x8x2x8x128xbf16, #tpu.memory_space<vmem>>, %arg3: memref<1x8x8x64xbf16, #tpu.memory_space<vmem>>) attributes {dimension_semantics = [#tpu.dimension_semantics<parallel>, #tpu.dimension_semantics<parallel>], iteration_bounds = array<i64: 2, 1>, scalar_prefetch = 0 : i64, scratch_operands = 0 : i64, tpu.core_type = #tpu.core_type<tc>, window_params = [{transform_indices = @transform_0, window_bounds = array<i64: 1, 8, 2, 8, 128>}, {transform_indices = @transform_1, window_bounds = array<i64: 1, 8, 8, 64>}]} {
    %c0 = arith.constant 0 : index
    %c0_0 = arith.constant 0 : index
    %c0_1 = arith.constant 0 : index
    %c0_2 = arith.constant 0 : index
    %c0_3 = arith.constant 0 : index
    %0 = vector.load %arg2[%c0, %c0_0, %c0_1, %c0_2, %c0_3] : memref<1x8x2x8x128xbf16, #tpu.memory_space<vmem>>, vector<1x8x2x8x128xbf16>
    %1 = vector.shape_cast %0 : vector<1x8x2x8x128xbf16> to vector<8x2x8x128xbf16>
    %2 = vector.extract_strided_slice %1 {offsets = [0, 0, 0, 0], sizes = [8, 1, 8, 128], strides = [1, 1, 1, 1]} : vector<8x2x8x128xbf16> to vector<8x1x8x128xbf16>
    %3 = vector.shape_cast %2 : vector<8x1x8x128xbf16> to vector<8x8x128xbf16>
    %4 = vector.extract_strided_slice %1 {offsets = [0, 1, 0, 0], sizes = [8, 1, 8, 128], strides = [1, 1, 1, 1]} : vector<8x2x8x128xbf16> to vector<8x1x8x128xbf16>
    %5 = vector.shape_cast %4 : vector<8x1x8x128xbf16> to vector<8x8x128xbf16>
    %6 = arith.maximumf %3, %5 : vector<8x8x128xbf16>
    %7 = vector.extract_strided_slice %6 {offsets = [0, 0, 0], sizes = [8, 8, 64], strides = [1, 1, 1]} : vector<8x8x128xbf16> to vector<8x8x64xbf16>
    %8 = vector.extract_strided_slice %6 {offsets = [0, 0, 64], sizes = [8, 8, 64], strides = [1, 1, 1]} : vector<8x8x128xbf16> to vector<8x8x64xbf16>
    %9 = arith.maximumf %7, %8 : vector<8x8x64xbf16>
    %c0_4 = arith.constant 0 : index
    %c0_5 = arith.constant 0 : index
    %c0_6 = arith.constant 0 : index
    %c0_7 = arith.constant 0 : index
    %10 = vector.load %arg3[%c0_4, %c0_5, %c0_6, %c0_7] : memref<1x8x8x64xbf16, #tpu.memory_space<vmem>>, vector<1x8x8x64xbf16>
    %11 = vector.shape_cast %10 : vector<1x8x8x64xbf16> to vector<8x8x64xbf16>
    %12 = vector.shape_cast %9 : vector<8x8x64xbf16> to vector<1x8x8x64xbf16>
    tpu.vector_store %arg3[%c0_4, %c0_5, %c0_6, %c0_7], %12 {strides = array<i32>} : memref<1x8x8x64xbf16, #tpu.memory_space<vmem>>, vector<1x8x8x64xbf16>,
    return
  }
  func.func @transform_0(%arg0: i32, %arg1: i32) -> (i32, i32, i32, i32, i32) {
    %c0_i32 = arith.constant 0 : i32
    %c0_i32_0 = arith.constant 0 : i32
    %c0_i32_1 = arith.constant 0 : i32
    %c0_i32_2 = arith.constant 0 : i32
    return %arg0, %arg1, %c0_i32, %c0_i32_0, %c0_i32_1 : i32, i32, i32, i32, i32
  }
  func.func @transform_1(%arg0: i32, %arg1: i32) -> (i32, i32, i32, i32) {
    %c0_i32 = arith.constant 0 : i32
    %c0_i32_0 = arith.constant 0 : i32
    %c0_i32_1 = arith.constant 0 : i32
    return %arg0, %arg1, %c0_i32, %c0_i32_0 : i32, i32, i32, i32
  }
}

module attributes {stable_mosaic.version = 11 : i64} {
  func.func @_conv3x3_kernel(%arg0: i32, %arg1: i32, %arg2: i32, %arg3: memref<1x8x64xbf16, #tpu.memory_space<vmem>>, %arg4: memref<1x64x64xbf16, #tpu.memory_space<vmem>>, %arg5: memref<1x8x64xbf16, #tpu.memory_space<vmem>>, %arg6: memref<9x64x128xbf16, #tpu.memory_space<vmem>>, %arg7: memref<1x128xf32, #tpu.memory_space<vmem>>, %arg8: memref<1x64x128xbf16, #tpu.memory_space<vmem>>, %arg9: memref<80x64xbf16, #tpu.memory_space<vmem>>, %arg10: memref<64x128xf32, #tpu.memory_space<vmem>>) attributes {dimension_semantics = [#tpu.dimension_semantics<parallel>, #tpu.dimension_semantics<parallel>, #tpu.dimension_semantics<parallel>], iteration_bounds = array<i64: 2, 1, 1>, scalar_prefetch = 0 : i64, scratch_operands = 2 : i64, tpu.core_type = #tpu.core_type<tc>, window_params = [{transform_indices = @transform_0, window_bounds = array<i64: 1, 8, 64>}, {transform_indices = @transform_1, window_bounds = array<i64: 1, 64, 64>}, {transform_indices = @transform_2, window_bounds = array<i64: 1, 8, 64>}, {transform_indices = @transform_3, window_bounds = array<i64: 9, 64, 128>}, {transform_indices = @transform_4, window_bounds = array<i64: 1, 128>}, {transform_indices = @transform_5, window_bounds = array<i64: 1, 64, 128>}]} {
    %c0_i32 = arith.constant 0 : i32
    %0 = arith.cmpi sgt, %arg2, %c0_i32 : i32
    %c0 = arith.constant 0 : index
    %c0_0 = arith.constant 0 : index
    %c0_1 = arith.constant 0 : index
    %1 = vector.load %arg3[%c0, %c0_0, %c0_1] : memref<1x8x64xbf16, #tpu.memory_space<vmem>>, vector<1x8x64xbf16>
    %2 = vector.shape_cast %1 : vector<1x8x64xbf16> to vector<8x64xbf16>
    %c0_i32_2 = arith.constant 0 : i32
    %3 = arith.sitofp %c0_i32_2 : i32 to bf16
    %4 = vector.broadcast %3 : bf16 to vector<8x64xbf16>
    %5 = arith.select %0, %2, %4 : vector<8x64xbf16>
    %c0_i32_3 = arith.constant 0 : i32
    %6 = arith.cmpi slt, %arg2, %c0_i32_3 : i32
    %c0_4 = arith.constant 0 : index
    %c0_5 = arith.constant 0 : index
    %c0_6 = arith.constant 0 : index
    %7 = vector.load %arg5[%c0_4, %c0_5, %c0_6] : memref<1x8x64xbf16, #tpu.memory_space<vmem>>, vector<1x8x64xbf16>
    %8 = vector.shape_cast %7 : vector<1x8x64xbf16> to vector<8x64xbf16>
    %c0_i32_7 = arith.constant 0 : i32
    %9 = arith.sitofp %c0_i32_7 : i32 to bf16
    %10 = vector.broadcast %9 : bf16 to vector<8x64xbf16>
    %11 = arith.select %6, %8, %10 : vector<8x64xbf16>
    %c0_8 = arith.constant 0 : index
    %c0_9 = arith.constant 0 : index
    %12 = vector.load %arg9[%c0_8, %c0_9] : memref<80x64xbf16, #tpu.memory_space<vmem>>, vector<8x64xbf16>
    tpu.vector_store %arg9[%c0_8, %c0_9], %5 {strides = array<i32>} : memref<80x64xbf16, #tpu.memory_space<vmem>>, vector<8x64xbf16>,
    %c0_10 = arith.constant 0 : index
    %c0_11 = arith.constant 0 : index
    %c0_12 = arith.constant 0 : index
    %13 = vector.load %arg4[%c0_10, %c0_11, %c0_12] : memref<1x64x64xbf16, #tpu.memory_space<vmem>>, vector<1x64x64xbf16>
    %14 = vector.shape_cast %13 : vector<1x64x64xbf16> to vector<64x64xbf16>
    %c8 = arith.constant 8 : index
    %c0_13 = arith.constant 0 : index
    %15 = vector.load %arg9[%c8, %c0_13] : memref<80x64xbf16, #tpu.memory_space<vmem>>, vector<64x64xbf16>
    tpu.vector_store %arg9[%c8, %c0_13], %14 {strides = array<i32>} : memref<80x64xbf16, #tpu.memory_space<vmem>>, vector<64x64xbf16>,
    %c72 = arith.constant 72 : index
    %c0_14 = arith.constant 0 : index
    %16 = vector.load %arg9[%c72, %c0_14] : memref<80x64xbf16, #tpu.memory_space<vmem>>, vector<8x64xbf16>
    tpu.vector_store %arg9[%c72, %c0_14], %11 {strides = array<i32>} : memref<80x64xbf16, #tpu.memory_space<vmem>>, vector<8x64xbf16>,
    %17 = tpu.iota {dimensions = array<i32: 0>} : vector<64x1xi32>
    %c8_i32 = arith.constant 8 : i32
    %c0_i32_15 = arith.constant 0 : i32
    %18 = arith.cmpi eq, %c8_i32, %c0_i32_15 : i32
    %c1_i32 = arith.constant 1 : i32
    %19 = arith.select %18, %c1_i32, %c8_i32 : i32
    %20 = vector.broadcast %19 : i32 to vector<64x1xi32>
    %21 = arith.remsi %17, %20 : vector<64x1xi32>
    %c0_i32_16 = arith.constant 0 : i32
    %22 = vector.broadcast %c0_i32_16 : i32 to vector<64x1xi32>
    %23 = arith.cmpi ne, %21, %22 : vector<64x1xi32>
    %c0_i32_17 = arith.constant 0 : i32
    %24 = vector.broadcast %c0_i32_17 : i32 to vector<64x1xi32>
    %25 = arith.cmpi slt, %21, %24 : vector<64x1xi32>
    %c0_i32_18 = arith.constant 0 : i32
    %26 = arith.cmpi slt, %19, %c0_i32_18 : i32
    %27 = vector.broadcast %26 : i1 to vector<64x1xi1>
    %28 = vector.broadcast %27 : vector<64x1xi1> to vector<64x1xi1>
    %29 = arith.xori %25, %28 : vector<64x1xi1>
    %30 = arith.andi %29, %23 : vector<64x1xi1>
    %31 = vector.broadcast %19 : i32 to vector<64x1xi32>
    %32 = arith.addi %21, %31 : vector<64x1xi32>
    %33 = arith.select %30, %32, %21 : vector<64x1xi1>, vector<64x1xi32>
    %cst = arith.constant 0.000000e+00 : f32
    %34 = vector.broadcast %cst : f32 to vector<1x128xf32>
    %c0_19 = arith.constant 0 : index
    %c0_20 = arith.constant 0 : index
    %35 = vector.load %arg9[%c0_19, %c0_20] : memref<80x64xbf16, #tpu.memory_space<vmem>>, vector<64x64xbf16>
    %c3 = arith.constant 3 : index
    %c0_21 = arith.constant 0 : index
    %c0_22 = arith.constant 0 : index
    %36 = vector.load %arg6[%c3, %c0_21, %c0_22] : memref<9x64x128xbf16, #tpu.memory_space<vmem>>, vector<1x64x128xbf16>
    %37 = vector.shape_cast %36 : vector<1x64x128xbf16> to vector<64x128xbf16>
    %cst_23 = arith.constant dense<0.000000e+00> : vector<64x128xf32>
    %38 = tpu.matmul %35, %37, %cst_23 {dimension_numbers = #tpu.dot_dimension_numbers<[1], [0], [0], [1], [0, 0, 1, 1], [], []>} : vector<64x64xbf16>, vector<64x128xbf16>, vector<64x128xf32> -> vector<64x128xf32>
    %c8_24 = arith.constant 8 : index
    %c0_25 = arith.constant 0 : index
    %39 = vector.load %arg9[%c8_24, %c0_25] : memref<80x64xbf16, #tpu.memory_space<vmem>>, vector<64x64xbf16>
    %c4 = arith.constant 4 : index
    %c0_26 = arith.constant 0 : index
    %c0_27 = arith.constant 0 : index
    %40 = vector.load %arg6[%c4, %c0_26, %c0_27] : memref<9x64x128xbf16, #tpu.memory_space<vmem>>, vector<1x64x128xbf16>
    %41 = vector.shape_cast %40 : vector<1x64x128xbf16> to vector<64x128xbf16>
    %cst_28 = arith.constant dense<0.000000e+00> : vector<64x128xf32>
    %42 = tpu.matmul %39, %41, %cst_28 {dimension_numbers = #tpu.dot_dimension_numbers<[1], [0], [0], [1], [0, 0, 1, 1], [], []>} : vector<64x64xbf16>, vector<64x128xbf16>, vector<64x128xf32> -> vector<64x128xf32>
    %43 = arith.addf %38, %42 : vector<64x128xf32>
    %c16 = arith.constant 16 : index
    %c0_29 = arith.constant 0 : index
    %44 = vector.load %arg9[%c16, %c0_29] : memref<80x64xbf16, #tpu.memory_space<vmem>>, vector<64x64xbf16>
    %c5 = arith.constant 5 : index
    %c0_30 = arith.constant 0 : index
    %c0_31 = arith.constant 0 : index
    %45 = vector.load %arg6[%c5, %c0_30, %c0_31] : memref<9x64x128xbf16, #tpu.memory_space<vmem>>, vector<1x64x128xbf16>
    %46 = vector.shape_cast %45 : vector<1x64x128xbf16> to vector<64x128xbf16>
    %cst_32 = arith.constant dense<0.000000e+00> : vector<64x128xf32>
    %47 = tpu.matmul %44, %46, %cst_32 {dimension_numbers = #tpu.dot_dimension_numbers<[1], [0], [0], [1], [0, 0, 1, 1], [], []>} : vector<64x64xbf16>, vector<64x128xbf16>, vector<64x128xf32> -> vector<64x128xf32>
    %48 = arith.addf %43, %47 : vector<64x128xf32>
    %c0_33 = arith.constant 0 : index
    %c0_34 = arith.constant 0 : index
    %49 = vector.load %arg7[%c0_33, %c0_34] : memref<1x128xf32, #tpu.memory_space<vmem>>, vector<1x128xf32>
    %50 = vector.broadcast %49 : vector<1x128xf32> to vector<64x128xf32>
    %51 = arith.addf %48, %50 : vector<64x128xf32>
    %c0_35 = arith.constant 0 : index
    %c0_36 = arith.constant 0 : index
    %52 = vector.load %arg10[%c0_35, %c0_36] : memref<64x128xf32, #tpu.memory_space<vmem>>, vector<64x128xf32>
    tpu.vector_store %arg10[%c0_35, %c0_36], %51 {strides = array<i32>} : memref<64x128xf32, #tpu.memory_space<vmem>>, vector<64x128xf32>,
    %c0_37 = arith.constant 0 : index
    %c0_38 = arith.constant 0 : index
    %53 = vector.load %arg9[%c0_37, %c0_38] : memref<80x64xbf16, #tpu.memory_space<vmem>>, vector<64x64xbf16>
    %c0_39 = arith.constant 0 : index
    %c0_40 = arith.constant 0 : index
    %c0_41 = arith.constant 0 : index
    %54 = vector.load %arg6[%c0_39, %c0_40, %c0_41] : memref<9x64x128xbf16, #tpu.memory_space<vmem>>, vector<1x64x128xbf16>
    %55 = vector.shape_cast %54 : vector<1x64x128xbf16> to vector<64x128xbf16>
    %cst_42 = arith.constant dense<0.000000e+00> : vector<64x128xf32>
    %56 = tpu.matmul %53, %55, %cst_42 {dimension_numbers = #tpu.dot_dimension_numbers<[1], [0], [0], [1], [0, 0, 1, 1], [], []>} : vector<64x64xbf16>, vector<64x128xbf16>, vector<64x128xf32> -> vector<64x128xf32>
    %c8_43 = arith.constant 8 : index
    %c0_44 = arith.constant 0 : index
    %57 = vector.load %arg9[%c8_43, %c0_44] : memref<80x64xbf16, #tpu.memory_space<vmem>>, vector<64x64xbf16>
    %c1 = arith.constant 1 : index
    %c0_45 = arith.constant 0 : index
    %c0_46 = arith.constant 0 : index
    %58 = vector.load %arg6[%c1, %c0_45, %c0_46] : memref<9x64x128xbf16, #tpu.memory_space<vmem>>, vector<1x64x128xbf16>
    %59 = vector.shape_cast %58 : vector<1x64x128xbf16> to vector<64x128xbf16>
    %cst_47 = arith.constant dense<0.000000e+00> : vector<64x128xf32>
    %60 = tpu.matmul %57, %59, %cst_47 {dimension_numbers = #tpu.dot_dimension_numbers<[1], [0], [0], [1], [0, 0, 1, 1], [], []>} : vector<64x64xbf16>, vector<64x128xbf16>, vector<64x128xf32> -> vector<64x128xf32>
    %61 = arith.addf %56, %60 : vector<64x128xf32>
    %c16_48 = arith.constant 16 : index
    %c0_49 = arith.constant 0 : index
    %62 = vector.load %arg9[%c16_48, %c0_49] : memref<80x64xbf16, #tpu.memory_space<vmem>>, vector<64x64xbf16>
    %c2 = arith.constant 2 : index
    %c0_50 = arith.constant 0 : index
    %c0_51 = arith.constant 0 : index
    %63 = vector.load %arg6[%c2, %c0_50, %c0_51] : memref<9x64x128xbf16, #tpu.memory_space<vmem>>, vector<1x64x128xbf16>
    %64 = vector.shape_cast %63 : vector<1x64x128xbf16> to vector<64x128xbf16>
    %cst_52 = arith.constant dense<0.000000e+00> : vector<64x128xf32>
    %65 = tpu.matmul %62, %64, %cst_52 {dimension_numbers = #tpu.dot_dimension_numbers<[1], [0], [0], [1], [0, 0, 1, 1], [], []>} : vector<64x64xbf16>, vector<64x128xbf16>, vector<64x128xf32> -> vector<64x128xf32>
    %66 = arith.addf %61, %65 : vector<64x128xf32>
    %c0_53 = arith.constant 0 : index
    %c0_54 = arith.constant 0 : index
    %67 = vector.load %arg10[%c0_53, %c0_54] : memref<64x128xf32, #tpu.memory_space<vmem>>, vector<64x128xf32>
    %c0_i32_55 = arith.constant 0 : i32
    %68 = vector.broadcast %c0_i32_55 : i32 to vector<64x1xi32>
    %69 = arith.cmpi ne, %33, %68 : vector<64x1xi32>
    %70 = vector.extract_strided_slice %66 {offsets = [0, 0], sizes = [63, 128], strides = [1, 1]} : vector<64x128xf32> to vector<63x128xf32>
    %71 = tpu.concatenate %34, %70 in 0 : vector<1x128xf32>, vector<63x128xf32> -> vector<64x128xf32>
    %cst_56 = arith.constant 0.000000e+00 : f32
    %72 = vector.shape_cast %69 : vector<64x1xi1> to vector<64x1xi1>
    %73 = vector.broadcast %72 : vector<64x1xi1> to vector<64x128xi1>
    %74 = vector.broadcast %cst_56 : f32 to vector<64x128xf32>
    %75 = arith.select %73, %71, %74 : vector<64x128xi1>, vector<64x128xf32>
    %76 = arith.addf %67, %75 : vector<64x128xf32>
    %c0_57 = arith.constant 0 : index
    %c0_58 = arith.constant 0 : index
    %77 = vector.load %arg10[%c0_57, %c0_58] : memref<64x128xf32, #tpu.memory_space<vmem>>, vector<64x128xf32>
    tpu.vector_store %arg10[%c0_57, %c0_58], %76 {strides = array<i32>} : memref<64x128xf32, #tpu.memory_space<vmem>>, vector<64x128xf32>,
    %c0_59 = arith.constant 0 : index
    %c0_60 = arith.constant 0 : index
    %78 = vector.load %arg9[%c0_59, %c0_60] : memref<80x64xbf16, #tpu.memory_space<vmem>>, vector<64x64xbf16>
    %c6 = arith.constant 6 : index
    %c0_61 = arith.constant 0 : index
    %c0_62 = arith.constant 0 : index
    %79 = vector.load %arg6[%c6, %c0_61, %c0_62] : memref<9x64x128xbf16, #tpu.memory_space<vmem>>, vector<1x64x128xbf16>
    %80 = vector.shape_cast %79 : vector<1x64x128xbf16> to vector<64x128xbf16>
    %cst_63 = arith.constant dense<0.000000e+00> : vector<64x128xf32>
    %81 = tpu.matmul %78, %80, %cst_63 {dimension_numbers = #tpu.dot_dimension_numbers<[1], [0], [0], [1], [0, 0, 1, 1], [], []>} : vector<64x64xbf16>, vector<64x128xbf16>, vector<64x128xf32> -> vector<64x128xf32>
    %c8_64 = arith.constant 8 : index
    %c0_65 = arith.constant 0 : index
    %82 = vector.load %arg9[%c8_64, %c0_65] : memref<80x64xbf16, #tpu.memory_space<vmem>>, vector<64x64xbf16>
    %c7 = arith.constant 7 : index
    %c0_66 = arith.constant 0 : index
    %c0_67 = arith.constant 0 : index
    %83 = vector.load %arg6[%c7, %c0_66, %c0_67] : memref<9x64x128xbf16, #tpu.memory_space<vmem>>, vector<1x64x128xbf16>
    %84 = vector.shape_cast %83 : vector<1x64x128xbf16> to vector<64x128xbf16>
    %cst_68 = arith.constant dense<0.000000e+00> : vector<64x128xf32>
    %85 = tpu.matmul %82, %84, %cst_68 {dimension_numbers = #tpu.dot_dimension_numbers<[1], [0], [0], [1], [0, 0, 1, 1], [], []>} : vector<64x64xbf16>, vector<64x128xbf16>, vector<64x128xf32> -> vector<64x128xf32>
    %86 = arith.addf %81, %85 : vector<64x128xf32>
    %c16_69 = arith.constant 16 : index
    %c0_70 = arith.constant 0 : index
    %87 = vector.load %arg9[%c16_69, %c0_70] : memref<80x64xbf16, #tpu.memory_space<vmem>>, vector<64x64xbf16>
    %c8_71 = arith.constant 8 : index
    %c0_72 = arith.constant 0 : index
    %c0_73 = arith.constant 0 : index
    %88 = vector.load %arg6[%c8_71, %c0_72, %c0_73] : memref<9x64x128xbf16, #tpu.memory_space<vmem>>, vector<1x64x128xbf16>
    %89 = vector.shape_cast %88 : vector<1x64x128xbf16> to vector<64x128xbf16>
    %cst_74 = arith.constant dense<0.000000e+00> : vector<64x128xf32>
    %90 = tpu.matmul %87, %89, %cst_74 {dimension_numbers = #tpu.dot_dimension_numbers<[1], [0], [0], [1], [0, 0, 1, 1], [], []>} : vector<64x64xbf16>, vector<64x128xbf16>, vector<64x128xf32> -> vector<64x128xf32>
    %91 = arith.addf %86, %90 : vector<64x128xf32>
    %c0_75 = arith.constant 0 : index
    %c0_76 = arith.constant 0 : index
    %92 = vector.load %arg10[%c0_75, %c0_76] : memref<64x128xf32, #tpu.memory_space<vmem>>, vector<64x128xf32>
    %c7_i32 = arith.constant 7 : i32
    %93 = vector.broadcast %c7_i32 : i32 to vector<64x1xi32>
    %94 = arith.cmpi ne, %33, %93 : vector<64x1xi32>
    %95 = vector.extract_strided_slice %91 {offsets = [1, 0], sizes = [63, 128], strides = [1, 1]} : vector<64x128xf32> to vector<63x128xf32>
    %96 = tpu.concatenate %95, %34 in 0 : vector<63x128xf32>, vector<1x128xf32> -> vector<64x128xf32>
    %cst_77 = arith.constant 0.000000e+00 : f32
    %97 = vector.shape_cast %94 : vector<64x1xi1> to vector<64x1xi1>
    %98 = vector.broadcast %97 : vector<64x1xi1> to vector<64x128xi1>
    %99 = vector.broadcast %cst_77 : f32 to vector<64x128xf32>
    %100 = arith.select %98, %96, %99 : vector<64x128xi1>, vector<64x128xf32>
    %101 = arith.addf %92, %100 : vector<64x128xf32>
    %c0_78 = arith.constant 0 : index
    %c0_79 = arith.constant 0 : index
    %102 = vector.load %arg10[%c0_78, %c0_79] : memref<64x128xf32, #tpu.memory_space<vmem>>, vector<64x128xf32>
    tpu.vector_store %arg10[%c0_78, %c0_79], %101 {strides = array<i32>} : memref<64x128xf32, #tpu.memory_space<vmem>>, vector<64x128xf32>,
    %c0_80 = arith.constant 0 : index
    %c0_81 = arith.constant 0 : index
    %103 = vector.load %arg10[%c0_80, %c0_81] : memref<64x128xf32, #tpu.memory_space<vmem>>, vector<64x128xf32>
    %cst_82 = arith.constant 0.000000e+00 : f32
    %104 = vector.broadcast %cst_82 : f32 to vector<64x128xf32>
    %105 = arith.maximumf %103, %104 : vector<64x128xf32>
    %106 = arith.truncf %105 : vector<64x128xf32> to vector<64x128xbf16>
    %c0_83 = arith.constant 0 : index
    %c0_84 = arith.constant 0 : index
    %c0_85 = arith.constant 0 : index
    %107 = vector.load %arg8[%c0_83, %c0_84, %c0_85] : memref<1x64x128xbf16, #tpu.memory_space<vmem>>, vector<1x64x128xbf16>
    %108 = vector.shape_cast %107 : vector<1x64x128xbf16> to vector<64x128xbf16>
    %109 = vector.shape_cast %106 : vector<64x128xbf16> to vector<1x64x128xbf16>
    tpu.vector_store %arg8[%c0_83, %c0_84, %c0_85], %109 {strides = array<i32>} : memref<1x64x128xbf16, #tpu.memory_space<vmem>>, vector<1x64x128xbf16>,
    return
  }
  func.func @transform_0(%arg0: i32, %arg1: i32, %arg2: i32) -> (i32, i32, i32) {
    %c8_i32 = arith.constant 8 : i32
    %0 = arith.muli %arg2, %c8_i32 : i32
    %c1_i32 = arith.constant 1 : i32
    %1 = arith.subi %0, %c1_i32 : i32
    %c0_i32 = arith.constant 0 : i32
    %2 = arith.maxsi %1, %c0_i32 : i32
    %c0_i32_0 = arith.constant 0 : i32
    %c0_i32_1 = arith.constant 0 : i32
    return %arg0, %2, %c0_i32_0 : i32, i32, i32
  }
  func.func @transform_1(%arg0: i32, %arg1: i32, %arg2: i32) -> (i32, i32, i32) {
    %c0_i32 = arith.constant 0 : i32
    %c0_i32_0 = arith.constant 0 : i32
    return %arg0, %arg2, %c0_i32 : i32, i32, i32
  }
  func.func @transform_2(%arg0: i32, %arg1: i32, %arg2: i32) -> (i32, i32, i32) {
    %c8_i32 = arith.constant 8 : i32
    %0 = arith.muli %arg2, %c8_i32 : i32
    %c8_i32_0 = arith.constant 8 : i32
    %1 = arith.addi %0, %c8_i32_0 : i32
    %c7_i32 = arith.constant 7 : i32
    %2 = arith.minsi %1, %c7_i32 : i32
    %c0_i32 = arith.constant 0 : i32
    %c0_i32_1 = arith.constant 0 : i32
    return %arg0, %2, %c0_i32 : i32, i32, i32
  }
  func.func @transform_3(%arg0: i32, %arg1: i32, %arg2: i32) -> (i32, i32, i32) {
    %c0_i32 = arith.constant 0 : i32
    %c0_i32_0 = arith.constant 0 : i32
    %c0_i32_1 = arith.constant 0 : i32
    return %c0_i32, %c0_i32_0, %arg1 : i32, i32, i32
  }
  func.func @transform_4(%arg0: i32, %arg1: i32, %arg2: i32) -> (i32, i32) {
    %c0_i32 = arith.constant 0 : i32
    %c0_i32_0 = arith.constant 0 : i32
    return %c0_i32, %arg1 : i32, i32
  }
  func.func @transform_5(%arg0: i32, %arg1: i32, %arg2: i32) -> (i32, i32, i32) {
    %c0_i32 = arith.constant 0 : i32
    return %arg0, %arg2, %arg1 : i32, i32, i32
  }
}

module attributes {stable_mosaic.version = 11 : i64} {
  func.func @_conv3x3_packed_kernel(%arg0: i32, %arg1: i32, %arg2: i32, %arg3: memref<1x8x128xbf16, #tpu.memory_space<vmem>>, %arg4: memref<1x64x128xbf16, #tpu.memory_space<vmem>>, %arg5: memref<1x8x128xbf16, #tpu.memory_space<vmem>>, %arg6: memref<3x384x128xbf16, #tpu.memory_space<vmem>>, %arg7: memref<1x128xf32, #tpu.memory_space<vmem>>, %arg8: memref<1x64x128xbf16, #tpu.memory_space<vmem>>, %arg9: memref<64x384xbf16, #tpu.memory_space<vmem>>, %arg10: memref<64x128xf32, #tpu.memory_space<vmem>>) attributes {dimension_semantics = [#tpu.dimension_semantics<parallel>, #tpu.dimension_semantics<parallel>, #tpu.dimension_semantics<parallel>], iteration_bounds = array<i64: 2, 1, 1>, scalar_prefetch = 0 : i64, scratch_operands = 2 : i64, tpu.core_type = #tpu.core_type<tc>, window_params = [{transform_indices = @transform_0, window_bounds = array<i64: 1, 8, 128>}, {transform_indices = @transform_1, window_bounds = array<i64: 1, 64, 128>}, {transform_indices = @transform_2, window_bounds = array<i64: 1, 8, 128>}, {transform_indices = @transform_3, window_bounds = array<i64: 3, 384, 128>}, {transform_indices = @transform_4, window_bounds = array<i64: 1, 128>}, {transform_indices = @transform_5, window_bounds = array<i64: 1, 64, 128>}]} {
    %c0 = arith.constant 0 : index
    %c0_0 = arith.constant 0 : index
    %c0_1 = arith.constant 0 : index
    %0 = vector.load %arg4[%c0, %c0_0, %c0_1] : memref<1x64x128xbf16, #tpu.memory_space<vmem>>, vector<1x64x128xbf16>
    %1 = vector.shape_cast %0 : vector<1x64x128xbf16> to vector<64x128xbf16>
    %c0_i32 = arith.constant 0 : i32
    %2 = arith.cmpi sgt, %arg2, %c0_i32 : i32
    %c0_2 = arith.constant 0 : index
    %c0_3 = arith.constant 0 : index
    %c0_4 = arith.constant 0 : index
    %3 = vector.load %arg3[%c0_2, %c0_3, %c0_4] : memref<1x8x128xbf16, #tpu.memory_space<vmem>>, vector<1x8x128xbf16>
    %4 = vector.shape_cast %3 : vector<1x8x128xbf16> to vector<8x128xbf16>
    %c0_i32_5 = arith.constant 0 : i32
    %5 = arith.sitofp %c0_i32_5 : i32 to bf16
    %6 = vector.broadcast %5 : bf16 to vector<8x128xbf16>
    %7 = arith.select %2, %4, %6 : vector<8x128xbf16>
    %c0_i32_6 = arith.constant 0 : i32
    %8 = arith.cmpi slt, %arg2, %c0_i32_6 : i32
    %c0_7 = arith.constant 0 : index
    %c0_8 = arith.constant 0 : index
    %c0_9 = arith.constant 0 : index
    %9 = vector.load %arg5[%c0_7, %c0_8, %c0_9] : memref<1x8x128xbf16, #tpu.memory_space<vmem>>, vector<1x8x128xbf16>
    %10 = vector.shape_cast %9 : vector<1x8x128xbf16> to vector<8x128xbf16>
    %c0_i32_10 = arith.constant 0 : i32
    %11 = arith.sitofp %c0_i32_10 : i32 to bf16
    %12 = vector.broadcast %11 : bf16 to vector<8x128xbf16>
    %13 = arith.select %8, %10, %12 : vector<8x128xbf16>
    %c0_11 = arith.constant 0 : index
    %c128 = arith.constant 128 : index
    %14 = vector.load %arg9[%c0_11, %c128] : memref<64x384xbf16, #tpu.memory_space<vmem>>, vector<64x128xbf16>
    tpu.vector_store %arg9[%c0_11, %c128], %1 {strides = array<i32>} : memref<64x384xbf16, #tpu.memory_space<vmem>>, vector<64x128xbf16>,
    %c0_12 = arith.constant 0 : index
    %c0_13 = arith.constant 0 : index
    %15 = vector.load %arg9[%c0_12, %c0_13] : memref<64x384xbf16, #tpu.memory_space<vmem>>, vector<8x128xbf16>
    tpu.vector_store %arg9[%c0_12, %c0_13], %7 {strides = array<i32>} : memref<64x384xbf16, #tpu.memory_space<vmem>>, vector<8x128xbf16>,
    %c56 = arith.constant 56 : index
    %c256 = arith.constant 256 : index
    %16 = vector.load %arg9[%c56, %c256] : memref<64x384xbf16, #tpu.memory_space<vmem>>, vector<8x128xbf16>
    tpu.vector_store %arg9[%c56, %c256], %13 {strides = array<i32>} : memref<64x384xbf16, #tpu.memory_space<vmem>>, vector<8x128xbf16>,
    %17 = vector.extract_strided_slice %1 {offsets = [0, 0], sizes = [56, 128], strides = [1, 1]} : vector<64x128xbf16> to vector<56x128xbf16>
    %c8 = arith.constant 8 : index
    %c0_14 = arith.constant 0 : index
    %18 = vector.load %arg9[%c8, %c0_14] : memref<64x384xbf16, #tpu.memory_space<vmem>>, vector<56x128xbf16>
    tpu.vector_store %arg9[%c8, %c0_14], %17 {strides = array<i32>} : memref<64x384xbf16, #tpu.memory_space<vmem>>, vector<56x128xbf16>,
    %19 = vector.extract_strided_slice %1 {offsets = [8, 0], sizes = [56, 128], strides = [1, 1]} : vector<64x128xbf16> to vector<56x128xbf16>
    %c0_15 = arith.constant 0 : index
    %c256_16 = arith.constant 256 : index
    %20 = vector.load %arg9[%c0_15, %c256_16] : memref<64x384xbf16, #tpu.memory_space<vmem>>, vector<56x128xbf16>
    tpu.vector_store %arg9[%c0_15, %c256_16], %19 {strides = array<i32>} : memref<64x384xbf16, #tpu.memory_space<vmem>>, vector<56x128xbf16>,
    %c0_17 = arith.constant 0 : index
    %c0_18 = arith.constant 0 : index
    %21 = vector.load %arg9[%c0_17, %c0_18] : memref<64x384xbf16, #tpu.memory_space<vmem>>, vector<64x384xbf16>
    %22 = tpu.iota {dimensions = array<i32: 0>} : vector<64x1xi32>
    %c8_i32 = arith.constant 8 : i32
    %c0_i32_19 = arith.constant 0 : i32
    %23 = arith.cmpi eq, %c8_i32, %c0_i32_19 : i32
    %c1_i32 = arith.constant 1 : i32
    %24 = arith.select %23, %c1_i32, %c8_i32 : i32
    %25 = vector.broadcast %24 : i32 to vector<64x1xi32>
    %26 = arith.remsi %22, %25 : vector<64x1xi32>
    %c0_i32_20 = arith.constant 0 : i32
    %27 = vector.broadcast %c0_i32_20 : i32 to vector<64x1xi32>
    %28 = arith.cmpi ne, %26, %27 : vector<64x1xi32>
    %c0_i32_21 = arith.constant 0 : i32
    %29 = vector.broadcast %c0_i32_21 : i32 to vector<64x1xi32>
    %30 = arith.cmpi slt, %26, %29 : vector<64x1xi32>
    %c0_i32_22 = arith.constant 0 : i32
    %31 = arith.cmpi slt, %24, %c0_i32_22 : i32
    %32 = vector.broadcast %31 : i1 to vector<64x1xi1>
    %33 = vector.broadcast %32 : vector<64x1xi1> to vector<64x1xi1>
    %34 = arith.xori %30, %33 : vector<64x1xi1>
    %35 = arith.andi %34, %28 : vector<64x1xi1>
    %36 = vector.broadcast %24 : i32 to vector<64x1xi32>
    %37 = arith.addi %26, %36 : vector<64x1xi32>
    %38 = arith.select %35, %37, %26 : vector<64x1xi1>, vector<64x1xi32>
    %cst = arith.constant 0.000000e+00 : f32
    %39 = vector.broadcast %cst : f32 to vector<1x128xf32>
    %c1 = arith.constant 1 : index
    %c0_23 = arith.constant 0 : index
    %c0_24 = arith.constant 0 : index
    %40 = vector.load %arg6[%c1, %c0_23, %c0_24] : memref<3x384x128xbf16, #tpu.memory_space<vmem>>, vector<1x384x128xbf16>
    %41 = vector.shape_cast %40 : vector<1x384x128xbf16> to vector<384x128xbf16>
    %cst_25 = arith.constant dense<0.000000e+00> : vector<64x128xf32>
    %42 = tpu.matmul %21, %41, %cst_25 {dimension_numbers = #tpu.dot_dimension_numbers<[1], [0], [0], [1], [0, 0, 1, 1], [], []>} : vector<64x384xbf16>, vector<384x128xbf16>, vector<64x128xf32> -> vector<64x128xf32>
    %c0_26 = arith.constant 0 : index
    %c0_27 = arith.constant 0 : index
    %43 = vector.load %arg7[%c0_26, %c0_27] : memref<1x128xf32, #tpu.memory_space<vmem>>, vector<1x128xf32>
    %44 = vector.broadcast %43 : vector<1x128xf32> to vector<64x128xf32>
    %45 = arith.addf %42, %44 : vector<64x128xf32>
    %c0_28 = arith.constant 0 : index
    %c0_29 = arith.constant 0 : index
    %46 = vector.load %arg10[%c0_28, %c0_29] : memref<64x128xf32, #tpu.memory_space<vmem>>, vector<64x128xf32>
    tpu.vector_store %arg10[%c0_28, %c0_29], %45 {strides = array<i32>} : memref<64x128xf32, #tpu.memory_space<vmem>>, vector<64x128xf32>,
    %c0_30 = arith.constant 0 : index
    %c0_31 = arith.constant 0 : index
    %c0_32 = arith.constant 0 : index
    %47 = vector.load %arg6[%c0_30, %c0_31, %c0_32] : memref<3x384x128xbf16, #tpu.memory_space<vmem>>, vector<1x384x128xbf16>
    %48 = vector.shape_cast %47 : vector<1x384x128xbf16> to vector<384x128xbf16>
    %cst_33 = arith.constant dense<0.000000e+00> : vector<64x128xf32>
    %49 = tpu.matmul %21, %48, %cst_33 {dimension_numbers = #tpu.dot_dimension_numbers<[1], [0], [0], [1], [0, 0, 1, 1], [], []>} : vector<64x384xbf16>, vector<384x128xbf16>, vector<64x128xf32> -> vector<64x128xf32>
    %c0_34 = arith.constant 0 : index
    %c0_35 = arith.constant 0 : index
    %50 = vector.load %arg10[%c0_34, %c0_35] : memref<64x128xf32, #tpu.memory_space<vmem>>, vector<64x128xf32>
    %c0_i32_36 = arith.constant 0 : i32
    %51 = vector.broadcast %c0_i32_36 : i32 to vector<64x1xi32>
    %52 = arith.cmpi ne, %38, %51 : vector<64x1xi32>
    %53 = vector.extract_strided_slice %49 {offsets = [0, 0], sizes = [63, 128], strides = [1, 1]} : vector<64x128xf32> to vector<63x128xf32>
    %54 = tpu.concatenate %39, %53 in 0 : vector<1x128xf32>, vector<63x128xf32> -> vector<64x128xf32>
    %cst_37 = arith.constant 0.000000e+00 : f32
    %55 = vector.shape_cast %52 : vector<64x1xi1> to vector<64x1xi1>
    %56 = vector.broadcast %55 : vector<64x1xi1> to vector<64x128xi1>
    %57 = vector.broadcast %cst_37 : f32 to vector<64x128xf32>
    %58 = arith.select %56, %54, %57 : vector<64x128xi1>, vector<64x128xf32>
    %59 = arith.addf %50, %58 : vector<64x128xf32>
    %c0_38 = arith.constant 0 : index
    %c0_39 = arith.constant 0 : index
    %60 = vector.load %arg10[%c0_38, %c0_39] : memref<64x128xf32, #tpu.memory_space<vmem>>, vector<64x128xf32>
    tpu.vector_store %arg10[%c0_38, %c0_39], %59 {strides = array<i32>} : memref<64x128xf32, #tpu.memory_space<vmem>>, vector<64x128xf32>,
    %c2 = arith.constant 2 : index
    %c0_40 = arith.constant 0 : index
    %c0_41 = arith.constant 0 : index
    %61 = vector.load %arg6[%c2, %c0_40, %c0_41] : memref<3x384x128xbf16, #tpu.memory_space<vmem>>, vector<1x384x128xbf16>
    %62 = vector.shape_cast %61 : vector<1x384x128xbf16> to vector<384x128xbf16>
    %cst_42 = arith.constant dense<0.000000e+00> : vector<64x128xf32>
    %63 = tpu.matmul %21, %62, %cst_42 {dimension_numbers = #tpu.dot_dimension_numbers<[1], [0], [0], [1], [0, 0, 1, 1], [], []>} : vector<64x384xbf16>, vector<384x128xbf16>, vector<64x128xf32> -> vector<64x128xf32>
    %c0_43 = arith.constant 0 : index
    %c0_44 = arith.constant 0 : index
    %64 = vector.load %arg10[%c0_43, %c0_44] : memref<64x128xf32, #tpu.memory_space<vmem>>, vector<64x128xf32>
    %c7_i32 = arith.constant 7 : i32
    %65 = vector.broadcast %c7_i32 : i32 to vector<64x1xi32>
    %66 = arith.cmpi ne, %38, %65 : vector<64x1xi32>
    %67 = vector.extract_strided_slice %63 {offsets = [1, 0], sizes = [63, 128], strides = [1, 1]} : vector<64x128xf32> to vector<63x128xf32>
    %68 = tpu.concatenate %67, %39 in 0 : vector<63x128xf32>, vector<1x128xf32> -> vector<64x128xf32>
    %cst_45 = arith.constant 0.000000e+00 : f32
    %69 = vector.shape_cast %66 : vector<64x1xi1> to vector<64x1xi1>
    %70 = vector.broadcast %69 : vector<64x1xi1> to vector<64x128xi1>
    %71 = vector.broadcast %cst_45 : f32 to vector<64x128xf32>
    %72 = arith.select %70, %68, %71 : vector<64x128xi1>, vector<64x128xf32>
    %73 = arith.addf %64, %72 : vector<64x128xf32>
    %c0_46 = arith.constant 0 : index
    %c0_47 = arith.constant 0 : index
    %74 = vector.load %arg10[%c0_46, %c0_47] : memref<64x128xf32, #tpu.memory_space<vmem>>, vector<64x128xf32>
    tpu.vector_store %arg10[%c0_46, %c0_47], %73 {strides = array<i32>} : memref<64x128xf32, #tpu.memory_space<vmem>>, vector<64x128xf32>,
    %c0_48 = arith.constant 0 : index
    %c0_49 = arith.constant 0 : index
    %75 = vector.load %arg10[%c0_48, %c0_49] : memref<64x128xf32, #tpu.memory_space<vmem>>, vector<64x128xf32>
    %cst_50 = arith.constant 0.000000e+00 : f32
    %76 = vector.broadcast %cst_50 : f32 to vector<64x128xf32>
    %77 = arith.maximumf %75, %76 : vector<64x128xf32>
    %78 = arith.truncf %77 : vector<64x128xf32> to vector<64x128xbf16>
    %c0_51 = arith.constant 0 : index
    %c0_52 = arith.constant 0 : index
    %c0_53 = arith.constant 0 : index
    %79 = vector.load %arg8[%c0_51, %c0_52, %c0_53] : memref<1x64x128xbf16, #tpu.memory_space<vmem>>, vector<1x64x128xbf16>
    %80 = vector.shape_cast %79 : vector<1x64x128xbf16> to vector<64x128xbf16>
    %81 = vector.shape_cast %78 : vector<64x128xbf16> to vector<1x64x128xbf16>
    tpu.vector_store %arg8[%c0_51, %c0_52, %c0_53], %81 {strides = array<i32>} : memref<1x64x128xbf16, #tpu.memory_space<vmem>>, vector<1x64x128xbf16>,
    return
  }
  func.func @transform_0(%arg0: i32, %arg1: i32, %arg2: i32) -> (i32, i32, i32) {
    %c8_i32 = arith.constant 8 : i32
    %0 = arith.muli %arg2, %c8_i32 : i32
    %c1_i32 = arith.constant 1 : i32
    %1 = arith.subi %0, %c1_i32 : i32
    %c0_i32 = arith.constant 0 : i32
    %2 = arith.maxsi %1, %c0_i32 : i32
    %c0_i32_0 = arith.constant 0 : i32
    %c0_i32_1 = arith.constant 0 : i32
    return %arg0, %2, %c0_i32_0 : i32, i32, i32
  }
  func.func @transform_1(%arg0: i32, %arg1: i32, %arg2: i32) -> (i32, i32, i32) {
    %c0_i32 = arith.constant 0 : i32
    %c0_i32_0 = arith.constant 0 : i32
    return %arg0, %arg2, %c0_i32 : i32, i32, i32
  }
  func.func @transform_2(%arg0: i32, %arg1: i32, %arg2: i32) -> (i32, i32, i32) {
    %c8_i32 = arith.constant 8 : i32
    %0 = arith.muli %arg2, %c8_i32 : i32
    %c8_i32_0 = arith.constant 8 : i32
    %1 = arith.addi %0, %c8_i32_0 : i32
    %c7_i32 = arith.constant 7 : i32
    %2 = arith.minsi %1, %c7_i32 : i32
    %c0_i32 = arith.constant 0 : i32
    %c0_i32_1 = arith.constant 0 : i32
    return %arg0, %2, %c0_i32 : i32, i32, i32
  }
  func.func @transform_3(%arg0: i32, %arg1: i32, %arg2: i32) -> (i32, i32, i32) {
    %c0_i32 = arith.constant 0 : i32
    %c0_i32_0 = arith.constant 0 : i32
    %c0_i32_1 = arith.constant 0 : i32
    return %c0_i32, %c0_i32_0, %arg1 : i32, i32, i32
  }
  func.func @transform_4(%arg0: i32, %arg1: i32, %arg2: i32) -> (i32, i32) {
    %c0_i32 = arith.constant 0 : i32
    %c0_i32_0 = arith.constant 0 : i32
    return %c0_i32, %arg1 : i32, i32
  }
  func.func @transform_5(%arg0: i32, %arg1: i32, %arg2: i32) -> (i32, i32, i32) {
    %c0_i32 = arith.constant 0 : i32
    return %arg0, %arg2, %arg1 : i32, i32, i32
  }
}

</mosaic_0001>

<bundles_post_ra>
// kernel: _lambda_.7
= control target key start
LH: loop header
LB: loop body
LE: loop exit
PB: predicated region body
PF: predicated region fallthrough
CT: control target
= control target key end

     0   :  { %s395_s6 = smov 0   ;;  %s397_s7 = smov 0   ;;  %s440_s0 = inlined_call_operand.vmem [shape: bf16[2,8,2,8,128], index: 0, kind: input, shape index: {}]   ;;  %s441_s1 = inlined_call_operand.vmem [shape: bf16[2,8,8,64], index: 1, kind: output, shape index: {}]  }
   0x1   :  { %s399_s8 = smov 0  }
   0x2 LB: > { %s23_s9 = sadd.s32 1, %s378_s7  ;;  %p326_p0 = scmp.ge.s32.totalorder %s382_s8, 1  ;;  %s382_s8 = sphi %s399_s8, %s11_s8   ;;  %s378_s7 = sphi %s397_s7, %s443_s7   ;;  %s374_s6 = sphi %s395_s6, %s442_s6  }
   0x3   : > { %p25_p1 = scmp.ge.s32.totalorder %s23_s9, 2  ;;  %p109_p2 = scmp.lt.s32.totalorder %s382_s8, 3 }
   0x5   : > { %s445_s9 = smov (%p25_p1, %s23_s9), 0  ;;  %p110_p3 = pnand %p326_p0, %p109_p2 }
   0x6   : > { %p139_p4 = scmp.lt.s32.totalorder (!%p110_p3), %s374_s6, 1  ;;  %s384_s14 = smov (!%p110_p3), 64  }
   0x7   : > { %113 = sbr.rel (%p110_p3) target bundleno = 149 (0x95), region = 24 }
   0xc   : > { %s447_s6 = smov (!%p139_p4, %s374_s6), 1  ;;  %vm223_vm0 = vcmask 519168  }
   0xd   : > { %s333_s10 = sshll.u32 %s447_s6, 6  ;;  %s334_s15 = sshll.u32 %s447_s6, 5 }
   0xe   : > { %s147_s13 = scalar_lea.vmem %s440_s0, %s333_s10  ;;  %s157_s18 = scalar_lea.vmem %s441_s1, %s334_s15 }
   0xf   : > { %v163_v0 = vld [vmem:[%s147_s13 + $0x10] sm:$0xf]  ;;  %v164_v1 = vld [vmem:[%s147_s13 + $0x14] sm:$0xf]  ;;  %v159_v2 = vld [vmem:[%s147_s13] sm:$0xf] }
  0x10   : > { %v177_v3 = vmax.bf16 %v164_v1, %v163_v0  ;;  %v160_v4 = vld [vmem:[%s147_s13 + $0x4] sm:$0xf]  ;;  %v165_v5 = vld [vmem:[%s147_s13 + $0x18] sm:$0xf]  ;;  %v166_v6 = vld [vmem:[%s147_s13 + $0x1c] sm:$0xf] }
  0x11   : > { %v175_v7 = vmax.bf16 %v160_v4, %v159_v2  ;;  %v161_v8 = vld [vmem:[%s147_s13 + $0x8] sm:$0xf]  ;;  %v162_v9 = vld [vmem:[%s147_s13 + $0xc] sm:$0xf]  ;;  %v178_v10 = vmax.bf16 %v166_v6, %v165_v5  ;;  %v167_v14 = vld [vmem:[%s147_s13 + $0x20] sm:$0xf] }
  0x12   : > { %195 = vrot.lane.b32.xlu1 %v177_v3, %s384_s14  ;;  %v176_v11 = vmax.bf16 %v162_v9, %v161_v8  ;;  %v169_v12 = vld [vmem:[%s147_s13 + $0x28] sm:$0xf]  ;;  %v170_v13 = vld [vmem:[%s147_s13 + $0x2c] sm:$0xf]  ;;  %v168_v15 = vld [vmem:[%s147_s13 + $0x24] sm:$0xf] }
  0x13   : > { %191 = vrot.lane.b32.xlu0 %v175_v7, %s384_s14  ;;  %v180_v16 = vmax.bf16 %v170_v13, %v169_v12  ;;  %v179_v17 = vmax.bf16 %v168_v15, %v167_v14  ;;  %v173_v18 = vld [vmem:[%s147_s13 + $0x38] sm:$0xf]  ;;  %v174_v19 = vld [vmem:[%s147_s13 + $0x3c] sm:$0xf]  ;;  %v171_v20 = vld [vmem:[%s147_s13 + $0x30] sm:$0xf] }
  0x14   : > { %v172_v21 = vld [vmem:[%s147_s13 + $0x34] sm:$0xf]  ;;  %v182_v22 = vmax.bf16 %v174_v19, %v173_v18 }
  0x15   : > { %v181_v23 = vmax.bf16 %v172_v21, %v171_v20 }
  0x16   : > { %197 = vrot.lane.b32.xlu1 %v178_v10, %s384_s14 }
  0x17   : > { %193 = vrot.lane.b32.xlu0 %v176_v11, %s384_s14 }
  0x1a   : > { %201 = vrot.lane.b32.xlu1 %v180_v16, %s384_s14 }
  0x1b   : > { %199 = vrot.lane.b32.xlu0 %v179_v17, %s384_s14 }
  0x1e   : > { %205 = vrot.lane.b32.xlu1 %v182_v22, %s384_s14 }
  0x1f   : > { %203 = vrot.lane.b32.xlu0 %v181_v23, %s384_s14 }
  0x84   : > { %v196_v24 = vpop.permute.xlu1 %195 }
  0x85   : > { %v217_v25 = vmax.bf16 %v196_v24, %v177_v3  ;;  %v192_v26 = vpop.permute.xlu0 %191 }
  0x86   : > { %v215_v27 = vmax.bf16 %v192_v26, %v175_v7 }
  0x87   : > { %226 = vst.msk [vmem:[%s157_s18 + $0x8] sm:$0xf] %vm223_vm0, %v217_v25 }
  0x88   : > { %224 = vst.msk [vmem:[%s157_s18] sm:$0xf] %vm223_vm0, %v215_v27  ;;  %v198_v28 = vpop.permute.xlu1 %197 }
  0x89   : > { %v218_v29 = vmax.bf16 %v198_v28, %v178_v10  ;;  %v194_v30 = vpop.permute.xlu0 %193 }
  0x8a   : > { %v216_v31 = vmax.bf16 %v194_v30, %v176_v11 }
  0x8b   : > { %227 = vst.msk [vmem:[%s157_s18 + $0xc] sm:$0xf] %vm223_vm0, %v218_v29 }
  0x8c   : > { %225 = vst.msk [vmem:[%s157_s18 + $0x4] sm:$0xf] %vm223_vm0, %v216_v31  ;;  %v202_v32 = vpop.permute.xlu1 %201 }
  0x8d   : > { %v220_v33 = vmax.bf16 %v202_v32, %v180_v16  ;;  %v200_v34 = vpop.permute.xlu0 %199 }
  0x8e   : > { %v219_v35 = vmax.bf16 %v200_v34, %v179_v17 }
  0x8f   : > { %229 = vst.msk [vmem:[%s157_s18 + $0x14] sm:$0xf] %vm223_vm0, %v220_v33 }
  0x90   : > { %228 = vst.msk [vmem:[%s157_s18 + $0x10] sm:$0xf] %vm223_vm0, %v219_v35  ;;  %v206_v36 = vpop.permute.xlu1 %205 }
  0x91   : > { %v222_v37 = vmax.bf16 %v206_v36, %v182_v22  ;;  %v204_v38 = vpop.permute.xlu0 %203 }
  0x92   : > { %v221_v39 = vmax.bf16 %v204_v38, %v181_v23 }
  0x93   : > { %231 = vst.msk [vmem:[%s157_s18 + $0x1c] sm:$0xf] %vm223_vm0, %v222_v37 }
  0x94   : > { %230 = vst.msk [vmem:[%s157_s18 + $0x18] sm:$0xf] %vm223_vm0, %v221_v39 }
  0x95 PF: > { %s11_s8 = sadd.s32 1, %s382_s8   ;;  %s442_s6 = smov %s378_s7 }
  0x96   : > { %p8_p5 = scmp.ge.s32.totalorder %s11_s8, 4   ;;  %s443_s7 = smov %s445_s9 }
  0x98   :  { %10 = sbr.rel (!%p8_p5) target bundleno = 2 (0x2), region = 54 }

// kernel: _lambda_.8
= control target key start
LH: loop header
LB: loop body
LE: loop exit
PB: predicated region body
PF: predicated region fallthrough
CT: control target
= control target key end

     0   :  { %s2795_s18 = smov 0   ;;  %s2797_s19 = smov 0   ;;  %s3300_s0 = inlined_call_operand.vmem [shape: bf16[2,64,64], index: 0, kind: input, shape index: {}, may-alias: {0,1,2}]   ;;  %s3301_s1 = inlined_call_operand.vmem [shape: bf16[2,64,64], index: 1, kind: input, shape index: {}, may-alias: {0,1,2}]   ;;  %s3302_s2 = inlined_call_operand.vmem [shape: bf16[2,64,64], index: 2, kind: input, shape index: {}, may-alias: {0,1,2}]   ;;  %s3303_s3 = inlined_call_operand.vmem [shape: bf16[9,64,128], index: 3, kind: input, shape index: {}]   ;;  %s3304_s4 = inlined_call_operand.vmem [shape: f32[1,128], index: 4, kind: input, shape index: {}]   ;;  %s3305_s5 = inlined_call_operand.vmem [shape: bf16[2,64,128], index: 5, kind: output, shape index: {}]  }
   0x1   :  { %s2799_s0 = smov 0  }
   0x2 LB: > { %s34_s2 = sadd.s32 1, %s2758_s19  ;;  %p2194_p0 = scmp.ge.s32.totalorder %s2762_s0, 1  ;;  %s2762_s0 = sphi %s2799_s0, %s15_s0   ;;  %s2758_s19 = sphi %s2797_s19, %s3353_s19   ;;  %s2754_s18 = sphi %s2795_s18, %s3352_s18  }
   0x3   : > { %p36_p1 = scmp.ge.s32.totalorder %s34_s2, 2  ;;  %p296_p2 = scmp.lt.s32.totalorder %s2762_s0, 3 }
   0x5   : > { %s3355_s2 = smov (%p36_p1, %s34_s2), 0  ;;  %p297_p3 = pnand %p2194_p0, %p296_p2 }
   0x6   : > { %p383_p4 = scmp.lt.s32.totalorder (!%p297_p3), %s2754_s18, 1 }
   0x7   : > { %300 = sbr.rel (%p297_p3) target bundleno = 309 (0x135), region = 40 }
   0xc   : > { %v2671_v0 = vld [vmem:[%s3303_s3 + $0x98] sm:$0xff]   ;;  %v2673_v2 = vld [vmem:[%s3303_s3 + $0x90] sm:$0xff]   ;;  %s3357_s18 = smov (!%p383_p4, %s2754_s18), 1  ;;  %vm441_vm0 = vcmask 519168   ;;  %v2675_v4 = vld [vmem:[%s3303_s3 + $0x88] sm:$0xff]   ;;  %v2764_v7 = vmov 0  }
   0xd   : > { %v2672_v1 = vld [vmem:[%s3303_s3 + $0x78] sm:$0xff]   ;;  %2494 = vmatprep.subr.bf16.mxu0 %v2671_v0  ;;  %v2674_v3 = vld [vmem:[%s3303_s3 + $0x70] sm:$0xff]   ;;  %s2387_s30 = sshll.u32 %s3357_s18, 5  ;;  %v2676_v5 = vld [vmem:[%s3303_s3 + $0x68] sm:$0xff]   ;;  %442 = vst.msk [vmem:[#allocation2] sm:$0xf] %vm441_vm0, %v2764_v7 }
   0xe   : > { %2510 = vmatprep.subr.bf16.mxu1 %v2672_v1  ;;  %2495 = vmatpush3.bf16.msra.mxu0 %v2671_v0  ;;  %s390_s10 = scalar_lea.vmem %s3301_s1, %s2387_s30  ;;  %v2677_v6 = vld [vmem:[%s3303_s3 + $0x80] sm:$0xff]   ;;  %459 = vst.msk [vmem:[#allocation2 + $0x24] sm:$0xf] %vm441_vm0, %v2764_v7  ;;  %v2682_v13 = vld [vmem:[%s3303_s3 + $0xb8] sm:$0xff]   ;;  %vm636_vm1 = vcmask 523264   ;;  %v2684_v23 = vld [vmem:[%s3303_s3 + $0xb0] sm:$0xff]   ;;  %s426_s9 = scalar_lea.vmem %s3305_s5, %s2387_s30 }
   0xf   : > { %2511 = vmatpush3.bf16.msra.mxu1 %v2672_v1  ;;  %2496 = vmatprep.subr.bf16.mxu0 %v2673_v2  ;;  %v2678_v8 = vld [vmem:[%s3303_s3 + $0x60] sm:$0xff]   ;;  %v445_v11 = vld [vmem:[%s390_s10 + $0x8] sm:$0xf]  ;;  %v446_v12 = vld [vmem:[%s390_s10 + $0xc] sm:$0xf]  ;;  %vm1414_vm3 = vcmask 1040384  }
  0x10   : > { %2512 = vmatprep.subr.bf16.mxu1 %v2674_v3  ;;  %v443_v9 = vld [vmem:[%s390_s10] sm:$0xf]  ;;  %v444_v10 = vld [vmem:[%s390_s10 + $0x4] sm:$0xf]  ;;  %453 = vst.msk [vmem:[#allocation2 + $0xc] sm:$0xf] %vm441_vm0, %v445_v11 }
  0x11   : > { %451 = vst.msk [vmem:[#allocation2 + $0x4] sm:$0xf] %vm441_vm0, %v443_v9  ;;  %452 = vst.msk [vmem:[#allocation2 + $0x8] sm:$0xf] %vm441_vm0, %v444_v10  ;;  %v2683_v15 = vld [vmem:[%s3303_s3 + $0x38] sm:$0xff]   ;;  %v2685_v29 = vld [vmem:[%s3303_s3 + $0x30] sm:$0xff]  }
  0x12   : > { %2497 = vmatpush3.bf16.msra.mxu0 %v2673_v2  ;;  %454 = vst.msk [vmem:[#allocation2 + $0x10] sm:$0xf] %vm441_vm0, %v446_v12  ;;  %v447_v16 = vld [vmem:[%s390_s10 + $0x10] sm:$0xf]  ;;  %v448_v17 = vld [vmem:[%s390_s10 + $0x14] sm:$0xf] }
  0x13   : > { %2513 = vmatpush3.bf16.msra.mxu1 %v2674_v3  ;;  %2498 = vmatprep.subr.bf16.mxu0 %v2675_v4  ;;  %455 = vst.msk [vmem:[#allocation2 + $0x14] sm:$0xf] %vm441_vm0, %v447_v16  ;;  %v449_v18 = vld [vmem:[%s390_s10 + $0x18] sm:$0xf]  ;;  %v450_v19 = vld [vmem:[%s390_s10 + $0x1c] sm:$0xf] }
  0x14   : > { %2514 = vmatprep.subr.bf16.mxu1 %v2676_v5  ;;  %v565_v14 = vld [vmem:[#allocation2] sm:$0xf]  ;;  %456 = vst.msk [vmem:[#allocation2 + $0x18] sm:$0xf] %vm441_vm0, %v448_v17  ;;  %457 = vst.msk [vmem:[#allocation2 + $0x1c] sm:$0xf] %vm441_vm0, %v449_v18 }
  0x15   : > { %458 = vst.msk [vmem:[#allocation2 + $0x20] sm:$0xf] %vm441_vm0, %v450_v19  ;;  %v2688_v31 = vld [vmem:[%s3303_s3 + $0xa8] sm:$0xff]   ;;  %v2690_v42 = vld [vmem:[%s3303_s3 + $0xa0] sm:$0xff]   ;;  %v2697_v48 = vld [vmem:[%s3303_s3 + $0x18] sm:$0xff]   ;;  %vm1904_vm11 = vcmask 1046528  }
  0x16   : > { %2499 = vmatpush3.bf16.msra.mxu0 %v2675_v4  ;;  %v2689_v37 = vld [vmem:[%s3303_s3 + $0x28] sm:$0xff]   ;;  %v2691_v43 = vld [vmem:[%s3303_s3 + $0x20] sm:$0xff]   ;;  %v2698_v49 = vld [vmem:[%s3303_s3 + $0x58] sm:$0xff]  }
  0x17   : > { %2515 = vmatpush3.bf16.msra.mxu1 %v2676_v5  ;;  %2500 = vmatprep.subr.bf16.mxu0 %v2677_v6  ;;  %v568_v22 = vld [vmem:[#allocation2 + $0xc] sm:$0xf]  ;;  %v2699_v54 = vld [vmem:[%s3303_s3 + $0x10] sm:$0xff]   ;;  %v990_v0 = vld [vmem:[#allocation2] sm:$0xf] }
  0x18   : > { %2516 = vmatprep.subr.bf16.mxu1 %v2678_v8  ;;  %v566_v20 = vld [vmem:[#allocation2 + $0x4] sm:$0xf]  ;;  %v567_v21 = vld [vmem:[#allocation2 + $0x8] sm:$0xf]  ;;  %v2893_v46 = vld [vmem:[#allocation2 + $0xc] sm:$0xf] }
  0x19   : > { %v569_v24 = vld [vmem:[#allocation2 + $0x10] sm:$0xf]  ;;  %v2219_v25 = vcombine.low %v566_v20, %v567_v21  ;;  %v2232_v26 = vcombine.low %v567_v21, %v568_v22  ;;  %v2231_v27 = vcombine.low %v565_v14, %v566_v20  ;;  %v2877_v38 = vld [vmem:[#allocation2 + $0x4] sm:$0xf]  ;;  %v2880_v41 = vld [vmem:[#allocation2 + $0x8] sm:$0xf] }
  0x1a   : > { %2501 = vmatpush3.bf16.msra.mxu0 %v2677_v6  ;;  %v2220_v28 = vcombine.low %v568_v22, %v569_v24  ;;  %v570_v30 = vld [vmem:[#allocation2 + $0x14] sm:$0xf]  ;;  %v2692_v44 = vld [vmem:[#allocation2 + $0x8] sm:$0xff]   ;;  %v2272_v45 = vcombine.low %v2877_v38, %v2880_v41  ;;  %v2895_v47 = vld [vmem:[#allocation2 + $0x10] sm:$0xf]  ;;  %v2284_v3 = vcombine.low %v990_v0, %v2877_v38  ;;  %v2285_v7 = vcombine.low %v2880_v41, %v2893_v46 }
  0x1b   : > { %2517 = vmatpush3.bf16.msra.mxu1 %v2678_v8  ;;  %2526 = vmatprep.subr.bf16.mxu0 %v2682_v13  ;;  %v571_v32 = vld [vmem:[#allocation2 + $0x18] sm:$0xf]  ;;  %v2233_v33 = vcombine.low %v569_v24, %v570_v30  ;;  %v572_v34 = vld [vmem:[#allocation2 + $0x1c] sm:$0xf]  ;;  %v2696_v50 = vld [vmem:[#allocation2 + $0x10] sm:$0xff]   ;;  %v2273_v52 = vcombine.low %v2893_v46, %v2895_v47 }
  0x1c   : > { %2542 = vmatprep.subr.bf16.mxu1 %v2683_v15  ;;  %2502 = vmatprep.mubr.msk.bf16.mxu0 %vm636_vm1, %v2219_v25  ;;  %v582_v35 = vld [vmem:[#allocation2 + $0x20] sm:$0xf]  ;;  %v2221_v36 = vcombine.low %v570_v30, %v571_v32  ;;  %v2234_v40 = vcombine.low %v571_v32, %v572_v34  ;;  %v2905_v51 = vld [vmem:[#allocation2 + $0x14] sm:$0xf]  ;;  %v2909_v53 = vld [vmem:[#allocation2 + $0x18] sm:$0xf] }
  0x1d   : > { %2518 = vmatprep.mubr.msk.bf16.mxu1 %vm636_vm1, %v2231_v27  ;;  %2503 = vmatmul.mubr.msk.bf16.vlgmr.msra.gmra.mxu0 %vm636_vm1, %v2220_v28  ;;  %v2222_v39 = vcombine.low %v572_v34, %v582_v35  ;;  %v2700_v55 = vld [vmem:[%s3303_s3 + $0x50] sm:$0xff]   ;;  %v2701_v56 = vld [vmem:[#allocation2 + $0x18] sm:$0xff]   ;;  %v2274_v57 = vcombine.low %v2905_v51, %v2909_v53  ;;  %v1006_v59 = vld [vmem:[#allocation2 + $0x20] sm:$0xf]  ;;  %v2286_v11 = vcombine.low %v2895_v47, %v2905_v51 }
  0x1e   : > { %2519 = vmatmul.mubr.msk.bf16.vlgmr.msra.gmra.mxu1 %vm636_vm1, %v2232_v26  ;;  %2527 = vmatpush3.bf16.msra.mxu0 %v2682_v13  ;;  %v2921_v58 = vld [vmem:[#allocation2 + $0x1c] sm:$0xf]  ;;  %v2705_v60 = vld [vmem:[%s3303_s3 + $0x8] sm:$0xff]   ;;  %v2703_v62 = vld [vmem:[#allocation2 + $0x20] sm:$0xff]  }
  0x1f   : > { %2543 = vmatpush3.bf16.msra.mxu1 %v2683_v15  ;;  %2528 = vmatprep.subr.bf16.mxu0 %v2684_v23  ;;  %v2706_v61 = vld [vmem:[%s3303_s3 + $0x48] sm:$0xff]   ;;  %v2275_v63 = vcombine.low %v2921_v58, %v1006_v59  ;;  %v2707_v1 = vld [vmem:[%s3303_s3] sm:$0xff]   ;;  %v2712_v5 = vld [vmem:[%s3303_s3 + $0xf8] sm:$0xff]   ;;  %v2287_v18 = vcombine.low %v2909_v53, %v2921_v58 }
  0x20   : > { %2544 = vmatprep.subr.bf16.mxu1 %v2685_v29  ;;  %2522 = vmatprep.mubr.msk.bf16.mxu1 %vm636_vm1, %v2233_v33  ;;  %v2708_v2 = vld [vmem:[%s3303_s3 + $0x40] sm:$0xff]   ;;  %v2710_v4 = vld [vmem:[#allocation2 + $0x8] sm:$0xff]   ;;  %v2713_v6 = vld [vmem:[%s3303_s3 + $0xd8] sm:$0xff]  }
  0x21   : > { %2506 = vmatprep.mubr.msk.bf16.mxu0 %vm636_vm1, %v2221_v36  ;;  %v2711_v8 = vld [vmem:[#allocation2 + $0x10] sm:$0xff]   ;;  %v2717_v12 = vld [vmem:[#allocation2 + $0x18] sm:$0xff]   ;;  %v2720_v13 = vld [vmem:[%s3303_s3 + $0xe8] sm:$0xff]  }
  0x22   : > { %2529 = vmatpush3.bf16.msra.mxu0 %v2684_v23  ;;  %v2714_v9 = vld [vmem:[%s3303_s3 + $0xf0] sm:$0xff]   ;;  %v2721_v14 = vld [vmem:[%s3303_s3 + $0xc8] sm:$0xff]   ;;  %v2719_v15 = vld [vmem:[#allocation2 + $0x20] sm:$0xff]  }
  0x23   : > { %2545 = vmatpush3.bf16.msra.mxu1 %v2685_v29  ;;  %2530 = vmatprep.subr.bf16.mxu0 %v2688_v31  ;;  %v2715_v10 = vld [vmem:[%s3303_s3 + $0xd0] sm:$0xff]   ;;  %v1480_v16 = vld [vmem:[#allocation2 + $0x4] sm:$0xf]  ;;  %v1481_v17 = vld [vmem:[#allocation2 + $0x8] sm:$0xf] }
  0x24   : > { %2546 = vmatprep.subr.bf16.mxu1 %v2689_v37  ;;  %v1479_v19 = vld [vmem:[#allocation2] sm:$0xf]  ;;  %v2332_v22 = vcombine.low %v1480_v16, %v1481_v17  ;;  %v1482_v24 = vld [vmem:[#allocation2 + $0xc] sm:$0xf]  ;;  %v1483_v25 = vld [vmem:[#allocation2 + $0x10] sm:$0xf] }
  0x25   : > { %2507 = vmatmul.mubr.msk.bf16.gmra.mxu0 %vm636_vm1, %v2222_v39  ;;  %v2722_v20 = vld [vmem:[%s3303_s3 + $0xe0] sm:$0xff]   ;;  %v2344_v23 = vcombine.low %v1479_v19, %v1480_v16  ;;  %v2728_v26 = vld [vmem:[%s3303_s3 + $0x118] sm:$0xff]   ;;  %v2333_v27 = vcombine.low %v1482_v24, %v1483_v25  ;;  %v2345_v28 = vcombine.low %v1481_v17, %v1482_v24  ;;  %v1484_v29 = vld [vmem:[#allocation2 + $0x14] sm:$0xf]  ;;  %v460_v19 = vlaneseq }
  0x26   : > { %2523 = vmatmul.mubr.msk.bf16.gmra.mxu1 %vm636_vm1, %v2234_v40  ;;  %2531 = vmatpush3.bf16.msra.mxu0 %v2688_v31  ;;  %v2723_v21 = vld [vmem:[%s3303_s3 + $0xc0] sm:$0xff]   ;;  %v1485_v30 = vld [vmem:[#allocation2 + $0x18] sm:$0xf]  ;;  %v2729_v31 = vld [vmem:[%s3303_s3 + $0x110] sm:$0xff]   ;;  %v2346_v33 = vcombine.low %v1483_v25, %v1484_v29 }
  0x27   : > { %2547 = vmatpush3.bf16.msra.mxu1 %v2689_v37  ;;  %2532 = vmatprep.subr.bf16.mxu0 %v2690_v42  ;;  %v2334_v32 = vcombine.low %v1484_v29, %v1485_v30  ;;  %v1486_v34 = vld [vmem:[#allocation2 + $0x1c] sm:$0xf]  ;;  %v1496_v35 = vld [vmem:[#allocation2 + $0x20] sm:$0xf]  ;;  %v2734_v36 = vld [vmem:[%s3303_s3 + $0x108] sm:$0xff]   ;;  %v3045_v24 = vshrl.u32 %v460_v19, 7 }
  0x28   : > { %2548 = vmatprep.subr.bf16.mxu1 %v2691_v43  ;;  %2534 = vmatprep.mubr.msk.bf16.mxu0 %vm636_vm1, %v2692_v44  ;;  %v2335_v37 = vcombine.low %v1486_v34, %v1496_v35  ;;  %v2347_v38 = vcombine.low %v1485_v30, %v1486_v34  ;;  %v2735_v39 = vld [vmem:[%s3303_s3 + $0x100] sm:$0xff]   ;;  %v2736_v40 = vld [vmem:[#allocation2 + $0x8] sm:$0xff]   ;;  %v2737_v41 = vld [vmem:[#allocation2 + $0x18] sm:$0xff]  }
  0x29   : > { %2550 = vmatprep.mubr.msk.bf16.mxu1 %vm636_vm1, %v2272_v45  ;;  %v3050_v29 = vadd.s32 24, %v3045_v24 }
  0x2a   : > { %2533 = vmatpush3.bf16.msra.mxu0 %v2690_v42  ;;  %v2738_v42 = vld [vmem:[#allocation2 + $0x10] sm:$0xff]  }
  0x2b   : > { %2549 = vmatpush3.bf16.msra.mxu1 %v2691_v43  ;;  %2558 = vmatprep.subr.bf16.mxu0 %v2697_v48  ;;  %v2739_v43 = vld [vmem:[#allocation2 + $0x20] sm:$0xff]  }
  0x2c   : > { %2574 = vmatprep.subr.bf16.mxu1 %v2698_v49 }
  0x2d   : > { %2535 = vmatmul.mubr.msk.bf16.vlgmr.msra.gmra.mxu0 %vm636_vm1, %v2696_v50 }
  0x2e   : > { %2551 = vmatmul.mubr.msk.bf16.vlgmr.msra.gmra.mxu1 %vm636_vm1, %v2273_v52  ;;  %2559 = vmatpush3.bf16.msra.mxu0 %v2697_v48 }
  0x2f   : > { %2575 = vmatpush3.bf16.msra.mxu1 %v2698_v49  ;;  %2560 = vmatprep.subr.bf16.mxu0 %v2699_v54 }
  0x30   : > { %2576 = vmatprep.subr.bf16.mxu1 %v2700_v55  ;;  %2538 = vmatprep.mubr.msk.bf16.mxu0 %vm636_vm1, %v2701_v56 }
  0x31   : > { %2554 = vmatprep.mubr.msk.bf16.mxu1 %vm636_vm1, %v2274_v57 }
  0x32   : > { %2561 = vmatpush3.bf16.msra.mxu0 %v2699_v54 }
  0x33   : > { %2577 = vmatpush3.bf16.msra.mxu1 %v2700_v55  ;;  %2562 = vmatprep.subr.bf16.mxu0 %v2705_v60 }
  0x34   : > { %2578 = vmatprep.subr.bf16.mxu1 %v2706_v61 }
  0x35   : > { %2539 = vmatmul.mubr.msk.bf16.gmra.mxu0 %vm636_vm1, %v2703_v62 }
  0x36   : > { %2555 = vmatmul.mubr.msk.bf16.gmra.mxu1 %vm636_vm1, %v2275_v63  ;;  %2563 = vmatpush3.bf16.msra.mxu0 %v2705_v60 }
  0x37   : > { %2579 = vmatpush3.bf16.msra.mxu1 %v2706_v61  ;;  %2564 = vmatprep.subr.bf16.mxu0 %v2707_v1 }
  0x38   : > { %2580 = vmatprep.subr.bf16.mxu1 %v2708_v2  ;;  %2566 = vmatprep.mubr.msk.bf16.mxu0 %vm636_vm1, %v2284_v3 }
  0x39   : > { %2582 = vmatprep.mubr.msk.bf16.mxu1 %vm636_vm1, %v2710_v4 }
  0x3a   : > { %2565 = vmatpush3.bf16.msra.mxu0 %v2707_v1 }
  0x3b   : > { %2581 = vmatpush3.bf16.msra.mxu1 %v2708_v2  ;;  %2590 = vmatprep.subr.bf16.mxu0 %v2712_v5 }
  0x3c   : > { %2606 = vmatprep.subr.bf16.mxu1 %v2713_v6 }
  0x3d   : > { %2567 = vmatmul.mubr.msk.bf16.vlgmr.msra.gmra.mxu0 %vm636_vm1, %v2285_v7 }
  0x3e   : > { %2583 = vmatmul.mubr.msk.bf16.vlgmr.msra.gmra.mxu1 %vm636_vm1, %v2711_v8  ;;  %2591 = vmatpush3.bf16.msra.mxu0 %v2712_v5 }
  0x3f   : > { %2607 = vmatpush3.bf16.msra.mxu1 %v2713_v6  ;;  %2592 = vmatprep.subr.bf16.mxu0 %v2714_v9 }
  0x40   : > { %2608 = vmatprep.subr.bf16.mxu1 %v2715_v10  ;;  %2570 = vmatprep.mubr.msk.bf16.mxu0 %vm636_vm1, %v2286_v11 }
  0x41   : > { %2586 = vmatprep.mubr.msk.bf16.mxu1 %vm636_vm1, %v2717_v12 }
  0x42   : > { %2593 = vmatpush3.bf16.msra.mxu0 %v2714_v9 }
  0x43   : > { %2609 = vmatpush3.bf16.msra.mxu1 %v2715_v10  ;;  %2594 = vmatprep.subr.bf16.mxu0 %v2720_v13 }
  0x44   : > { %2610 = vmatprep.subr.bf16.mxu1 %v2721_v14 }
  0x45   : > { %2571 = vmatmul.mubr.msk.bf16.gmra.mxu0 %vm636_vm1, %v2287_v18 }
  0x46   : > { %2587 = vmatmul.mubr.msk.bf16.gmra.mxu1 %vm636_vm1, %v2719_v15  ;;  %2595 = vmatpush3.bf16.msra.mxu0 %v2720_v13 }
  0x47   : > { %2611 = vmatpush3.bf16.msra.mxu1 %v2721_v14  ;;  %2596 = vmatprep.subr.bf16.mxu0 %v2722_v20 }
  0x48   : > { %2612 = vmatprep.subr.bf16.mxu1 %v2723_v21  ;;  %2598 = vmatprep.mubr.msk.bf16.mxu0 %vm636_vm1, %v2332_v22 }
  0x49   : > { %2614 = vmatprep.mubr.msk.bf16.mxu1 %vm636_vm1, %v2344_v23 }
  0x4a   : > { %2597 = vmatpush3.bf16.msra.mxu0 %v2722_v20 }
  0x4b   : > { %2613 = vmatpush3.bf16.msra.mxu1 %v2723_v21  ;;  %2622 = vmatprep.subr.bf16.mxu0 %v2728_v26 }
  0x4c   : > { %2638 = vmatprep.subr.bf16.mxu1 %v2728_v26 }
  0x4d   : > { %2599 = vmatmul.mubr.msk.bf16.vlgmr.msra.gmra.mxu0 %vm636_vm1, %v2333_v27 }
  0x4e   : > { %2615 = vmatmul.mubr.msk.bf16.vlgmr.msra.gmra.mxu1 %vm636_vm1, %v2345_v28  ;;  %2623 = vmatpush3.bf16.msra.mxu0 %v2728_v26 }
  0x4f   : > { %2642 = vmatpush3.bf16.msra.mxu1 %v2728_v26  ;;  %2624 = vmatprep.subr.bf16.mxu0 %v2729_v31 }
  0x50   : > { %2639 = vmatprep.subr.bf16.mxu1 %v2729_v31  ;;  %2602 = vmatprep.mubr.msk.bf16.mxu0 %vm636_vm1, %v2334_v32  ;;  %v3053_v32 = vadd.s32 8, %v3045_v24 }
  0x51   : > { %2618 = vmatprep.mubr.msk.bf16.mxu1 %vm636_vm1, %v2346_v33  ;;  %v3056_v33 = vadd.s32 16, %v3045_v24 }
  0x52   : > { %2625 = vmatpush3.bf16.msra.mxu0 %v2729_v31 }
  0x53   : > { %2643 = vmatpush3.bf16.msra.mxu1 %v2729_v31  ;;  %2626 = vmatprep.subr.bf16.mxu0 %v2734_v36 }
  0x54   : > { %2640 = vmatprep.subr.bf16.mxu1 %v2734_v36 }
  0x55   : > { %2603 = vmatmul.mubr.msk.bf16.gmra.mxu0 %vm636_vm1, %v2335_v37 }
  0x56   : > { %2619 = vmatmul.mubr.msk.bf16.gmra.mxu1 %vm636_vm1, %v2347_v38  ;;  %2627 = vmatpush3.bf16.msra.mxu0 %v2734_v36 }
  0x57   : > { %2644 = vmatpush3.bf16.msra.mxu1 %v2734_v36  ;;  %2628 = vmatprep.subr.bf16.mxu0 %v2735_v39  ;;  %v3059_v36 = vadd.s32 32, %v3045_v24 }
  0x58   : > { %2641 = vmatprep.subr.bf16.mxu1 %v2735_v39  ;;  %2630 = vmatprep.mubr.msk.bf16.mxu0 %vm636_vm1, %v2736_v40  ;;  %v3063_v40 = vadd.s32 56, %v3045_v24 }
  0x59   : > { %2634 = vmatprep.mubr.msk.bf16.mxu1 %vm636_vm1, %v2737_v41 }
  0x5a   : > { %2629 = vmatpush3.bf16.msra.mxu0 %v2735_v39 }
  0x5b   : > { %2645 = vmatpush3.bf16.msra.mxu1 %v2735_v39  ;;  %v3306_v39 = vand.u32 7, %v3045_v24 }
  0x5d   : > { %2631 = vmatmul.mubr.msk.bf16.vlgmr.msra.gmra.mxu0 %vm636_vm1, %v2738_v42  ;;  %v3307_v42 = vand.u32 7, %v3050_v29  ;;  %vm3089_vm2 = vcmp.ne.s32.totalorder %v3306_v39, 0 }
  0x5e   : > { %2635 = vmatmul.mubr.msk.bf16.vlgmr.msra.gmra.mxu1 %vm636_vm1, %v2739_v43  ;;  %v3067_v43 = vadd.s32 40, %v3045_v24 }
  0x5f   : > { %vm3096_vm4 = vcmp.ne.s32.totalorder %v3307_v42, 0 }
  0xdd   : > { %v2504_v44 = vpop.f32.mrf.mxu0 }
  0xde   : > { %v2520_v45 = vpop.f32.mrf.mxu1 }
  0xdf   : > { %v3003_v46 = vadd.f32 %v2520_v45, %v2504_v44  ;;  %v683_v47 = vpop.f32.mrf.mxu0  ;;  %v3070_v44 = vadd.s32 48, %v3045_v24 }
  0xe0   : > { %v790_v48 = vpop.f32.mrf.mxu1 }
  0xe1   : > { %v3005_v49 = vadd.f32 %v790_v48, %v683_v47  ;;  %v3007_v50 = vpop.f32.mrf.mxu0 }
  0xe2   : > { %v3009_v51 = vpop.f32.mrf.mxu1 }
  0xe3   : > { %v686_v52 = vpop.f32.mrf.mxu0 }
  0xe4   : > { %v793_v53 = vpop.f32.mrf.mxu1 }
  0xe5   : > { %v3011_v54 = vadd.f32 %v793_v53, %v686_v52  ;;  %v3013_v55 = vpop.f32.mrf.mxu0  ;;  %v3309_v52 = vand.u32 7, %v3053_v32  ;;  %v487_v53 = vand.u32 7, %v3056_v33 }
  0xe6   : > { %v3015_v56 = vpop.f32.mrf.mxu1 }
  0xe7   : > { %v3017_v57 = vpop.f32.mrf.mxu0  ;;  %vm3112_vm5 = vcmp.ne.s32.totalorder %v3309_v52, 0  ;;  %vm3120_vm6 = vcmp.ne.s32.totalorder %v487_v53, 0  ;;  %vm3190_vm12 = vcmp.ne.s32.totalorder %v487_v53, 7 }
  0xe8   : > { %v3019_v58 = vpop.f32.mrf.mxu1 }
  0xe9   : > { %v3021_v59 = vpop.f32.mrf.mxu0 }
  0xea   : > { %v3023_v60 = vpop.f32.mrf.mxu1 }
  0xeb   : > { %v3025_v61 = vpop.f32.mrf.mxu0 }
  0xec   : > { %v3027_v62 = vpop.f32.mrf.mxu1 }
  0xed   : > { %v3029_v63 = vpop.f32.mrf.mxu0 }
  0xee   : > { %v2552_v0 = vpop.f32.mrf.mxu1 }
  0xef   : > { %v3031_v1 = vpop.f32.mrf.mxu0 }
  0xf0   : > { %v1106_v2 = vpop.f32.mrf.mxu1 }
  0xf1   : > { %v3033_v3 = vpop.f32.mrf.mxu0 }
  0xf2   : > { %v2553_v4 = vpop.f32.mrf.mxu1 }
  0xf3   : > { %v3035_v5 = vpop.f32.mrf.mxu0 }
  0xf4   : > { %v1109_v6 = vpop.f32.mrf.mxu1 }
  0xf5   : > { %v3037_v7 = vpop.f32.mrf.mxu0 }
  0xf6   : > { %v2556_v8 = vpop.f32.mrf.mxu1 }
  0xf7   : > { %v3039_v9 = vpop.f32.mrf.mxu0 }
  0xf8   : > { %v1122_v10 = vpop.f32.mrf.mxu1 }
  0xf9   : > { %v3041_v11 = vpop.f32.mrf.mxu0 }
  0xfa   : > { %v2557_v12 = vpop.f32.mrf.mxu1 }
  0xfb   : > { %v3043_v13 = vpop.f32.mrf.mxu0 }
  0xfc   : > { %v1125_v14 = vpop.f32.mrf.mxu1 }
  0xfd   : > { %v2568_v15 = vpop.f32.mrf.mxu0 }
  0xfe   : > { %v2584_v16 = vpop.f32.mrf.mxu1  ;;  %v1222_v41 = vadd.f32 %v2568_v15, %v2552_v0  ;;  %v3308_v15 = vand.u32 7, %v3059_v36 }
  0xff   : > { %v1213_v17 = vpop.f32.mrf.mxu0 }
 0x100   : > { %v1351_v18 = vpop.f32.mrf.mxu1  ;;  %v1214_v34 = vadd.f32 %v1213_v17, %v1106_v2  ;;  %vm3128_vm7 = vcmp.ne.s32.totalorder %v3308_v15, 0 }
 0x101   : > { %v2569_v20 = vpop.f32.mrf.mxu0 }
 0x102   : > { %v2585_v21 = vpop.f32.mrf.mxu1  ;;  %v1225_v35 = vadd.f32 %v2569_v20, %v2553_v4  ;;  %v3078_v2 = vadd.f32 %v1351_v18, %v1214_v34  ;;  %v3310_v18 = vand.u32 7, %v3063_v40 }
 0x103   : > { %v1216_v22 = vpop.f32.mrf.mxu0 }
 0x104   : > { %v1354_v23 = vpop.f32.mrf.mxu1  ;;  %v1217_v48 = vadd.f32 %v1216_v22, %v1109_v6  ;;  %v3080_v0 = vadd.f32 %v2585_v21, %v1225_v35  ;;  %v1384_v22 = vadd.f32 %v2584_v16, %v1222_v41  ;;  %v815_v16 = vadd.f32 %v3015_v56, %v3013_v55 }
 0x105   : > { %v2572_v25 = vpop.f32.mrf.mxu0  ;;  %v1415_v42 = vrot.slane %v3078_v2, 7  ;;  %vm3144_vm8 = vcmp.ne.s32.totalorder %v3310_v18, 0 }
 0x106   : > { %v3047_v26 = vpop.f32.mrf.mxu1  ;;  %v1238_v39 = vadd.f32 %v2572_v25, %v2556_v8  ;;  %v818_v25 = vadd.f32 %v3023_v60, %v3021_v59 }
 0x107   : > { %v1229_v27 = vpop.f32.mrf.mxu0 }
 0x108   : > { %v1367_v28 = vpop.f32.mrf.mxu1  ;;  %v1230_v4 = vadd.f32 %v1229_v27, %v1122_v10  ;;  %v1420_v27 = vrot.slane %v3080_v0, 7  ;;  %v3331_v10 = vand.u32 7, %v3050_v29 }
 0x109   : > { %v2573_v30 = vpop.f32.mrf.mxu0 }
 0x10a   : > { %v2589_v31 = vpop.f32.mrf.mxu1  ;;  %v1241_v6 = vadd.f32 %v2573_v30, %v2557_v12  ;;  %v802_v12 = vadd.f32 %v3009_v51, %v3007_v50  ;;  %v1383_v30 = vadd.f32 %v1354_v23, %v1217_v48  ;;  %v3124_v50 = vadd.f32 %v1367_v28, %v1230_v4 }
 0x10b   : > { %v1232_v37 = vpop.f32.mrf.mxu0  ;;  %v807_v23 = vadd.f32 %v3019_v58, %v3017_v57  ;;  %v961_v28 = vadd.f32 %v3029_v63, %v3003_v46  ;;  %v960_v57 = vadd.f32 %v3035_v5, %v3011_v54  ;;  %v1418_v58 = vrot.slane %v1384_v22, 7  ;;  %v2263_v63 = vld [vmem:[%s3304_s4] ss:$0 sm:$0xff] }
 0x10c   : > { %v1370_v38 = vpop.f32.mrf.mxu1  ;;  %v1233_v55 = vadd.f32 %v1232_v37, %v1125_v14  ;;  %v1389_v48 = vadd.f32 %v2589_v31, %v1241_v6  ;;  %v959_v14 = vadd.f32 %v3031_v1, %v3005_v49  ;;  %v962_v37 = vadd.f32 %v3033_v3, %v802_v12 }
 0x10d   : > { %v3072_v45 = vpop.f32.mrf.mxu0  ;;  %v810_v46 = vadd.f32 %v3027_v62, %v3025_v61  ;;  %v965_v31 = vadd.f32 %v3037_v7, %v815_v16  ;;  %v1416_v0 = vrot.slane %v1383_v30, 7  ;;  %v1388_v49 = vadd.f32 %v3047_v26, %v1238_v39 }
 0x10e   : > { %v3074_v47 = vpop.f32.mrf.mxu1  ;;  %v1438_v1 = vsel %vm1414_vm3, 0.0, %v1415_v42  ;;  %v1421_v3 = vsel %vm1414_vm3, %v1418_v58, %v1420_v27  ;;  %v1422_v54 = vrot.slane %v3124_v50, 7  ;;  %v1387_v5 = vadd.f32 %v1370_v38, %v1233_v55 }
 0x10f   : > { %v3083_v17 = vpop.f32.mrf.mxu0  ;;  %v3323_v4 = vand.u32 7, %v3067_v43  ;;  %v3326_v62 = vand.u32 7, %v3070_v44  ;;  %v963_v6 = vadd.f32 %v3039_v9, %v807_v23  ;;  %v966_v22 = vadd.f32 %v3041_v11, %v818_v25 }
 0x110   : > { %v3085_v19 = vpop.f32.mrf.mxu1  ;;  %v964_v38 = vadd.f32 %v3043_v13, %v810_v46  ;;  %v1428_v12 = vrot.slane %v1389_v48, 7  ;;  %v976_v16 = vadd.f32 %v2263_v63, %v961_v28  ;;  %v974_v30 = vadd.f32 %v2263_v63, %v959_v14 }
 0x111   : > { %v3102_v34 = vpop.f32.mrf.mxu0  ;;  %vm3165_vm9 = vcmp.ne.s32.totalorder %v3323_v4, 0  ;;  %vm3171_vm10 = vcmp.ne.s32.totalorder %v3326_v62, 0  ;;  %v977_v50 = vadd.f32 %v2263_v63, %v962_v37  ;;  %v975_v55 = vadd.f32 %v2263_v63, %v960_v57 }
 0x112   : > { %v3104_v35 = vpop.f32.mrf.mxu1  ;;  %v1455_v62 = vsel %vm3089_vm2, %v1438_v1, 0.0  ;;  %v1458_v52 = vsel %vm3096_vm4, %v1421_v3, 0.0  ;;  %v1417_v18 = vsel %vm1414_vm3, %v1415_v42, %v1416_v0  ;;  %v1426_v9 = vrot.slane %v1388_v49, 7 }
 0x113   : > { %v3132_v56 = vpop.f32.mrf.mxu0  ;;  %v980_v23 = vadd.f32 %v2263_v63, %v965_v31  ;;  %v1419_v11 = vsel %vm1414_vm3, %v1416_v0, %v1418_v58  ;;  %v1423_v13 = vsel %vm1414_vm3, %v1420_v27, %v1422_v54  ;;  %v1424_v25 = vrot.slane %v1387_v5, 7 }
 0x114   : > { %v3134_v8 = vpop.f32.mrf.mxu1  ;;  %v978_v14 = vadd.f32 %v2263_v63, %v963_v6  ;;  %v981_v37 = vadd.f32 %v2263_v63, %v966_v22  ;;  %v3185_v57 = vadd.f32 %v2263_v63, %v964_v38  ;;  %v1429_v20 = vsel %vm1414_vm3, %v1426_v9, %v1428_v12 }
 0x115   : > { %v2604_v59 = vpop.f32.mrf.mxu0  ;;  %vm3196_vm13 = vcmp.ne.s32.totalorder %v3331_v10, 7  ;;  %v3334_v58 = vand.u32 7, %v3070_v44  ;;  %v3337_v63 = vand.u32 7, %v3063_v40  ;;  %v3212_v53 = vadd.f32 %v1455_v62, %v974_v30 }
 0x116   : > { %v2620_v60 = vpop.f32.mrf.mxu1  ;;  %v1466_v31 = vadd.f32 %v1458_v52, %v977_v50  ;;  %v1456_v29 = vsel %vm3112_vm5, %v1417_v18, 0.0  ;;  %v1712_v0 = vadd.f32 %v3074_v47, %v3072_v45  ;;  %v1457_v1 = vsel %vm3120_vm6, %v1419_v11, 0.0 }
 0x117   : > { %v1612_v26 = vpop.f32.mrf.mxu0  ;;  %vm3202_vm14 = vcmp.ne.s32.totalorder %v3334_v58, 7  ;;  %vm3208_vm15 = vcmp.ne.s32.totalorder %v3337_v63, 7  ;;  %v1459_v40 = vsel %vm3128_vm7, %v1423_v13, 0.0  ;;  %v1728_v3 = vadd.f32 %v2620_v60, %v2604_v59 }
 0x118   : > { %v1719_v39 = vpop.f32.mrf.mxu1  ;;  %v1462_v6 = vsel %vm3144_vm8, %v1429_v20, 0.0  ;;  %v1425_v52 = vsel %vm1414_vm3, %v1422_v54, %v1424_v25  ;;  %v1427_v18 = vsel %vm1414_vm3, %v1424_v25, %v1426_v9  ;;  %v1715_v47 = vadd.f32 %v3104_v35, %v3102_v34 }
 0x119   : > { %v2605_v4 = vpop.f32.mrf.mxu0  ;;  %v1720_v5 = vadd.f32 %v1719_v39, %v1612_v26  ;;  %v1464_v51 = vadd.f32 %v1456_v29, %v975_v55  ;;  %v1465_v30 = vadd.f32 %v1457_v1, %v976_v16  ;;  %v1467_v59 = vadd.f32 %v1459_v40, %v978_v14 }
 0x11a   : > { %v2621_v15 = vpop.f32.mrf.mxu1  ;;  %v1704_v2 = vadd.f32 %v3085_v19, %v3083_v17  ;;  %v3340_v54 = vand.u32 7, %v3045_v24  ;;  %v3343_v50 = vand.u32 7, %v3053_v32  ;;  %v1460_v34 = vsel %vm3165_vm9, %v1425_v52, 0.0 }
 0x11b   : > { %v1615_v28 = vpop.f32.mrf.mxu0  ;;  %v1731_v21 = vadd.f32 %v2621_v15, %v2605_v4  ;;  %v1461_v17 = vsel %vm3171_vm10, %v1427_v18, 0.0  ;;  %v3346_v24 = vand.u32 7, %v3059_v36  ;;  %v3349_v32 = vand.u32 7, %v3067_v43 }
 0x11c   : > { %v1722_v48 = vpop.f32.mrf.mxu1  ;;  %vm3232_vm0 = vcmp.ne.s32.totalorder %v3340_v54, 7  ;;  %vm3238_vm1 = vcmp.ne.s32.totalorder %v3343_v50, 7  ;;  %v1707_v61 = vadd.f32 %v3134_v8, %v3132_v56  ;;  %v1470_v62 = vadd.f32 %v1462_v6, %v981_v37 }
 0x11d   : > { %v2632_v44 = vpop.f32.mrf.mxu0  ;;  %vm3248_vm2 = vcmp.ne.s32.totalorder %v3346_v24, 7  ;;  %vm3254_vm3 = vcmp.ne.s32.totalorder %v3349_v32, 7  ;;  %v1723_v4 = vadd.f32 %v1722_v48, %v1615_v28  ;;  %v1469_v20 = vadd.f32 %v1461_v17, %v980_v23 }
 0x11e   : > { %v2636_v49 = vpop.f32.mrf.mxu1  ;;  %v1874_v41 = vadd.f32 %v2632_v44, %v1712_v0  ;;  %v1468_v40 = vadd.f32 %v1460_v34, %v3185_v57 }
 0x11f   : > { %v1841_v22 = vpop.f32.mrf.mxu0  ;;  %v1878_v38 = vadd.f32 %v2636_v49, %v1728_v3 }
 0x120   : > { %v1857_v45 = vpop.f32.mrf.mxu1  ;;  %v1908_v7 = vrot.slane %v1874_v41, 1  ;;  %v1872_v10 = vadd.f32 %v1841_v22, %v1704_v2 }
 0x121   : > { %v1876_v12 = vadd.f32 %v1857_v45, %v1720_v5  ;;  %v2633_v60 = vpop.f32.mrf.mxu0  ;;  %v1916_v13 = vrot.slane %v1878_v38, 1 }
 0x122   : > { %v2637_v26 = vpop.f32.mrf.mxu1  ;;  %v1875_v19 = vadd.f32 %v2633_v60, %v1715_v47  ;;  %v1905_v3 = vrot.slane %v1872_v10, 1 }
 0x123   : > { %v1879_v35 = vadd.f32 %v2637_v26, %v1731_v21  ;;  %v1844_v9 = vpop.f32.mrf.mxu0  ;;  %v1912_v36 = vrot.slane %v1876_v12, 1 }
 0x124   : > { %v1860_v11 = vpop.f32.mrf.mxu1  ;;  %v1910_v25 = vrot.slane %v1875_v19, 1  ;;  %v1873_v58 = vadd.f32 %v1844_v9, %v1707_v61 }
 0x125   : > { %v1918_v14 = vrot.slane %v1879_v35, 1  ;;  %v1877_v43 = vadd.f32 %v1860_v11, %v1723_v4 }
 0x126   : > { %v1911_v63 = vsel %vm1904_vm11, %v1908_v7, %v1910_v25  ;;  %v1913_v29 = vsel %vm1904_vm11, %v1910_v25, %v1912_v36  ;;  %v1906_v5 = vrot.slane %v1873_v58, 1 }
 0x127   : > { %v1919_v0 = vsel %vm1904_vm11, %v1916_v13, %v1918_v14  ;;  %v1928_v56 = vsel %vm1904_vm11, %v1918_v14, 0.0  ;;  %v1947_v8 = vsel %vm3190_vm12, %v1911_v63, 0.0  ;;  %v1948_v28 = vsel %vm3196_vm13, %v1913_v29, 0.0 }
 0x128   : > { %v1951_v23 = vsel %vm3202_vm14, %v1919_v0, 0.0  ;;  %v1952_v48 = vsel %vm3208_vm15, %v1928_v56, 0.0  ;;  %v1955_v37 = vadd.f32 %v1947_v8, %v1465_v30  ;;  %v1956_v44 = vadd.f32 %v1948_v28, %v1466_v31 }
 0x129   : > { %v1959_v49 = vadd.f32 %v1951_v23, %v1469_v20  ;;  %v1960_v1 = vadd.f32 %v1952_v48, %v1470_v62  ;;  %v1914_v42 = vrot.slane %v1877_v43, 1  ;;  %v1907_v46 = vsel %vm1904_vm11, %v1905_v3, %v1906_v5 }
 0x12a   : > { %v1979_v6 = vmax.f32 %v1955_v37, 0.0  ;;  %v1980_v52 = vmax.f32 %v1956_v44, 0.0  ;;  %v1909_v33 = vsel %vm1904_vm11, %v1906_v5, %v1908_v7  ;;  %v1945_v45 = vsel %vm3232_vm0, %v1907_v46, 0.0 }
 0x12b   : > { %v1983_v27 = vmax.f32 %v1959_v49, 0.0  ;;  %v1984_v18 = vmax.f32 %v1960_v1, 0.0  ;;  %v1915_v31 = vsel %vm1904_vm11, %v1912_v36, %v1914_v42  ;;  %v1917_v57 = vsel %vm1904_vm11, %v1914_v42, %v1916_v13 }
 0x12c   : > { %v2407_v41 = vpack.c.bf16 %v1980_v52, %v1979_v6  ;;  %v1946_v47 = vsel %vm3238_vm1, %v1909_v33, 0.0  ;;  %v1953_v21 = vadd.f32 %v1945_v45, %v3212_v53  ;;  %v1949_v12 = vsel %vm3248_vm2, %v1915_v31, 0.0 }
 0x12d   : > { %v2417_v22 = vpack.c.bf16 %v1984_v18, %v1983_v27  ;;  %v1954_v38 = vadd.f32 %v1946_v47, %v1464_v51  ;;  %v1950_v30 = vsel %vm3254_vm3, %v1917_v57, 0.0  ;;  %v1957_v2 = vadd.f32 %v1949_v12, %v1467_v59 }
 0x12e   : > { %2419 = vst [vmem:[%s426_s9 + $0x8] sm:$0xff] %v2407_v41   ;;  %v1958_v60 = vadd.f32 %v1950_v30, %v1468_v40  ;;  %v1977_v26 = vmax.f32 %v1953_v21, 0.0 }
 0x12f   : > { %2421 = vst [vmem:[%s426_s9 + $0x18] sm:$0xff] %v2417_v22   ;;  %v1978_v54 = vmax.f32 %v1954_v38, 0.0  ;;  %v1981_v39 = vmax.f32 %v1957_v2, 0.0 }
 0x130   : > { %v1982_v50 = vmax.f32 %v1958_v60, 0.0 }
 0x131   : > { %v2402_v34 = vpack.c.bf16 %v1978_v54, %v1977_v26 }
 0x132   : > { %v2412_v15 = vpack.c.bf16 %v1982_v50, %v1981_v39 }
 0x133   : > { %2403 = vst [vmem:[%s426_s9] sm:$0xff] %v2402_v34  }
 0x134   : > { %2420 = vst [vmem:[%s426_s9 + $0x10] sm:$0xff] %v2412_v15  }
 0x135 PF: > { %s15_s0 = sadd.s32 1, %s2762_s0   ;;  %s3352_s18 = smov %s2758_s19 }
 0x136   : > { %p12_p5 = scmp.ge.s32.totalorder %s15_s0, 4   ;;  %s3353_s19 = smov %s3355_s2 }
 0x138   :  { %14 = sbr.rel (!%p12_p5) target bundleno = 2 (0x2), region = 90 }

// kernel: _lambda_.9
= control target key start
LH: loop header
LB: loop body
LE: loop exit
PB: predicated region body
PF: predicated region fallthrough
CT: control target
= control target key end

     0   :  { %s2674_s18 = smov 0   ;;  %s2676_s19 = smov 0   ;;  %s3259_s0 = inlined_call_operand.vmem [shape: bf16[2,64,128], index: 0, kind: input, shape index: {}, may-alias: {0,1,2}]   ;;  %s3260_s1 = inlined_call_operand.vmem [shape: bf16[2,64,128], index: 1, kind: input, shape index: {}, may-alias: {0,1,2}]   ;;  %s3261_s2 = inlined_call_operand.vmem [shape: bf16[2,64,128], index: 2, kind: input, shape index: {}, may-alias: {0,1,2}]   ;;  %s3262_s3 = inlined_call_operand.vmem [shape: bf16[3,384,128], index: 3, kind: input, shape index: {}]   ;;  %s3263_s4 = inlined_call_operand.vmem [shape: f32[1,128], index: 4, kind: input, shape index: {}]   ;;  %s3264_s5 = inlined_call_operand.vmem [shape: bf16[2,64,128], index: 5, kind: output, shape index: {}]  }
   0x1   :  { %s2678_s0 = smov 0  }
   0x2 LB: > { %s34_s2 = sadd.s32 1, %s2637_s19  ;;  %p2044_p0 = scmp.ge.s32.totalorder %s2641_s0, 1  ;;  %s2641_s0 = sphi %s2678_s0, %s15_s0   ;;  %s2637_s19 = sphi %s2676_s19, %s3300_s19   ;;  %s2633_s18 = sphi %s2674_s18, %s3299_s18  }
   0x3   : > { %p36_p1 = scmp.ge.s32.totalorder %s34_s2, 2  ;;  %p296_p2 = scmp.lt.s32.totalorder %s2641_s0, 3 }
   0x5   : > { %s3302_s2 = smov (%p36_p1, %s34_s2), 0  ;;  %p297_p3 = pnand %p2044_p0, %p296_p2 }
   0x6   : > { %p383_p4 = scmp.lt.s32.totalorder (!%p297_p3), %s2633_s18, 1 }
   0x7   : > { %300 = sbr.rel (%p297_p3) target bundleno = 347 (0x15b), region = 40 }
   0xc   : > { %v2533_v0 = vld [vmem:[%s3262_s3 + $0x138] sm:$0xff]   ;;  %v2643_v3 = vmov 0   ;;  %v2536_v4 = vld [vmem:[%s3262_s3 + $0x130] sm:$0xff]   ;;  %v2539_v7 = vld [vmem:[%s3262_s3 + $0x128] sm:$0xff]   ;;  %s3304_s18 = smov (!%p383_p4, %s2633_s18), 1  ;;  %vm1342_vm0 = vcmask 1040384  }
   0xd   : > { %v2534_v1 = vld [vmem:[%s3262_s3 + $0xf8] sm:$0xff]   ;;  %2280 = vmatprep.subr.bf16.mxu0 %v2533_v0  ;;  %457 = vst [vmem:[#allocation2] sm:$0xf] %v2643_v3  ;;  %458 = vst [vmem:[#allocation2 + $0x5c] sm:$0xf] %v2643_v3  ;;  %v2537_v5 = vld [vmem:[%s3262_s3 + $0xf0] sm:$0xff]  }
   0xe   : > { %v2535_v2 = vld [vmem:[%s3262_s3 + $0x178] sm:$0xff]   ;;  %2281 = vmatpush3.bf16.msra.mxu0 %v2534_v1  ;;  %v2538_v6 = vld [vmem:[%s3262_s3 + $0x170] sm:$0xff]   ;;  %v2540_v8 = vld [vmem:[%s3262_s3 + $0xe8] sm:$0xff]   ;;  %s2245_s6 = sshll.u32 %s3304_s18, 5  ;;  %vm1754_vm6 = vcmask 1046528  }
   0xf   : > { %2436 = vmatprep.subr.bf16.mxu1 %v2535_v2  ;;  %2282 = vmatprep.subr.bf16.mxu0 %v2536_v4  ;;  %v2541_v9 = vld [vmem:[%s3262_s3 + $0x168] sm:$0xff]   ;;  %v2542_v10 = vld [vmem:[%s3262_s3 + $0x120] sm:$0xff]   ;;  %v2545_v13 = vld [vmem:[%s3262_s3 + $0x118] sm:$0xff]   ;;  %s2764_s15 = scalar_lea.vmem %s3260_s1, %s2245_s6  ;;  %s3191_s14 = scalar_lea.vmem %s3264_s5, %s2245_s6 }
  0x10   : > { %2437 = vmatpush3.bf16.msra.mxu1 %v2535_v2  ;;  %v2543_v11 = vld [vmem:[%s3262_s3 + $0xe0] sm:$0xff]   ;;  %v2547_v14 = vld [vmem:[%s3262_s3 + $0x158] sm:$0xff]   ;;  %v2548_v16 = vld [vmem:[%s3262_s3 + $0x110] sm:$0xff]  }
  0x11   : > { %2438 = vmatprep.subr.bf16.mxu1 %v2538_v6  ;;  %v2544_v12 = vld [vmem:[%s3262_s3 + $0x160] sm:$0xff]   ;;  %v2546_v15 = vld [vmem:[%s3262_s3 + $0xd8] sm:$0xff]   ;;  %v2550_v17 = vld [vmem:[%s3262_s3 + $0x150] sm:$0xff]  }
  0x12   : > { %2283 = vmatpush3.bf16.msra.mxu0 %v2537_v5  ;;  %v2549_v18 = vld [vmem:[%s3262_s3 + $0xd0] sm:$0xff]   ;;  %v2551_v19 = vld [vmem:[%s3262_s3 + $0x108] sm:$0xff]   ;;  %v2554_v22 = vld [vmem:[%s3262_s3 + $0x100] sm:$0xff]  }
  0x13   : > { %2284 = vmatprep.subr.bf16.mxu0 %v2539_v7  ;;  %v2552_v20 = vld [vmem:[%s3262_s3 + $0xc8] sm:$0xff]   ;;  %v429_v23 = vld [vmem:[%s2764_s15] sm:$0xf]  ;;  %v430_v24 = vld [vmem:[%s2764_s15 + $0x4] sm:$0xf] }
  0x14   : > { %2439 = vmatpush3.bf16.msra.mxu1 %v2538_v6  ;;  %v2553_v21 = vld [vmem:[%s3262_s3 + $0x148] sm:$0xff]   ;;  %v2555_v25 = vld [vmem:[%s3262_s3 + $0xc0] sm:$0xff]   ;;  %449 = vst [vmem:[#allocation2 + $0x4] sm:$0xf] %v429_v23  ;;  %450 = vst [vmem:[#allocation2 + $0x10] sm:$0xf] %v430_v24 }
  0x15   : > { %2440 = vmatprep.subr.bf16.mxu1 %v2541_v9  ;;  %459 = vst [vmem:[#allocation2 + $0xc] sm:$0xf] %v429_v23  ;;  %460 = vst [vmem:[#allocation2 + $0x18] sm:$0xf] %v430_v24  ;;  %v2556_v26 = vld [vmem:[%s3262_s3 + $0x140] sm:$0xff]   ;;  %v2559_v28 = vld [vmem:[%s3262_s3 + $0x78] sm:$0xff]  }
  0x16   : > { %2285 = vmatpush3.bf16.msra.mxu0 %v2540_v8  ;;  %466 = vst [vmem:[#allocation2 + $0x8] sm:$0xf] %v430_v24  ;;  %v431_v27 = vld [vmem:[%s2764_s15 + $0x8] sm:$0xf]  ;;  %v432_v29 = vld [vmem:[%s2764_s15 + $0xc] sm:$0xf] }
  0x17   : > { %2286 = vmatprep.subr.bf16.mxu0 %v2542_v10  ;;  %467 = vst [vmem:[#allocation2 + $0x14] sm:$0xf] %v431_v27  ;;  %451 = vst [vmem:[#allocation2 + $0x1c] sm:$0xf] %v431_v27  ;;  %v433_v30 = vld [vmem:[%s2764_s15 + $0x10] sm:$0xf] }
  0x18   : > { %2441 = vmatpush3.bf16.msra.mxu1 %v2541_v9  ;;  %461 = vst [vmem:[#allocation2 + $0x24] sm:$0xf] %v431_v27  ;;  %468 = vst [vmem:[#allocation2 + $0x20] sm:$0xf] %v432_v29  ;;  %v2562_v31 = vld [vmem:[%s3262_s3 + $0xb8] sm:$0xff]   ;;  %v2564_v37 = vld [vmem:[%s3262_s3 + $0x70] sm:$0xff]  }
  0x19   : > { %2442 = vmatprep.subr.bf16.mxu1 %v2544_v12  ;;  %469 = vst [vmem:[#allocation2 + $0x2c] sm:$0xf] %v433_v30  ;;  %452 = vst [vmem:[#allocation2 + $0x28] sm:$0xf] %v432_v29  ;;  %v2560_v32 = vld [vmem:[%s3262_s3 + $0x38] sm:$0xff]   ;;  %v2565_v39 = vld [vmem:[%s3262_s3 + $0x30] sm:$0xff]  }
  0x1a   : > { %2287 = vmatpush3.bf16.msra.mxu0 %v2543_v11  ;;  %453 = vst [vmem:[#allocation2 + $0x34] sm:$0xf] %v433_v30  ;;  %462 = vst [vmem:[#allocation2 + $0x30] sm:$0xf] %v432_v29  ;;  %v2566_v40 = vld [vmem:[%s3262_s3 + $0xb0] sm:$0xff]   ;;  %v2570_v43 = vld [vmem:[%s3262_s3 + $0x68] sm:$0xff]  }
  0x1b   : > { %2288 = vmatprep.subr.bf16.mxu0 %v2545_v13  ;;  %463 = vst [vmem:[#allocation2 + $0x3c] sm:$0xf] %v433_v30  ;;  %v473_v33 = vld [vmem:[#allocation2] sm:$0xff]  ;;  %v2571_v44 = vld [vmem:[%s3262_s3 + $0x28] sm:$0xff]   ;;  %v434_v48 = vld [vmem:[%s2764_s15 + $0x14] sm:$0xf] }
  0x1c   : > { %2443 = vmatpush3.bf16.msra.mxu1 %v2544_v12  ;;  %v475_v34 = vld [vmem:[#allocation2 + $0xc] sm:$0xff]  ;;  %v2573_v47 = vld [vmem:[%s3262_s3 + $0x60] sm:$0xff]   ;;  %454 = vst [vmem:[#allocation2 + $0x40] sm:$0xf] %v434_v48  ;;  %464 = vst [vmem:[#allocation2 + $0x48] sm:$0xf] %v434_v48 }
  0x1d   : > { %2444 = vmatprep.subr.bf16.mxu1 %v2547_v14  ;;  %v2792_v35 = vld [vmem:[#allocation2 + $0x4] ss:$12 sps:$4 sm:$0xff]   ;;  %v2794_v36 = vcombine.low %v473_v33, %v475_v34  ;;  %v2572_v46 = vld [vmem:[%s3262_s3 + $0xa8] sm:$0xff]   ;;  %470 = vst [vmem:[#allocation2 + $0x38] sm:$0xf] %v434_v48  ;;  %v2578_v51 = vld [vmem:[%s3262_s3 + $0x58] sm:$0xff]  }
  0x1e   : > { %2289 = vmatpush3.bf16.msra.mxu0 %v2546_v15  ;;  %890 = vmatprep.mubr.bf16.mxu0 %v2792_v35  ;;  %v2800_v38 = vld [vmem:[#allocation2 + $0x8] ss:$12 sps:$4 sm:$0xff]   ;;  %v2574_v49 = vld [vmem:[%s3262_s3 + $0x20] sm:$0xff]   ;;  %v435_v52 = vld [vmem:[%s2764_s15 + $0x18] sm:$0xf] }
  0x1f   : > { %2290 = vmatprep.subr.bf16.mxu0 %v2548_v16  ;;  %2452 = vmatprep.mubr.bf16.mxu1 %v2800_v38  ;;  %v2822_v45 = vld [vmem:[#allocation2 + $0x18] ss:$12 sps:$4 sm:$0xff]   ;;  %471 = vst [vmem:[#allocation2 + $0x44] sm:$0xf] %v435_v52  ;;  %455 = vst [vmem:[#allocation2 + $0x4c] sm:$0xf] %v435_v52 }
  0x20   : > { %2445 = vmatpush3.bf16.msra.mxu1 %v2547_v14  ;;  %v2810_v41 = vld [vmem:[#allocation2 + $0x20] ss:$12 sps:$4 sm:$0xff]   ;;  %v2812_v42 = vld [vmem:[#allocation2 + $0x1c] ss:$12 sps:$4 sm:$0xff]   ;;  %465 = vst [vmem:[#allocation2 + $0x54] sm:$0xf] %v435_v52 }
  0x21   : > { %2446 = vmatprep.subr.bf16.mxu1 %v2550_v17  ;;  %v2575_v50 = vld [vmem:[%s3262_s3 + $0xa0] sm:$0xff]   ;;  %v481_v53 = vld [vmem:[#allocation2 + $0x30] sm:$0xff]  ;;  %v436_v54 = vld [vmem:[%s2764_s15 + $0x1c] sm:$0xf] }
  0x22   : > { %2291 = vmatpush3.bf16.msra.mxu0 %v2549_v18  ;;  %v2579_v55 = vld [vmem:[%s3262_s3 + $0x18] sm:$0xff]   ;;  %472 = vst [vmem:[#allocation2 + $0x50] sm:$0xf] %v436_v54  ;;  %456 = vst [vmem:[#allocation2 + $0x58] sm:$0xf] %v436_v54  ;;  %v2583_v57 = vld [vmem:[%s3262_s3 + $0x50] sm:$0xff]  }
  0x23   : > { %2292 = vmatprep.subr.bf16.mxu0 %v2551_v19  ;;  %v2580_v56 = vld [vmem:[%s3262_s3 + $0x98] sm:$0xff]   ;;  %v2852_v59 = vld [vmem:[#allocation2 + $0x34] ss:$12 sps:$4 sm:$0xff]   ;;  %v2589_v63 = vld [vmem:[%s3262_s3 + $0x48] sm:$0xff]  }
  0x24   : > { %2447 = vmatpush3.bf16.msra.mxu1 %v2550_v17  ;;  %v483_v58 = vld [vmem:[#allocation2 + $0x3c] sm:$0xff]  ;;  %v2584_v60 = vld [vmem:[%s3262_s3 + $0x10] sm:$0xff]   ;;  %v2590_v2 = vld [vmem:[%s3262_s3 + $0x8] sm:$0xff]  }
  0x25   : > { %2448 = vmatprep.subr.bf16.mxu1 %v2553_v21  ;;  %v2857_v61 = vcombine.low %v481_v53, %v483_v58  ;;  %v2585_v62 = vld [vmem:[%s3262_s3 + $0x90] sm:$0xff]   ;;  %v2591_v5 = vld [vmem:[%s3262_s3 + $0x88] sm:$0xff]   ;;  %v2592_v6 = vld [vmem:[%s3262_s3 + $0x40] sm:$0xff]  }
  0x26   : > { %2293 = vmatpush3.bf16.msra.mxu0 %v2552_v20  ;;  %v2867_v0 = vld [vmem:[#allocation2 + $0x38] ss:$12 sps:$4 sm:$0xff]   ;;  %v2598_v12 = vld [vmem:[%s3262_s3 + $0x1f0] sm:$0xff]   ;;  %v2601_v15 = vld [vmem:[%s3262_s3 + $0x1e8] sm:$0xff]  }
  0x27   : > { %2294 = vmatprep.subr.bf16.mxu0 %v2554_v22  ;;  %v2877_v4 = vld [vmem:[#allocation2 + $0x48] ss:$12 sps:$4 sm:$0xff]   ;;  %v2593_v7 = vld [vmem:[%s3262_s3] sm:$0xff]   ;;  %v2595_v9 = vld [vmem:[%s3262_s3 + $0x1f8] sm:$0xff]  }
  0x28   : > { %2449 = vmatpush3.bf16.msra.mxu1 %v2553_v21  ;;  %v2594_v8 = vld [vmem:[%s3262_s3 + $0x80] sm:$0xff]   ;;  %v2597_v10 = vld [vmem:[%s3262_s3 + $0x238] sm:$0xff]   ;;  %v2600_v13 = vld [vmem:[%s3262_s3 + $0x230] sm:$0xff]  }
  0x29   : > { %2450 = vmatprep.subr.bf16.mxu1 %v2556_v26  ;;  %v2869_v1 = vld [vmem:[#allocation2 + $0x50] ss:$12 sps:$4 sm:$0xff]   ;;  %v2875_v3 = vld [vmem:[#allocation2 + $0x4c] ss:$12 sps:$4 sm:$0xff]   ;;  %v2604_v18 = vld [vmem:[%s3262_s3 + $0x1e0] sm:$0xff]  }
  0x2a   : > { %2295 = vmatpush3.bf16.msra.mxu0 %v2555_v25  ;;  %v2596_v11 = vld [vmem:[%s3262_s3 + $0x1b8] sm:$0xff]   ;;  %v2599_v14 = vld [vmem:[%s3262_s3 + $0x1b0] sm:$0xff]   ;;  %v2603_v16 = vld [vmem:[%s3262_s3 + $0x228] sm:$0xff]  }
  0x2b   : > { %2332 = vmatprep.subr.bf16.mxu0 %v2559_v28  ;;  %v2602_v17 = vld [vmem:[%s3262_s3 + $0x1a8] sm:$0xff]   ;;  %v2606_v19 = vld [vmem:[%s3262_s3 + $0x220] sm:$0xff]   ;;  %v2607_v21 = vld [vmem:[%s3262_s3 + $0x1d8] sm:$0xff]  }
  0x2c   : > { %2451 = vmatpush3.bf16.msra.mxu1 %v2556_v26  ;;  %v2605_v20 = vld [vmem:[%s3262_s3 + $0x1a0] sm:$0xff]   ;;  %v2609_v22 = vld [vmem:[%s3262_s3 + $0x218] sm:$0xff]   ;;  %v2610_v24 = vld [vmem:[%s3262_s3 + $0x1d0] sm:$0xff]  }
  0x2d   : > { %2460 = vmatprep.subr.bf16.mxu1 %v2562_v31  ;;  %891 = vmatmul.mubr.bf16.vlgmr.msra.gmra.mxu0 %v2794_v36  ;;  %v2608_v23 = vld [vmem:[%s3262_s3 + $0x198] sm:$0xff]   ;;  %v2612_v25 = vld [vmem:[%s3262_s3 + $0x210] sm:$0xff]   ;;  %v2613_v27 = vld [vmem:[%s3262_s3 + $0x1c8] sm:$0xff]  }
  0x2e   : > { %2333 = vmatpush3.bf16.msra.mxu0 %v2560_v32  ;;  %898 = vmatprep.mubr.bf16.mxu0 %v2812_v42  ;;  %v2611_v26 = vld [vmem:[%s3262_s3 + $0x190] sm:$0xff]   ;;  %v2615_v28 = vld [vmem:[%s3262_s3 + $0x208] sm:$0xff]   ;;  %v2616_v30 = vld [vmem:[%s3262_s3 + $0x1c0] sm:$0xff]  }
  0x2f   : > { %2334 = vmatprep.subr.bf16.mxu0 %v2564_v37  ;;  %2453 = vmatmul.mubr.bf16.vlgmr.msra.gmra.mxu1 %v2810_v41  ;;  %v2614_v29 = vld [vmem:[%s3262_s3 + $0x188] sm:$0xff]   ;;  %v2617_v32 = vld [vmem:[%s3262_s3 + $0x180] sm:$0xff]  }
  0x30   : > { %2461 = vmatpush3.bf16.msra.mxu1 %v2562_v31  ;;  %2456 = vmatprep.mubr.bf16.mxu1 %v2867_v0  ;;  %v2618_v31 = vld [vmem:[%s3262_s3 + $0x200] sm:$0xff]  }
  0x31   : > { %2462 = vmatprep.subr.bf16.mxu1 %v2566_v40 }
  0x32   : > { %2335 = vmatpush3.bf16.msra.mxu0 %v2565_v39 }
  0x33   : > { %2336 = vmatprep.subr.bf16.mxu0 %v2570_v43 }
  0x34   : > { %2463 = vmatpush3.bf16.msra.mxu1 %v2566_v40 }
  0x35   : > { %899 = vmatmul.mubr.bf16.gmra.mxu0 %v2822_v45  ;;  %2464 = vmatprep.subr.bf16.mxu1 %v2572_v46 }
  0x36   : > { %2337 = vmatpush3.bf16.msra.mxu0 %v2571_v44  ;;  %906 = vmatprep.mubr.bf16.mxu0 %v2852_v59 }
  0x37   : > { %2338 = vmatprep.subr.bf16.mxu0 %v2573_v47  ;;  %2457 = vmatmul.mubr.bf16.gmra.mxu1 %v2869_v1 }
  0x38   : > { %2465 = vmatpush3.bf16.msra.mxu1 %v2572_v46  ;;  %2476 = vmatprep.mubr.bf16.mxu1 %v2800_v38 }
  0x39   : > { %2466 = vmatprep.subr.bf16.mxu1 %v2575_v50 }
  0x3a   : > { %2339 = vmatpush3.bf16.msra.mxu0 %v2574_v49 }
  0x3b   : > { %2340 = vmatprep.subr.bf16.mxu0 %v2578_v51 }
  0x3c   : > { %2467 = vmatpush3.bf16.msra.mxu1 %v2575_v50 }
  0x3d   : > { %907 = vmatmul.mubr.bf16.gmra.mxu0 %v2857_v61  ;;  %2468 = vmatprep.subr.bf16.mxu1 %v2580_v56 }
  0x3e   : > { %2341 = vmatpush3.bf16.msra.mxu0 %v2579_v55  ;;  %914 = vmatprep.mubr.bf16.mxu0 %v2875_v3 }
  0x3f   : > { %2342 = vmatprep.subr.bf16.mxu0 %v2583_v57 }
  0x40   : > { %2469 = vmatpush3.bf16.msra.mxu1 %v2580_v56 }
  0x41   : > { %2470 = vmatprep.subr.bf16.mxu1 %v2585_v62 }
  0x42   : > { %2343 = vmatpush3.bf16.msra.mxu0 %v2584_v60 }
  0x43   : > { %2344 = vmatprep.subr.bf16.mxu0 %v2589_v63 }
  0x44   : > { %2471 = vmatpush3.bf16.msra.mxu1 %v2585_v62 }
  0x45   : > { %2472 = vmatprep.subr.bf16.mxu1 %v2591_v5  ;;  %915 = vmatmul.mubr.bf16.gmra.mxu0 %v2877_v4 }
  0x46   : > { %2345 = vmatpush3.bf16.msra.mxu0 %v2590_v2  ;;  %1220 = vmatprep.mubr.bf16.mxu0 %v2792_v35 }
  0x47   : > { %2346 = vmatprep.subr.bf16.mxu0 %v2592_v6 }
  0x48   : > { %2473 = vmatpush3.bf16.msra.mxu1 %v2591_v5 }
  0x49   : > { %2474 = vmatprep.subr.bf16.mxu1 %v2594_v8 }
  0x4a   : > { %2347 = vmatpush3.bf16.msra.mxu0 %v2593_v7 }
  0x4b   : > { %2384 = vmatprep.subr.bf16.mxu0 %v2595_v9 }
  0x4c   : > { %2475 = vmatpush3.bf16.msra.mxu1 %v2594_v8 }
  0x4d   : > { %2484 = vmatprep.subr.bf16.mxu1 %v2597_v10  ;;  %1221 = vmatmul.mubr.bf16.vlgmr.msra.gmra.mxu0 %v2794_v36 }
  0x4e   : > { %2385 = vmatpush3.bf16.msra.mxu0 %v2596_v11  ;;  %1228 = vmatprep.mubr.bf16.mxu0 %v2812_v42 }
  0x4f   : > { %2477 = vmatmul.mubr.bf16.vlgmr.msra.gmra.mxu1 %v2810_v41  ;;  %2386 = vmatprep.subr.bf16.mxu0 %v2598_v12 }
  0x50   : > { %2485 = vmatpush3.bf16.msra.mxu1 %v2597_v10  ;;  %2480 = vmatprep.mubr.bf16.mxu1 %v2867_v0 }
  0x51   : > { %2486 = vmatprep.subr.bf16.mxu1 %v2600_v13 }
  0x52   : > { %2387 = vmatpush3.bf16.msra.mxu0 %v2599_v14 }
  0x53   : > { %2388 = vmatprep.subr.bf16.mxu0 %v2601_v15 }
  0x54   : > { %2487 = vmatpush3.bf16.msra.mxu1 %v2600_v13 }
  0x55   : > { %2488 = vmatprep.subr.bf16.mxu1 %v2603_v16  ;;  %1229 = vmatmul.mubr.bf16.gmra.mxu0 %v2822_v45 }
  0x56   : > { %2389 = vmatpush3.bf16.msra.mxu0 %v2602_v17  ;;  %1236 = vmatprep.mubr.bf16.mxu0 %v2852_v59 }
  0x57   : > { %2390 = vmatprep.subr.bf16.mxu0 %v2604_v18  ;;  %2481 = vmatmul.mubr.bf16.gmra.mxu1 %v2869_v1 }
  0x58   : > { %2489 = vmatpush3.bf16.msra.mxu1 %v2603_v16  ;;  %2500 = vmatprep.mubr.bf16.mxu1 %v2800_v38 }
  0x59   : > { %2490 = vmatprep.subr.bf16.mxu1 %v2606_v19 }
  0x5a   : > { %2391 = vmatpush3.bf16.msra.mxu0 %v2605_v20  ;;  %v489_v20 = vlaneseq }
  0x5b   : > { %2392 = vmatprep.subr.bf16.mxu0 %v2607_v21 }
  0x5c   : > { %2491 = vmatpush3.bf16.msra.mxu1 %v2606_v19 }
  0x5d   : > { %2492 = vmatprep.subr.bf16.mxu1 %v2609_v22  ;;  %1237 = vmatmul.mubr.bf16.gmra.mxu0 %v2857_v61 }
  0x5e   : > { %2393 = vmatpush3.bf16.msra.mxu0 %v2608_v23  ;;  %1244 = vmatprep.mubr.bf16.mxu0 %v2875_v3 }
  0x5f   : > { %2394 = vmatprep.subr.bf16.mxu0 %v2610_v24 }
  0x60   : > { %2493 = vmatpush3.bf16.msra.mxu1 %v2609_v22 }
  0x61   : > { %2494 = vmatprep.subr.bf16.mxu1 %v2612_v25 }
  0x62   : > { %2395 = vmatpush3.bf16.msra.mxu0 %v2611_v26 }
  0x63   : > { %2396 = vmatprep.subr.bf16.mxu0 %v2613_v27 }
  0x64   : > { %2495 = vmatpush3.bf16.msra.mxu1 %v2612_v25  ;;  %v490_v25 = vshrl.u32 %v489_v20, 7 }
  0x65   : > { %2496 = vmatprep.subr.bf16.mxu1 %v2615_v28  ;;  %1245 = vmatmul.mubr.bf16.gmra.mxu0 %v2877_v4 }
  0x66   : > { %2397 = vmatpush3.bf16.msra.mxu0 %v2614_v29  ;;  %1632 = vmatprep.mubr.bf16.mxu0 %v2792_v35  ;;  %v3046_v29 = vadd.s32 16, %v490_v25 }
  0x67   : > { %2398 = vmatprep.subr.bf16.mxu0 %v2616_v30 }
  0x68   : > { %2497 = vmatpush3.bf16.msra.mxu1 %v2615_v28  ;;  %v3044_v28 = vadd.s32 8, %v490_v25 }
  0x69   : > { %2498 = vmatprep.subr.bf16.mxu1 %v2618_v31 }
  0x6a   : > { %2399 = vmatpush3.bf16.msra.mxu0 %v2617_v32 }
  0x6c   : > { %2499 = vmatpush3.bf16.msra.mxu1 %v2618_v31 }
  0x6d   : > { %1633 = vmatmul.mubr.bf16.vlgmr.msra.gmra.mxu0 %v2794_v36 }
  0x6e   : > { %1640 = vmatprep.mubr.bf16.mxu0 %v2812_v42 }
  0x6f   : > { %2501 = vmatmul.mubr.bf16.vlgmr.msra.gmra.mxu1 %v2810_v41 }
  0x70   : > { %2504 = vmatprep.mubr.bf16.mxu1 %v2867_v0 }
  0x75   : > { %1641 = vmatmul.mubr.bf16.gmra.mxu0 %v2822_v45 }
  0x76   : > { %1648 = vmatprep.mubr.bf16.mxu0 %v2852_v59 }
  0x77   : > { %2505 = vmatmul.mubr.bf16.gmra.mxu1 %v2869_v1 }
  0x7d   : > { %1649 = vmatmul.mubr.bf16.gmra.mxu0 %v2857_v61 }
  0x7e   : > { %1656 = vmatprep.mubr.bf16.mxu0 %v2875_v3 }
  0x85   : > { %1657 = vmatmul.mubr.bf16.gmra.mxu0 %v2877_v4 }
  0xed   : > { %v2296_v33 = vpop.f32.mrf.mxu0 }
  0xef   : > { %v2297_v34 = vpop.f32.mrf.mxu0  ;;  %v2994_v41 = vpop.f32.mrf.mxu1 }
  0xf0   : > { %v2990_v35 = vadd.f32 %v2297_v34, %v2296_v33  ;;  %v3052_v34 = vadd.s32 24, %v490_v25 }
  0xf1   : > { %v2299_v36 = vpop.f32.mrf.mxu0  ;;  %v2998_v45 = vpop.f32.mrf.mxu1 }
  0xf3   : > { %v2300_v37 = vpop.f32.mrf.mxu0  ;;  %v3002_v48 = vpop.f32.mrf.mxu1 }
  0xf4   : > { %v2992_v38 = vadd.f32 %v2300_v37, %v2299_v36  ;;  %v502_v37 = vand.u32 7, %v490_v25 }
  0xf5   : > { %v2302_v39 = vpop.f32.mrf.mxu0  ;;  %v3006_v52 = vpop.f32.mrf.mxu1 }
  0xf6   : > { %vm3071_vm1 = vcmp.ne.s32.totalorder %v502_v37, 0  ;;  %vm3100_vm5 = vcmp.ne.s32.totalorder %v502_v37, 7 }
  0xf7   : > { %v2303_v40 = vpop.f32.mrf.mxu0  ;;  %v3008_v54 = vpop.f32.mrf.mxu1 }
  0xf8   : > { %v2996_v42 = vadd.f32 %v2303_v40, %v2302_v39  ;;  %v3057_v40 = vld [vmem:[%s3263_s4] ss:$0 sm:$0xff] }
  0xf9   : > { %v2305_v43 = vpop.f32.mrf.mxu0  ;;  %v3012_v58 = vpop.f32.mrf.mxu1 }
  0xfb   : > { %v2306_v44 = vpop.f32.mrf.mxu0  ;;  %v3016_v62 = vpop.f32.mrf.mxu1 }
  0xfc   : > { %v3000_v46 = vadd.f32 %v2306_v44, %v2305_v43  ;;  %v509_v43 = vand.u32 7, %v3044_v28  ;;  %v516_v44 = vand.u32 7, %v3046_v29 }
  0xfd   : > { %v2308_v47 = vpop.f32.mrf.mxu0  ;;  %v3020_v2 = vpop.f32.mrf.mxu1 }
  0xfe   : > { %vm3077_vm2 = vcmp.ne.s32.totalorder %v509_v43, 0  ;;  %vm3083_vm3 = vcmp.ne.s32.totalorder %v516_v44, 0  ;;  %vm3121_vm7 = vcmp.ne.s32.totalorder %v509_v43, 7  ;;  %vm3125_vm8 = vcmp.ne.s32.totalorder %v516_v44, 7 }
  0xff   : > { %v2309_v49 = vpop.f32.mrf.mxu0 }
 0x100   : > { %v3004_v50 = vadd.f32 %v2309_v49, %v2308_v47  ;;  %v3061_v47 = vadd.s32 32, %v490_v25 }
 0x101   : > { %v2311_v51 = vpop.f32.mrf.mxu0 }
 0x103   : > { %v2312_v53 = vpop.f32.mrf.mxu0 }
 0x104   : > { %v3010_v55 = vadd.f32 %v2312_v53, %v2311_v51 }
 0x105   : > { %v2314_v56 = vpop.f32.mrf.mxu0 }
 0x107   : > { %v2315_v57 = vpop.f32.mrf.mxu0 }
 0x108   : > { %v3014_v59 = vadd.f32 %v2315_v57, %v2314_v56  ;;  %v3063_v57 = vadd.s32 40, %v490_v25 }
 0x109   : > { %v2317_v60 = vpop.f32.mrf.mxu0 }
 0x10b   : > { %v2318_v61 = vpop.f32.mrf.mxu0 }
 0x10c   : > { %v3018_v63 = vadd.f32 %v2318_v61, %v2317_v60  ;;  %v3065_v60 = vadd.s32 48, %v490_v25 }
 0x10d   : > { %v2348_v0 = vpop.f32.mrf.mxu0 }
 0x10f   : > { %v2349_v1 = vpop.f32.mrf.mxu0  ;;  %v2478_v4 = vpop.f32.mrf.mxu1 }
 0x110   : > { %v2350_v23 = vadd.f32 %v2349_v1, %v2348_v0  ;;  %v523_v1 = vand.u32 7, %v3052_v34 }
 0x111   : > { %v2351_v3 = vpop.f32.mrf.mxu0  ;;  %v1287_v7 = vpop.f32.mrf.mxu1 }
 0x112   : > { %v1288_v31 = vadd.f32 %v2350_v23, %v1287_v7  ;;  %v893_v7 = vadd.f32 %v2990_v35, %v3057_v40  ;;  %v530_v23 = vand.u32 7, %v3061_v47  ;;  %vm3094_vm4 = vcmp.ne.s32.totalorder %v523_v1, 0 }
 0x113   : > { %v2352_v5 = vpop.f32.mrf.mxu0  ;;  %v2479_v10 = vpop.f32.mrf.mxu1  ;;  %vm3129_vm9 = vcmp.ne.s32.totalorder %v523_v1, 7 }
 0x114   : > { %v2353_v26 = vadd.f32 %v2352_v5, %v2351_v3  ;;  %v1343_v53 = vrot.slane %v1288_v31, 7  ;;  %vm3143_vm10 = vcmp.ne.s32.totalorder %v530_v23, 0  ;;  %vm3205_vm14 = vcmp.ne.s32.totalorder %v530_v23, 7 }
 0x115   : > { %v2354_v6 = vpop.f32.mrf.mxu0  ;;  %v1290_v13 = vpop.f32.mrf.mxu1 }
 0x116   : > { %v3050_v33 = vadd.f32 %v2353_v26, %v1290_v13 }
 0x117   : > { %v2355_v8 = vpop.f32.mrf.mxu0  ;;  %v3026_v15 = vpop.f32.mrf.mxu1 }
 0x118   : > { %v2356_v56 = vadd.f32 %v2355_v8, %v2354_v6  ;;  %v1344_v0 = vrot.slane %v3050_v33, 7  ;;  %v3075_v6 = vadd.s32 56, %v490_v25  ;;  %v896_v33 = vadd.f32 %v2992_v38, %v3057_v40 }
 0x119   : > { %v2357_v9 = vpop.f32.mrf.mxu0  ;;  %v3032_v18 = vpop.f32.mrf.mxu1 }
 0x11a   : > { %v1296_v29 = vadd.f32 %v2478_v4, %v2356_v56  ;;  %v1345_v34 = vsel %vm1342_vm0, %v1343_v53, %v1344_v0  ;;  %v961_v56 = vadd.f32 %v3006_v52, %v896_v33 }
 0x11b   : > { %v2358_v11 = vpop.f32.mrf.mxu0  ;;  %v3038_v22 = vpop.f32.mrf.mxu1 }
 0x11c   : > { %v2359_v3 = vadd.f32 %v2358_v11, %v2357_v9  ;;  %v1366_v11 = vsel %vm1342_vm0, 0.0, %v1343_v53 }
 0x11d   : > { %v3022_v12 = vpop.f32.mrf.mxu0  ;;  %v3048_v30 = vpop.f32.mrf.mxu1 }
 0x11f   : > { %v3024_v14 = vpop.f32.mrf.mxu0 }
 0x120   : > { %v2362_v37 = vadd.f32 %v3024_v14, %v3022_v12 }
 0x121   : > { %v3028_v16 = vpop.f32.mrf.mxu0 }
 0x122   : > { %v1304_v43 = vadd.f32 %v2362_v37, %v3032_v18  ;;  %v3286_v37 = vand.u32 7, %v3065_v60 }
 0x123   : > { %v3030_v17 = vpop.f32.mrf.mxu0 }
 0x124   : > { %vm3171_vm12 = vcmp.ne.s32.totalorder %v3286_v37, 0 }
 0x125   : > { %v3034_v19 = vpop.f32.mrf.mxu0 }
 0x127   : > { %v3036_v21 = vpop.f32.mrf.mxu0 }
 0x128   : > { %v2368_v44 = vadd.f32 %v3036_v21, %v3034_v19  ;;  %v904_v21 = vadd.f32 %v3000_v46, %v3057_v40  ;;  %v1350_v46 = vrot.slane %v1304_v43, 7 }
 0x129   : > { %v3040_v24 = vpop.f32.mrf.mxu0 }
 0x12b   : > { %v3042_v27 = vpop.f32.mrf.mxu0 }
 0x12d   : > { %v2400_v32 = vpop.f32.mrf.mxu0 }
 0x12f   : > { %v2502_v36 = vpop.f32.mrf.mxu1  ;;  %v2401_v39 = vpop.f32.mrf.mxu0 }
 0x130   : > { %v2402_v49 = vadd.f32 %v2401_v39, %v2400_v32  ;;  %v3092_v39 = vadd.f32 %v2479_v10, %v2359_v3  ;;  %v1383_v10 = vsel %vm3071_vm1, %v1366_v11, 0.0  ;;  %v901_v11 = vadd.f32 %v2996_v42, %v3057_v40 }
 0x131   : > { %v1699_v51 = vpop.f32.mrf.mxu1  ;;  %v2403_v61 = vpop.f32.mrf.mxu0 }
 0x132   : > { %v1700_v26 = vadd.f32 %v2402_v49, %v1699_v51  ;;  %v958_v51 = vadd.f32 %v2998_v45, %v893_v7  ;;  %v1346_v45 = vrot.slane %v1296_v29, 7  ;;  %v2365_v7 = vadd.f32 %v3030_v17, %v3028_v16 }
 0x133   : > { %v2503_v5 = vpop.f32.mrf.mxu1  ;;  %v2404_v8 = vpop.f32.mrf.mxu0  ;;  %v1348_v25 = vrot.slane %v3092_v39, 7  ;;  %v966_v19 = vadd.f32 %v2994_v41, %v901_v11  ;;  %v969_v49 = vadd.f32 %v3002_v48, %v904_v21  ;;  %v909_v11 = vadd.f32 %v3004_v50, %v3057_v40 }
 0x134   : > { %v2405_v28 = vadd.f32 %v2404_v8, %v2403_v61  ;;  %v1755_v53 = vrot.slane %v1700_v26, 1  ;;  %v1391_v16 = vadd.f32 %v1383_v10, %v958_v51  ;;  %v1347_v42 = vsel %vm1342_vm0, %v1344_v0, %v1346_v45 }
 0x135   : > { %v1702_v9 = vpop.f32.mrf.mxu1  ;;  %v2406_v32 = vpop.f32.mrf.mxu0  ;;  %v3136_v33 = vadd.f32 %v2365_v7, %v3048_v30  ;;  %v1349_v39 = vsel %vm1342_vm0, %v1346_v45, %v1348_v25  ;;  %v3297_v7 = vand.u32 7, %v3065_v60 }
 0x136   : > { %v1703_v4 = vadd.f32 %v2405_v28, %v1702_v9  ;;  %v1384_v28 = vsel %vm3077_vm2, %v1345_v34, 0.0  ;;  %v1386_v41 = vsel %vm3094_vm4, %v1349_v39, 0.0 }
 0x137   : > { %v2407_v8 = vpop.f32.mrf.mxu0  ;;  %v3104_v38 = vpop.f32.mrf.mxu1  ;;  %v1392_v17 = vadd.f32 %v1384_v28, %v961_v56  ;;  %v2371_v56 = vadd.f32 %v3042_v27, %v3040_v24  ;;  %v1352_v45 = vrot.slane %v3136_v33, 7  ;;  %v1312_v24 = vadd.f32 %v3026_v15, %v2368_v44 }
 0x138   : > { %v1756_v3 = vrot.slane %v1703_v4, 1  ;;  %v2408_v31 = vadd.f32 %v2407_v8, %v2406_v32  ;;  %v3283_v4 = vand.u32 7, %v3063_v57  ;;  %v3289_v15 = vand.u32 7, %v3075_v6 }
 0x139   : > { %v2409_v9 = vpop.f32.mrf.mxu0  ;;  %v1715_v52 = vpop.f32.mrf.mxu1  ;;  %v1394_v43 = vadd.f32 %v1386_v41, %v969_v49  ;;  %v1353_v44 = vsel %vm1342_vm0, %v1350_v46, %v1352_v45 }
 0x13a   : > { %v1757_v13 = vsel %vm1754_vm6, %v1755_v53, %v1756_v3  ;;  %v1708_v26 = vadd.f32 %v2502_v36, %v2408_v31  ;;  %vm3149_vm11 = vcmp.ne.s32.totalorder %v3283_v4, 0  ;;  %v1385_v53 = vsel %vm3083_vm3, %v1347_v42, 0.0 }
 0x13b   : > { %v1795_v20 = vsel %vm3100_vm5, %v1757_v13, 0.0  ;;  %v2410_v12 = vpop.f32.mrf.mxu0  ;;  %v3161_v10 = vpop.f32.mrf.mxu1  ;;  %vm3182_vm13 = vcmp.ne.s32.totalorder %v3289_v15, 0  ;;  %v1354_v42 = vrot.slane %v1312_v24, 7  ;;  %v1388_v23 = vsel %vm3149_vm11, %v1353_v44, 0.0 }
 0x13c   : > { %v1758_v32 = vrot.slane %v1708_v26, 1  ;;  %v2411_v36 = vadd.f32 %v2410_v12, %v2409_v9  ;;  %v1803_v18 = vadd.f32 %v1795_v20, %v1391_v16  ;;  %v1315_v20 = vadd.f32 %v3038_v22, %v2371_v56 }
 0x13d   : > { %v2412_v34 = vpop.f32.mrf.mxu0  ;;  %v1718_v50 = vpop.f32.mrf.mxu1 }
 0x13e   : > { %v1759_v30 = vsel %vm1754_vm6, %v1756_v3, %v1758_v32  ;;  %v1711_v51 = vadd.f32 %v2503_v5, %v2411_v36  ;;  %v1827_v35 = vmax.f32 %v1803_v18, 0.0  ;;  %v1351_v36 = vsel %vm1342_vm0, %v1348_v25, %v1350_v46 }
 0x13f   : > { %v1796_v61 = vsel %vm3121_vm7, %v1759_v30, 0.0  ;;  %v2413_v8 = vpop.f32.mrf.mxu0  ;;  %v1356_v4 = vrot.slane %v1315_v20, 7  ;;  %v3294_v30 = vand.u32 7, %v3063_v57  ;;  %v1387_v47 = vsel %vm3143_vm10, %v1351_v36, 0.0 }
 0x140   : > { %v1804_v28 = vadd.f32 %v1796_v61, %v1392_v17  ;;  %v1760_v3 = vrot.slane %v1711_v51, 1  ;;  %v2414_v5 = vadd.f32 %v2413_v8, %v2412_v34  ;;  %v1355_v8 = vsel %vm1342_vm0, %v1352_v45, %v1354_v42 }
 0x141   : > { %v2415_v27 = vpop.f32.mrf.mxu0  ;;  %vm3211_vm15 = vcmp.ne.s32.totalorder %v3294_v30, 7  ;;  %v1357_v1 = vsel %vm1342_vm0, %v1354_v42, %v1356_v4  ;;  %vm1744_vm0 = vcmp.ne.s32.totalorder %v3297_v7, 7 }
 0x142   : > { %v1828_v9 = vmax.f32 %v1804_v28, 0.0  ;;  %v1761_v13 = vsel %vm1754_vm6, %v1758_v32, %v1760_v3  ;;  %v1716_v26 = vadd.f32 %v2414_v5, %v1715_v52  ;;  %v1393_v52 = vadd.f32 %v1385_v53, %v966_v19 }
 0x143   : > { %v1797_v48 = vsel %vm3125_vm8, %v1761_v13, 0.0  ;;  %v2416_v12 = vpop.f32.mrf.mxu0  ;;  %v912_v32 = vadd.f32 %v3010_v55, %v3057_v40  ;;  %v974_v19 = vadd.f32 %v3012_v58, %v909_v11  ;;  %v917_v5 = vadd.f32 %v3014_v59, %v3057_v40 }
 0x144   : > { %v2260_v22 = vpack.c.bf16 %v1828_v9, %v1827_v35  ;;  %v1762_v16 = vrot.slane %v1716_v26, 1  ;;  %v2417_v17 = vadd.f32 %v2416_v12, %v2415_v27  ;;  %v1805_v14 = vadd.f32 %v1797_v48, %v1393_v52 }
 0x145   : > { %v2418_v33 = vpop.f32.mrf.mxu0  ;;  %v977_v31 = vadd.f32 %v3020_v2, %v912_v32  ;;  %v920_v2 = vadd.f32 %v3018_v63, %v3057_v40  ;;  %v1395_v46 = vadd.f32 %v1387_v47, %v974_v19  ;;  %v1390_v59 = vsel %vm3182_vm13, %v1357_v1, 0.0 }
 0x146   : > { %2261 = vst [vmem:[%s3191_s14] sm:$0xff] %v2260_v22   ;;  %v1763_v34 = vsel %vm1754_vm6, %v1760_v3, %v1762_v16  ;;  %v1719_v39 = vadd.f32 %v2417_v17, %v1718_v50  ;;  %v1829_v53 = vmax.f32 %v1805_v14, 0.0  ;;  %v982_v9 = vadd.f32 %v3008_v54, %v917_v5 }
 0x147   : > { %v1798_v18 = vsel %vm3129_vm9, %v1763_v34, 0.0  ;;  %v2419_v25 = vpop.f32.mrf.mxu0  ;;  %v1396_v37 = vadd.f32 %v1388_v23, %v977_v31  ;;  %v985_v13 = vadd.f32 %v3016_v62, %v920_v2  ;;  %v3298_v11 = vmov %v3289_v15 }
 0x148   : > { %v1806_v21 = vadd.f32 %v1798_v18, %v1394_v43  ;;  %v1764_v56 = vrot.slane %v1719_v39, 1  ;;  %v2420_v61 = vadd.f32 %v2419_v25, %v2418_v33  ;;  %vm1745_vm1 = vcmp.ne.s32.totalorder %v3298_v11, 7 }
 0x149   : > { %v2421_v57 = vpop.f32.mrf.mxu0  ;;  %v1398_v29 = vadd.f32 %v1390_v59, %v985_v13 }
 0x14a   : > { %v1830_v28 = vmax.f32 %v1806_v21, 0.0  ;;  %v1765_v3 = vsel %vm1754_vm6, %v1762_v16, %v1764_v56  ;;  %v1724_v58 = vadd.f32 %v3104_v38, %v2420_v61  ;;  %v1389_v38 = vsel %vm3171_vm12, %v1355_v8, 0.0 }
 0x14b   : > { %v1799_v0 = vsel %vm3205_vm14, %v1765_v3, 0.0  ;;  %v2422_v41 = vpop.f32.mrf.mxu0  ;;  %v1397_v15 = vadd.f32 %v1389_v38, %v982_v9 }
 0x14c   : > { %v2265_v45 = vpack.c.bf16 %v1830_v28, %v1829_v53  ;;  %v1766_v24 = vrot.slane %v1724_v58, 1  ;;  %v2423_v27 = vadd.f32 %v2422_v41, %v2421_v57  ;;  %v1807_v35 = vadd.f32 %v1799_v0, %v1395_v46 }
 0x14e   : > { %2277 = vst [vmem:[%s3191_s14 + $0x8] sm:$0xff] %v2265_v45   ;;  %v1767_v63 = vsel %vm1754_vm6, %v1764_v56, %v1766_v24  ;;  %v1727_v40 = vadd.f32 %v3161_v10, %v2423_v27  ;;  %v1831_v10 = vmax.f32 %v1807_v35, 0.0 }
 0x14f   : > { %v1800_v26 = vsel %vm3211_vm15, %v1767_v63, 0.0 }
 0x150   : > { %v1808_v49 = vadd.f32 %v1800_v26, %v1396_v37  ;;  %v1768_v20 = vrot.slane %v1727_v40, 1 }
 0x152   : > { %v1832_v48 = vmax.f32 %v1808_v49, 0.0  ;;  %v1769_v54 = vsel %vm1754_vm6, %v1766_v24, %v1768_v20  ;;  %v1778_v62 = vsel %vm1754_vm6, %v1768_v20, 0.0 }
 0x153   : > { %v1801_v12 = vsel %vm1744_vm0, %v1769_v54, 0.0  ;;  %v1802_v50 = vsel %vm1745_vm1, %v1778_v62, 0.0 }
 0x154   : > { %v2270_v52 = vpack.c.bf16 %v1832_v48, %v1831_v10  ;;  %v1809_v22 = vadd.f32 %v1801_v12, %v1397_v15  ;;  %v1810_v16 = vadd.f32 %v1802_v50, %v1398_v29 }
 0x156   : > { %2278 = vst [vmem:[%s3191_s14 + $0x10] sm:$0xff] %v2270_v52   ;;  %v1833_v60 = vmax.f32 %v1809_v22, 0.0  ;;  %v1834_v17 = vmax.f32 %v1810_v16, 0.0 }
 0x158   : > { %v2275_v6 = vpack.c.bf16 %v1834_v17, %v1833_v60 }
 0x15a   : > { %2279 = vst [vmem:[%s3191_s14 + $0x18] sm:$0xff] %v2275_v6  }
 0x15b PF: > { %s15_s0 = sadd.s32 1, %s2641_s0   ;;  %s3299_s18 = smov %s2637_s19 }
 0x15c   : > { %p12_p5 = scmp.ge.s32.totalorder %s15_s0, 4   ;;  %s3300_s19 = smov %s3302_s2 }
 0x15e   :  { %14 = sbr.rel (!%p12_p5) target bundleno = 2 (0x2), region = 84 }

// kernel: _lambda_.5
= control target key start
LH: loop header
LB: loop body
LE: loop exit
PB: predicated region body
PF: predicated region fallthrough
CT: control target
= control target key end

     0   :  { %s5670_s18 = smov 0   ;;  %s5672_s19 = smov 0   ;;  %s7003_s0 = inlined_call_operand.vmem [shape: bf16[2,256,3], index: 0, kind: input, shape index: {}, may-alias: {0,1,2}]   ;;  %s7004_s1 = inlined_call_operand.vmem [shape: bf16[2,256,3], index: 1, kind: input, shape index: {}, may-alias: {0,1,2}]   ;;  %s7005_s2 = inlined_call_operand.vmem [shape: bf16[2,256,3], index: 2, kind: input, shape index: {}, may-alias: {0,1,2}]   ;;  %s7006_s3 = inlined_call_operand.vmem [shape: bf16[9,3,64], index: 3, kind: input, shape index: {}]   ;;  %s7007_s4 = inlined_call_operand.vmem [shape: f32[1,64], index: 4, kind: input, shape index: {}]   ;;  %s7008_s5 = inlined_call_operand.vmem [shape: bf16[2,256,64], index: 5, kind: output, shape index: {}]  }
   0x1   :  { %s5674_s0 = smov 0  }
   0x2 LB: > { %s34_s2 = sadd.s32 1, %s5632_s19  ;;  %p4696_p0 = scmp.ge.s32.totalorder %s5636_s0, 1  ;;  %s5636_s0 = sphi %s5674_s0, %s15_s0   ;;  %s5632_s19 = sphi %s5672_s19, %s7100_s19   ;;  %s5628_s18 = sphi %s5670_s18, %s7099_s18  }
   0x3   : > { %p36_p1 = scmp.ge.s32.totalorder %s34_s2, 2  ;;  %p300_p2 = scmp.lt.s32.totalorder %s5636_s0, 3 }
   0x5   : > { %s7102_s2 = smov (%p36_p1, %s34_s2), 0  ;;  %p301_p3 = pnand %p4696_p0, %p300_p2 }
   0x7   : > { %304 = sbr.rel (%p301_p3) target bundleno = 539 (0x21b), region = 40 }
   0xc   : > { %v4706_v0 = vld [vmem:[%s7006_s3 + $0x8] sm:$0x3]  ;;  %vm1108_vm0 = vcmask 1040384   ;;  %vm1109_vm1 = vcmask 1041408   ;;  %p391_p4 = scmp.lt.s32.totalorder %s5628_s18, 1  ;;  %v5638_v1 = vmov 65535  }
   0xd   : > { %v1110_v2 = vsel %vm1108_vm0, 4294967295, %v5638_v1  ;;  %vm455_vm2 = vcmask 19456   ;;  %v4705_v3 = vld [vmem:[%s7006_s3 + $0x6] sm:$0x3]  ;;  %v4756_v5 = vld [vmem:[%s7006_s3 + $0xa] sm:$0x3] }
   0xe   : > { %v5695_v4 = vsel %vm1109_vm1, %v1110_v2, 0  ;;  %s7104_s18 = smov (!%p391_p4, %s5628_s18), 1  ;;  %v5639_v6 = vmov 0   ;;  %vm1059_vm3 = vcmask 23552   ;;  %v4790_v31 = vld [vmem:[%s7006_s3 + $0x2] sm:$0x3] }
   0xf   : > { %456 = vst.msk [vmem:[#allocation2] sm:$0xf] %vm455_vm2, %v5639_v6  ;;  %457 = vst.msk [vmem:[#allocation2 + $0x4] sm:$0xf] %vm455_vm2, %v5639_v6  ;;  %v1113_v7 = vand.u32 %v4706_v0, %v5695_v4  ;;  %v5708_v8 = vand.u32 %v4705_v3, %v5695_v4  ;;  %v5711_v9 = vand.u32 %v4756_v5, %v5695_v4  ;;  %s4992_s26 = sshll.u32 %s7104_s18, 7  ;;  %vm1845_vm4 = vcmask 523264  }
  0x10   : > { %522 = vst.msk [vmem:[#allocation2 + $0x88] sm:$0xf] %vm455_vm2, %v5639_v6  ;;  %523 = vst.msk [vmem:[#allocation2 + $0x8c] sm:$0xf] %vm455_vm2, %v5639_v6  ;;  %s5719_s29 = scalar_lea.vmem %s7004_s1, %s4992_s26  ;;  %v1910_v35 = vld [vmem:[%s7006_s3] sm:$0x3]  ;;  %v2044_v40 = vand.u32 %v4790_v31, %v5695_v4  ;;  %s6712_s23 = scalar_lea.vmem %s7008_s5, %s4992_s26 }
  0x11   : > { %5487 = vmatprep.subr.bf16.mxu1 %v1113_v7  ;;  %5181 = vmatprep.subr.bf16.mxu0 %v1113_v7  ;;  %v458_v10 = vld [vmem:[%s5719_s29] sm:$0xf]  ;;  %v459_v11 = vld [vmem:[%s5719_s29 + $0x4] sm:$0xf]  ;;  %v460_v14 = vld [vmem:[%s5719_s29 + $0x8] sm:$0xf]  ;;  %v2216_v42 = vand.u32 %v1910_v35, %v5695_v4 }
  0x12   : > { %5488 = vmatpush3.bf16.msra.mxu1 %v1113_v7  ;;  %5182 = vmatpush3.bf16.msra.mxu0 %v1113_v7  ;;  %v474_v12 = vld [vmem:[%s5719_s29 + $0x40] sm:$0xf]  ;;  %490 = vst.msk [vmem:[#allocation2 + $0x8] sm:$0xf] %vm455_vm2, %v458_v10  ;;  %491 = vst.msk [vmem:[#allocation2 + $0xc] sm:$0xf] %vm455_vm2, %v459_v11 }
  0x13   : > { %v475_v13 = vld [vmem:[%s5719_s29 + $0x44] sm:$0xf]  ;;  %506 = vst.msk [vmem:[#allocation2 + $0x48] sm:$0xf] %vm455_vm2, %v474_v12  ;;  %5215 = vmatprep.subr.bf16.mxu1 %v5708_v8  ;;  %v461_v15 = vld [vmem:[%s5719_s29 + $0xc] sm:$0xf]  ;;  %5249 = vmatprep.subr.bf16.mxu0 %v5711_v9 }
  0x14   : > { %507 = vst.msk [vmem:[#allocation2 + $0x4c] sm:$0xf] %vm455_vm2, %v475_v13  ;;  %492 = vst.msk [vmem:[#allocation2 + $0x10] sm:$0xf] %vm455_vm2, %v460_v14  ;;  %v476_v16 = vld [vmem:[%s5719_s29 + $0x48] sm:$0xf] }
  0x15   : > { %493 = vst.msk [vmem:[#allocation2 + $0x14] sm:$0xf] %vm455_vm2, %v461_v15  ;;  %v477_v17 = vld [vmem:[%s5719_s29 + $0x4c] sm:$0xf]  ;;  %v462_v18 = vld [vmem:[%s5719_s29 + $0x10] sm:$0xf] }
  0x16   : > { %508 = vst.msk [vmem:[#allocation2 + $0x50] sm:$0xf] %vm455_vm2, %v476_v16  ;;  %509 = vst.msk [vmem:[#allocation2 + $0x54] sm:$0xf] %vm455_vm2, %v477_v17  ;;  %v463_v19 = vld [vmem:[%s5719_s29 + $0x14] sm:$0xf] }
  0x17   : > { %494 = vst.msk [vmem:[#allocation2 + $0x18] sm:$0xf] %vm455_vm2, %v462_v18  ;;  %v478_v20 = vld [vmem:[%s5719_s29 + $0x50] sm:$0xf]  ;;  %v479_v21 = vld [vmem:[%s5719_s29 + $0x54] sm:$0xf] }
  0x18   : > { %495 = vst.msk [vmem:[#allocation2 + $0x1c] sm:$0xf] %vm455_vm2, %v463_v19  ;;  %510 = vst.msk [vmem:[#allocation2 + $0x58] sm:$0xf] %vm455_vm2, %v478_v20  ;;  %v464_v22 = vld [vmem:[%s5719_s29 + $0x18] sm:$0xf] }
  0x19   : > { %511 = vst.msk [vmem:[#allocation2 + $0x5c] sm:$0xf] %vm455_vm2, %v479_v21  ;;  %v465_v23 = vld [vmem:[%s5719_s29 + $0x1c] sm:$0xf]  ;;  %v480_v24 = vld [vmem:[%s5719_s29 + $0x58] sm:$0xf] }
  0x1a   : > { %496 = vst.msk [vmem:[#allocation2 + $0x20] sm:$0xf] %vm455_vm2, %v464_v22  ;;  %497 = vst.msk [vmem:[#allocation2 + $0x24] sm:$0xf] %vm455_vm2, %v465_v23  ;;  %v481_v25 = vld [vmem:[%s5719_s29 + $0x5c] sm:$0xf] }
  0x1b   : > { %512 = vst.msk [vmem:[#allocation2 + $0x60] sm:$0xf] %vm455_vm2, %v480_v24  ;;  %v466_v26 = vld [vmem:[%s5719_s29 + $0x20] sm:$0xf]  ;;  %v467_v27 = vld [vmem:[%s5719_s29 + $0x24] sm:$0xf] }
  0x1c   : > { %513 = vst.msk [vmem:[#allocation2 + $0x64] sm:$0xf] %vm455_vm2, %v481_v25  ;;  %498 = vst.msk [vmem:[#allocation2 + $0x28] sm:$0xf] %vm455_vm2, %v466_v26  ;;  %v482_v28 = vld [vmem:[%s5719_s29 + $0x60] sm:$0xf] }
  0x1d   : > { %499 = vst.msk [vmem:[#allocation2 + $0x2c] sm:$0xf] %vm455_vm2, %v467_v27  ;;  %v483_v29 = vld [vmem:[%s5719_s29 + $0x64] sm:$0xf]  ;;  %v468_v30 = vld [vmem:[%s5719_s29 + $0x28] sm:$0xf] }
  0x1e   : > { %514 = vst.msk [vmem:[#allocation2 + $0x68] sm:$0xf] %vm455_vm2, %v482_v28  ;;  %515 = vst.msk [vmem:[#allocation2 + $0x6c] sm:$0xf] %vm455_vm2, %v483_v29  ;;  %v469_v32 = vld [vmem:[%s5719_s29 + $0x2c] sm:$0xf] }
  0x1f   : > { %500 = vst.msk [vmem:[#allocation2 + $0x30] sm:$0xf] %vm455_vm2, %v468_v30  ;;  %v484_v33 = vld [vmem:[%s5719_s29 + $0x68] sm:$0xf]  ;;  %v485_v34 = vld [vmem:[%s5719_s29 + $0x6c] sm:$0xf] }
  0x20   : > { %v5774_v36 = vld [vmem:[#allocation2 + $0x8] sm:$0xff]   ;;  %501 = vst.msk [vmem:[#allocation2 + $0x34] sm:$0xf] %vm455_vm2, %v469_v32  ;;  %516 = vst.msk [vmem:[#allocation2 + $0x70] sm:$0xf] %vm455_vm2, %v484_v33  ;;  %v5783_v38 = vld [vmem:[#allocation2 + $0x10] sm:$0xff]  }
  0x21   : > { %517 = vst.msk [vmem:[#allocation2 + $0x74] sm:$0xf] %vm455_vm2, %v485_v34  ;;  %v5779_v37 = vld [vmem:[#allocation2 + $0x48] sm:$0xff]   ;;  %5183 = vmatprep.mubr.msk.bf16.mxu0 %vm1059_vm3, %v5774_v36  ;;  %v5787_v39 = vld [vmem:[#allocation2 + $0x50] sm:$0xff]   ;;  %v5792_v41 = vld [vmem:[#allocation2 + $0x18] sm:$0xff]  }
  0x22   : > { %5199 = vmatprep.mubr.msk.bf16.mxu1 %vm1059_vm3, %v5779_v37  ;;  %5184 = vmatmul.mubr.msk.bf16.vlgmr.msra.gmra.mxu0 %vm1059_vm3, %v5783_v38  ;;  %v5798_v43 = vld [vmem:[#allocation2 + $0x58] sm:$0xff]   ;;  %v5521_v44 = vld [vmem:[#allocation2 + $0x20] sm:$0xff]   ;;  %v470_v48 = vld [vmem:[%s5719_s29 + $0x30] sm:$0xf] }
  0x23   : > { %5200 = vmatmul.mubr.msk.bf16.vlgmr.msra.gmra.mxu1 %vm1059_vm3, %v5787_v39  ;;  %5250 = vmatpush3.bf16.msra.mxu0 %v5711_v9  ;;  %v5805_v45 = vld [vmem:[#allocation2 + $0x60] sm:$0xff]   ;;  %v471_v49 = vld [vmem:[%s5719_s29 + $0x34] sm:$0xf]  ;;  %v486_v50 = vld [vmem:[%s5719_s29 + $0x70] sm:$0xf] }
  0x24   : > { %5216 = vmatpush3.bf16.msra.mxu1 %v5708_v8  ;;  %5187 = vmatprep.mubr.msk.bf16.mxu0 %vm1059_vm3, %v5792_v41  ;;  %v5523_v46 = vld [vmem:[#allocation2 + $0x28] sm:$0xff]   ;;  %502 = vst.msk [vmem:[#allocation2 + $0x38] sm:$0xf] %vm455_vm2, %v470_v48  ;;  %503 = vst.msk [vmem:[#allocation2 + $0x3c] sm:$0xf] %vm455_vm2, %v471_v49  ;;  %v5532_v60 = vld [vmem:[#allocation2 + $0x10] sm:$0xff]  }
  0x25   : > { %5203 = vmatprep.mubr.msk.bf16.mxu1 %vm1059_vm3, %v5798_v43  ;;  %5283 = vmatprep.subr.bf16.mxu1 %v2044_v40  ;;  %v5807_v47 = vld [vmem:[#allocation2 + $0x68] sm:$0xff]   ;;  %v487_v51 = vld [vmem:[%s5719_s29 + $0x74] sm:$0xf]  ;;  %518 = vst.msk [vmem:[#allocation2 + $0x78] sm:$0xf] %vm455_vm2, %v486_v50  ;;  %v5531_v63 = vld [vmem:[#allocation2] sm:$0xff]  }
  0x26   : > { %5317 = vmatprep.subr.bf16.mxu0 %v2216_v42  ;;  %v472_v52 = vld [vmem:[%s5719_s29 + $0x38] sm:$0xf]  ;;  %v473_v53 = vld [vmem:[%s5719_s29 + $0x3c] sm:$0xf]  ;;  %519 = vst.msk [vmem:[#allocation2 + $0x7c] sm:$0xf] %vm455_vm2, %v487_v51 }
  0x27   : > { %504 = vst.msk [vmem:[#allocation2 + $0x40] sm:$0xf] %vm455_vm2, %v472_v52  ;;  %505 = vst.msk [vmem:[#allocation2 + $0x44] sm:$0xf] %vm455_vm2, %v473_v53  ;;  %v488_v54 = vld [vmem:[%s5719_s29 + $0x78] sm:$0xf] }
  0x28   : > { %v489_v55 = vld [vmem:[%s5719_s29 + $0x7c] sm:$0xf]  ;;  %520 = vst.msk [vmem:[#allocation2 + $0x80] sm:$0xf] %vm455_vm2, %v488_v54  ;;  %v5525_v56 = vld [vmem:[#allocation2 + $0x30] sm:$0xff]   ;;  %v5534_v3 = vld [vmem:[#allocation2 + $0x20] sm:$0xff]  }
  0x29   : > { %521 = vst.msk [vmem:[#allocation2 + $0x84] sm:$0xf] %vm455_vm2, %v489_v55  ;;  %v5831_v57 = vld [vmem:[#allocation2 + $0x70] sm:$0xff]   ;;  %v4840_v0 = vld [vmem:[%s7006_s3 + $0x4] sm:$0x3]  ;;  %v5533_v1 = vld [vmem:[#allocation2 + $0x18] sm:$0xff]  }
  0x2a   : > { %5188 = vmatmul.mubr.msk.bf16.gmra.mxu0 %vm1059_vm3, %v5521_v44  ;;  %v4874_v2 = vld [vmem:[%s7006_s3 + $0xe] sm:$0x3]  ;;  %v2542_v5 = vand.u32 %v4840_v0, %v5695_v4  ;;  %v5536_v8 = vld [vmem:[#allocation2 + $0x30] sm:$0xff]   ;;  %v5541_v13 = vld [vmem:[#allocation2 + $0x58] sm:$0xff]  }
  0x2b   : > { %5204 = vmatmul.mubr.msk.bf16.gmra.mxu1 %vm1059_vm3, %v5805_v45  ;;  %5191 = vmatprep.mubr.msk.bf16.mxu0 %vm1059_vm3, %v5523_v46  ;;  %v5527_v58 = vld [vmem:[#allocation2 + $0x38] sm:$0xff]   ;;  %v3256_v6 = vand.u32 %v4874_v2, %v5695_v4  ;;  %v5535_v7 = vld [vmem:[#allocation2 + $0x28] sm:$0xff]   ;;  %v5540_v12 = vld [vmem:[#allocation2 + $0x50] sm:$0xff]  }
  0x2c   : > { %5207 = vmatprep.mubr.msk.bf16.mxu1 %vm1059_vm3, %v5807_v47  ;;  %v5537_v9 = vld [vmem:[#allocation2 + $0x38] sm:$0xff]   ;;  %v5539_v11 = vld [vmem:[#allocation2 + $0x48] sm:$0xff]   ;;  %v5542_v14 = vld [vmem:[#allocation2 + $0x60] sm:$0xff]  }
  0x2d   : > { %v5836_v59 = vld [vmem:[#allocation2 + $0x78] sm:$0xff]   ;;  %v5543_v15 = vld [vmem:[#allocation2 + $0x68] sm:$0xff]   ;;  %v5544_v16 = vld [vmem:[#allocation2 + $0x70] sm:$0xff]  }
  0x2e   : > { %v5529_v61 = vld [vmem:[#allocation2 + $0x40] sm:$0xff]   ;;  %v5545_v17 = vld [vmem:[#allocation2 + $0x78] sm:$0xff]   ;;  %v5547_v19 = vld [vmem:[#allocation2 + $0x88] sm:$0xff]  }
  0x2f   : > { %v5538_v10 = vld [vmem:[#allocation2 + $0x40] sm:$0xff]   ;;  %v5548_v21 = vld [vmem:[#allocation2 + $0x8] sm:$0xff]   ;;  %v5550_v23 = vld [vmem:[#allocation2 + $0x10] sm:$0xff]  }
  0x30   : > { %v5530_v62 = vld [vmem:[#allocation2 + $0x80] sm:$0xff]   ;;  %v4873_v22 = vld [vmem:[%s7006_s3 + $0xc] sm:$0x3]  ;;  %v4924_v24 = vld [vmem:[%s7006_s3 + $0x10] sm:$0x3] }
  0x31   : > { %v5546_v18 = vld [vmem:[#allocation2 + $0x80] sm:$0xff]   ;;  %v5551_v25 = vld [vmem:[#allocation2 + $0x18] sm:$0xff]   ;;  %v3428_v26 = vand.u32 %v4873_v22, %v5695_v4  ;;  %v3754_v27 = vand.u32 %v4924_v24, %v5695_v4  ;;  %v5553_v29 = vld [vmem:[#allocation2 + $0x28] sm:$0xff]  }
  0x32   : > { %5192 = vmatmul.mubr.msk.bf16.gmra.mxu0 %vm1059_vm3, %v5525_v56  ;;  %v5549_v20 = vld [vmem:[#allocation2] sm:$0xff]   ;;  %v5554_v4 = vld [vmem:[#allocation2 + $0x30] sm:$0xff]   ;;  %v5555_v30 = vld [vmem:[#allocation2 + $0x38] sm:$0xff]  }
  0x33   : > { %5208 = vmatmul.mubr.msk.bf16.gmra.mxu1 %vm1059_vm3, %v5831_v57  ;;  %5195 = vmatprep.mubr.msk.bf16.mxu0 %vm1059_vm3, %v5527_v58  ;;  %v5552_v28 = vld [vmem:[#allocation2 + $0x20] sm:$0xff]   ;;  %v5557_v32 = vld [vmem:[#allocation2 + $0x48] sm:$0xff]   ;;  %v5558_v33 = vld [vmem:[#allocation2 + $0x50] sm:$0xff]  }
  0x34   : > { %5211 = vmatprep.mubr.msk.bf16.mxu1 %vm1059_vm3, %v5836_v59  ;;  %v5556_v31 = vld [vmem:[#allocation2 + $0x40] sm:$0xff]   ;;  %v5559_v34 = vld [vmem:[#allocation2 + $0x58] sm:$0xff]   ;;  %v5950_v48 = vld [vmem:[#allocation2 + $0x28] sm:$0xff]  }
  0x35   : > { %v5560_v35 = vld [vmem:[#allocation2 + $0x60] sm:$0xff]   ;;  %v5573_v49 = vld [vmem:[#allocation2 + $0x30] sm:$0xff]   ;;  %v5575_v51 = vld [vmem:[#allocation2 + $0x38] sm:$0xff]  }
  0x36   : > { %v5958_v50 = vld [vmem:[#allocation2 + $0x30] sm:$0xff]   ;;  %v5960_v52 = vld [vmem:[#allocation2 + $0x38] sm:$0xff]   ;;  %v5577_v53 = vld [vmem:[#allocation2 + $0x40] sm:$0xff]  }
  0x37   : > { %v5968_v54 = vld [vmem:[#allocation2 + $0x40] sm:$0xff]   ;;  %v5579_v55 = vld [vmem:[#allocation2 + $0x48] sm:$0xff]  }
  0x3a   : > { %5196 = vmatmul.mubr.msk.bf16.gmra.mxu0 %vm1059_vm3, %v5529_v61 }
  0x3b   : > { %5212 = vmatmul.mubr.msk.bf16.gmra.mxu1 %vm1059_vm3, %v5530_v62  ;;  %5251 = vmatprep.mubr.msk.bf16.mxu0 %vm1059_vm3, %v5532_v60  ;;  %v5980_v60 = vld [vmem:[#allocation2 + $0x58] sm:$0xff]  }
  0x3c   : > { %5217 = vmatprep.mubr.msk.bf16.mxu1 %vm1059_vm3, %v5531_v63 }
  0x42   : > { %5252 = vmatmul.mubr.msk.bf16.vlgmr.msra.gmra.mxu0 %vm1059_vm3, %v5533_v1 }
  0x43   : > { %5218 = vmatmul.mubr.msk.bf16.vlgmr.msra.gmra.mxu1 %vm1059_vm3, %v5774_v36  ;;  %5318 = vmatpush3.bf16.msra.mxu0 %v2216_v42  ;;  %v5561_v36 = vld [vmem:[#allocation2 + $0x68] sm:$0xff]   ;;  %v5938_v42 = vld [vmem:[#allocation2 + $0x10] sm:$0xff]  }
  0x44   : > { %5284 = vmatpush3.bf16.msra.mxu1 %v2044_v40  ;;  %5221 = vmatprep.mubr.msk.bf16.mxu1 %vm1059_vm3, %v5783_v38  ;;  %v5563_v38 = vld [vmem:[#allocation2 + $0x78] sm:$0xff]   ;;  %v5931_v40 = vld [vmem:[#allocation2 + $0x8] sm:$0xff]  }
  0x45   : > { %5255 = vmatprep.mubr.msk.bf16.mxu0 %vm1059_vm3, %v5534_v3  ;;  %5351 = vmatprep.subr.bf16.mxu1 %v2542_v5  ;;  %v5998_v3 = vld [vmem:[#allocation2 + $0x60] sm:$0xff]  }
  0x46   : > { %5385 = vmatprep.subr.bf16.mxu0 %v3256_v6 }
  0x4a   : > { %5256 = vmatmul.mubr.msk.bf16.gmra.mxu0 %vm1059_vm3, %v5535_v7  ;;  %v6002_v7 = vld [vmem:[#allocation2 + $0x68] sm:$0xff]  }
  0x4b   : > { %5222 = vmatmul.mubr.msk.bf16.gmra.mxu1 %vm1059_vm3, %v5792_v41  ;;  %5259 = vmatprep.mubr.msk.bf16.mxu0 %vm1059_vm3, %v5536_v8  ;;  %v5565_v41 = vld [vmem:[#allocation2 + $0x10] sm:$0xff]  }
  0x4c   : > { %5225 = vmatprep.mubr.msk.bf16.mxu1 %vm1059_vm3, %v5521_v44  ;;  %v5569_v44 = vld [vmem:[#allocation2 + $0x20] sm:$0xff]  }
  0x52   : > { %5260 = vmatmul.mubr.msk.bf16.gmra.mxu0 %vm1059_vm3, %v5537_v9  ;;  %v5589_v9 = vld [vmem:[#allocation2 + $0x70] sm:$0xff]  }
  0x53   : > { %5226 = vmatmul.mubr.msk.bf16.gmra.mxu1 %vm1059_vm3, %v5523_v46  ;;  %5263 = vmatprep.mubr.msk.bf16.mxu0 %vm1059_vm3, %v5538_v10  ;;  %v5948_v46 = vld [vmem:[#allocation2 + $0x20] sm:$0xff]  }
  0x54   : > { %5229 = vmatprep.mubr.msk.bf16.mxu1 %vm1059_vm3, %v5525_v56  ;;  %v5970_v56 = vld [vmem:[#allocation2 + $0x48] sm:$0xff]  }
  0x5a   : > { %5264 = vmatmul.mubr.msk.bf16.gmra.mxu0 %vm1059_vm3, %v5539_v11 }
  0x5b   : > { %5230 = vmatmul.mubr.msk.bf16.gmra.mxu1 %vm1059_vm3, %v5527_v58  ;;  %5267 = vmatprep.mubr.msk.bf16.mxu0 %vm1059_vm3, %v5540_v12  ;;  %v5978_v58 = vld [vmem:[#allocation2 + $0x50] sm:$0xff]  }
  0x5c   : > { %5233 = vmatprep.mubr.msk.bf16.mxu1 %vm1059_vm3, %v5529_v61  ;;  %v5585_v61 = vld [vmem:[#allocation2 + $0x60] sm:$0xff]  }
  0x62   : > { %5268 = vmatmul.mubr.msk.bf16.gmra.mxu0 %vm1059_vm3, %v5541_v13 }
  0x63   : > { %5234 = vmatmul.mubr.msk.bf16.gmra.mxu1 %vm1059_vm3, %v5779_v37  ;;  %5271 = vmatprep.mubr.msk.bf16.mxu0 %vm1059_vm3, %v5542_v14  ;;  %v5562_v37 = vld [vmem:[#allocation2 + $0x70] sm:$0xff]  }
  0x64   : > { %5237 = vmatprep.mubr.msk.bf16.mxu1 %vm1059_vm3, %v5787_v39  ;;  %v5564_v39 = vld [vmem:[#allocation2 + $0x80] sm:$0xff]  }
  0x6a   : > { %5272 = vmatmul.mubr.msk.bf16.gmra.mxu0 %vm1059_vm3, %v5543_v15 }
  0x6b   : > { %5238 = vmatmul.mubr.msk.bf16.gmra.mxu1 %vm1059_vm3, %v5798_v43  ;;  %5275 = vmatprep.mubr.msk.bf16.mxu0 %vm1059_vm3, %v5544_v16  ;;  %v5567_v43 = vld [vmem:[#allocation2 + $0x18] sm:$0xff]   ;;  %v6024_v16 = vld [vmem:[#allocation2 + $0x70] sm:$0xff]  }
  0x6c   : > { %5241 = vmatprep.mubr.msk.bf16.mxu1 %vm1059_vm3, %v5805_v45  ;;  %v5940_v45 = vld [vmem:[#allocation2 + $0x18] sm:$0xff]  }
  0x72   : > { %5276 = vmatmul.mubr.msk.bf16.gmra.mxu0 %vm1059_vm3, %v5545_v17 }
  0x73   : > { %5242 = vmatmul.mubr.msk.bf16.gmra.mxu1 %vm1059_vm3, %v5807_v47  ;;  %5279 = vmatprep.mubr.msk.bf16.mxu0 %vm1059_vm3, %v5546_v18  ;;  %v5571_v47 = vld [vmem:[#allocation2 + $0x28] sm:$0xff]   ;;  %v5591_v18 = vld [vmem:[#allocation2 + $0x78] sm:$0xff]  }
  0x74   : > { %5245 = vmatprep.mubr.msk.bf16.mxu1 %vm1059_vm3, %v5831_v57  ;;  %v5581_v57 = vld [vmem:[#allocation2 + $0x50] sm:$0xff]  }
  0x7a   : > { %5280 = vmatmul.mubr.msk.bf16.gmra.mxu0 %vm1059_vm3, %v5547_v19  ;;  %v6028_v19 = vld [vmem:[#allocation2 + $0x78] sm:$0xff]  }
  0x7b   : > { %5246 = vmatmul.mubr.msk.bf16.gmra.mxu1 %vm1059_vm3, %v5836_v59  ;;  %5319 = vmatprep.mubr.msk.bf16.mxu0 %vm1059_vm3, %v5549_v20  ;;  %v5583_v59 = vld [vmem:[#allocation2 + $0x58] sm:$0xff]  }
  0x7c   : > { %5285 = vmatprep.mubr.msk.bf16.mxu1 %vm1059_vm3, %v5548_v21 }
  0x82   : > { %5320 = vmatmul.mubr.msk.bf16.vlgmr.msra.gmra.mxu0 %vm1059_vm3, %v5548_v21  ;;  %v5593_v21 = vld [vmem:[#allocation2 + $0x80] sm:$0xff]  }
  0x83   : > { %5286 = vmatmul.mubr.msk.bf16.vlgmr.msra.gmra.mxu1 %vm1059_vm3, %v5550_v23  ;;  %5386 = vmatpush3.bf16.msra.mxu0 %v3256_v6  ;;  %v5587_v6 = vld [vmem:[#allocation2 + $0x68] sm:$0xff]  }
  0x84   : > { %5352 = vmatpush3.bf16.msra.mxu1 %v2542_v5  ;;  %5289 = vmatprep.mubr.msk.bf16.mxu1 %vm1059_vm3, %v5551_v25 }
  0x85   : > { %5323 = vmatprep.mubr.msk.bf16.mxu0 %vm1059_vm3, %v5550_v23  ;;  %5419 = vmatprep.subr.bf16.mxu1 %v3428_v26 }
  0x86   : > { %5453 = vmatprep.subr.bf16.mxu0 %v3754_v27 }
  0x8a   : > { %5324 = vmatmul.mubr.msk.bf16.gmra.mxu0 %vm1059_vm3, %v5551_v25 }
  0x8b   : > { %5290 = vmatmul.mubr.msk.bf16.gmra.mxu1 %vm1059_vm3, %v5552_v28  ;;  %5327 = vmatprep.mubr.msk.bf16.mxu0 %vm1059_vm3, %v5552_v28  ;;  %v5596_v28 = vld [vmem:[#allocation2 + $0x80] sm:$0xff]  }
  0x8c   : > { %5293 = vmatprep.mubr.msk.bf16.mxu1 %vm1059_vm3, %v5553_v29 }
  0x92   : > { %5328 = vmatmul.mubr.msk.bf16.gmra.mxu0 %vm1059_vm3, %v5553_v29 }
  0x93   : > { %5294 = vmatmul.mubr.msk.bf16.gmra.mxu1 %vm1059_vm3, %v5554_v4  ;;  %5331 = vmatprep.mubr.msk.bf16.mxu0 %vm1059_vm3, %v5554_v4  ;;  %v5595_v4 = vld [vmem:[#allocation2 + $0x88] sm:$0xff]  }
  0x94   : > { %5297 = vmatprep.mubr.msk.bf16.mxu1 %vm1059_vm3, %v5555_v30 }
  0x9a   : > { %5332 = vmatmul.mubr.msk.bf16.gmra.mxu0 %vm1059_vm3, %v5555_v30  ;;  %v5598_v30 = vld [vmem:[#allocation2 + $0x10] sm:$0xff]  }
  0x9b   : > { %5298 = vmatmul.mubr.msk.bf16.gmra.mxu1 %vm1059_vm3, %v5556_v31  ;;  %5335 = vmatprep.mubr.msk.bf16.mxu0 %vm1059_vm3, %v5556_v31 }
  0x9c   : > { %5301 = vmatprep.mubr.msk.bf16.mxu1 %vm1059_vm3, %v5557_v32 }
  0xa2   : > { %5336 = vmatmul.mubr.msk.bf16.gmra.mxu0 %vm1059_vm3, %v5557_v32  ;;  %v5597_v32 = vld [vmem:[#allocation2] sm:$0xff]  }
  0xa3   : > { %5302 = vmatmul.mubr.msk.bf16.gmra.mxu1 %vm1059_vm3, %v5558_v33  ;;  %5339 = vmatprep.mubr.msk.bf16.mxu0 %vm1059_vm3, %v5558_v33 }
  0xa4   : > { %5305 = vmatprep.mubr.msk.bf16.mxu1 %vm1059_vm3, %v5559_v34 }
  0xaa   : > { %5340 = vmatmul.mubr.msk.bf16.gmra.mxu0 %vm1059_vm3, %v5559_v34 }
  0xab   : > { %5306 = vmatmul.mubr.msk.bf16.gmra.mxu1 %vm1059_vm3, %v5560_v35  ;;  %5343 = vmatprep.mubr.msk.bf16.mxu0 %vm1059_vm3, %v5560_v35 }
  0xac   : > { %5309 = vmatprep.mubr.msk.bf16.mxu1 %vm1059_vm3, %v5561_v36 }
  0xb2   : > { %5344 = vmatmul.mubr.msk.bf16.gmra.mxu0 %vm1059_vm3, %v5561_v36 }
  0xb3   : > { %5310 = vmatmul.mubr.msk.bf16.gmra.mxu1 %vm1059_vm3, %v5562_v37  ;;  %5347 = vmatprep.mubr.msk.bf16.mxu0 %vm1059_vm3, %v5562_v37 }
  0xb4   : > { %5313 = vmatprep.mubr.msk.bf16.mxu1 %vm1059_vm3, %v5563_v38 }
  0xba   : > { %5348 = vmatmul.mubr.msk.bf16.gmra.mxu0 %vm1059_vm3, %v5563_v38 }
  0xbb   : > { %5314 = vmatmul.mubr.msk.bf16.gmra.mxu1 %vm1059_vm3, %v5564_v39  ;;  %5387 = vmatprep.mubr.msk.bf16.mxu0 %vm1059_vm3, %v5931_v40  ;;  %v5599_v39 = vld [vmem:[#allocation2 + $0x18] sm:$0xff]  }
  0xbc   : > { %5353 = vmatprep.mubr.msk.bf16.mxu1 %vm1059_vm3, %v5565_v41 }
  0xc2   : > { %5388 = vmatmul.mubr.msk.bf16.vlgmr.msra.gmra.mxu0 %vm1059_vm3, %v5938_v42 }
  0xc3   : > { %5354 = vmatmul.mubr.msk.bf16.vlgmr.msra.gmra.mxu1 %vm1059_vm3, %v5567_v43  ;;  %5454 = vmatpush3.bf16.msra.mxu0 %v3754_v27  ;;  %v5600_v43 = vld [vmem:[#allocation2 + $0x20] sm:$0xff]  }
  0xc4   : > { %5420 = vmatpush3.bf16.msra.mxu1 %v3428_v26  ;;  %5357 = vmatprep.mubr.msk.bf16.mxu1 %vm1059_vm3, %v5569_v44 }
  0xc5   : > { %5391 = vmatprep.mubr.msk.bf16.mxu0 %vm1059_vm3, %v5940_v45 }
  0xca   : > { %5392 = vmatmul.mubr.msk.bf16.gmra.mxu0 %vm1059_vm3, %v5948_v46 }
  0xcb   : > { %5358 = vmatmul.mubr.msk.bf16.gmra.mxu1 %vm1059_vm3, %v5571_v47  ;;  %5395 = vmatprep.mubr.msk.bf16.mxu0 %vm1059_vm3, %v5950_v48 }
  0xcc   : > { %5361 = vmatprep.mubr.msk.bf16.mxu1 %vm1059_vm3, %v5573_v49 }
  0xd2   : > { %5396 = vmatmul.mubr.msk.bf16.gmra.mxu0 %vm1059_vm3, %v5958_v50 }
  0xd3   : > { %5362 = vmatmul.mubr.msk.bf16.gmra.mxu1 %vm1059_vm3, %v5575_v51  ;;  %5399 = vmatprep.mubr.msk.bf16.mxu0 %vm1059_vm3, %v5960_v52 }
  0xd4   : > { %5365 = vmatprep.mubr.msk.bf16.mxu1 %vm1059_vm3, %v5577_v53 }
  0xda   : > { %5400 = vmatmul.mubr.msk.bf16.gmra.mxu0 %vm1059_vm3, %v5968_v54 }
  0xdb   : > { %5366 = vmatmul.mubr.msk.bf16.gmra.mxu1 %vm1059_vm3, %v5579_v55  ;;  %5403 = vmatprep.mubr.msk.bf16.mxu0 %vm1059_vm3, %v5970_v56 }
  0xdc   : > { %5369 = vmatprep.mubr.msk.bf16.mxu1 %vm1059_vm3, %v5581_v57  ;;  %v6086_v57 = vld [vmem:[%s7007_s4] ss:$0 sm:$0xff] }
  0xe2   : > { %v5982_v62 = vpop.f32.mrf.mxu0  ;;  %5404 = vmatmul.mubr.msk.bf16.gmra.mxu0 %vm1059_vm3, %v5978_v58 }
  0xe3   : > { %v5986_v63 = vpop.f32.mrf.mxu1  ;;  %5370 = vmatmul.mubr.msk.bf16.gmra.mxu1 %vm1059_vm3, %v5583_v59  ;;  %5407 = vmatprep.mubr.msk.bf16.mxu0 %vm1059_vm3, %v5980_v60 }
  0xe4   : > { %v5991_v0 = vpop.f32.mrf.mxu0  ;;  %5373 = vmatprep.mubr.msk.bf16.mxu1 %vm1059_vm3, %v5585_v61 }
  0xe5   : > { %v5994_v1 = vpop.f32.mrf.mxu1 }
  0xe6   : > { %v5996_v2 = vpop.f32.mrf.mxu0 }
  0xe7   : > { %v6000_v5 = vpop.f32.mrf.mxu1 }
  0xe8   : > { %v6004_v8 = vpop.f32.mrf.mxu0 }
  0xe9   : > { %v6006_v10 = vpop.f32.mrf.mxu1 }
  0xea   : > { %v6008_v11 = vpop.f32.mrf.mxu0  ;;  %5408 = vmatmul.mubr.msk.bf16.gmra.mxu0 %vm1059_vm3, %v5998_v3 }
  0xeb   : > { %v6012_v12 = vpop.f32.mrf.mxu1  ;;  %5374 = vmatmul.mubr.msk.bf16.gmra.mxu1 %vm1059_vm3, %v5587_v6  ;;  %5411 = vmatprep.mubr.msk.bf16.mxu0 %vm1059_vm3, %v6002_v7 }
  0xec   : > { %v6017_v13 = vpop.f32.mrf.mxu0  ;;  %5377 = vmatprep.mubr.msk.bf16.mxu1 %vm1059_vm3, %v5589_v9 }
  0xed   : > { %v6020_v14 = vpop.f32.mrf.mxu1 }
  0xee   : > { %v6022_v15 = vpop.f32.mrf.mxu0 }
  0xef   : > { %v6026_v17 = vpop.f32.mrf.mxu1 }
  0xf0   : > { %v6030_v20 = vpop.f32.mrf.mxu0 }
  0xf1   : > { %v6032_v22 = vpop.f32.mrf.mxu1 }
  0xf2   : > { %v6034_v23 = vpop.f32.mrf.mxu0  ;;  %5412 = vmatmul.mubr.msk.bf16.gmra.mxu0 %vm1059_vm3, %v6024_v16 }
  0xf3   : > { %v6038_v24 = vpop.f32.mrf.mxu1  ;;  %5378 = vmatmul.mubr.msk.bf16.gmra.mxu1 %vm1059_vm3, %v5591_v18  ;;  %5415 = vmatprep.mubr.msk.bf16.mxu0 %vm1059_vm3, %v6028_v19  ;;  %v5601_v18 = vld [vmem:[#allocation2 + $0x28] sm:$0xff]  }
  0xf4   : > { %v6043_v25 = vpop.f32.mrf.mxu0  ;;  %5381 = vmatprep.mubr.msk.bf16.mxu1 %vm1059_vm3, %v5593_v21  ;;  %v5602_v21 = vld [vmem:[#allocation2 + $0x30] sm:$0xff]  }
  0xf5   : > { %v6046_v26 = vpop.f32.mrf.mxu1 }
  0xf6   : > { %v6048_v27 = vpop.f32.mrf.mxu0 }
  0xf7   : > { %v6050_v29 = vpop.f32.mrf.mxu1 }
  0xf8   : > { %v6052_v31 = vpop.f32.mrf.mxu0 }
  0xf9   : > { %v6054_v33 = vpop.f32.mrf.mxu1 }
  0xfa   : > { %v6056_v34 = vpop.f32.mrf.mxu0  ;;  %5416 = vmatmul.mubr.msk.bf16.gmra.mxu0 %vm1059_vm3, %v5596_v28 }
  0xfb   : > { %v6059_v35 = vpop.f32.mrf.mxu1  ;;  %5382 = vmatmul.mubr.msk.bf16.gmra.mxu1 %vm1059_vm3, %v5595_v4  ;;  %5455 = vmatprep.mubr.msk.bf16.mxu0 %vm1059_vm3, %v5598_v30 }
  0xfc   : > { %v6063_v36 = vpop.f32.mrf.mxu0  ;;  %5421 = vmatprep.mubr.msk.bf16.mxu1 %vm1059_vm3, %v5597_v32 }
  0xfd   : > { %v6066_v37 = vpop.f32.mrf.mxu1 }
  0xfe   : > { %v6068_v38 = vpop.f32.mrf.mxu0 }
  0xff   : > { %v6070_v41 = vpop.f32.mrf.mxu1 }
 0x100   : > { %v6072_v44 = vpop.f32.mrf.mxu0 }
 0x101   : > { %v6074_v47 = vpop.f32.mrf.mxu1 }
 0x102   : > { %v5253_v49 = vpop.f32.mrf.mxu0  ;;  %5456 = vmatmul.mubr.msk.bf16.vlgmr.msra.gmra.mxu0 %vm1059_vm3, %v5599_v39 }
 0x103   : > { %v5219_v51 = vpop.f32.mrf.mxu1  ;;  %5422 = vmatmul.mubr.msk.bf16.vlgmr.msra.gmra.mxu1 %vm1059_vm3, %v5931_v40  ;;  %5459 = vmatprep.mubr.msk.bf16.mxu0 %vm1059_vm3, %v5600_v43 }
 0x104   : > { %v1330_v53 = vadd.f32 %v5219_v51, %v5982_v62  ;;  %v1647_v55 = vpop.f32.mrf.mxu0  ;;  %5425 = vmatprep.mubr.msk.bf16.mxu1 %vm1059_vm3, %v5938_v42 }
 0x105   : > { %v1321_v59 = vpop.f32.mrf.mxu1 }
 0x106   : > { %v1776_v61 = vadd.f32 %v5253_v49, %v1330_v53  ;;  %v1322_v6 = vadd.f32 %v1321_v59, %v5991_v0  ;;  %v5254_v9 = vpop.f32.mrf.mxu0 }
 0x107   : > { %v5220_v40 = vpop.f32.mrf.mxu1 }
 0x108   : > { %v1815_v62 = vadd.f32 %v6086_v57, %v1776_v61  ;;  %v1774_v28 = vadd.f32 %v1647_v55, %v1322_v6  ;;  %v1333_v4 = vadd.f32 %v5220_v40, %v5996_v2  ;;  %v1650_v42 = vpop.f32.mrf.mxu0  ;;  %v5604_v40 = vld [vmem:[#allocation2 + $0x40] sm:$0xff]  }
 0x109   : > { %v1324_v30 = vpop.f32.mrf.mxu1 }
 0x10a   : > { %1848 = vst.msk [vmem:[#allocation3 + $0x10] sm:$0xff] %vm1845_vm4, %v1815_v62  ;;  %v1813_v32 = vadd.f32 %v6086_v57, %v1774_v28  ;;  %v1777_v39 = vadd.f32 %v5254_v9, %v1333_v4  ;;  %v1325_v43 = vadd.f32 %v1324_v30, %v6004_v8  ;;  %v5257_v0 = vpop.f32.mrf.mxu0  ;;  %5460 = vmatmul.mubr.msk.bf16.gmra.mxu0 %vm1059_vm3, %v5601_v18  ;;  %v5603_v9 = vld [vmem:[#allocation2 + $0x38] sm:$0xff]  }
 0x10b   : > { %v5223_v49 = vpop.f32.mrf.mxu1  ;;  %5426 = vmatmul.mubr.msk.bf16.gmra.mxu1 %vm1059_vm3, %v5940_v45  ;;  %5463 = vmatprep.mubr.msk.bf16.mxu0 %vm1059_vm3, %v5602_v21 }
 0x10c   : > { %1846 = vst.msk [vmem:[#allocation3] sm:$0xff] %vm1845_vm4, %v1813_v32  ;;  %v1816_v2 = vadd.f32 %v6086_v57, %v1777_v39  ;;  %v1775_v51 = vadd.f32 %v1650_v42, %v1325_v43  ;;  %v1346_v53 = vadd.f32 %v5223_v49, %v6008_v11  ;;  %v1663_v55 = vpop.f32.mrf.mxu0  ;;  %5429 = vmatprep.mubr.msk.bf16.mxu1 %vm1059_vm3, %v5948_v46 }
 0x10d   : > { %v1337_v8 = vpop.f32.mrf.mxu1 }
 0x10e   : > { %1849 = vst.msk [vmem:[#allocation3 + $0x18] sm:$0xff] %vm1845_vm4, %v1816_v2  ;;  %v1814_v59 = vadd.f32 %v6086_v57, %v1775_v51  ;;  %v1780_v61 = vadd.f32 %v5257_v0, %v1346_v53  ;;  %v1338_v45 = vadd.f32 %v1337_v8, %v6017_v13  ;;  %v5258_v6 = vpop.f32.mrf.mxu0  ;;  %v5605_v53 = vld [vmem:[#allocation2 + $0x48] sm:$0xff]   ;;  %v5606_v8 = vld [vmem:[#allocation2 + $0x50] sm:$0xff]  }
 0x10f   : > { %v5224_v18 = vpop.f32.mrf.mxu1 }
 0x110   : > { %1847 = vst.msk [vmem:[#allocation3 + $0x8] sm:$0xff] %vm1845_vm4, %v1814_v59  ;;  %v1819_v11 = vadd.f32 %v6086_v57, %v1780_v61  ;;  %v1778_v21 = vadd.f32 %v1663_v55, %v1338_v45  ;;  %v1349_v62 = vadd.f32 %v5224_v18, %v6022_v15  ;;  %v1666_v46 = vpop.f32.mrf.mxu0 }
 0x111   : > { %v1340_v28 = vpop.f32.mrf.mxu1 }
 0x112   : > { %1852 = vst.msk [vmem:[#allocation3 + $0x30] sm:$0xff] %vm1845_vm4, %v1819_v11  ;;  %v1817_v4 = vadd.f32 %v6086_v57, %v1778_v21  ;;  %v1781_v42 = vadd.f32 %v5258_v6, %v1349_v62  ;;  %v1341_v13 = vadd.f32 %v1340_v28, %v6030_v20  ;;  %v5261_v30 = vpop.f32.mrf.mxu0  ;;  %5464 = vmatmul.mubr.msk.bf16.gmra.mxu0 %vm1059_vm3, %v5603_v9 }
 0x113   : > { %v5227_v32 = vpop.f32.mrf.mxu1  ;;  %5430 = vmatmul.mubr.msk.bf16.gmra.mxu1 %vm1059_vm3, %v5950_v48  ;;  %5467 = vmatprep.mubr.msk.bf16.mxu0 %vm1059_vm3, %v5604_v40 }
 0x114   : > { %1850 = vst.msk [vmem:[#allocation3 + $0x20] sm:$0xff] %vm1845_vm4, %v1817_v4  ;;  %v1820_v15 = vadd.f32 %v6086_v57, %v1781_v42  ;;  %v1779_v39 = vadd.f32 %v1666_v46, %v1341_v13  ;;  %v1362_v43 = vadd.f32 %v5227_v32, %v6034_v23  ;;  %v1679_v0 = vpop.f32.mrf.mxu0  ;;  %5433 = vmatprep.mubr.msk.bf16.mxu1 %vm1059_vm3, %v5958_v50  ;;  %v5607_v42 = vld [vmem:[#allocation2 + $0x58] sm:$0xff]  }
 0x115   : > { %v1353_v20 = vpop.f32.mrf.mxu1 }
 0x116   : > { %1853 = vst.msk [vmem:[#allocation3 + $0x38] sm:$0xff] %vm1845_vm4, %v1820_v15  ;;  %v1818_v49 = vadd.f32 %v6086_v57, %v1779_v39  ;;  %v1784_v2 = vadd.f32 %v5261_v30, %v1362_v43  ;;  %v1354_v48 = vadd.f32 %v1353_v20, %v6043_v25  ;;  %v5262_v51 = vpop.f32.mrf.mxu0  ;;  %v5608_v30 = vld [vmem:[#allocation2 + $0x60] sm:$0xff]  }
 0x117   : > { %v5228_v55 = vpop.f32.mrf.mxu1 }
 0x118   : > { %1851 = vst.msk [vmem:[#allocation3 + $0x28] sm:$0xff] %vm1845_vm4, %v1818_v49  ;;  %v1823_v23 = vadd.f32 %v6086_v57, %v1784_v2  ;;  %v1782_v59 = vadd.f32 %v1679_v0, %v1354_v48  ;;  %v1365_v61 = vadd.f32 %v5228_v55, %v6048_v27  ;;  %v1682_v50 = vpop.f32.mrf.mxu0 }
 0x119   : > { %v1356_v45 = vpop.f32.mrf.mxu1 }
 0x11a   : > { %1856 = vst.msk [vmem:[#allocation3 + $0x50] sm:$0xff] %vm1845_vm4, %v1823_v23  ;;  %v1821_v6 = vadd.f32 %v6086_v57, %v1782_v59  ;;  %v1785_v9 = vadd.f32 %v5262_v51, %v1365_v61  ;;  %v1357_v25 = vadd.f32 %v1356_v45, %v6052_v31  ;;  %v5265_v18 = vpop.f32.mrf.mxu0  ;;  %5468 = vmatmul.mubr.msk.bf16.gmra.mxu0 %vm1059_vm3, %v5605_v53  ;;  %v5609_v23 = vld [vmem:[#allocation2 + $0x68] sm:$0xff]   ;;  %v5610_v61 = vld [vmem:[#allocation2 + $0x70] sm:$0xff]  }
 0x11b   : > { %v5231_v40 = vpop.f32.mrf.mxu1  ;;  %5434 = vmatmul.mubr.msk.bf16.gmra.mxu1 %vm1059_vm3, %v5960_v52  ;;  %5471 = vmatprep.mubr.msk.bf16.mxu0 %vm1059_vm3, %v5606_v8 }
 0x11c   : > { %1854 = vst.msk [vmem:[#allocation3 + $0x40] sm:$0xff] %vm1845_vm4, %v1821_v6  ;;  %v1824_v27 = vadd.f32 %v6086_v57, %v1785_v9  ;;  %v1783_v11 = vadd.f32 %v1682_v50, %v1357_v25  ;;  %v1378_v21 = vadd.f32 %v5231_v40, %v6056_v34  ;;  %v1695_v62 = vpop.f32.mrf.mxu0  ;;  %5437 = vmatprep.mubr.msk.bf16.mxu1 %vm1059_vm3, %v5968_v54 }
 0x11d   : > { %v1369_v31 = vpop.f32.mrf.mxu1 }
 0x11e   : > { %1857 = vst.msk [vmem:[#allocation3 + $0x58] sm:$0xff] %vm1845_vm4, %v1824_v27  ;;  %v1822_v46 = vadd.f32 %v6086_v57, %v1783_v11  ;;  %v1788_v28 = vadd.f32 %v5265_v18, %v1378_v21  ;;  %v1370_v52 = vadd.f32 %v1369_v31, %v6063_v36  ;;  %v5266_v4 = vpop.f32.mrf.mxu0 }
 0x11f   : > { %v5232_v13 = vpop.f32.mrf.mxu1 }
 0x120   : > { %1855 = vst.msk [vmem:[#allocation3 + $0x48] sm:$0xff] %vm1845_vm4, %v1822_v46  ;;  %v1827_v34 = vadd.f32 %v6086_v57, %v1788_v28  ;;  %v1786_v32 = vadd.f32 %v1695_v62, %v1370_v52  ;;  %v1381_v15 = vadd.f32 %v5232_v13, %v6068_v38  ;;  %v1698_v54 = vpop.f32.mrf.mxu0  ;;  %v5611_v28 = vld [vmem:[#allocation2 + $0x78] sm:$0xff]  }
 0x121   : > { %v1372_v39 = vpop.f32.mrf.mxu1 }
 0x122   : > { %1860 = vst.msk [vmem:[#allocation3 + $0x70] sm:$0xff] %vm1845_vm4, %v1827_v34  ;;  %v1825_v43 = vadd.f32 %v6086_v57, %v1786_v32  ;;  %v1789_v0 = vadd.f32 %v5266_v4, %v1381_v15  ;;  %v1373_v36 = vadd.f32 %v1372_v39, %v6072_v44  ;;  %v5269_v20 = vpop.f32.mrf.mxu0  ;;  %5472 = vmatmul.mubr.msk.bf16.gmra.mxu0 %vm1059_vm3, %v5607_v42  ;;  %v5612_v4 = vld [vmem:[#allocation2 + $0x80] sm:$0xff]  }
 0x123   : > { %v5235_v49 = vpop.f32.mrf.mxu1  ;;  %5438 = vmatmul.mubr.msk.bf16.gmra.mxu1 %vm1059_vm3, %v5970_v56  ;;  %5475 = vmatprep.mubr.msk.bf16.mxu0 %vm1059_vm3, %v5608_v30 }
 0x124   : > { %1858 = vst.msk [vmem:[#allocation3 + $0x60] sm:$0xff] %vm1845_vm4, %v1825_v43  ;;  %v1828_v38 = vadd.f32 %v6086_v57, %v1789_v0  ;;  %v1787_v2 = vadd.f32 %v1698_v54, %v1373_v36  ;;  %v1394_v48 = vadd.f32 %v5235_v49, %v5986_v63  ;;  %v1711_v51 = vpop.f32.mrf.mxu0  ;;  %5441 = vmatprep.mubr.msk.bf16.mxu1 %vm1059_vm3, %v5978_v58 }
 0x125   : > { %v1385_v44 = vpop.f32.mrf.mxu1 }
 0x126   : > { %1861 = vst.msk [vmem:[#allocation3 + $0x78] sm:$0xff] %vm1845_vm4, %v1828_v38  ;;  %v1826_v53 = vadd.f32 %v6086_v57, %v1787_v2  ;;  %v1792_v55 = vadd.f32 %v5269_v20, %v1394_v48  ;;  %v1386_v56 = vadd.f32 %v1385_v44, %v5994_v1  ;;  %v5270_v8 = vpop.f32.mrf.mxu0  ;;  %v5613_v38 = vld [vmem:[#allocation2 + $0x88] sm:$0xff]  }
 0x127   : > { %v5236_v59 = vpop.f32.mrf.mxu1 }
 0x128   : > { %1859 = vst.msk [vmem:[#allocation3 + $0x68] sm:$0xff] %vm1845_vm4, %v1826_v53  ;;  %v1831_v63 = vadd.f32 %v6086_v57, %v1792_v55  ;;  %v1790_v50 = vadd.f32 %v1711_v51, %v1386_v56  ;;  %v1397_v45 = vadd.f32 %v5236_v59, %v6000_v5  ;;  %v1714_v58 = vpop.f32.mrf.mxu0 }
 0x129   : > { %v1388_v6 = vpop.f32.mrf.mxu1 }
 0x12a   : > { %1864 = vst.msk [vmem:[#allocation3 + $0x90] sm:$0xff] %vm1845_vm4, %v1831_v63  ;;  %v1829_v9 = vadd.f32 %v6086_v57, %v1790_v50  ;;  %v1793_v25 = vadd.f32 %v5270_v8, %v1397_v45  ;;  %v1389_v1 = vadd.f32 %v1388_v6, %v6006_v10  ;;  %v5273_v18 = vpop.f32.mrf.mxu0  ;;  %5476 = vmatmul.mubr.msk.bf16.gmra.mxu0 %vm1059_vm3, %v5609_v23 }
 0x12b   : > { %v5239_v40 = vpop.f32.mrf.mxu1  ;;  %5442 = vmatmul.mubr.msk.bf16.gmra.mxu1 %vm1059_vm3, %v5980_v60  ;;  %5479 = vmatprep.mubr.msk.bf16.mxu0 %vm1059_vm3, %v5610_v61 }
 0x12c   : > { %1862 = vst.msk [vmem:[#allocation3 + $0x80] sm:$0xff] %vm1845_vm4, %v1829_v9  ;;  %v1832_v5 = vadd.f32 %v6086_v57, %v1793_v25  ;;  %v1791_v27 = vadd.f32 %v1714_v58, %v1389_v1  ;;  %v1410_v11 = vadd.f32 %v5239_v40, %v6012_v12  ;;  %v1727_v21 = vpop.f32.mrf.mxu0  ;;  %5445 = vmatprep.mubr.msk.bf16.mxu1 %vm1059_vm3, %v5998_v3 }
 0x12d   : > { %v1401_v10 = vpop.f32.mrf.mxu1 }
 0x12e   : > { %1865 = vst.msk [vmem:[#allocation3 + $0x98] sm:$0xff] %vm1845_vm4, %v1832_v5  ;;  %v1830_v62 = vadd.f32 %v6086_v57, %v1791_v27  ;;  %v1796_v31 = vadd.f32 %v5273_v18, %v1410_v11  ;;  %v1402_v60 = vadd.f32 %v1401_v10, %v6020_v14  ;;  %v5274_v46 = vpop.f32.mrf.mxu0 }
 0x12f   : > { %v5240_v52 = vpop.f32.mrf.mxu1 }
 0x130   : > { %1863 = vst.msk [vmem:[#allocation3 + $0x88] sm:$0xff] %vm1845_vm4, %v1830_v62  ;;  %v1835_v12 = vadd.f32 %v6086_v57, %v1796_v31  ;;  %v1794_v42 = vadd.f32 %v1727_v21, %v1402_v60  ;;  %v1413_v13 = vadd.f32 %v5240_v52, %v6026_v17  ;;  %v1730_v3 = vpop.f32.mrf.mxu0 }
 0x131   : > { %v1404_v30 = vpop.f32.mrf.mxu1 }
 0x132   : > { %1868 = vst.msk [vmem:[#allocation3 + $0xb0] sm:$0xff] %vm1845_vm4, %v1835_v12  ;;  %v1833_v34 = vadd.f32 %v6086_v57, %v1794_v42  ;;  %v1797_v32 = vadd.f32 %v5274_v46, %v1413_v13  ;;  %v1405_v14 = vadd.f32 %v1404_v30, %v6032_v22  ;;  %v5277_v15 = vpop.f32.mrf.mxu0  ;;  %5480 = vmatmul.mubr.msk.bf16.gmra.mxu0 %vm1059_vm3, %v5611_v28 }
 0x133   : > { %v5243_v54 = vpop.f32.mrf.mxu1  ;;  %5446 = vmatmul.mubr.msk.bf16.gmra.mxu1 %vm1059_vm3, %v6002_v7  ;;  %5483 = vmatprep.mubr.msk.bf16.mxu0 %vm1059_vm3, %v5612_v4 }
 0x134   : > { %1866 = vst.msk [vmem:[#allocation3 + $0xa0] sm:$0xff] %vm1845_vm4, %v1833_v34  ;;  %v1836_v17 = vadd.f32 %v6086_v57, %v1797_v32  ;;  %v1795_v39 = vadd.f32 %v1730_v3, %v1405_v14  ;;  %v1426_v43 = vadd.f32 %v5243_v54, %v6038_v24  ;;  %v1743_v0 = vpop.f32.mrf.mxu0  ;;  %5449 = vmatprep.mubr.msk.bf16.mxu1 %vm1059_vm3, %v6024_v16 }
 0x135   : > { %v1417_v22 = vpop.f32.mrf.mxu1 }
 0x136   : > { %1869 = vst.msk [vmem:[#allocation3 + $0xb8] sm:$0xff] %vm1845_vm4, %v1836_v17  ;;  %v1834_v36 = vadd.f32 %v6086_v57, %v1795_v39  ;;  %v1800_v20 = vadd.f32 %v5277_v15, %v1426_v43  ;;  %v1418_v7 = vadd.f32 %v1417_v22, %v6046_v26  ;;  %v5278_v49 = vpop.f32.mrf.mxu0 }
 0x137   : > { %v5244_v2 = vpop.f32.mrf.mxu1 }
 0x138   : > { %1867 = vst.msk [vmem:[#allocation3 + $0xa8] sm:$0xff] %vm1845_vm4, %v1834_v36  ;;  %v1839_v48 = vadd.f32 %v6086_v57, %v1800_v20  ;;  %v1798_v24 = vadd.f32 %v1743_v0, %v1418_v7  ;;  %v1429_v51 = vadd.f32 %v5244_v2, %v6050_v29  ;;  %v1746_v44 = vpop.f32.mrf.mxu0 }
 0x139   : > { %v1420_v16 = vpop.f32.mrf.mxu1 }
 0x13a   : > { %1872 = vst.msk [vmem:[#allocation3 + $0xd0] sm:$0xff] %vm1845_vm4, %v1839_v48  ;;  %v1837_v53 = vadd.f32 %v6086_v57, %v1798_v24  ;;  %v1801_v55 = vadd.f32 %v5278_v49, %v1429_v51  ;;  %v1421_v56 = vadd.f32 %v1420_v16, %v6054_v33  ;;  %v5281_v26 = vpop.f32.mrf.mxu0  ;;  %5484 = vmatmul.mubr.msk.bf16.gmra.mxu0 %vm1059_vm3, %v5613_v38 }
 0x13b   : > { %v5247_v8 = vpop.f32.mrf.mxu1  ;;  %5450 = vmatmul.mubr.msk.bf16.gmra.mxu1 %vm1059_vm3, %v6028_v19 }
 0x13c   : > { %1870 = vst.msk [vmem:[#allocation3 + $0xc0] sm:$0xff] %vm1845_vm4, %v1837_v53  ;;  %v1840_v29 = vadd.f32 %v6086_v57, %v1801_v55  ;;  %v1799_v23 = vadd.f32 %v1746_v44, %v1421_v56  ;;  %v1442_v59 = vadd.f32 %v5247_v8, %v6059_v35  ;;  %v1759_v61 = vpop.f32.mrf.mxu0 }
 0x13d   : > { %v1433_v63 = vpop.f32.mrf.mxu1 }
 0x13e   : > { %1873 = vst.msk [vmem:[#allocation3 + $0xd8] sm:$0xff] %vm1845_vm4, %v1840_v29  ;;  %v1838_v33 = vadd.f32 %v6086_v57, %v1799_v23  ;;  %v1804_v50 = vadd.f32 %v5281_v26, %v1442_v59  ;;  %v1434_v45 = vadd.f32 %v1433_v63, %v6066_v37  ;;  %v5282_v58 = vpop.f32.mrf.mxu0 }
 0x13f   : > { %v5248_v6 = vpop.f32.mrf.mxu1 }
 0x140   : > { %1871 = vst.msk [vmem:[#allocation3 + $0xc8] sm:$0xff] %vm1845_vm4, %v1838_v33  ;;  %v1843_v19 = vadd.f32 %v6086_v57, %v1804_v50  ;;  %v1802_v9 = vadd.f32 %v1759_v61, %v1434_v45  ;;  %v1445_v25 = vadd.f32 %v5248_v6, %v6070_v41  ;;  %v1762_v1 = vpop.f32.mrf.mxu0 }
 0x141   : > { %v1436_v35 = vpop.f32.mrf.mxu1 }
 0x142   : > { %1876 = vst.msk [vmem:[#allocation3 + $0xf0] sm:$0xff] %vm1845_vm4, %v1843_v19  ;;  %v1841_v18 = vadd.f32 %v6086_v57, %v1802_v9  ;;  %v1805_v40 = vadd.f32 %v5282_v58, %v1445_v25  ;;  %v1437_v5 = vadd.f32 %v1436_v35, %v6074_v47  ;;  %v5321_v27 = vpop.f32.mrf.mxu0 }
 0x143   : > { %v5287_v37 = vpop.f32.mrf.mxu1 }
 0x144   : > { %1874 = vst.msk [vmem:[#allocation3 + $0xe0] sm:$0xff] %vm1845_vm4, %v1841_v18  ;;  %v1844_v11 = vadd.f32 %v6086_v57, %v1805_v40  ;;  %v1803_v21 = vadd.f32 %v1762_v1, %v1437_v5  ;;  %v6219_v10 = vadd.f32 %v5321_v27, %v5287_v37  ;;  %v6221_v62 = vpop.f32.mrf.mxu0 }
 0x145   : > { %v6223_v41 = vpop.f32.mrf.mxu1 }
 0x146   : > { %1877 = vst.msk [vmem:[#allocation3 + $0xf8] sm:$0xff] %vm1845_vm4, %v1844_v11  ;;  %v1842_v31 = vadd.f32 %v6086_v57, %v1803_v21  ;;  %v6227_v60 = vpop.f32.mrf.mxu0 }
 0x147   : > { %v6229_v47 = vpop.f32.mrf.mxu1 }
 0x148   : > { %1875 = vst.msk [vmem:[#allocation3 + $0xe8] sm:$0xff] %vm1845_vm4, %v1842_v31  ;;  %v6232_v46 = vpop.f32.mrf.mxu0 }
 0x149   : > { %v6234_v28 = vpop.f32.mrf.mxu1 }
 0x14a   : > { %v5325_v52 = vpop.f32.mrf.mxu0 }
 0x14b   : > { %v5291_v4 = vpop.f32.mrf.mxu1 }
 0x14c   : > { %v6236_v12 = vadd.f32 %v5325_v52, %v5291_v4  ;;  %v6238_v42 = vpop.f32.mrf.mxu0  ;;  %v524_v4 = vlaneseq }
 0x14d   : > { %v6240_v13 = vpop.f32.mrf.mxu1 }
 0x14e   : > { %v6242_v3 = vpop.f32.mrf.mxu0 }
 0x14f   : > { %v6244_v57 = vpop.f32.mrf.mxu1 }
 0x150   : > { %v6246_v30 = vpop.f32.mrf.mxu0 }
 0x151   : > { %v6248_v34 = vpop.f32.mrf.mxu1 }
 0x152   : > { %v5329_v32 = vpop.f32.mrf.mxu0 }
 0x153   : > { %v5295_v14 = vpop.f32.mrf.mxu1 }
 0x154   : > { %v6250_v15 = vadd.f32 %v5329_v32, %v5295_v14  ;;  %v6252_v54 = vpop.f32.mrf.mxu0 }
 0x155   : > { %v6254_v17 = vpop.f32.mrf.mxu1 }
 0x156   : > { %v6256_v39 = vpop.f32.mrf.mxu0 }
 0x157   : > { %v6258_v43 = vpop.f32.mrf.mxu1 }
 0x158   : > { %v6260_v0 = vpop.f32.mrf.mxu0 }
 0x159   : > { %v6262_v22 = vpop.f32.mrf.mxu1 }
 0x15a   : > { %v5333_v36 = vpop.f32.mrf.mxu0 }
 0x15b   : > { %v5299_v20 = vpop.f32.mrf.mxu1 }
 0x15c   : > { %v6264_v7 = vadd.f32 %v5333_v36, %v5299_v20  ;;  %v6266_v49 = vpop.f32.mrf.mxu0 }
 0x15d   : > { %v6268_v38 = vpop.f32.mrf.mxu1 }
 0x15e   : > { %v6270_v2 = vpop.f32.mrf.mxu0 }
 0x15f   : > { %v6272_v48 = vpop.f32.mrf.mxu1 }
 0x160   : > { %v6274_v24 = vpop.f32.mrf.mxu0 }
 0x161   : > { %v6276_v51 = vpop.f32.mrf.mxu1 }
 0x162   : > { %v5337_v44 = vpop.f32.mrf.mxu0 }
 0x163   : > { %v5303_v16 = vpop.f32.mrf.mxu1 }
 0x164   : > { %v6278_v53 = vadd.f32 %v5337_v44, %v5303_v16  ;;  %v6280_v55 = vpop.f32.mrf.mxu0  ;;  %v6332_v44 = vshrl.u32 %v524_v4, 7 }
 0x165   : > { %v6282_v56 = vpop.f32.mrf.mxu1 }
 0x166   : > { %v6284_v26 = vpop.f32.mrf.mxu0 }
 0x167   : > { %v6286_v8 = vpop.f32.mrf.mxu1 }
 0x168   : > { %v6288_v29 = vpop.f32.mrf.mxu0 }
 0x169   : > { %v6290_v23 = vpop.f32.mrf.mxu1 }
 0x16a   : > { %v5341_v59 = vpop.f32.mrf.mxu0 }
 0x16b   : > { %v5307_v61 = vpop.f32.mrf.mxu1 }
 0x16c   : > { %v6292_v63 = vadd.f32 %v5341_v59, %v5307_v61  ;;  %v6294_v33 = vpop.f32.mrf.mxu0 }
 0x16d   : > { %v6296_v50 = vpop.f32.mrf.mxu1 }
 0x16e   : > { %v6298_v45 = vpop.f32.mrf.mxu0 }
 0x16f   : > { %v6300_v58 = vpop.f32.mrf.mxu1 }
 0x170   : > { %v6302_v6 = vpop.f32.mrf.mxu0 }
 0x171   : > { %v6304_v19 = vpop.f32.mrf.mxu1 }
 0x172   : > { %v5345_v9 = vpop.f32.mrf.mxu0 }
 0x173   : > { %v5311_v25 = vpop.f32.mrf.mxu1 }
 0x174   : > { %v6306_v1 = vadd.f32 %v5345_v9, %v5311_v25  ;;  %v6308_v35 = vpop.f32.mrf.mxu0  ;;  %v527_v9 = vadd.s32 16, %v6332_v44  ;;  %v2253_v25 = vadd.f32 %v6221_v62, %v6223_v41  ;;  %v2256_v62 = vadd.f32 %v6232_v46, %v6234_v28 }
 0x175   : > { %v6310_v18 = vpop.f32.mrf.mxu1 }
 0x176   : > { %v6312_v40 = vpop.f32.mrf.mxu0 }
 0x177   : > { %v6314_v5 = vpop.f32.mrf.mxu1 }
 0x178   : > { %v6316_v27 = vpop.f32.mrf.mxu0 }
 0x179   : > { %7009 = vst [vmem:[#allocation4_spill] sm:$0xff] %v6316_v27  ;;  %v6318_v37 = vpop.f32.mrf.mxu1 }
 0x17a   : > { %v5349_v11 = vpop.f32.mrf.mxu0 }
 0x17b   : > { %v5315_v21 = vpop.f32.mrf.mxu1 }
 0x17c   : > { %v6320_v31 = vadd.f32 %v5349_v11, %v5315_v21  ;;  %v6322_v52 = vpop.f32.mrf.mxu0  ;;  %v561_v11 = vand.u32 15, %v6332_v44 }
 0x17d   : > { %7011 = vst [vmem:[#allocation6_spill] sm:$0xff] %v6322_v52  ;;  %v6324_v32 = vpop.f32.mrf.mxu1  ;;  %v529_v52 = vadd.s32 32, %v6332_v44 }
 0x17e   : > { %7010 = vst [vmem:[#allocation5_spill] sm:$0xff] %v6320_v31  ;;  %7012 = vst [vmem:[#allocation7_spill] sm:$0xff] %v6324_v32  ;;  %v6326_v14 = vpop.f32.mrf.mxu0  ;;  %vm6352_vm5 = vcmp.ne.s32.totalorder %v561_v11, 0  ;;  %v2269_v11 = vadd.f32 %v6238_v42, %v6240_v13 }
 0x17f   : > { %7013 = vst [vmem:[#allocation8_spill] sm:$0xff] %v6326_v14  ;;  %v6328_v36 = vpop.f32.mrf.mxu1 }
 0x180   : > { %7014 = vst [vmem:[#allocation9_spill] sm:$0xff] %v6328_v36  ;;  %v6330_v20 = vpop.f32.mrf.mxu0  ;;  %v575_v36 = vand.u32 15, %v527_v9 }
 0x181   : > { %7015 = vst [vmem:[#allocation10_spill] sm:$0xff] %v6330_v20  ;;  %v6334_v16 = vpop.f32.mrf.mxu1  ;;  %v2264_v20 = vadd.f32 %v6227_v60, %v6229_v47 }
 0x182   : > { %7016 = vst [vmem:[#allocation11_spill] sm:$0xff] %v6334_v16  ;;  %v6336_v59 = vpop.f32.mrf.mxu0  ;;  %vm6363_vm6 = vcmp.ne.s32.totalorder %v575_v36, 0  ;;  %v2280_v36 = vadd.f32 %v6242_v3, %v6244_v57 }
 0x183   : > { %7017 = vst [vmem:[#allocation12_spill] sm:$0xff] %v6336_v59  ;;  %v5355_v61 = vpop.f32.mrf.mxu1 }
 0x184   : > { %v6342_v21 = vpop.f32.mrf.mxu0  ;;  %v2707_v4 = vadd.f32 %v5355_v61, %v6219_v10 }
 0x185   : > { %7018 = vst [vmem:[#allocation13_spill] sm:$0xff] %v6342_v21  ;;  %v2578_v31 = vpop.f32.mrf.mxu1 }
 0x186   : > { %v2705_v14 = vadd.f32 %v2578_v31, %v2253_v25  ;;  %v6347_v16 = vpop.f32.mrf.mxu0  ;;  %v2836_v10 = vrot.slane %v2707_v4, 7  ;;  %v2737_v25 = vld [vmem:[#allocation3] sm:$0xff] }
 0x187   : > { %7019 = vst [vmem:[#allocation14_spill] sm:$0xff] %v6347_v16  ;;  %v5356_v59 = vpop.f32.mrf.mxu1 }
 0x188   : > { %v2833_v21 = vrot.slane %v2705_v14, 7  ;;  %v2708_v32 = vadd.f32 %v5356_v59, %v2264_v20  ;;  %v6356_v27 = vpop.f32.mrf.mxu0  ;;  %v589_v20 = vand.u32 15, %v529_v52  ;;  %v531_v59 = vadd.s32 48, %v6332_v44  ;;  %v2738_v52 = vld [vmem:[#allocation3 + $0x8] sm:$0xff] }
 0x189   : > { %7022 = vst [vmem:[#allocation15_spill] sm:$0xff] %v6356_v27  ;;  %v2581_v60 = vpop.f32.mrf.mxu1  ;;  %v533_v27 = vadd.s32 64, %v6332_v44 }
 0x18a   : > { %v2928_v47 = vsel %vm1108_vm0, 0.0, %v2833_v21  ;;  %v2838_v31 = vrot.slane %v2708_v32, 7  ;;  %v2706_v61 = vadd.f32 %v2581_v60, %v2256_v62  ;;  %v6359_v9 = vpop.f32.mrf.mxu0  ;;  %v2740_v32 = vld [vmem:[#allocation3 + $0x18] sm:$0xff]  ;;  %vm6385_vm7 = vcmp.ne.s32.totalorder %v589_v20, 0 }
 0x18b   : > { %7023 = vst [vmem:[#allocation16_spill] sm:$0xff] %v6359_v9  ;;  %v2993_v46 = vsel %vm6352_vm5, %v2928_v47, 0.0  ;;  %v5359_v14 = vpop.f32.mrf.mxu1  ;;  %v617_v28 = vand.u32 15, %v533_v27  ;;  %v535_v27 = vadd.s32 80, %v6332_v44 }
 0x18c   : > { %v3025_v4 = vadd.f32 %v2993_v46, %v2737_v25  ;;  %v2839_v62 = vsel %vm1108_vm0, %v2836_v10, %v2838_v31  ;;  %v2834_v60 = vrot.slane %v2706_v61, 7  ;;  %v6371_v9 = vpop.f32.mrf.mxu0  ;;  %v2711_v13 = vadd.f32 %v5359_v14, %v6236_v12  ;;  %v2739_v46 = vld [vmem:[#allocation3 + $0x10] sm:$0xff] }
 0x18d   : > { %v3028_v41 = vadd.f32 %v2839_v62, %v2740_v32  ;;  %v2594_v47 = vpop.f32.mrf.mxu1  ;;  %vm6412_vm9 = vcmp.ne.s32.totalorder %v617_v28, 0 }
 0x18e   : > { %3057 = vst.msk [vmem:[#allocation3] sm:$0xff] %vm1845_vm4, %v3025_v4  ;;  %v2835_v16 = vsel %vm1108_vm0, %v2833_v21, %v2834_v60  ;;  %v2837_v42 = vsel %vm1108_vm0, %v2834_v60, %v2836_v10  ;;  %v2709_v25 = vadd.f32 %v2594_v47, %v2269_v11  ;;  %v6380_v61 = vpop.f32.mrf.mxu0  ;;  %v603_v21 = vand.u32 15, %v531_v59 }
 0x18f   : > { %3060 = vst.msk [vmem:[#allocation3 + $0x18] sm:$0xff] %vm1845_vm4, %v3028_v41  ;;  %v2995_v3 = vsel %vm6363_vm6, %v2837_v42, 0.0  ;;  %v3026_v57 = vadd.f32 %v2835_v16, %v2738_v52  ;;  %v5360_v4 = vpop.f32.mrf.mxu1  ;;  %v2272_v10 = vadd.f32 %v6246_v30, %v6248_v34  ;;  %v2844_v16 = vrot.slane %v2711_v13, 7  ;;  %v2741_v52 = vld [vmem:[#allocation3 + $0x20] sm:$0xff] }
 0x190   : > { %v3027_v12 = vadd.f32 %v2995_v3, %v2739_v46  ;;  %v2840_v14 = vrot.slane %v2709_v25, 7  ;;  %v2712_v11 = vadd.f32 %v5360_v4, %v2280_v36  ;;  %v6391_v62 = vpop.f32.mrf.mxu0  ;;  %vm6400_vm8 = vcmp.ne.s32.totalorder %v603_v21, 0 }
 0x191   : > { %3058 = vst.msk [vmem:[#allocation3 + $0x8] sm:$0xff] %vm1845_vm4, %v3026_v57  ;;  %v2597_v60 = vpop.f32.mrf.mxu1  ;;  %v2285_v42 = vadd.f32 %v6252_v54, %v6254_v17  ;;  %v2296_v57 = vadd.f32 %v6256_v39, %v6258_v43  ;;  %v2743_v39 = vld [vmem:[#allocation3 + $0x30] sm:$0xff]  ;;  %v2312_v21 = vadd.f32 %v6270_v2, %v6272_v48 }
 0x192   : > { %3059 = vst.msk [vmem:[#allocation3 + $0x10] sm:$0xff] %vm1845_vm4, %v3027_v12  ;;  %v2841_v20 = vsel %vm1108_vm0, %v2838_v31, %v2840_v14  ;;  %v2846_v41 = vrot.slane %v2712_v11, 7  ;;  %v2710_v47 = vadd.f32 %v2597_v60, %v2272_v10  ;;  %v6396_v59 = vpop.f32.mrf.mxu0  ;;  %v2744_v31 = vld [vmem:[#allocation3 + $0x38] sm:$0xff]  ;;  %v2742_v10 = vld [vmem:[#allocation3 + $0x28] sm:$0xff] }
 0x193   : > { %v2997_v30 = vsel %vm6385_vm7, %v2841_v20, 0.0  ;;  %v5363_v36 = vpop.f32.mrf.mxu1 }
 0x194   : > { %v3029_v13 = vadd.f32 %v2997_v30, %v2741_v52  ;;  %v2847_v25 = vsel %vm1108_vm0, %v2844_v16, %v2846_v41  ;;  %v2842_v46 = vrot.slane %v2710_v47, 7  ;;  %v6408_v3 = vpop.f32.mrf.mxu0  ;;  %v2715_v12 = vadd.f32 %v5363_v36, %v6250_v15 }
 0x195   : > { %v3032_v32 = vadd.f32 %v2847_v25, %v2744_v31  ;;  %v2610_v4 = vpop.f32.mrf.mxu1  ;;  %v631_v47 = vand.u32 15, %v535_v27  ;;  %v537_v52 = vadd.s32 96, %v6332_v44 }
 0x196   : > { %3061 = vst.msk [vmem:[#allocation3 + $0x20] sm:$0xff] %vm1845_vm4, %v3029_v13  ;;  %v2843_v54 = vsel %vm1108_vm0, %v2840_v14, %v2842_v46  ;;  %v2845_v17 = vsel %vm1108_vm0, %v2842_v46, %v2844_v16  ;;  %v2713_v11 = vadd.f32 %v2610_v4, %v2285_v42  ;;  %v6420_v60 = vpop.f32.mrf.mxu0  ;;  %v2288_v14 = vadd.f32 %v6260_v0, %v6262_v22  ;;  %v2745_v46 = vld [vmem:[#allocation3 + $0x40] sm:$0xff] }
 0x197   : > { %3064 = vst.msk [vmem:[#allocation3 + $0x38] sm:$0xff] %vm1845_vm4, %v3032_v32  ;;  %v2999_v43 = vsel %vm6400_vm8, %v2845_v17, 0.0  ;;  %v3030_v28 = vadd.f32 %v2843_v54, %v2742_v10  ;;  %v5364_v20 = vpop.f32.mrf.mxu1  ;;  %v2852_v34 = vrot.slane %v2715_v12, 7  ;;  %vm6437_vm10 = vcmp.ne.s32.totalorder %v631_v47, 0  ;;  %v2748_v54 = vld [vmem:[#allocation3 + $0x58] sm:$0xff] }
 0x198   : > { %v3031_v16 = vadd.f32 %v2999_v43, %v2743_v39  ;;  %v2848_v30 = vrot.slane %v2713_v11, 7  ;;  %v2716_v15 = vadd.f32 %v5364_v20, %v2296_v57  ;;  %v6428_v36 = vpop.f32.mrf.mxu0  ;;  %v645_v32 = vand.u32 15, %v537_v52  ;;  %v2746_v20 = vld [vmem:[#allocation3 + $0x48] sm:$0xff] }
 0x199   : > { %3062 = vst.msk [vmem:[#allocation3 + $0x28] sm:$0xff] %vm1845_vm4, %v3030_v28  ;;  %v2613_v42 = vpop.f32.mrf.mxu1  ;;  %v539_v4 = vadd.s32 112, %v6332_v44  ;;  %v2301_v10 = vadd.f32 %v6266_v49, %v6268_v38  ;;  %v541_v28 = vadd.s32 128, %v6332_v44 }
 0x19a   : > { %3063 = vst.msk [vmem:[#allocation3 + $0x30] sm:$0xff] %vm1845_vm4, %v3031_v16  ;;  %v2849_v13 = vsel %vm1108_vm0, %v2846_v41, %v2848_v30  ;;  %v2854_v31 = vrot.slane %v2716_v15, 7  ;;  %v2714_v27 = vadd.f32 %v2613_v42, %v2288_v14  ;;  %v6433_v25 = vpop.f32.mrf.mxu0  ;;  %v2747_v16 = vld [vmem:[#allocation3 + $0x50] sm:$0xff]  ;;  %vm6459_vm11 = vcmp.ne.s32.totalorder %v645_v32, 0 }
 0x19b   : > { %v3001_v0 = vsel %vm6412_vm9, %v2849_v13, 0.0  ;;  %v5367_v57 = vpop.f32.mrf.mxu1  ;;  %v673_v22 = vand.u32 15, %v541_v28  ;;  %vm4494_vm9 = vcmask 519168  }
 0x19c   : > { %v3033_v41 = vadd.f32 %v3001_v0, %v2745_v46  ;;  %v2855_v17 = vsel %vm1108_vm0, %v2852_v34, %v2854_v31  ;;  %v2850_v12 = vrot.slane %v2714_v27, 7  ;;  %v6445_v11 = vpop.f32.mrf.mxu0  ;;  %v2719_v38 = vadd.f32 %v5367_v57, %v6264_v7 }
 0x19d   : > { %v3036_v39 = vadd.f32 %v2855_v17, %v2748_v54  ;;  %v2626_v43 = vpop.f32.mrf.mxu1  ;;  %v2749_v54 = vld [vmem:[#allocation3 + $0x60] sm:$0xff]  ;;  %vm6486_vm13 = vcmp.ne.s32.totalorder %v673_v22, 0 }
 0x19e   : > { %3065 = vst.msk [vmem:[#allocation3 + $0x40] sm:$0xff] %vm1845_vm4, %v3033_v41  ;;  %v2851_v47 = vsel %vm1108_vm0, %v2848_v30, %v2850_v12  ;;  %v2853_v49 = vsel %vm1108_vm0, %v2850_v12, %v2852_v34  ;;  %v2717_v52 = vadd.f32 %v2626_v43, %v2301_v10  ;;  %v6454_v14 = vpop.f32.mrf.mxu0  ;;  %v659_v30 = vand.u32 15, %v539_v4 }
 0x19f   : > { %3068 = vst.msk [vmem:[#allocation3 + $0x58] sm:$0xff] %vm1845_vm4, %v3036_v39  ;;  %v3003_v2 = vsel %vm6437_vm10, %v2853_v49, 0.0  ;;  %v3034_v48 = vadd.f32 %v2851_v47, %v2746_v20  ;;  %v5368_v42 = vpop.f32.mrf.mxu1  ;;  %v2304_v34 = vadd.f32 %v6274_v24, %v6276_v51  ;;  %v2860_v57 = vrot.slane %v2719_v38, 7 }
 0x1a0   : > { %v3035_v7 = vadd.f32 %v3003_v2, %v2747_v16  ;;  %v2856_v13 = vrot.slane %v2717_v52, 7  ;;  %v2720_v27 = vadd.f32 %v5368_v42, %v2312_v21  ;;  %v6465_v46 = vpop.f32.mrf.mxu0  ;;  %vm6474_vm12 = vcmp.ne.s32.totalorder %v659_v30, 0  ;;  %v2750_v16 = vld [vmem:[#allocation3 + $0x68] sm:$0xff] }
 0x1a1   : > { %3066 = vst.msk [vmem:[#allocation3 + $0x48] sm:$0xff] %vm1845_vm4, %v3034_v48  ;;  %v2629_v0 = vpop.f32.mrf.mxu1  ;;  %v543_v12 = vadd.s32 144, %v6332_v44  ;;  %v2317_v21 = vadd.f32 %v6280_v55, %v6282_v56  ;;  %v2328_v47 = vadd.f32 %v6284_v26, %v6286_v8  ;;  %v2751_v26 = vld [vmem:[#allocation3 + $0x70] sm:$0xff] }
 0x1a2   : > { %3067 = vst.msk [vmem:[#allocation3 + $0x50] sm:$0xff] %vm1845_vm4, %v3035_v7  ;;  %v2857_v32 = vsel %vm1108_vm0, %v2854_v31, %v2856_v13  ;;  %v2862_v10 = vrot.slane %v2720_v27, 7  ;;  %v2718_v41 = vadd.f32 %v2629_v0, %v2304_v34  ;;  %v6470_v4 = vpop.f32.mrf.mxu0  ;;  %v2752_v31 = vld [vmem:[#allocation3 + $0x78] sm:$0xff]  ;;  %v545_v7 = vadd.s32 160, %v6332_v44 }
 0x1a3   : > { %v3005_v24 = vsel %vm6459_vm11, %v2857_v32, 0.0  ;;  %v5371_v17 = vpop.f32.mrf.mxu1  ;;  %v687_v34 = vand.u32 15, %v543_v12 }
 0x1a4   : > { %v3037_v39 = vadd.f32 %v3005_v24, %v2749_v54  ;;  %v2863_v43 = vsel %vm1108_vm0, %v2860_v57, %v2862_v10  ;;  %v2858_v28 = vrot.slane %v2718_v41, 7  ;;  %v6482_v20 = vpop.f32.mrf.mxu0  ;;  %v2723_v2 = vadd.f32 %v5371_v17, %v6278_v53  ;;  %v2753_v17 = vld [vmem:[#allocation3 + $0x80] sm:$0xff] }
 0x1a5   : > { %v3040_v49 = vadd.f32 %v2863_v43, %v2752_v31  ;;  %v2642_v38 = vpop.f32.mrf.mxu1  ;;  %vm6511_vm14 = vcmp.ne.s32.totalorder %v687_v34, 0  ;;  %v2333_v31 = vadd.f32 %v6294_v33, %v6296_v50  ;;  %v2756_v43 = vld [vmem:[#allocation3 + $0x98] sm:$0xff] }
 0x1a6   : > { %3069 = vst.msk [vmem:[#allocation3 + $0x60] sm:$0xff] %vm1845_vm4, %v3037_v39  ;;  %v2859_v55 = vsel %vm1108_vm0, %v2856_v13, %v2858_v28  ;;  %v2861_v56 = vsel %vm1108_vm0, %v2858_v28, %v2860_v57  ;;  %v2721_v48 = vadd.f32 %v2642_v38, %v2317_v21  ;;  %v6494_v15 = vpop.f32.mrf.mxu0  ;;  %v2320_v13 = vadd.f32 %v6288_v29, %v6290_v23  ;;  %v2757_v23 = vld [vmem:[#allocation3 + $0xa0] sm:$0xff] }
 0x1a7   : > { %3072 = vst.msk [vmem:[#allocation3 + $0x78] sm:$0xff] %vm1845_vm4, %v3040_v49  ;;  %v3007_v8 = vsel %vm6474_vm12, %v2861_v56, 0.0  ;;  %v3038_v42 = vadd.f32 %v2859_v55, %v2750_v16  ;;  %v5372_v30 = vpop.f32.mrf.mxu1  ;;  %v2868_v32 = vrot.slane %v2723_v2, 7  ;;  %v701_v21 = vand.u32 15, %v545_v7  ;;  %v2754_v56 = vld [vmem:[#allocation3 + $0x88] sm:$0xff] }
 0x1a8   : > { %v3039_v27 = vadd.f32 %v3007_v8, %v2751_v26  ;;  %v2864_v0 = vrot.slane %v2721_v48, 7  ;;  %v2724_v53 = vadd.f32 %v5372_v30, %v2328_v47  ;;  %v6502_v22 = vpop.f32.mrf.mxu0  ;;  %v547_v39 = vadd.s32 176, %v6332_v44  ;;  %v2755_v8 = vld [vmem:[#allocation3 + $0x90] sm:$0xff] }
 0x1a9   : > { %3070 = vst.msk [vmem:[#allocation3 + $0x68] sm:$0xff] %vm1845_vm4, %v3038_v42  ;;  %v2645_v57 = vpop.f32.mrf.mxu1  ;;  %v2344_v38 = vadd.f32 %v6298_v45, %v6300_v58  ;;  %v549_v55 = vadd.s32 192, %v6332_v44  ;;  %vm6533_vm15 = vcmp.ne.s32.totalorder %v701_v21, 0  ;;  %v2336_v7 = vadd.f32 %v6302_v6, %v6304_v19 }
 0x1aa   : > { %3071 = vst.msk [vmem:[#allocation3 + $0x70] sm:$0xff] %vm1845_vm4, %v3039_v27  ;;  %v2865_v41 = vsel %vm1108_vm0, %v2862_v10, %v2864_v0  ;;  %v2870_v54 = vrot.slane %v2724_v53, 7  ;;  %v2722_v24 = vadd.f32 %v2645_v57, %v2320_v13  ;;  %v6507_v51 = vpop.f32.mrf.mxu0  ;;  %v715_v34 = vand.u32 15, %v547_v39 }
 0x1ab   : > { %v3009_v29 = vsel %vm6486_vm13, %v2865_v41, 0.0  ;;  %v5375_v12 = vpop.f32.mrf.mxu1  ;;  %v729_v57 = vand.u32 15, %v549_v55  ;;  %v551_v21 = vadd.s32 208, %v6332_v44  ;;  %v2349_v39 = vadd.f32 %v6308_v35, %v6310_v18  ;;  %v2758_v55 = vld [vmem:[#allocation3 + $0xa8] sm:$0xff] }
 0x1ac   : > { %v3041_v10 = vadd.f32 %v3009_v29, %v2753_v17  ;;  %v2871_v28 = vsel %vm1108_vm0, %v2868_v32, %v2870_v54  ;;  %v2866_v47 = vrot.slane %v2722_v24, 7  ;;  %v6519_v49 = vpop.f32.mrf.mxu0  ;;  %v2727_v50 = vadd.f32 %v5375_v12, %v6292_v63 }
 0x1ad   : > { %v3044_v52 = vadd.f32 %v2871_v28, %v2756_v43  ;;  %v2658_v16 = vpop.f32.mrf.mxu1  ;;  %vm6548_vm1 = vcmp.ne.s32.totalorder %v715_v34, 0  ;;  %vm6560_vm2 = vcmp.ne.s32.totalorder %v729_v57, 0  ;;  %v555_v19 = vadd.s32 240, %v6332_v44 }
 0x1ae   : > { %3073 = vst.msk [vmem:[#allocation3 + $0x80] sm:$0xff] %vm1845_vm4, %v3041_v10  ;;  %v2867_v2 = vsel %vm1108_vm0, %v2864_v0, %v2866_v47  ;;  %v2869_v33 = vsel %vm1108_vm0, %v2866_v47, %v2868_v32  ;;  %v2725_v48 = vadd.f32 %v2658_v16, %v2333_v31  ;;  %v6528_v26 = vpop.f32.mrf.mxu0  ;;  %v2876_v32 = vrot.slane %v2727_v50, 7 }
 0x1af   : > { %3076 = vst.msk [vmem:[#allocation3 + $0x98] sm:$0xff] %vm1845_vm4, %v3044_v52  ;;  %v3011_v45 = vsel %vm6511_vm14, %v2869_v33, 0.0  ;;  %v3042_v58 = vadd.f32 %v2867_v2, %v2754_v56  ;;  %v5376_v30 = vpop.f32.mrf.mxu1  ;;  %v2360_v47 = vadd.f32 %v6312_v40, %v6314_v5  ;;  %v2759_v40 = vld [vmem:[#allocation3 + $0xb0] sm:$0xff] }
 0x1b0   : > { %v3043_v63 = vadd.f32 %v3011_v45, %v2755_v8  ;;  %v2872_v13 = vrot.slane %v2725_v48, 7  ;;  %v2728_v27 = vadd.f32 %v5376_v30, %v2344_v38  ;;  %v6539_v0 = vpop.f32.mrf.mxu0  ;;  %v743_v8 = vand.u32 15, %v551_v21  ;;  %v7052_v21 = vld [vmem:[#allocation6_spill] sm:$0xff] }
 0x1b1   : > { %3074 = vst.msk [vmem:[#allocation3 + $0x88] sm:$0xff] %vm1845_vm4, %v3042_v58  ;;  %v2661_v53 = vpop.f32.mrf.mxu1  ;;  %v553_v45 = vadd.s32 224, %v6332_v44  ;;  %v7048_v58 = vld [vmem:[#allocation4_spill] sm:$0xff] }
 0x1b2   : > { %3075 = vst.msk [vmem:[#allocation3 + $0x90] sm:$0xff] %vm1845_vm4, %v3043_v63  ;;  %v2873_v41 = vsel %vm1108_vm0, %v2870_v54, %v2872_v13  ;;  %v2878_v24 = vrot.slane %v2728_v27, 7  ;;  %v2726_v17 = vadd.f32 %v2661_v53, %v2336_v7  ;;  %v6544_v29 = vpop.f32.mrf.mxu0  ;;  %v2760_v54 = vld [vmem:[#allocation3 + $0xb8] sm:$0xff]  ;;  %v2352_v42 = vadd.f32 %v7048_v58, %v6318_v37  ;;  %v2767_v58 = vld [vmem:[#allocation3 + $0xf0] sm:$0xff] }
 0x1b3   : > { %v3013_v6 = vsel %vm6533_vm15, %v2873_v41, 0.0  ;;  %v5379_v12 = vpop.f32.mrf.mxu1  ;;  %v2761_v41 = vld [vmem:[#allocation3 + $0xc0] sm:$0xff]  ;;  %vm6585_vm3 = vcmp.ne.s32.totalorder %v743_v8, 0 }
 0x1b4   : > { %v3045_v31 = vadd.f32 %v3013_v6, %v2757_v23  ;;  %v2879_v10 = vsel %vm1108_vm0, %v2876_v32, %v2878_v24  ;;  %v2874_v43 = vrot.slane %v2726_v17, 7  ;;  %v6556_v28 = vpop.f32.mrf.mxu0  ;;  %v2731_v56 = vadd.f32 %v5379_v12, %v6306_v1  ;;  %v7051_v12 = vld [vmem:[#allocation7_spill] sm:$0xff] }
 0x1b5   : > { %v3048_v38 = vadd.f32 %v2879_v10, %v2760_v54  ;;  %v2674_v52 = vpop.f32.mrf.mxu1  ;;  %v757_v6 = vand.u32 15, %v553_v45 }
 0x1b6   : > { %3077 = vst.msk [vmem:[#allocation3 + $0xa0] sm:$0xff] %vm1845_vm4, %v3045_v31  ;;  %v2875_v35 = vsel %vm1108_vm0, %v2872_v13, %v2874_v43  ;;  %v2877_v18 = vsel %vm1108_vm0, %v2874_v43, %v2876_v32  ;;  %v2729_v2 = vadd.f32 %v2674_v52, %v2349_v39  ;;  %v6568_v33 = vpop.f32.mrf.mxu0  ;;  %v2884_v13 = vrot.slane %v2731_v56, 7  ;;  %v2764_v31 = vld [vmem:[#allocation3 + $0xd8] sm:$0xff] }
 0x1b7   : > { %3080 = vst.msk [vmem:[#allocation3 + $0xb8] sm:$0xff] %vm1845_vm4, %v3048_v38  ;;  %v3015_v5 = vsel %vm6548_vm1, %v2877_v18, 0.0  ;;  %v3046_v50 = vadd.f32 %v2875_v35, %v2758_v55  ;;  %v5380_v48 = vpop.f32.mrf.mxu1  ;;  %v2365_v39 = vadd.f32 %v7052_v21, %v7051_v12  ;;  %v7054_v38 = vld [vmem:[#allocation8_spill] sm:$0xff]  ;;  %v2762_v35 = vld [vmem:[#allocation3 + $0xc8] sm:$0xff]  ;;  %vm6606_vm5 = vcmp.ne.s32.totalorder %v757_v6, 0 }
 0x1b8   : > { %v3047_v30 = vadd.f32 %v3015_v5, %v2759_v40  ;;  %v2880_v34 = vrot.slane %v2729_v2, 7  ;;  %v2732_v1 = vadd.f32 %v5380_v48, %v2360_v47  ;;  %v6576_v7 = vpop.f32.mrf.mxu0  ;;  %v7053_v47 = vld [vmem:[#allocation9_spill] sm:$0xff]  ;;  %v2763_v48 = vld [vmem:[#allocation3 + $0xd0] sm:$0xff] }
 0x1b9   : > { %3078 = vst.msk [vmem:[#allocation3 + $0xa8] sm:$0xff] %vm1845_vm4, %v3046_v50  ;;  %v2677_v63 = vpop.f32.mrf.mxu1  ;;  %v2376_v52 = vadd.f32 %v7054_v38, %v7053_v47  ;;  %v7055_v2 = vld [vmem:[#allocation5_spill] sm:$0xff] }
 0x1ba   : > { %3079 = vst.msk [vmem:[#allocation3 + $0xb0] sm:$0xff] %vm1845_vm4, %v3047_v30  ;;  %v2881_v27 = vsel %vm1108_vm0, %v2878_v24, %v2880_v34  ;;  %v2886_v53 = vrot.slane %v2732_v1, 7  ;;  %v2730_v57 = vadd.f32 %v2677_v63, %v2352_v42  ;;  %v6581_v32 = vpop.f32.mrf.mxu0  ;;  %v771_v30 = vand.u32 15, %v555_v19  ;;  %v7059_v1 = vld [vmem:[#allocation10_spill] sm:$0xff]  ;;  %v2765_v19 = vld [vmem:[#allocation3 + $0xe0] sm:$0xff] }
 0x1bb   : > { %v3017_v37 = vsel %vm6560_vm2, %v2881_v27, 0.0  ;;  %v5383_v23 = vpop.f32.mrf.mxu1 }
 0x1bc   : > { %v3049_v24 = vadd.f32 %v3017_v37, %v2761_v41  ;;  %v2887_v54 = vsel %vm1108_vm0, %v2884_v13, %v2886_v53  ;;  %v2882_v10 = vrot.slane %v2730_v57, 7  ;;  %v6593_v43 = vpop.f32.mrf.mxu0  ;;  %v2735_v40 = vadd.f32 %v5383_v23, %v7055_v2  ;;  %v2766_v2 = vld [vmem:[#allocation3 + $0xe8] sm:$0xff] }
 0x1bd   : > { %v3052_v16 = vadd.f32 %v2887_v54, %v2764_v31  ;;  %v2690_v55 = vpop.f32.mrf.mxu1  ;;  %vm6619_vm6 = vcmp.ne.s32.totalorder %v771_v30, 0 }
 0x1be   : > { %3081 = vst.msk [vmem:[#allocation3 + $0xc0] sm:$0xff] %vm1845_vm4, %v3049_v24  ;;  %v2883_v18 = vsel %vm1108_vm0, %v2880_v34, %v2882_v10  ;;  %v2885_v56 = vsel %vm1108_vm0, %v2882_v10, %v2884_v13  ;;  %v2733_v5 = vadd.f32 %v2690_v55, %v2365_v39  ;;  %v6601_v50 = vpop.f32.mrf.mxu0  ;;  %v7058_v34 = vld [vmem:[#allocation11_spill] sm:$0xff]  ;;  %v2892_v17 = vrot.slane %v2735_v40, 7 }
 0x1bf   : > { %3084 = vst.msk [vmem:[#allocation3 + $0xd8] sm:$0xff] %vm1845_vm4, %v3052_v16  ;;  %v3019_v8 = vsel %vm6585_vm3, %v2885_v56, 0.0  ;;  %v3050_v45 = vadd.f32 %v2883_v18, %v2762_v35  ;;  %v5384_v42 = vpop.f32.mrf.mxu1  ;;  %v2368_v63 = vadd.f32 %v7059_v1, %v7058_v34  ;;  %v2768_v10 = vld [vmem:[#allocation3 + $0xf8] sm:$0xff]  ;;  %v526_v18 = vadd.s32 8, %v6332_v44 }
 0x1c0   : > { %v3051_v13 = vadd.f32 %v3019_v8, %v2763_v48  ;;  %v2888_v27 = vrot.slane %v2733_v5, 7  ;;  %v2736_v57 = vadd.f32 %v5384_v42, %v2376_v52  ;;  %v6612_v41 = vpop.f32.mrf.mxu0  ;;  %v7062_v52 = vld [vmem:[#allocation12_spill] sm:$0xff]  ;;  %v528_v56 = vadd.s32 24, %v6332_v44  ;;  %v7063_v48 = vld [vmem:[#allocation13_spill] sm:$0xff] }
 0x1c1   : > { %3082 = vst.msk [vmem:[#allocation3 + $0xc8] sm:$0xff] %vm1845_vm4, %v3050_v45  ;;  %v2693_v37 = vpop.f32.mrf.mxu1 }
 0x1c2   : > { %3083 = vst.msk [vmem:[#allocation3 + $0xd0] sm:$0xff] %vm1845_vm4, %v3051_v13  ;;  %v2889_v23 = vsel %vm1108_vm0, %v2886_v53, %v2888_v27  ;;  %v2894_v6 = vrot.slane %v2736_v57, 7  ;;  %v2734_v12 = vadd.f32 %v2693_v37, %v2368_v63  ;;  %v5457_v21 = vpop.f32.mrf.mxu0  ;;  %v7064_v13 = vld [vmem:[#allocation14_spill] sm:$0xff] }
 0x1c3   : > { %v3021_v39 = vsel %vm6606_vm5, %v2889_v23, 0.0  ;;  %v5423_v31 = vpop.f32.mrf.mxu1  ;;  %v582_v23 = vand.u32 15, %v528_v56  ;;  %v534_v56 = vadd.s32 72, %v6332_v44 }
 0x1c4   : > { %v3053_v54 = vadd.f32 %v3021_v39, %v2765_v19  ;;  %v2895_v47 = vsel %vm1108_vm0, %v2892_v17, %v2894_v6  ;;  %v2890_v38 = vrot.slane %v2734_v12, 7  ;;  %v3473_v16 = vadd.f32 %v5423_v31, %v7062_v52  ;;  %v3790_v53 = vpop.f32.mrf.mxu0  ;;  %v7065_v19 = vld [vmem:[#allocation15_spill] sm:$0xff] }
 0x1c5   : > { %v3056_v55 = vadd.f32 %v2895_v47, %v2768_v10  ;;  %v3464_v35 = vpop.f32.mrf.mxu1  ;;  %vm6645_vm8 = vcmp.ne.s32.totalorder %v582_v23, 15 }
 0x1c6   : > { %3085 = vst.msk [vmem:[#allocation3 + $0xe0] sm:$0xff] %vm1845_vm4, %v3053_v54  ;;  %v2891_v40 = vsel %vm1108_vm0, %v2888_v27, %v2890_v38  ;;  %v2893_v5 = vsel %vm1108_vm0, %v2890_v38, %v2892_v17  ;;  %v3465_v8 = vadd.f32 %v3464_v35, %v7063_v48  ;;  %v5458_v45 = vpop.f32.mrf.mxu0  ;;  %v3919_v63 = vadd.f32 %v5457_v21, %v3473_v16 }
 0x1c7   : > { %3088 = vst.msk [vmem:[#allocation3 + $0xf8] sm:$0xff] %vm1845_vm4, %v3056_v55  ;;  %v3023_v42 = vsel %vm6619_vm6, %v2893_v5, 0.0  ;;  %v3054_v30 = vadd.f32 %v2891_v40, %v2766_v2  ;;  %v5424_v34 = vpop.f32.mrf.mxu1  ;;  %v568_v17 = vand.u32 15, %v526_v18  ;;  %vm4045_vm0 = vcmask 1046528   ;;  %v7068_v55 = vld [vmem:[#allocation16_spill] sm:$0xff]  ;;  %v3951_v40 = vld [vmem:[#allocation3 + $0x10] sm:$0xff] }
 0x1c8   : > { %v3055_v1 = vadd.f32 %v3023_v42, %v2767_v58  ;;  %v3476_v57 = vadd.f32 %v5424_v34, %v7064_v13  ;;  %v3793_v37 = vpop.f32.mrf.mxu0  ;;  %v3917_v6 = vadd.f32 %v3790_v53, %v3465_v8  ;;  %v530_v54 = vadd.s32 40, %v6332_v44 }
 0x1c9   : > { %3086 = vst.msk [vmem:[#allocation3 + $0xe8] sm:$0xff] %vm1845_vm4, %v3054_v30  ;;  %v3467_v27 = vpop.f32.mrf.mxu1  ;;  %v532_v21 = vadd.s32 56, %v6332_v44  ;;  %v4049_v10 = vrot.slane %v3919_v63, 1  ;;  %vm6640_vm7 = vcmp.ne.s32.totalorder %v568_v17, 15  ;;  %v3949_v63 = vld [vmem:[#allocation3] sm:$0xff]  ;;  %v6658_v17 = vadd.s32 104, %v6332_v44 }
 0x1ca   : > { %3087 = vst.msk [vmem:[#allocation3 + $0xf0] sm:$0xff] %vm1845_vm4, %v3055_v1  ;;  %v3920_v12 = vadd.f32 %v5458_v45, %v3476_v57  ;;  %v3468_v39 = vadd.f32 %v3467_v27, %v7065_v19  ;;  %v5461_v24 = vpop.f32.mrf.mxu0  ;;  %v4046_v2 = vrot.slane %v3917_v6, 1  ;;  %v596_v30 = vand.u32 15, %v530_v54 }
 0x1cb   : > { %v5427_v31 = vpop.f32.mrf.mxu1  ;;  %v610_v34 = vand.u32 15, %v532_v21  ;;  %v6653_v1 = vadd.s32 88, %v6332_v44 }
 0x1cc   : > { %v4051_v47 = vrot.slane %v3920_v12, 1  ;;  %v3918_v38 = vadd.f32 %v3793_v37, %v3468_v39  ;;  %v3806_v52 = vpop.f32.mrf.mxu0  ;;  %v3489_v53 = vadd.f32 %v5427_v31, %v7068_v55  ;;  %vm6668_vm10 = vcmp.ne.s32.totalorder %v596_v30, 15 }
 0x1cd   : > { %v3480_v35 = vpop.f32.mrf.mxu1  ;;  %vm6672_vm11 = vcmp.ne.s32.totalorder %v610_v34, 15  ;;  %v6690_v34 = vadd.s32 120, %v6332_v44 }
 0x1ce   : > { %v4052_v5 = vsel %vm4045_vm0, %v4049_v10, %v4051_v47  ;;  %v4047_v48 = vrot.slane %v3918_v38, 1  ;;  %v3481_v8 = vadd.f32 %v3480_v35, %v6371_v9  ;;  %v5462_v45 = vpop.f32.mrf.mxu0  ;;  %v3950_v9 = vld [vmem:[#allocation3 + $0x8] sm:$0xff]  ;;  %v3923_v12 = vadd.f32 %v5461_v24, %v3489_v53 }
 0x1cf   : > { %v4240_v58 = vadd.f32 %v4052_v5, %v3951_v40  ;;  %v5428_v42 = vpop.f32.mrf.mxu1  ;;  %v624_v38 = vand.u32 15, %v534_v56  ;;  %v638_v56 = vand.u32 15, %v6653_v1  ;;  %v3952_v40 = vld [vmem:[#allocation3 + $0x18] sm:$0xff]  ;;  %v3955_v1 = vld [vmem:[#allocation3 + $0x30] sm:$0xff]  ;;  %v666_v55 = vand.u32 15, %v6690_v34 }
 0x1d0   : > { %v4048_v13 = vsel %vm4045_vm0, %v4046_v2, %v4047_v48  ;;  %v4050_v57 = vsel %vm4045_vm0, %v4047_v48, %v4049_v10  ;;  %v3921_v37 = vadd.f32 %v3806_v52, %v3481_v8  ;;  %v3809_v27 = vpop.f32.mrf.mxu0  ;;  %v3492_v19 = vadd.f32 %v5428_v42, %v6380_v61 }
 0x1d1   : > { %4272 = vst.msk [vmem:[#allocation3 + $0x10] sm:$0xff] %vm1845_vm4, %v4240_v58  ;;  %v4207_v23 = vsel %vm6640_vm7, %v4050_v57, 0.0  ;;  %v4238_v6 = vadd.f32 %v4048_v13, %v3949_v63  ;;  %v3483_v39 = vpop.f32.mrf.mxu1  ;;  %v4057_v2 = vrot.slane %v3923_v12, 1  ;;  %vm6685_vm12 = vcmp.ne.s32.totalorder %v624_v38, 15 }
 0x1d2   : > { %v4239_v31 = vadd.f32 %v4207_v23, %v3950_v9  ;;  %v4053_v54 = vrot.slane %v3921_v37, 1  ;;  %v3484_v21 = vadd.f32 %v3483_v39, %v6391_v62  ;;  %v5465_v10 = vpop.f32.mrf.mxu0  ;;  %v6666_v52 = vadd.f32 %v5462_v45, %v3492_v19  ;;  %v3953_v9 = vld [vmem:[#allocation3 + $0x20] sm:$0xff] }
 0x1d3   : > { %4270 = vst.msk [vmem:[#allocation3] sm:$0xff] %vm1845_vm4, %v4238_v6  ;;  %v5431_v16 = vpop.f32.mrf.mxu1  ;;  %v652_v45 = vand.u32 15, %v6658_v17  ;;  %v6694_v13 = vadd.s32 136, %v6332_v44  ;;  %v6697_v57 = vadd.s32 152, %v6332_v44  ;;  %vm6725_vm13 = vcmp.ne.s32.totalorder %v638_v56, 15 }
 0x1d4   : > { %4271 = vst.msk [vmem:[#allocation3 + $0x8] sm:$0xff] %vm1845_vm4, %v4239_v31  ;;  %v4054_v61 = vsel %vm4045_vm0, %v4051_v47, %v4053_v54  ;;  %v3922_v62 = vadd.f32 %v3809_v27, %v3484_v21  ;;  %v3505_v53 = vadd.f32 %v5431_v16, %v6396_v59  ;;  %v3822_v35 = vpop.f32.mrf.mxu0  ;;  %v4059_v48 = vrot.slane %v6666_v52, 1  ;;  %v3954_v31 = vld [vmem:[#allocation3 + $0x28] sm:$0xff] }
 0x1d5   : > { %v4209_v5 = vsel %vm6645_vm8, %v4054_v61, 0.0  ;;  %v3496_v8 = vpop.f32.mrf.mxu1  ;;  %v694_v34 = vand.u32 15, %v6697_v57  ;;  %vm6743_vm14 = vcmp.ne.s32.totalorder %v652_v45, 15  ;;  %v6748_v24 = vadd.s32 184, %v6332_v44 }
 0x1d6   : > { %v4241_v58 = vadd.f32 %v4209_v5, %v3952_v40  ;;  %v4055_v42 = vrot.slane %v3922_v62, 1  ;;  %v3497_v47 = vadd.f32 %v3496_v8, %v6408_v3  ;;  %v5466_v30 = vpop.f32.mrf.mxu0  ;;  %v4060_v18 = vsel %vm4045_vm0, %v4057_v2, %v4059_v48 }
 0x1d7   : > { %v5432_v63 = vpop.f32.mrf.mxu1  ;;  %v6700_v3 = vadd.s32 168, %v6332_v44  ;;  %v4244_v27 = vadd.f32 %v4060_v18, %v3955_v1  ;;  %v3927_v12 = vadd.f32 %v5465_v10, %v3505_v53  ;;  %vm6761_vm15 = vcmp.ne.s32.totalorder %v666_v55, 15 }
 0x1d8   : > { %v4304_v37 = vld [vmem:[#allocation3 + $0x10] sm:$0xff]  ;;  %4273 = vst.msk [vmem:[#allocation3 + $0x18] sm:$0xff] %vm1845_vm4, %v4241_v58  ;;  %v4056_v23 = vsel %vm4045_vm0, %v4053_v54, %v4055_v42  ;;  %v4058_v6 = vsel %vm4045_vm0, %v4055_v42, %v4057_v2  ;;  %v3825_v19 = vpop.f32.mrf.mxu0  ;;  %v3925_v52 = vadd.f32 %v3822_v35, %v3497_v47  ;;  %v3508_v10 = vadd.f32 %v5432_v63, %v6420_v60 }
 0x1d9   : > { %v4336_v39 = vmax.f32 %v4304_v37, 0.0  ;;  %v4211_v21 = vsel %vm6668_vm10, %v4058_v6, 0.0  ;;  %v4242_v38 = vadd.f32 %v4056_v23, %v3953_v9  ;;  %v3499_v16 = vpop.f32.mrf.mxu1  ;;  %4276 = vst.msk [vmem:[#allocation3 + $0x30] sm:$0xff] %vm1845_vm4, %v4244_v27  ;;  %v680_v58 = vand.u32 15, %v6694_v13  ;;  %v3956_v23 = vld [vmem:[#allocation3 + $0x38] sm:$0xff]  ;;  %v3962_v13 = vld [vmem:[#allocation3 + $0x68] sm:$0xff] }
 0x1da   : > { %v4302_v61 = vld [vmem:[#allocation3] sm:$0xff]  ;;  %v4243_v54 = vadd.f32 %v4211_v21, %v3954_v31  ;;  %v3500_v62 = vadd.f32 %v3499_v16, %v6428_v36  ;;  %v6717_v53 = vpop.f32.mrf.mxu0  ;;  %v4061_v5 = vrot.slane %v3925_v52, 1  ;;  %v6723_v60 = vadd.f32 %v5466_v30, %v3508_v10 }
 0x1db   : > { %v4998_v35 = vpack.c.bf16 %v4336_v39, %v4336_v39  ;;  %v4303_v2 = vld [vmem:[#allocation3 + $0x8] sm:$0xff]  ;;  %v4334_v40 = vmax.f32 %v4302_v61, 0.0  ;;  %4274 = vst.msk [vmem:[#allocation3 + $0x20] sm:$0xff] %vm1845_vm4, %v4242_v38  ;;  %v5435_v8 = vpop.f32.mrf.mxu1  ;;  %v4065_v63 = vrot.slane %v3927_v12, 1  ;;  %v708_v30 = vand.u32 15, %v6700_v3  ;;  %v3959_v61 = vld [vmem:[#allocation3 + $0x50] sm:$0xff] }
 0x1dc   : > { %v4335_v42 = vmax.f32 %v4303_v2, 0.0  ;;  %4275 = vst.msk [vmem:[#allocation3 + $0x28] sm:$0xff] %vm1845_vm4, %v4243_v54  ;;  %v3926_v36 = vadd.f32 %v3825_v19, %v3500_v62  ;;  %v3838_v47 = vpop.f32.mrf.mxu0  ;;  %v4062_v37 = vsel %vm4045_vm0, %v4059_v48, %v4061_v5  ;;  %v4067_v6 = vrot.slane %v6723_v60, 1  ;;  %v3957_v10 = vld [vmem:[#allocation3 + $0x40] sm:$0xff] }
 0x1dd   : > { %4497 = vst.msk [vmem:[%s6712_s23 + $0x8] sm:$0xf] %vm4494_vm9, %v4998_v35  ;;  %v4996_v18 = vpack.c.bf16 %v4334_v40, %v4334_v40  ;;  %v3512_v27 = vpop.f32.mrf.mxu1  ;;  %v4213_v56 = vsel %vm6672_vm11, %v4062_v37, 0.0  ;;  %v3521_v12 = vadd.f32 %v5435_v8, %v6433_v25  ;;  %v3958_v35 = vld [vmem:[#allocation3 + $0x48] sm:$0xff]  ;;  %vm6795_vm1 = vcmp.ne.s32.totalorder %v680_v58, 15 }
 0x1de   : > { %v4997_v9 = vpack.c.bf16 %v4335_v42, %v4335_v42  ;;  %v4063_v19 = vrot.slane %v3926_v36, 1  ;;  %v5470_v39 = vpop.f32.mrf.mxu0  ;;  %v4245_v21 = vadd.f32 %v4213_v56, %v3956_v23  ;;  %v3513_v48 = vadd.f32 %v3512_v27, %v6445_v11 }
 0x1df   : > { %4495 = vst.msk [vmem:[%s6712_s23] sm:$0xf] %vm4494_vm9, %v4996_v18  ;;  %v4305_v31 = vld [vmem:[#allocation3 + $0x18] sm:$0xff]  ;;  %v5436_v38 = vpop.f32.mrf.mxu1  ;;  %v4068_v54 = vsel %vm4045_vm0, %v4065_v63, %v4067_v6  ;;  %v6759_v42 = vadd.s32 200, %v6332_v44  ;;  %v3931_v59 = vadd.f32 %v6717_v53, %v3521_v12  ;;  %vm6808_vm2 = vcmp.ne.s32.totalorder %v694_v34, 15 }
 0x1e0   : > { %4496 = vst.msk [vmem:[%s6712_s23 + $0x4] sm:$0xf] %vm4494_vm9, %v4997_v9  ;;  %v4337_v16 = vmax.f32 %v4305_v31, 0.0  ;;  %v4064_v25 = vsel %vm4045_vm0, %v4061_v5, %v4063_v19  ;;  %v4066_v11 = vsel %vm4045_vm0, %v4063_v19, %v4065_v63  ;;  %v3841_v62 = vpop.f32.mrf.mxu0  ;;  %v4308_v17 = vld [vmem:[#allocation3 + $0x30] sm:$0xff]  ;;  %v4248_v45 = vadd.f32 %v4068_v54, %v3959_v61 }
 0x1e1   : > { %4277 = vst.msk [vmem:[#allocation3 + $0x38] sm:$0xff] %vm1845_vm4, %v4245_v21  ;;  %v4215_v2 = vsel %vm6685_vm12, %v4066_v11, 0.0  ;;  %v4246_v40 = vadd.f32 %v4064_v25, %v3957_v10  ;;  %v3515_v8 = vpop.f32.mrf.mxu1  ;;  %v4340_v36 = vmax.f32 %v4308_v17, 0.0  ;;  %v3929_v63 = vadd.f32 %v3838_v47, %v3513_v48 }
 0x1e2   : > { %v4999_v60 = vpack.c.bf16 %v4337_v16, %v4337_v16  ;;  %v4306_v5 = vld [vmem:[#allocation3 + $0x20] sm:$0xff]  ;;  %v4247_v18 = vadd.f32 %v4215_v2, %v3958_v35  ;;  %v5473_v37 = vpop.f32.mrf.mxu0  ;;  %4280 = vst.msk [vmem:[#allocation3 + $0x50] sm:$0xff] %vm1845_vm4, %v4248_v45  ;;  %v3524_v56 = vadd.f32 %v5436_v38, %v6454_v14  ;;  %v3516_v19 = vadd.f32 %v3515_v8, %v6465_v46 }
 0x1e3   : > { %v4307_v9 = vld [vmem:[#allocation3 + $0x28] sm:$0xff]  ;;  %v4338_v23 = vmax.f32 %v4306_v5, 0.0  ;;  %4278 = vst.msk [vmem:[#allocation3 + $0x40] sm:$0xff] %vm1845_vm4, %v4246_v40  ;;  %v5439_v31 = vpop.f32.mrf.mxu1  ;;  %v5002_v55 = vpack.c.bf16 %v4340_v36, %v4340_v36  ;;  %v4069_v21 = vrot.slane %v3929_v63, 1  ;;  %v6775_v14 = vadd.s32 216, %v6332_v44  ;;  %v3963_v5 = vld [vmem:[#allocation3 + $0x70] sm:$0xff] }
 0x1e4   : > { %4498 = vst.msk [vmem:[%s6712_s23 + $0xc] sm:$0xf] %vm4494_vm9, %v4999_v60  ;;  %v4339_v47 = vmax.f32 %v4307_v9, 0.0  ;;  %v3537_v48 = vadd.f32 %v5439_v31, %v6470_v4  ;;  %v3854_v16 = vpop.f32.mrf.mxu0  ;;  %v3932_v54 = vadd.f32 %v5470_v39, %v3524_v56  ;;  %v3930_v53 = vadd.f32 %v3841_v62, %v3516_v19  ;;  %v3960_v39 = vld [vmem:[#allocation3 + $0x58] sm:$0xff]  ;;  %v3961_v63 = vld [vmem:[#allocation3 + $0x60] sm:$0xff] }
 0x1e5   : > { %4279 = vst.msk [vmem:[#allocation3 + $0x48] sm:$0xff] %vm1845_vm4, %v4247_v18  ;;  %v5000_v61 = vpack.c.bf16 %v4338_v23, %v4338_v23  ;;  %v3528_v12 = vpop.f32.mrf.mxu1  ;;  %v4070_v38 = vsel %vm4045_vm0, %v4067_v6, %v4069_v21  ;;  %v4073_v4 = vrot.slane %v3931_v59, 1  ;;  %vm6834_vm3 = vcmp.ne.s32.totalorder %v708_v30, 15 }
 0x1e6   : > { %4501 = vst.msk [vmem:[%s6712_s23 + $0x18] sm:$0xf] %vm4494_vm9, %v5002_v55  ;;  %v5001_v46 = vpack.c.bf16 %v4339_v47, %v4339_v47  ;;  %v6780_v10 = vadd.f32 %v5473_v37, %v3537_v48  ;;  %v3529_v25 = vadd.f32 %v3528_v12, %v6482_v20  ;;  %v5474_v11 = vpop.f32.mrf.mxu0  ;;  %v4217_v62 = vsel %vm6725_vm13, %v4070_v38, 0.0 }
 0x1e7   : > { %4499 = vst.msk [vmem:[%s6712_s23 + $0x10] sm:$0xf] %vm4494_vm9, %v5000_v61  ;;  %v4075_v17 = vrot.slane %v3932_v54, 1  ;;  %v4071_v45 = vrot.slane %v3930_v53, 1  ;;  %v5440_v35 = vpop.f32.mrf.mxu1  ;;  %v4249_v40 = vadd.f32 %v4217_v62, %v3960_v39 }
 0x1e8   : > { %4500 = vst.msk [vmem:[%s6712_s23 + $0x14] sm:$0xf] %vm4494_vm9, %v5001_v46  ;;  %v4309_v2 = vld [vmem:[#allocation3 + $0x38] sm:$0xff]  ;;  %v4081_v6 = vrot.slane %v6780_v10, 1  ;;  %v6790_v8 = vadd.f32 %v3854_v16, %v3529_v25  ;;  %v3540_v20 = vadd.f32 %v5440_v35, %v6494_v15  ;;  %v3857_v60 = vpop.f32.mrf.mxu0 }
 0x1e9   : > { %v4341_v1 = vmax.f32 %v4309_v2, 0.0  ;;  %v4076_v18 = vsel %vm4045_vm0, %v4073_v4, %v4075_v17  ;;  %v4072_v37 = vsel %vm4045_vm0, %v4069_v21, %v4071_v45  ;;  %v4074_v9 = vsel %vm4045_vm0, %v4071_v45, %v4073_v4  ;;  %v3531_v23 = vpop.f32.mrf.mxu1  ;;  %v4312_v59 = vld [vmem:[#allocation3 + $0x50] sm:$0xff]  ;;  %4281 = vst.msk [vmem:[#allocation3 + $0x58] sm:$0xff] %vm1845_vm4, %v4249_v40  ;;  %v3964_v4 = vld [vmem:[#allocation3 + $0x78] sm:$0xff] }
 0x1ea   : > { %v4310_v56 = vld [vmem:[#allocation3 + $0x40] sm:$0xff]  ;;  %v4252_v15 = vadd.f32 %v4076_v18, %v3963_v5  ;;  %v4219_v58 = vsel %vm6743_vm14, %v4074_v9, 0.0  ;;  %v4250_v19 = vadd.f32 %v4072_v37, %v3961_v63  ;;  %v4077_v31 = vrot.slane %v6790_v8, 1  ;;  %v5477_v55 = vpop.f32.mrf.mxu0 }
 0x1eb   : > { %v5003_v47 = vpack.c.bf16 %v4341_v1, %v4341_v1  ;;  %v4344_v48 = vmax.f32 %v4312_v59, 0.0  ;;  %v4342_v16 = vmax.f32 %v4310_v56, 0.0  ;;  %v4251_v61 = vadd.f32 %v4219_v58, %v3962_v13  ;;  %v5443_v54 = vpop.f32.mrf.mxu1  ;;  %v3967_v1 = vld [vmem:[#allocation3 + $0x90] sm:$0xff] }
 0x1ec   : > { %v4311_v21 = vld [vmem:[#allocation3 + $0x48] sm:$0xff]  ;;  %4284 = vst.msk [vmem:[#allocation3 + $0x70] sm:$0xff] %vm1845_vm4, %v4252_v15  ;;  %4282 = vst.msk [vmem:[#allocation3 + $0x60] sm:$0xff] %vm1845_vm4, %v4250_v19  ;;  %v4078_v52 = vsel %vm4045_vm0, %v4075_v17, %v4077_v31  ;;  %v6815_v46 = vadd.f32 %v5474_v11, %v3540_v20  ;;  %v3532_v38 = vadd.f32 %v3531_v23, %v6502_v22  ;;  %v3870_v25 = vpop.f32.mrf.mxu0  ;;  %v722_v20 = vand.u32 15, %v6748_v24  ;;  %v3965_v15 = vld [vmem:[#allocation3 + $0x80] sm:$0xff] }
 0x1ed   : > { %v4343_v12 = vmax.f32 %v4311_v21, 0.0  ;;  %4502 = vst.msk [vmem:[%s6712_s23 + $0x1c] sm:$0xf] %vm4494_vm9, %v5003_v47  ;;  %v5006_v57 = vpack.c.bf16 %v4344_v48, %v4344_v48  ;;  %v5004_v34 = vpack.c.bf16 %v4342_v16, %v4342_v16  ;;  %v4221_v39 = vsel %vm6761_vm15, %v4078_v52, 0.0  ;;  %v3544_v11 = vpop.f32.mrf.mxu1  ;;  %v3966_v48 = vld [vmem:[#allocation3 + $0x88] sm:$0xff] }
 0x1ee   : > { %4283 = vst.msk [vmem:[#allocation3 + $0x68] sm:$0xff] %vm1845_vm4, %v4251_v61  ;;  %v3553_v62 = vadd.f32 %v5443_v54, %v6507_v51  ;;  %v4253_v45 = vadd.f32 %v4221_v39, %v3964_v4  ;;  %v4083_v22 = vrot.slane %v6815_v46, 1  ;;  %v3934_v35 = vadd.f32 %v3857_v60, %v3532_v38  ;;  %v5478_v2 = vpop.f32.mrf.mxu0 }
 0x1ef   : > { %v5005_v17 = vpack.c.bf16 %v4343_v12, %v4343_v12  ;;  %4505 = vst.msk [vmem:[%s6712_s23 + $0x28] sm:$0xf] %vm4494_vm9, %v5006_v57  ;;  %4503 = vst.msk [vmem:[%s6712_s23 + $0x20] sm:$0xf] %vm4494_vm9, %v5004_v34  ;;  %v3545_v8 = vadd.f32 %v3544_v11, %v6519_v49  ;;  %v5444_v27 = vpop.f32.mrf.mxu1  ;;  %v736_v60 = vand.u32 15, %v6759_v42  ;;  %v750_v18 = vand.u32 15, %v6775_v14 }
 0x1f0   : > { %v6829_v40 = vadd.f32 %v5477_v55, %v3553_v62  ;;  %4285 = vst.msk [vmem:[#allocation3 + $0x78] sm:$0xff] %vm1845_vm4, %v4253_v45  ;;  %v4084_v49 = vsel %vm4045_vm0, %v4081_v6, %v4083_v22  ;;  %v4079_v5 = vrot.slane %v3934_v35, 1  ;;  %v3556_v3 = vadd.f32 %v5444_v27, %v6528_v26  ;;  %v3873_v30 = vpop.f32.mrf.mxu0  ;;  %v4313_v63 = vld [vmem:[#allocation3 + $0x58] sm:$0xff] }
 0x1f1   : > { %4504 = vst.msk [vmem:[%s6712_s23 + $0x24] sm:$0xf] %vm4494_vm9, %v5005_v17  ;;  %v4256_v37 = vadd.f32 %v4084_v49, %v3967_v1  ;;  %v3937_v9 = vadd.f32 %v3870_v25, %v3545_v8  ;;  %v3547_v23 = vpop.f32.mrf.mxu1  ;;  %v6850_v59 = vadd.s32 248, %v6332_v44  ;;  %v4345_v56 = vmax.f32 %v4313_v63, 0.0  ;;  %v3968_v11 = vld [vmem:[#allocation3 + $0x98] sm:$0xff]  ;;  %v3971_v8 = vld [vmem:[#allocation3 + $0xb0] sm:$0xff] }
 0x1f2   : > { %v4089_v24 = vrot.slane %v6829_v40, 1  ;;  %v4080_v13 = vsel %vm4045_vm0, %v4077_v31, %v4079_v5  ;;  %v4082_v26 = vsel %vm4045_vm0, %v4079_v5, %v4081_v6  ;;  %v6856_v58 = vadd.f32 %v5478_v2, %v3556_v3  ;;  %v5481_v19 = vpop.f32.mrf.mxu0 }
 0x1f3   : > { %v4316_v55 = vld [vmem:[#allocation3 + $0x70] sm:$0xff]  ;;  %v4314_v47 = vld [vmem:[#allocation3 + $0x60] sm:$0xff]  ;;  %4288 = vst.msk [vmem:[#allocation3 + $0x90] sm:$0xff] %vm1845_vm4, %v4256_v37  ;;  %v4223_v21 = vsel %vm6795_vm1, %v4082_v26, 0.0  ;;  %v4254_v16 = vadd.f32 %v4080_v13, %v3965_v15  ;;  %v4085_v61 = vrot.slane %v3937_v9, 1  ;;  %v3548_v31 = vadd.f32 %v3547_v23, %v6539_v0  ;;  %v5447_v54 = vpop.f32.mrf.mxu1  ;;  %v3970_v13 = vld [vmem:[#allocation3 + $0xa8] sm:$0xff] }
 0x1f4   : > { %v5007_v10 = vpack.c.bf16 %v4345_v56, %v4345_v56  ;;  %v4348_v12 = vmax.f32 %v4316_v55, 0.0  ;;  %v4346_v52 = vmax.f32 %v4314_v47, 0.0  ;;  %v4255_v46 = vadd.f32 %v4223_v21, %v3966_v48  ;;  %v3886_v38 = vpop.f32.mrf.mxu0 }
 0x1f5   : > { %v4315_v6 = vld [vmem:[#allocation3 + $0x68] sm:$0xff]  ;;  %4286 = vst.msk [vmem:[#allocation3 + $0x80] sm:$0xff] %vm1845_vm4, %v4254_v16  ;;  %v4086_v57 = vsel %vm4045_vm0, %v4083_v22, %v4085_v61  ;;  %v4091_v36 = vrot.slane %v6856_v58, 1  ;;  %v3938_v34 = vadd.f32 %v3873_v30, %v3548_v31  ;;  %v3560_v4 = vpop.f32.mrf.mxu1  ;;  %vm6865_vm5 = vcmp.ne.s32.totalorder %v722_v20, 15  ;;  %v3969_v30 = vld [vmem:[#allocation3 + $0xa0] sm:$0xff] }
 0x1f6   : > { %v4347_v25 = vmax.f32 %v4315_v6, 0.0  ;;  %4506 = vst.msk [vmem:[%s6712_s23 + $0x2c] sm:$0xf] %vm4494_vm9, %v5007_v10  ;;  %v5010_v0 = vpack.c.bf16 %v4348_v12, %v4348_v12  ;;  %v5008_v62 = vpack.c.bf16 %v4346_v52, %v4346_v52  ;;  %v4225_v17 = vsel %vm6808_vm2, %v4086_v57, 0.0  ;;  %v5482_v22 = vpop.f32.mrf.mxu0  ;;  %v3975_v57 = vld [vmem:[#allocation3 + $0xd0] sm:$0xff] }
 0x1f7   : > { %4287 = vst.msk [vmem:[#allocation3 + $0x88] sm:$0xff] %vm1845_vm4, %v4255_v46  ;;  %v3569_v45 = vadd.f32 %v5447_v54, %v6544_v29  ;;  %v4317_v2 = vld [vmem:[#allocation3 + $0x78] sm:$0xff]  ;;  %v4257_v40 = vadd.f32 %v4225_v17, %v3968_v11  ;;  %v4092_v27 = vsel %vm4045_vm0, %v4089_v24, %v4091_v36  ;;  %v4087_v20 = vrot.slane %v3938_v34, 1  ;;  %v5448_v1 = vpop.f32.mrf.mxu1 }
 0x1f8   : > { %v5009_v35 = vpack.c.bf16 %v4347_v25, %v4347_v25  ;;  %4509 = vst.msk [vmem:[%s6712_s23 + $0x38] sm:$0xf] %vm4494_vm9, %v5010_v0  ;;  %4507 = vst.msk [vmem:[%s6712_s23 + $0x30] sm:$0xf] %vm4494_vm9, %v5008_v62  ;;  %v4349_v53 = vmax.f32 %v4317_v2, 0.0  ;;  %v4260_v49 = vadd.f32 %v4092_v27, %v3971_v8  ;;  %v3561_v29 = vadd.f32 %v3560_v4, %v6556_v28  ;;  %v3889_v3 = vpop.f32.mrf.mxu0  ;;  %v3973_v8 = vld [vmem:[#allocation3 + $0xc0] sm:$0xff] }
 0x1f9   : > { %v6882_v5 = vadd.f32 %v5481_v19, %v3569_v45  ;;  %4289 = vst.msk [vmem:[#allocation3 + $0x98] sm:$0xff] %vm1845_vm4, %v4257_v40  ;;  %v4088_v63 = vsel %vm4045_vm0, %v4085_v61, %v4087_v20  ;;  %v4090_v37 = vsel %vm4045_vm0, %v4087_v20, %v4089_v24  ;;  %v3572_v9 = vadd.f32 %v5448_v1, %v6568_v33  ;;  %v3563_v23 = vpop.f32.mrf.mxu1 }
 0x1fa   : > { %4508 = vst.msk [vmem:[%s6712_s23 + $0x34] sm:$0xf] %vm4494_vm9, %v5009_v35  ;;  %vm6893_vm6 = vcmp.ne.s32.totalorder %v736_v60, 15  ;;  %v5011_v28 = vpack.c.bf16 %v4349_v53, %v4349_v53  ;;  %v4320_v15 = vld [vmem:[#allocation3 + $0x90] sm:$0xff]  ;;  %v4227_v26 = vsel %vm6834_vm3, %v4090_v37, 0.0  ;;  %v4258_v19 = vadd.f32 %v4088_v63, %v3969_v30  ;;  %v5485_v24 = vpop.f32.mrf.mxu0 }
 0x1fb   : > { %4292 = vst.msk [vmem:[#allocation3 + $0xb0] sm:$0xff] %vm1845_vm4, %v4260_v49  ;;  %v778_v33 = vand.u32 15, %v6850_v59  ;;  %v4352_v55 = vmax.f32 %v4320_v15, 0.0  ;;  %v4259_v47 = vadd.f32 %v4227_v26, %v3970_v13  ;;  %v3941_v48 = vadd.f32 %v3886_v38, %v3561_v29  ;;  %v5451_v60 = vpop.f32.mrf.mxu1  ;;  %v3974_v29 = vld [vmem:[#allocation3 + $0xc8] sm:$0xff] }
 0x1fc   : > { %v6901_v42 = vadd.f32 %v5482_v22, %v3572_v9  ;;  %4510 = vst.msk [vmem:[%s6712_s23 + $0x3c] sm:$0xf] %vm4494_vm9, %v5011_v28  ;;  %v4318_v21 = vld [vmem:[#allocation3 + $0x80] sm:$0xff]  ;;  %v4097_v16 = vrot.slane %v6882_v5, 1  ;;  %v3564_v51 = vadd.f32 %v3563_v23, %v6576_v7  ;;  %v3585_v61 = vadd.f32 %v5451_v60, %v6581_v32  ;;  %v3902_v32 = vpop.f32.mrf.mxu0 }
 0x1fd   : > { %4290 = vst.msk [vmem:[#allocation3 + $0xa0] sm:$0xff] %vm1845_vm4, %v4258_v19  ;;  %vm6911_vm7 = vcmp.ne.s32.totalorder %v750_v18, 15  ;;  %v5014_v31 = vpack.c.bf16 %v4352_v55, %v4352_v55  ;;  %v4350_v10 = vmax.f32 %v4318_v21, 0.0  ;;  %4291 = vst.msk [vmem:[#allocation3 + $0xa8] sm:$0xff] %vm1845_vm4, %v4259_v47  ;;  %v4093_v12 = vrot.slane %v3941_v48, 1  ;;  %v3576_v52 = vpop.f32.mrf.mxu1 }
 0x1fe   : > { %v4319_v54 = vld [vmem:[#allocation3 + $0x88] sm:$0xff]  ;;  %v4099_v6 = vrot.slane %v6901_v42, 1  ;;  %v3942_v38 = vadd.f32 %v3889_v3, %v3564_v51  ;;  %v3577_v7 = vadd.f32 %v3576_v52, %v6593_v43  ;;  %v6919_v14 = vadd.s32 232, %v6332_v44  ;;  %v3972_v44 = vld [vmem:[#allocation3 + $0xb8] sm:$0xff]  ;;  %v5486_v1 = vpop.f32.mrf.mxu0 }
 0x1ff   : > { %v4351_v46 = vmax.f32 %v4319_v54, 0.0  ;;  %4513 = vst.msk [vmem:[%s6712_s23 + $0x48] sm:$0xf] %vm4494_vm9, %v5014_v31  ;;  %v5012_v18 = vpack.c.bf16 %v4350_v10, %v4350_v10  ;;  %v4094_v25 = vsel %vm4045_vm0, %v4091_v36, %v4093_v12  ;;  %v5452_v4 = vpop.f32.mrf.mxu1  ;;  %vm6927_vm8 = vcmp.ne.s32.totalorder %v778_v33, 15  ;;  %v3976_v33 = vld [vmem:[#allocation3 + $0xd8] sm:$0xff] }
 0x200   : > { %v4100_v34 = vsel %vm4045_vm0, %v4097_v16, %v4099_v6  ;;  %v4321_v62 = vld [vmem:[#allocation3 + $0x98] sm:$0xff]  ;;  %v4229_v11 = vsel %vm6865_vm5, %v4094_v25, 0.0  ;;  %v4095_v45 = vrot.slane %v3942_v38, 1  ;;  %v3947_v35 = vadd.f32 %v5485_v24, %v3585_v61  ;;  %v3905_v48 = vpop.f32.mrf.mxu0 }
 0x201   : > { %v5013_v43 = vpack.c.bf16 %v4351_v46, %v4351_v46  ;;  %v4264_v17 = vadd.f32 %v4100_v34, %v3975_v57  ;;  %4511 = vst.msk [vmem:[%s6712_s23 + $0x40] sm:$0xf] %vm4494_vm9, %v5012_v18  ;;  %v4353_v58 = vmax.f32 %v4321_v62, 0.0  ;;  %v4261_v22 = vadd.f32 %v4229_v11, %v3972_v44  ;;  %v3579_v53 = vpop.f32.mrf.mxu1  ;;  %v3980_v31 = vld [vmem:[#allocation3 + $0xf8] sm:$0xff]  ;;  %v3978_v57 = vld [vmem:[#allocation3 + $0xe8] sm:$0xff] }
 0x202   : > { %v4324_v36 = vld [vmem:[#allocation3 + $0xb0] sm:$0xff]  ;;  %v3945_v2 = vadd.f32 %v3902_v32, %v3577_v7  ;;  %v4096_v27 = vsel %vm4045_vm0, %v4093_v12, %v4095_v45  ;;  %v4098_v39 = vsel %vm4045_vm0, %v4095_v45, %v4097_v16  ;;  %v3588_v20 = vadd.f32 %v5452_v4, %v6601_v50  ;;  %v3977_v7 = vld [vmem:[#allocation3 + $0xe0] sm:$0xff] }
 0x203   : > { %4512 = vst.msk [vmem:[%s6712_s23 + $0x44] sm:$0xf] %vm4494_vm9, %v5013_v43  ;;  %v4356_v40 = vmax.f32 %v4324_v36, 0.0  ;;  %v5015_v49 = vpack.c.bf16 %v4353_v58, %v4353_v58  ;;  %v4231_v3 = vsel %vm6893_vm6, %v4098_v39, 0.0  ;;  %v4262_v30 = vadd.f32 %v4096_v27, %v3973_v8 }
 0x204   : > { %4296 = vst.msk [vmem:[#allocation3 + $0xd0] sm:$0xff] %vm1845_vm4, %v4264_v17  ;;  %v4322_v5 = vld [vmem:[#allocation3 + $0xa0] sm:$0xff]  ;;  %4293 = vst.msk [vmem:[#allocation3 + $0xb8] sm:$0xff] %vm1845_vm4, %v4261_v22  ;;  %v4101_v63 = vrot.slane %v3945_v2, 1  ;;  %v4323_v9 = vld [vmem:[#allocation3 + $0xa8] sm:$0xff]  ;;  %v4263_v28 = vadd.f32 %v4231_v3, %v3974_v29  ;;  %v3948_v15 = vadd.f32 %v5486_v1, %v3588_v20  ;;  %v3580_v26 = vadd.f32 %v3579_v53, %v6612_v41 }
 0x205   : > { %v5018_v37 = vpack.c.bf16 %v4356_v40, %v4356_v40  ;;  %v4354_v23 = vmax.f32 %v4322_v5, 0.0  ;;  %4514 = vst.msk [vmem:[%s6712_s23 + $0x4c] sm:$0xf] %vm4494_vm9, %v5015_v49  ;;  %v4355_v50 = vmax.f32 %v4323_v9, 0.0  ;;  %v764_v56 = vand.u32 15, %v6919_v14  ;;  %v3979_v41 = vld [vmem:[#allocation3 + $0xf0] sm:$0xff] }
 0x206   : > { %4294 = vst.msk [vmem:[#allocation3 + $0xc0] sm:$0xff] %vm1845_vm4, %v4262_v30  ;;  %v4102_v13 = vsel %vm4045_vm0, %v4099_v6, %v4101_v63  ;;  %4295 = vst.msk [vmem:[#allocation3 + $0xc8] sm:$0xff] %vm1845_vm4, %v4263_v28  ;;  %v4105_v24 = vrot.slane %v3947_v35, 1  ;;  %v4107_v47 = vrot.slane %v3948_v15, 1  ;;  %v3946_v21 = vadd.f32 %v3905_v48, %v3580_v26 }
 0x207   : > { %4517 = vst.msk [vmem:[%s6712_s23 + $0x58] sm:$0xf] %vm4494_vm9, %v5018_v37  ;;  %v5016_v19 = vpack.c.bf16 %v4354_v23, %v4354_v23  ;;  %v4233_v55 = vsel %vm6911_vm7, %v4102_v13, 0.0  ;;  %v5017_v42 = vpack.c.bf16 %v4355_v50, %v4355_v50  ;;  %vm6964_vm10 = vcmp.ne.s32.totalorder %v764_v56, 15 }
 0x208   : > { %v4265_v60 = vadd.f32 %v4233_v55, %v3976_v33  ;;  %v4108_v16 = vsel %vm4045_vm0, %v4105_v24, %v4107_v47  ;;  %v4141_v51 = vsel %vm4045_vm0, %v4107_v47, 0.0  ;;  %v4103_v12 = vrot.slane %v3946_v21, 1 }
 0x209   : > { %4515 = vst.msk [vmem:[%s6712_s23 + $0x50] sm:$0xf] %vm4494_vm9, %v5016_v19  ;;  %4516 = vst.msk [vmem:[%s6712_s23 + $0x54] sm:$0xf] %vm4494_vm9, %v5017_v42  ;;  %v4237_v59 = vsel %vm6927_vm8, %v4141_v51, 0.0  ;;  %v4268_v54 = vadd.f32 %v4108_v16, %v3979_v41 }
 0x20a   : > { %4297 = vst.msk [vmem:[#allocation3 + $0xd8] sm:$0xff] %vm1845_vm4, %v4265_v60  ;;  %v4269_v46 = vadd.f32 %v4237_v59, %v3980_v31  ;;  %v4104_v32 = vsel %vm4045_vm0, %v4101_v63, %v4103_v12  ;;  %v4106_v14 = vsel %vm4045_vm0, %v4103_v12, %v4105_v24 }
 0x20b   : > { %v4328_v61 = vld [vmem:[#allocation3 + $0xd0] sm:$0xff]  ;;  %v4325_v6 = vld [vmem:[#allocation3 + $0xb8] sm:$0xff]  ;;  %4300 = vst.msk [vmem:[#allocation3 + $0xf0] sm:$0xff] %vm1845_vm4, %v4268_v54  ;;  %v4235_v34 = vsel %vm6964_vm10, %v4106_v14, 0.0  ;;  %v4266_v4 = vadd.f32 %v4104_v32, %v3977_v7 }
 0x20c   : > { %v4360_v52 = vmax.f32 %v4328_v61, 0.0  ;;  %v4357_v38 = vmax.f32 %v4325_v6, 0.0  ;;  %4301 = vst.msk [vmem:[#allocation3 + $0xf8] sm:$0xff] %vm1845_vm4, %v4269_v46  ;;  %v4267_v44 = vadd.f32 %v4235_v34, %v3978_v57 }
 0x20d   : > { %v4326_v25 = vld [vmem:[#allocation3 + $0xc0] sm:$0xff]  ;;  %v4327_v43 = vld [vmem:[#allocation3 + $0xc8] sm:$0xff]  ;;  %4298 = vst.msk [vmem:[#allocation3 + $0xe0] sm:$0xff] %vm1845_vm4, %v4266_v4 }
 0x20e   : > { %v5022_v18 = vpack.c.bf16 %v4360_v52, %v4360_v52  ;;  %v5019_v0 = vpack.c.bf16 %v4357_v38, %v4357_v38  ;;  %v4358_v62 = vmax.f32 %v4326_v25, 0.0  ;;  %v4359_v11 = vmax.f32 %v4327_v43, 0.0  ;;  %4299 = vst.msk [vmem:[#allocation3 + $0xe8] sm:$0xff] %vm1845_vm4, %v4267_v44 }
 0x210   : > { %4521 = vst.msk [vmem:[%s6712_s23 + $0x68] sm:$0xf] %vm4494_vm9, %v5022_v18  ;;  %4518 = vst.msk [vmem:[%s6712_s23 + $0x5c] sm:$0xf] %vm4494_vm9, %v5019_v0  ;;  %v5020_v17 = vpack.c.bf16 %v4358_v62, %v4358_v62  ;;  %v5021_v45 = vpack.c.bf16 %v4359_v11, %v4359_v11 }
 0x211   : > { %v4329_v58 = vld [vmem:[#allocation3 + $0xd8] sm:$0xff] }
 0x212   : > { %4519 = vst.msk [vmem:[%s6712_s23 + $0x60] sm:$0xf] %vm4494_vm9, %v5020_v17  ;;  %v4361_v36 = vmax.f32 %v4329_v58, 0.0  ;;  %4520 = vst.msk [vmem:[%s6712_s23 + $0x64] sm:$0xf] %vm4494_vm9, %v5021_v45  ;;  %v4332_v22 = vld [vmem:[#allocation3 + $0xf0] sm:$0xff] }
 0x213   : > { %v4333_v2 = vld [vmem:[#allocation3 + $0xf8] sm:$0xff]  ;;  %v4364_v40 = vmax.f32 %v4332_v22, 0.0 }
 0x214   : > { %v5023_v35 = vpack.c.bf16 %v4361_v36, %v4361_v36  ;;  %v4365_v8 = vmax.f32 %v4333_v2, 0.0  ;;  %v4330_v39 = vld [vmem:[#allocation3 + $0xe0] sm:$0xff] }
 0x215   : > { %v5026_v27 = vpack.c.bf16 %v4364_v40, %v4364_v40  ;;  %v4331_v1 = vld [vmem:[#allocation3 + $0xe8] sm:$0xff]  ;;  %v4362_v53 = vmax.f32 %v4330_v39, 0.0 }
 0x216   : > { %4522 = vst.msk [vmem:[%s6712_s23 + $0x6c] sm:$0xf] %vm4494_vm9, %v5023_v35  ;;  %v5027_v20 = vpack.c.bf16 %v4365_v8, %v4365_v8  ;;  %v4363_v49 = vmax.f32 %v4331_v1, 0.0 }
 0x217   : > { %4525 = vst.msk [vmem:[%s6712_s23 + $0x78] sm:$0xf] %vm4494_vm9, %v5026_v27  ;;  %v5024_v5 = vpack.c.bf16 %v4362_v53, %v4362_v53 }
 0x218   : > { %4526 = vst.msk [vmem:[%s6712_s23 + $0x7c] sm:$0xf] %vm4494_vm9, %v5027_v20  ;;  %v5025_v29 = vpack.c.bf16 %v4363_v49, %v4363_v49 }
 0x219   : > { %4523 = vst.msk [vmem:[%s6712_s23 + $0x70] sm:$0xf] %vm4494_vm9, %v5024_v5 }
 0x21a   : > { %4524 = vst.msk [vmem:[%s6712_s23 + $0x74] sm:$0xf] %vm4494_vm9, %v5025_v29 }
 0x21b PF: > { %s15_s0 = sadd.s32 1, %s5636_s0   ;;  %s7099_s18 = smov %s5632_s19 }
 0x21c   : > { %p12_p5 = scmp.ge.s32.totalorder %s15_s0, 4   ;;  %s7100_s19 = smov %s7102_s2 }
 0x21e   :  { %14 = sbr.rel (!%p12_p5) target bundleno = 2 (0x2), region = 90 }

// kernel: _lambda_.6
= control target key start
LH: loop header
LB: loop body
LE: loop exit
PB: predicated region body
PF: predicated region fallthrough
CT: control target
= control target key end

     0   :  { %s6130_s18 = smov 0   ;;  %s6132_s19 = smov 0   ;;  %s7540_s0 = inlined_call_operand.vmem [shape: bf16[2,256,64], index: 0, kind: input, shape index: {}, may-alias: {0,1,2}]   ;;  %s7541_s1 = inlined_call_operand.vmem [shape: bf16[2,256,64], index: 1, kind: input, shape index: {}, may-alias: {0,1,2}]   ;;  %s7542_s2 = inlined_call_operand.vmem [shape: bf16[2,256,64], index: 2, kind: input, shape index: {}, may-alias: {0,1,2}]   ;;  %s7543_s3 = inlined_call_operand.vmem [shape: bf16[9,64,64], index: 3, kind: input, shape index: {}]   ;;  %s7544_s4 = inlined_call_operand.vmem [shape: f32[1,64], index: 4, kind: input, shape index: {}]   ;;  %s7545_s5 = inlined_call_operand.vmem [shape: bf16[2,256,64], index: 5, kind: output, shape index: {}]  }
   0x1   :  { %s6134_s0 = smov 0  }
   0x2 LB: > { %s34_s2 = sadd.s32 1, %s6093_s19  ;;  %p4943_p0 = scmp.ge.s32.totalorder %s6097_s0, 1  ;;  %s6097_s0 = sphi %s6134_s0, %s15_s0   ;;  %s6093_s19 = sphi %s6132_s19, %s7637_s19   ;;  %s6089_s18 = sphi %s6130_s18, %s7636_s18  }
   0x3   : > { %p36_p1 = scmp.ge.s32.totalorder %s34_s2, 2  ;;  %p300_p2 = scmp.lt.s32.totalorder %s6097_s0, 3 }
   0x5   : > { %s7639_s2 = smov (%p36_p1, %s34_s2), 0  ;;  %p301_p3 = pnand %p4943_p0, %p300_p2 }
   0x7   : > { %304 = sbr.rel (%p301_p3) target bundleno = 535 (0x217), region = 40 }
   0xc   : > { %v5940_v0 = vld [vmem:[%s7543_s3 + $0x98] sm:$0xff]   ;;  %p391_p4 = scmp.lt.s32.totalorder %s6089_s18, 1  ;;  %v5941_v1 = vld [vmem:[%s7543_s3 + $0x90] sm:$0xff]   ;;  %vm455_vm0 = vcmask 519168   ;;  %v5942_v2 = vld [vmem:[%s7543_s3 + $0x88] sm:$0xff]   ;;  %v6099_v7 = vmov 0  }
   0xd   : > { %5547 = vmatprep.subr.bf16.mxu0 %v5940_v0  ;;  %5907 = vmatprep.subr.bf16.mxu1 %v5940_v0  ;;  %v5943_v3 = vld [vmem:[%s7543_s3 + $0x80] sm:$0xff]   ;;  %456 = vst.msk [vmem:[#allocation2] sm:$0xf] %vm455_vm0, %v6099_v7  ;;  %457 = vst.msk [vmem:[#allocation2 + $0x4] sm:$0xf] %vm455_vm0, %v6099_v7  ;;  %v5948_v21 = vld [vmem:[%s7543_s3 + $0x78] sm:$0xff]  }
   0xe   : > { %s7641_s18 = smov (!%p391_p4, %s6089_s18), 1  ;;  %5548 = vmatpush3.bf16.msra.mxu0 %v5940_v0  ;;  %5911 = vmatpush3.bf16.msra.mxu1 %v5940_v0  ;;  %522 = vst.msk [vmem:[#allocation2 + $0x88] sm:$0xf] %vm455_vm0, %v6099_v7  ;;  %523 = vst.msk [vmem:[#allocation2 + $0x8c] sm:$0xf] %vm455_vm0, %v6099_v7  ;;  %vm1097_vm1 = vcmask 523264  }
   0xf   : > { %5549 = vmatprep.subr.bf16.mxu0 %v5941_v1  ;;  %5908 = vmatprep.subr.bf16.mxu1 %v5941_v1  ;;  %s5331_s26 = sshll.u32 %s7641_s18, 7  ;;  %v5949_v22 = vld [vmem:[%s7543_s3 + $0xb8] sm:$0xff]   ;;  %v5954_v27 = vld [vmem:[%s7543_s3 + $0x70] sm:$0xff]   ;;  %v5960_v42 = vld [vmem:[%s7543_s3 + $0x68] sm:$0xff]   ;;  %vm2996_vm2 = vcmask 1040384  }
  0x10   : > { %s6165_s29 = scalar_lea.vmem %s7541_s1, %s5331_s26  ;;  %v5955_v29 = vld [vmem:[%s7543_s3 + $0xb0] sm:$0xff]   ;;  %v5961_v43 = vld [vmem:[%s7543_s3 + $0xa8] sm:$0xff]   ;;  %v5966_v52 = vld [vmem:[%s7543_s3 + $0x60] sm:$0xff]   ;;  %s7249_s9 = scalar_lea.vmem %s7545_s5, %s5331_s26 }
  0x11   : > { %v458_v4 = vld [vmem:[%s6165_s29] sm:$0xf]  ;;  %v459_v5 = vld [vmem:[%s6165_s29 + $0x4] sm:$0xf]  ;;  %v460_v9 = vld [vmem:[%s6165_s29 + $0x8] sm:$0xf] }
  0x12   : > { %v474_v6 = vld [vmem:[%s6165_s29 + $0x40] sm:$0xf]  ;;  %5550 = vmatpush3.bf16.msra.mxu0 %v5941_v1  ;;  %5912 = vmatpush3.bf16.msra.mxu1 %v5941_v1  ;;  %490 = vst.msk [vmem:[#allocation2 + $0x8] sm:$0xf] %vm455_vm0, %v458_v4  ;;  %491 = vst.msk [vmem:[#allocation2 + $0xc] sm:$0xf] %vm455_vm0, %v459_v5 }
  0x13   : > { %v475_v8 = vld [vmem:[%s6165_s29 + $0x44] sm:$0xf]  ;;  %506 = vst.msk [vmem:[#allocation2 + $0x48] sm:$0xf] %vm455_vm0, %v474_v6  ;;  %v461_v10 = vld [vmem:[%s6165_s29 + $0xc] sm:$0xf]  ;;  %5551 = vmatprep.subr.bf16.mxu0 %v5942_v2  ;;  %5909 = vmatprep.subr.bf16.mxu1 %v5942_v2 }
  0x14   : > { %507 = vst.msk [vmem:[#allocation2 + $0x4c] sm:$0xf] %vm455_vm0, %v475_v8  ;;  %492 = vst.msk [vmem:[#allocation2 + $0x10] sm:$0xf] %vm455_vm0, %v460_v9  ;;  %v476_v11 = vld [vmem:[%s6165_s29 + $0x48] sm:$0xf] }
  0x15   : > { %493 = vst.msk [vmem:[#allocation2 + $0x14] sm:$0xf] %vm455_vm0, %v461_v10  ;;  %v477_v12 = vld [vmem:[%s6165_s29 + $0x4c] sm:$0xf]  ;;  %v462_v13 = vld [vmem:[%s6165_s29 + $0x10] sm:$0xf] }
  0x16   : > { %508 = vst.msk [vmem:[#allocation2 + $0x50] sm:$0xf] %vm455_vm0, %v476_v11  ;;  %509 = vst.msk [vmem:[#allocation2 + $0x54] sm:$0xf] %vm455_vm0, %v477_v12  ;;  %v463_v14 = vld [vmem:[%s6165_s29 + $0x14] sm:$0xf]  ;;  %5552 = vmatpush3.bf16.msra.mxu0 %v5942_v2  ;;  %5913 = vmatpush3.bf16.msra.mxu1 %v5942_v2 }
  0x17   : > { %494 = vst.msk [vmem:[#allocation2 + $0x18] sm:$0xf] %vm455_vm0, %v462_v13  ;;  %v478_v15 = vld [vmem:[%s6165_s29 + $0x50] sm:$0xf]  ;;  %v479_v16 = vld [vmem:[%s6165_s29 + $0x54] sm:$0xf]  ;;  %5553 = vmatprep.subr.bf16.mxu0 %v5943_v3  ;;  %5910 = vmatprep.subr.bf16.mxu1 %v5943_v3 }
  0x18   : > { %495 = vst.msk [vmem:[#allocation2 + $0x1c] sm:$0xf] %vm455_vm0, %v463_v14  ;;  %510 = vst.msk [vmem:[#allocation2 + $0x58] sm:$0xf] %vm455_vm0, %v478_v15  ;;  %v464_v17 = vld [vmem:[%s6165_s29 + $0x18] sm:$0xf] }
  0x19   : > { %511 = vst.msk [vmem:[#allocation2 + $0x5c] sm:$0xf] %vm455_vm0, %v479_v16  ;;  %v465_v18 = vld [vmem:[%s6165_s29 + $0x1c] sm:$0xf]  ;;  %v480_v19 = vld [vmem:[%s6165_s29 + $0x58] sm:$0xf] }
  0x1a   : > { %496 = vst.msk [vmem:[#allocation2 + $0x20] sm:$0xf] %vm455_vm0, %v464_v17  ;;  %497 = vst.msk [vmem:[#allocation2 + $0x24] sm:$0xf] %vm455_vm0, %v465_v18  ;;  %v481_v20 = vld [vmem:[%s6165_s29 + $0x5c] sm:$0xf]  ;;  %5554 = vmatpush3.bf16.msra.mxu0 %v5943_v3  ;;  %5914 = vmatpush3.bf16.msra.mxu1 %v5943_v3 }
  0x1b   : > { %512 = vst.msk [vmem:[#allocation2 + $0x60] sm:$0xf] %vm455_vm0, %v480_v19  ;;  %513 = vst.msk [vmem:[#allocation2 + $0x64] sm:$0xf] %vm455_vm0, %v481_v20  ;;  %v466_v23 = vld [vmem:[%s6165_s29 + $0x20] sm:$0xf]  ;;  %5587 = vmatprep.subr.bf16.mxu1 %v5948_v21  ;;  %5627 = vmatprep.subr.bf16.mxu0 %v5949_v22 }
  0x1c   : > { %v467_v24 = vld [vmem:[%s6165_s29 + $0x24] sm:$0xf]  ;;  %v6214_v25 = vld [vmem:[#allocation2 + $0x8] sm:$0xff]   ;;  %498 = vst.msk [vmem:[#allocation2 + $0x28] sm:$0xf] %vm455_vm0, %v466_v23  ;;  %v6225_v28 = vld [vmem:[#allocation2 + $0x10] sm:$0xff]  }
  0x1d   : > { %499 = vst.msk [vmem:[#allocation2 + $0x2c] sm:$0xf] %vm455_vm0, %v467_v24  ;;  %v6218_v26 = vld [vmem:[#allocation2 + $0x48] sm:$0xff]   ;;  %5555 = vmatprep.mubr.msk.bf16.mxu0 %vm1097_vm1, %v6214_v25  ;;  %v6232_v30 = vld [vmem:[#allocation2 + $0x50] sm:$0xff]   ;;  %v482_v36 = vld [vmem:[%s6165_s29 + $0x60] sm:$0xf] }
  0x1e   : > { %5571 = vmatprep.mubr.msk.bf16.mxu1 %vm1097_vm1, %v6218_v26  ;;  %5556 = vmatmul.mubr.msk.bf16.vlgmr.msra.gmra.mxu0 %vm1097_vm1, %v6225_v28  ;;  %v483_v37 = vld [vmem:[%s6165_s29 + $0x64] sm:$0xf]  ;;  %v468_v38 = vld [vmem:[%s6165_s29 + $0x28] sm:$0xf]  ;;  %514 = vst.msk [vmem:[#allocation2 + $0x68] sm:$0xf] %vm455_vm0, %v482_v36 }
  0x1f   : > { %v6236_v31 = vld [vmem:[#allocation2 + $0x18] sm:$0xff]   ;;  %5572 = vmatmul.mubr.msk.bf16.vlgmr.msra.gmra.mxu1 %vm1097_vm1, %v6232_v30  ;;  %5628 = vmatpush3.bf16.msra.mxu0 %v5949_v22  ;;  %515 = vst.msk [vmem:[#allocation2 + $0x6c] sm:$0xf] %vm455_vm0, %v483_v37  ;;  %v469_v39 = vld [vmem:[%s6165_s29 + $0x2c] sm:$0xf]  ;;  %v5967_v56 = vld [vmem:[%s7543_s3 + $0xa0] sm:$0xff]  }
  0x20   : > { %v6240_v32 = vld [vmem:[#allocation2 + $0x58] sm:$0xff]   ;;  %5588 = vmatpush3.bf16.msra.mxu1 %v5948_v21  ;;  %5559 = vmatprep.mubr.msk.bf16.mxu0 %vm1097_vm1, %v6236_v31  ;;  %500 = vst.msk [vmem:[#allocation2 + $0x30] sm:$0xf] %vm455_vm0, %v468_v38  ;;  %v484_v40 = vld [vmem:[%s6165_s29 + $0x68] sm:$0xf]  ;;  %v5968_v61 = vld [vmem:[#allocation2] sm:$0xff]  }
  0x21   : > { %v6244_v33 = vld [vmem:[#allocation2 + $0x20] sm:$0xff]   ;;  %5575 = vmatprep.mubr.msk.bf16.mxu1 %vm1097_vm1, %v6240_v32  ;;  %5589 = vmatprep.subr.bf16.mxu1 %v5954_v27  ;;  %v485_v41 = vld [vmem:[%s6165_s29 + $0x6c] sm:$0xf]  ;;  %501 = vst.msk [vmem:[#allocation2 + $0x34] sm:$0xf] %vm455_vm0, %v469_v39  ;;  %v5969_v62 = vld [vmem:[#allocation2 + $0x10] sm:$0xff]  }
  0x22   : > { %v6248_v34 = vld [vmem:[#allocation2 + $0x60] sm:$0xff]   ;;  %5629 = vmatprep.subr.bf16.mxu0 %v5955_v29  ;;  %516 = vst.msk [vmem:[#allocation2 + $0x70] sm:$0xf] %vm455_vm0, %v484_v40  ;;  %517 = vst.msk [vmem:[#allocation2 + $0x74] sm:$0xf] %vm455_vm0, %v485_v41  ;;  %v5971_v63 = vld [vmem:[%s7543_s3 + $0x38] sm:$0xff]  }
  0x23   : > { %5630 = vmatpush3.bf16.msra.mxu0 %v5955_v29  ;;  %v470_v44 = vld [vmem:[%s6165_s29 + $0x30] sm:$0xf]  ;;  %v471_v45 = vld [vmem:[%s6165_s29 + $0x34] sm:$0xf]  ;;  %v472_v48 = vld [vmem:[%s6165_s29 + $0x38] sm:$0xf] }
  0x24   : > { %v6250_v35 = vld [vmem:[#allocation2 + $0x28] sm:$0xff]   ;;  %5590 = vmatpush3.bf16.msra.mxu1 %v5954_v27  ;;  %v486_v46 = vld [vmem:[%s6165_s29 + $0x70] sm:$0xf]  ;;  %5631 = vmatprep.subr.bf16.mxu0 %v5961_v43  ;;  %502 = vst.msk [vmem:[#allocation2 + $0x38] sm:$0xf] %vm455_vm0, %v470_v44  ;;  %v5972_v0 = vld [vmem:[%s7543_s3 + $0x18] sm:$0xff]  }
  0x25   : > { %5591 = vmatprep.subr.bf16.mxu1 %v5960_v42  ;;  %503 = vst.msk [vmem:[#allocation2 + $0x3c] sm:$0xf] %vm455_vm0, %v471_v45  ;;  %v487_v47 = vld [vmem:[%s6165_s29 + $0x74] sm:$0xf]  ;;  %518 = vst.msk [vmem:[#allocation2 + $0x78] sm:$0xf] %vm455_vm0, %v486_v46 }
  0x26   : > { %5560 = vmatmul.mubr.msk.bf16.gmra.mxu0 %vm1097_vm1, %v6244_v33  ;;  %v473_v49 = vld [vmem:[%s6165_s29 + $0x3c] sm:$0xf]  ;;  %519 = vst.msk [vmem:[#allocation2 + $0x7c] sm:$0xf] %vm455_vm0, %v487_v47  ;;  %504 = vst.msk [vmem:[#allocation2 + $0x40] sm:$0xf] %vm455_vm0, %v472_v48 }
  0x27   : > { %5576 = vmatmul.mubr.msk.bf16.gmra.mxu1 %vm1097_vm1, %v6248_v34  ;;  %5563 = vmatprep.mubr.msk.bf16.mxu0 %vm1097_vm1, %v6250_v35  ;;  %505 = vst.msk [vmem:[#allocation2 + $0x44] sm:$0xf] %vm455_vm0, %v473_v49  ;;  %v488_v50 = vld [vmem:[%s6165_s29 + $0x78] sm:$0xf]  ;;  %v489_v51 = vld [vmem:[%s6165_s29 + $0x7c] sm:$0xf] }
  0x28   : > { %5592 = vmatpush3.bf16.msra.mxu1 %v5960_v42  ;;  %5632 = vmatpush3.bf16.msra.mxu0 %v5961_v43  ;;  %520 = vst.msk [vmem:[#allocation2 + $0x80] sm:$0xf] %vm455_vm0, %v488_v50  ;;  %521 = vst.msk [vmem:[#allocation2 + $0x84] sm:$0xf] %vm455_vm0, %v489_v51  ;;  %v6295_v53 = vld [vmem:[#allocation2 + $0x68] sm:$0xff]   ;;  %v6297_v54 = vld [vmem:[#allocation2 + $0x30] sm:$0xff]  }
  0x29   : > { %5593 = vmatprep.subr.bf16.mxu1 %v5966_v52  ;;  %5579 = vmatprep.mubr.msk.bf16.mxu1 %vm1097_vm1, %v6295_v53  ;;  %v6301_v55 = vld [vmem:[#allocation2 + $0x70] sm:$0xff]   ;;  %v5970_v1 = vld [vmem:[#allocation2 + $0x18] sm:$0xff]   ;;  %v5973_v2 = vld [vmem:[#allocation2 + $0x20] sm:$0xff]  }
  0x2a   : > { %5633 = vmatprep.subr.bf16.mxu0 %v5967_v56  ;;  %v5977_v3 = vld [vmem:[%s7543_s3 + $0x30] sm:$0xff]   ;;  %v5974_v5 = vld [vmem:[#allocation2 + $0x28] sm:$0xff]   ;;  %v5989_v9 = vld [vmem:[%s7543_s3 + $0x20] sm:$0xff]  }
  0x2b   : > { %v5978_v4 = vld [vmem:[%s7543_s3 + $0x10] sm:$0xff]   ;;  %v5983_v7 = vld [vmem:[%s7543_s3 + $0x28] sm:$0xff]   ;;  %v5990_v10 = vld [vmem:[%s7543_s3] sm:$0xff]  }
  0x2c   : > { %5594 = vmatpush3.bf16.msra.mxu1 %v5966_v52  ;;  %v6310_v57 = vld [vmem:[#allocation2 + $0x38] sm:$0xff]   ;;  %5634 = vmatpush3.bf16.msra.mxu0 %v5967_v56  ;;  %v5975_v6 = vld [vmem:[#allocation2 + $0x30] sm:$0xff]   ;;  %v5984_v8 = vld [vmem:[%s7543_s3 + $0x8] sm:$0xff]  }
  0x2d   : > { %v6312_v58 = vld [vmem:[#allocation2 + $0x78] sm:$0xff]   ;;  %5667 = vmatprep.subr.bf16.mxu1 %v5971_v63  ;;  %5707 = vmatprep.subr.bf16.mxu0 %v5972_v0  ;;  %v5980_v15 = vld [vmem:[#allocation2 + $0x48] sm:$0xff]   ;;  %v5981_v16 = vld [vmem:[#allocation2 + $0x50] sm:$0xff]  }
  0x2e   : > { %5564 = vmatmul.mubr.msk.bf16.gmra.mxu0 %vm1097_vm1, %v6297_v54  ;;  %v5964_v59 = vld [vmem:[#allocation2 + $0x40] sm:$0xff]   ;;  %v5976_v11 = vld [vmem:[#allocation2 + $0x38] sm:$0xff]   ;;  %v5986_v19 = vld [vmem:[#allocation2 + $0x68] sm:$0xff]  }
  0x2f   : > { %5580 = vmatmul.mubr.msk.bf16.gmra.mxu1 %vm1097_vm1, %v6301_v55  ;;  %5567 = vmatprep.mubr.msk.bf16.mxu0 %vm1097_vm1, %v6310_v57  ;;  %v5965_v60 = vld [vmem:[#allocation2 + $0x80] sm:$0xff]   ;;  %v5996_v13 = vld [vmem:[%s7543_s3 + $0x58] sm:$0xff]   ;;  %v5987_v20 = vld [vmem:[#allocation2 + $0x70] sm:$0xff]  }
  0x30   : > { %5583 = vmatprep.mubr.msk.bf16.mxu1 %vm1097_vm1, %v6312_v58  ;;  %v5979_v12 = vld [vmem:[#allocation2 + $0x40] sm:$0xff]   ;;  %v5997_v14 = vld [vmem:[%s7543_s3 + $0xf8] sm:$0xff]   ;;  %v5992_v23 = vld [vmem:[#allocation2 + $0x88] sm:$0xff]  }
  0x31   : > { %v5982_v17 = vld [vmem:[#allocation2 + $0x58] sm:$0xff]   ;;  %v5985_v18 = vld [vmem:[#allocation2 + $0x60] sm:$0xff]   ;;  %v6003_v29 = vld [vmem:[%s7543_s3 + $0xf0] sm:$0xff]  }
  0x32   : > { %v5988_v21 = vld [vmem:[#allocation2 + $0x78] sm:$0xff]   ;;  %v5991_v22 = vld [vmem:[#allocation2 + $0x80] sm:$0xff]   ;;  %v6001_v38 = vld [vmem:[#allocation2 + $0x30] sm:$0xff]  }
  0x33   : > { %v5994_v24 = vld [vmem:[#allocation2] sm:$0xff]   ;;  %v5998_v27 = vld [vmem:[#allocation2 + $0x18] sm:$0xff]   ;;  %v6006_v41 = vld [vmem:[#allocation2 + $0x48] sm:$0xff]  }
  0x34   : > { %v6022_v36 = vld [vmem:[%s7543_s3 + $0xd8] sm:$0xff]   ;;  %v6005_v40 = vld [vmem:[#allocation2 + $0x40] sm:$0xff]   ;;  %v6007_v42 = vld [vmem:[#allocation2 + $0x50] sm:$0xff]  }
  0x35   : > { %v6023_v37 = vld [vmem:[%s7543_s3 + $0x118] sm:$0xff]   ;;  %v6011_v44 = vld [vmem:[#allocation2 + $0x60] sm:$0xff]   ;;  %v6012_v45 = vld [vmem:[#allocation2 + $0x68] sm:$0xff]  }
  0x36   : > { %5568 = vmatmul.mubr.msk.bf16.gmra.mxu0 %vm1097_vm1, %v5964_v59  ;;  %v6004_v39 = vld [vmem:[#allocation2 + $0x38] sm:$0xff]   ;;  %v6013_v46 = vld [vmem:[#allocation2 + $0x70] sm:$0xff]   ;;  %v6017_v48 = vld [vmem:[#allocation2 + $0x80] sm:$0xff]  }
  0x37   : > { %5584 = vmatmul.mubr.msk.bf16.gmra.mxu1 %vm1097_vm1, %v5965_v60  ;;  %5635 = vmatprep.mubr.msk.bf16.mxu0 %vm1097_vm1, %v5969_v62  ;;  %v6010_v43 = vld [vmem:[#allocation2 + $0x58] sm:$0xff]   ;;  %v6450_v49 = vld [vmem:[#allocation2 + $0x8] sm:$0xff]   ;;  %v6018_v50 = vld [vmem:[#allocation2 + $0x10] sm:$0xff]  }
  0x38   : > { %5595 = vmatprep.mubr.msk.bf16.mxu1 %vm1097_vm1, %v5968_v61  ;;  %v6016_v47 = vld [vmem:[#allocation2 + $0x78] sm:$0xff]   ;;  %v6457_v51 = vld [vmem:[#allocation2 + $0x10] sm:$0xff]   ;;  %v6026_v60 = vld [vmem:[#allocation2 + $0x28] sm:$0xff]  }
  0x39   : > { %v6020_v52 = vld [vmem:[#allocation2 + $0x18] sm:$0xff]   ;;  %v6033_v56 = vld [vmem:[%s7543_s3 + $0x110] sm:$0xff]   ;;  %v6481_v61 = vld [vmem:[#allocation2 + $0x28] sm:$0xff]  }
  0x3a   : > { %v6028_v62 = vld [vmem:[#allocation2 + $0x30] sm:$0xff]  }
  0x3e   : > { %5636 = vmatmul.mubr.msk.bf16.vlgmr.msra.gmra.mxu0 %vm1097_vm1, %v5970_v1  ;;  %v6495_v1 = vld [vmem:[#allocation2 + $0x30] sm:$0xff]  }
  0x3f   : > { %5596 = vmatmul.mubr.msk.bf16.vlgmr.msra.gmra.mxu1 %vm1097_vm1, %v6214_v25  ;;  %5708 = vmatpush3.bf16.msra.mxu0 %v5972_v0  ;;  %v5993_v25 = vld [vmem:[#allocation2 + $0x8] sm:$0xff]   ;;  %v6053_v0 = vld [vmem:[%s7543_s3 + $0x100] sm:$0xff]  }
  0x40   : > { %5668 = vmatpush3.bf16.msra.mxu1 %v5971_v63  ;;  %5599 = vmatprep.mubr.msk.bf16.mxu1 %vm1097_vm1, %v6225_v28  ;;  %v6002_v28 = vld [vmem:[%s7543_s3 + $0x50] sm:$0xff]   ;;  %v6052_v63 = vld [vmem:[%s7543_s3 + $0xc0] sm:$0xff]  }
  0x41   : > { %5639 = vmatprep.mubr.msk.bf16.mxu0 %vm1097_vm1, %v5973_v2  ;;  %5669 = vmatprep.subr.bf16.mxu1 %v5977_v3  ;;  %v6030_v2 = vld [vmem:[#allocation2 + $0x38] sm:$0xff]  }
  0x42   : > { %5709 = vmatprep.subr.bf16.mxu0 %v5978_v4 }
  0x43   : > { %5710 = vmatpush3.bf16.msra.mxu0 %v5978_v4  ;;  %v6034_v4 = vld [vmem:[#allocation2 + $0x40] sm:$0xff]  }
  0x44   : > { %5670 = vmatpush3.bf16.msra.mxu1 %v5977_v3  ;;  %5711 = vmatprep.subr.bf16.mxu0 %v5984_v8  ;;  %v6497_v3 = vld [vmem:[#allocation2 + $0x38] sm:$0xff]  }
  0x45   : > { %5671 = vmatprep.subr.bf16.mxu1 %v5983_v7 }
  0x46   : > { %5640 = vmatmul.mubr.msk.bf16.gmra.mxu0 %vm1097_vm1, %v5974_v5  ;;  %v6505_v5 = vld [vmem:[#allocation2 + $0x40] sm:$0xff]  }
  0x47   : > { %5600 = vmatmul.mubr.msk.bf16.gmra.mxu1 %vm1097_vm1, %v6236_v31  ;;  %5643 = vmatprep.mubr.msk.bf16.mxu0 %vm1097_vm1, %v5975_v6  ;;  %v6008_v31 = vld [vmem:[%s7543_s3 + $0x48] sm:$0xff]  }
  0x48   : > { %5603 = vmatprep.mubr.msk.bf16.mxu1 %vm1097_vm1, %v6244_v33  ;;  %5672 = vmatpush3.bf16.msra.mxu1 %v5983_v7  ;;  %v6000_v33 = vld [vmem:[#allocation2 + $0x28] sm:$0xff]  }
  0x49   : > { %5712 = vmatpush3.bf16.msra.mxu0 %v5984_v8  ;;  %5673 = vmatprep.subr.bf16.mxu1 %v5989_v9  ;;  %v6036_v6 = vld [vmem:[#allocation2 + $0x48] sm:$0xff]   ;;  %v6038_v8 = vld [vmem:[#allocation2 + $0x50] sm:$0xff]  }
  0x4a   : > { %5713 = vmatprep.subr.bf16.mxu0 %v5990_v10  ;;  %v6507_v7 = vld [vmem:[#allocation2 + $0x48] sm:$0xff]  }
  0x4c   : > { %5674 = vmatpush3.bf16.msra.mxu1 %v5989_v9  ;;  %v6515_v9 = vld [vmem:[#allocation2 + $0x50] sm:$0xff]  }
  0x4d   : > { %5714 = vmatpush3.bf16.msra.mxu0 %v5990_v10  ;;  %5747 = vmatprep.subr.bf16.mxu1 %v5996_v13  ;;  %v6040_v10 = vld [vmem:[#allocation2 + $0x58] sm:$0xff]  }
  0x4e   : > { %5644 = vmatmul.mubr.msk.bf16.gmra.mxu0 %vm1097_vm1, %v5976_v11  ;;  %5787 = vmatprep.subr.bf16.mxu0 %v5997_v14  ;;  %v6517_v11 = vld [vmem:[#allocation2 + $0x58] sm:$0xff]  }
  0x4f   : > { %5604 = vmatmul.mubr.msk.bf16.gmra.mxu1 %vm1097_vm1, %v6250_v35  ;;  %5647 = vmatprep.mubr.msk.bf16.mxu0 %vm1097_vm1, %v5979_v12  ;;  %v6015_v35 = vld [vmem:[%s7543_s3 + $0xe0] sm:$0xff]  }
  0x50   : > { %5607 = vmatprep.mubr.msk.bf16.mxu1 %vm1097_vm1, %v6297_v54  ;;  %v6459_v54 = vld [vmem:[#allocation2 + $0x18] sm:$0xff]   ;;  %v6044_v12 = vld [vmem:[#allocation2 + $0x60] sm:$0xff]  }
  0x56   : > { %5648 = vmatmul.mubr.msk.bf16.gmra.mxu0 %vm1097_vm1, %v5980_v15 }
  0x57   : > { %5608 = vmatmul.mubr.msk.bf16.gmra.mxu1 %vm1097_vm1, %v6310_v57  ;;  %5651 = vmatprep.mubr.msk.bf16.mxu0 %vm1097_vm1, %v5981_v16  ;;  %v6043_v57 = vld [vmem:[%s7543_s3 + $0x108] sm:$0xff]  }
  0x58   : > { %5611 = vmatprep.mubr.msk.bf16.mxu1 %vm1097_vm1, %v5964_v59  ;;  %v6479_v59 = vld [vmem:[#allocation2 + $0x20] sm:$0xff]  }
  0x5e   : > { %5652 = vmatmul.mubr.msk.bf16.gmra.mxu0 %vm1097_vm1, %v5982_v17 }
  0x5f   : > { %5612 = vmatmul.mubr.msk.bf16.gmra.mxu1 %vm1097_vm1, %v6218_v26  ;;  %5655 = vmatprep.mubr.msk.bf16.mxu0 %vm1097_vm1, %v5985_v18  ;;  %v5995_v26 = vld [vmem:[#allocation2 + $0x10] sm:$0xff]   ;;  %v6535_v18 = vld [vmem:[#allocation2 + $0x60] sm:$0xff]  }
  0x60   : > { %5615 = vmatprep.mubr.msk.bf16.mxu1 %vm1097_vm1, %v6232_v30  ;;  %v6009_v30 = vld [vmem:[%s7543_s3 + $0xe8] sm:$0xff]  }
  0x66   : > { %5656 = vmatmul.mubr.msk.bf16.gmra.mxu0 %vm1097_vm1, %v5986_v19 }
  0x67   : > { %5616 = vmatmul.mubr.msk.bf16.gmra.mxu1 %vm1097_vm1, %v6240_v32  ;;  %5659 = vmatprep.mubr.msk.bf16.mxu0 %vm1097_vm1, %v5987_v20  ;;  %v5999_v32 = vld [vmem:[#allocation2 + $0x20] sm:$0xff]   ;;  %v6046_v20 = vld [vmem:[#allocation2 + $0x68] sm:$0xff]  }
  0x68   : > { %5619 = vmatprep.mubr.msk.bf16.mxu1 %vm1097_vm1, %v6248_v34  ;;  %v6014_v34 = vld [vmem:[%s7543_s3 + $0x40] sm:$0xff]  }
  0x6e   : > { %5660 = vmatmul.mubr.msk.bf16.gmra.mxu0 %vm1097_vm1, %v5988_v21  ;;  %v6539_v21 = vld [vmem:[#allocation2 + $0x68] sm:$0xff]  }
  0x6f   : > { %5620 = vmatmul.mubr.msk.bf16.gmra.mxu1 %vm1097_vm1, %v6295_v53  ;;  %5663 = vmatprep.mubr.msk.bf16.mxu0 %vm1097_vm1, %v5991_v22  ;;  %v6024_v53 = vld [vmem:[#allocation2 + $0x20] sm:$0xff]  }
  0x70   : > { %5623 = vmatprep.mubr.msk.bf16.mxu1 %vm1097_vm1, %v6301_v55  ;;  %v6032_v55 = vld [vmem:[%s7543_s3 + $0xd0] sm:$0xff]  }
  0x76   : > { %5664 = vmatmul.mubr.msk.bf16.gmra.mxu0 %vm1097_vm1, %v5992_v23  ;;  %v6048_v23 = vld [vmem:[#allocation2 + $0x70] sm:$0xff]  }
  0x77   : > { %5624 = vmatmul.mubr.msk.bf16.gmra.mxu1 %vm1097_vm1, %v6312_v58  ;;  %5715 = vmatprep.mubr.msk.bf16.mxu0 %vm1097_vm1, %v5994_v24  ;;  %v6042_v58 = vld [vmem:[%s7543_s3 + $0xc8] sm:$0xff]  }
  0x78   : > { %5675 = vmatprep.mubr.msk.bf16.mxu1 %vm1097_vm1, %v5993_v25 }
  0x7e   : > { %5716 = vmatmul.mubr.msk.bf16.vlgmr.msra.gmra.mxu0 %vm1097_vm1, %v5993_v25 }
  0x7f   : > { %5676 = vmatmul.mubr.msk.bf16.vlgmr.msra.gmra.mxu1 %vm1097_vm1, %v5995_v26  ;;  %5788 = vmatpush3.bf16.msra.mxu0 %v5997_v14 }
  0x80   : > { %5748 = vmatpush3.bf16.msra.mxu1 %v5996_v13  ;;  %5679 = vmatprep.mubr.msk.bf16.mxu1 %vm1097_vm1, %v5998_v27 }
  0x81   : > { %5719 = vmatprep.mubr.msk.bf16.mxu0 %vm1097_vm1, %v5995_v26  ;;  %5749 = vmatprep.subr.bf16.mxu1 %v6002_v28 }
  0x82   : > { %5789 = vmatprep.subr.bf16.mxu0 %v6003_v29 }
  0x83   : > { %5790 = vmatpush3.bf16.msra.mxu0 %v6003_v29 }
  0x84   : > { %5750 = vmatpush3.bf16.msra.mxu1 %v6002_v28  ;;  %5791 = vmatprep.subr.bf16.mxu0 %v6009_v30 }
  0x85   : > { %5751 = vmatprep.subr.bf16.mxu1 %v6008_v31 }
  0x86   : > { %5720 = vmatmul.mubr.msk.bf16.gmra.mxu0 %vm1097_vm1, %v5998_v27 }
  0x87   : > { %5680 = vmatmul.mubr.msk.bf16.gmra.mxu1 %vm1097_vm1, %v5999_v32  ;;  %5723 = vmatprep.mubr.msk.bf16.mxu0 %vm1097_vm1, %v5999_v32  ;;  %v6050_v32 = vld [vmem:[#allocation2 + $0x78] sm:$0xff]  }
  0x88   : > { %5683 = vmatprep.mubr.msk.bf16.mxu1 %vm1097_vm1, %v6000_v33  ;;  %5752 = vmatpush3.bf16.msra.mxu1 %v6008_v31 }
  0x89   : > { %5792 = vmatpush3.bf16.msra.mxu0 %v6009_v30  ;;  %5753 = vmatprep.subr.bf16.mxu1 %v6014_v34  ;;  %v6561_v30 = vld [vmem:[#allocation2 + $0x70] sm:$0xff]  }
  0x8a   : > { %5793 = vmatprep.subr.bf16.mxu0 %v6015_v35 }
  0x8c   : > { %5754 = vmatpush3.bf16.msra.mxu1 %v6014_v34 }
  0x8d   : > { %5794 = vmatpush3.bf16.msra.mxu0 %v6015_v35  ;;  %5827 = vmatprep.subr.bf16.mxu1 %v6022_v36  ;;  %v6054_v35 = vld [vmem:[#allocation2 + $0x80] sm:$0xff]  }
  0x8e   : > { %5724 = vmatmul.mubr.msk.bf16.gmra.mxu0 %vm1097_vm1, %v6000_v33  ;;  %5867 = vmatprep.subr.bf16.mxu0 %v6023_v37  ;;  %v6565_v33 = vld [vmem:[#allocation2 + $0x78] sm:$0xff]  }
  0x8f   : > { %5684 = vmatmul.mubr.msk.bf16.gmra.mxu1 %vm1097_vm1, %v6001_v38  ;;  %5727 = vmatprep.mubr.msk.bf16.mxu0 %vm1097_vm1, %v6001_v38 }
  0x90   : > { %5687 = vmatprep.mubr.msk.bf16.mxu1 %vm1097_vm1, %v6004_v39 }
  0x96   : > { %5728 = vmatmul.mubr.msk.bf16.gmra.mxu0 %vm1097_vm1, %v6004_v39 }
  0x97   : > { %5688 = vmatmul.mubr.msk.bf16.gmra.mxu1 %vm1097_vm1, %v6005_v40  ;;  %5731 = vmatprep.mubr.msk.bf16.mxu0 %vm1097_vm1, %v6005_v40 }
  0x98   : > { %5691 = vmatprep.mubr.msk.bf16.mxu1 %vm1097_vm1, %v6006_v41 }
  0x9e   : > { %5732 = vmatmul.mubr.msk.bf16.gmra.mxu0 %vm1097_vm1, %v6006_v41 }
  0x9f   : > { %5692 = vmatmul.mubr.msk.bf16.gmra.mxu1 %vm1097_vm1, %v6007_v42  ;;  %5735 = vmatprep.mubr.msk.bf16.mxu0 %vm1097_vm1, %v6007_v42  ;;  %v6057_v42 = vld [vmem:[#allocation2 + $0x80] sm:$0xff]  }
  0xa0   : > { %5695 = vmatprep.mubr.msk.bf16.mxu1 %vm1097_vm1, %v6010_v43 }
  0xa6   : > { %5736 = vmatmul.mubr.msk.bf16.gmra.mxu0 %vm1097_vm1, %v6010_v43 }
  0xa7   : > { %5696 = vmatmul.mubr.msk.bf16.gmra.mxu1 %vm1097_vm1, %v6011_v44  ;;  %5739 = vmatprep.mubr.msk.bf16.mxu0 %vm1097_vm1, %v6011_v44  ;;  %v6056_v44 = vld [vmem:[#allocation2 + $0x88] sm:$0xff]  }
  0xa8   : > { %5699 = vmatprep.mubr.msk.bf16.mxu1 %vm1097_vm1, %v6012_v45 }
  0xae   : > { %5740 = vmatmul.mubr.msk.bf16.gmra.mxu0 %vm1097_vm1, %v6012_v45  ;;  %v6059_v45 = vld [vmem:[#allocation2 + $0x10] sm:$0xff]  }
  0xaf   : > { %5700 = vmatmul.mubr.msk.bf16.gmra.mxu1 %vm1097_vm1, %v6013_v46  ;;  %5743 = vmatprep.mubr.msk.bf16.mxu0 %vm1097_vm1, %v6013_v46 }
  0xb0   : > { %5703 = vmatprep.mubr.msk.bf16.mxu1 %vm1097_vm1, %v6016_v47 }
  0xb6   : > { %5744 = vmatmul.mubr.msk.bf16.gmra.mxu0 %vm1097_vm1, %v6016_v47  ;;  %v6058_v47 = vld [vmem:[#allocation2] sm:$0xff]  }
  0xb7   : > { %5704 = vmatmul.mubr.msk.bf16.gmra.mxu1 %vm1097_vm1, %v6017_v48  ;;  %5795 = vmatprep.mubr.msk.bf16.mxu0 %vm1097_vm1, %v6450_v49 }
  0xb8   : > { %5755 = vmatprep.mubr.msk.bf16.mxu1 %vm1097_vm1, %v6018_v50 }
  0xbe   : > { %5796 = vmatmul.mubr.msk.bf16.vlgmr.msra.gmra.mxu0 %vm1097_vm1, %v6457_v51 }
  0xbf   : > { %5756 = vmatmul.mubr.msk.bf16.vlgmr.msra.gmra.mxu1 %vm1097_vm1, %v6020_v52  ;;  %5868 = vmatpush3.bf16.msra.mxu0 %v6023_v37 }
  0xc0   : > { %5828 = vmatpush3.bf16.msra.mxu1 %v6022_v36  ;;  %5759 = vmatprep.mubr.msk.bf16.mxu1 %vm1097_vm1, %v6024_v53 }
  0xc1   : > { %5799 = vmatprep.mubr.msk.bf16.mxu0 %vm1097_vm1, %v6459_v54  ;;  %5829 = vmatprep.subr.bf16.mxu1 %v6032_v55 }
  0xc2   : > { %5869 = vmatprep.subr.bf16.mxu0 %v6033_v56 }
  0xc3   : > { %5870 = vmatpush3.bf16.msra.mxu0 %v6033_v56 }
  0xc4   : > { %5830 = vmatpush3.bf16.msra.mxu1 %v6032_v55  ;;  %5871 = vmatprep.subr.bf16.mxu0 %v6043_v57 }
  0xc5   : > { %5831 = vmatprep.subr.bf16.mxu1 %v6042_v58 }
  0xc6   : > { %5800 = vmatmul.mubr.msk.bf16.gmra.mxu0 %vm1097_vm1, %v6479_v59 }
  0xc7   : > { %5760 = vmatmul.mubr.msk.bf16.gmra.mxu1 %vm1097_vm1, %v6026_v60  ;;  %5803 = vmatprep.mubr.msk.bf16.mxu0 %vm1097_vm1, %v6481_v61  ;;  %v6061_v60 = vld [vmem:[#allocation2 + $0x20] sm:$0xff]  }
  0xc8   : > { %5763 = vmatprep.mubr.msk.bf16.mxu1 %vm1097_vm1, %v6028_v62  ;;  %5832 = vmatpush3.bf16.msra.mxu1 %v6042_v58 }
  0xc9   : > { %5872 = vmatpush3.bf16.msra.mxu0 %v6043_v57  ;;  %5833 = vmatprep.subr.bf16.mxu1 %v6052_v63  ;;  %v6060_v57 = vld [vmem:[#allocation2 + $0x18] sm:$0xff]  }
  0xca   : > { %5873 = vmatprep.subr.bf16.mxu0 %v6053_v0 }
  0xcc   : > { %5834 = vmatpush3.bf16.msra.mxu1 %v6052_v63 }
  0xcd   : > { %5874 = vmatpush3.bf16.msra.mxu0 %v6053_v0 }
  0xce   : > { %5804 = vmatmul.mubr.msk.bf16.gmra.mxu0 %vm1097_vm1, %v6495_v1 }
  0xcf   : > { %5764 = vmatmul.mubr.msk.bf16.gmra.mxu1 %vm1097_vm1, %v6030_v2  ;;  %5807 = vmatprep.mubr.msk.bf16.mxu0 %vm1097_vm1, %v6497_v3 }
  0xd0   : > { %5767 = vmatprep.mubr.msk.bf16.mxu1 %vm1097_vm1, %v6034_v4 }
  0xd6   : > { %5808 = vmatmul.mubr.msk.bf16.gmra.mxu0 %vm1097_vm1, %v6505_v5 }
  0xd7   : > { %5768 = vmatmul.mubr.msk.bf16.gmra.mxu1 %vm1097_vm1, %v6036_v6  ;;  %5811 = vmatprep.mubr.msk.bf16.mxu0 %vm1097_vm1, %v6507_v7 }
  0xd8   : > { %5771 = vmatprep.mubr.msk.bf16.mxu1 %vm1097_vm1, %v6038_v8  ;;  %v6623_v8 = vld [vmem:[%s7544_s4] ss:$0 sm:$0xff] }
  0xde   : > { %v6519_v13 = vpop.f32.mrf.mxu0  ;;  %5812 = vmatmul.mubr.msk.bf16.gmra.mxu0 %vm1097_vm1, %v6515_v9 }
  0xdf   : > { %v6523_v14 = vpop.f32.mrf.mxu1  ;;  %5772 = vmatmul.mubr.msk.bf16.gmra.mxu1 %vm1097_vm1, %v6040_v10  ;;  %5815 = vmatprep.mubr.msk.bf16.mxu0 %vm1097_vm1, %v6517_v11 }
  0xe0   : > { %v6528_v15 = vpop.f32.mrf.mxu0  ;;  %5775 = vmatprep.mubr.msk.bf16.mxu1 %vm1097_vm1, %v6044_v12 }
  0xe1   : > { %v6531_v16 = vpop.f32.mrf.mxu1 }
  0xe2   : > { %v6533_v17 = vpop.f32.mrf.mxu0 }
  0xe3   : > { %v6537_v19 = vpop.f32.mrf.mxu1 }
  0xe4   : > { %v6541_v22 = vpop.f32.mrf.mxu0 }
  0xe5   : > { %v6543_v24 = vpop.f32.mrf.mxu1 }
  0xe6   : > { %v6545_v25 = vpop.f32.mrf.mxu0  ;;  %5816 = vmatmul.mubr.msk.bf16.gmra.mxu0 %vm1097_vm1, %v6535_v18 }
  0xe7   : > { %v6549_v26 = vpop.f32.mrf.mxu1  ;;  %5776 = vmatmul.mubr.msk.bf16.gmra.mxu1 %vm1097_vm1, %v6046_v20  ;;  %5819 = vmatprep.mubr.msk.bf16.mxu0 %vm1097_vm1, %v6539_v21 }
  0xe8   : > { %v6554_v27 = vpop.f32.mrf.mxu0  ;;  %5779 = vmatprep.mubr.msk.bf16.mxu1 %vm1097_vm1, %v6048_v23 }
  0xe9   : > { %v6557_v28 = vpop.f32.mrf.mxu1 }
  0xea   : > { %v6559_v29 = vpop.f32.mrf.mxu0 }
  0xeb   : > { %v6563_v31 = vpop.f32.mrf.mxu1 }
  0xec   : > { %v6567_v34 = vpop.f32.mrf.mxu0 }
  0xed   : > { %v6569_v36 = vpop.f32.mrf.mxu1 }
  0xee   : > { %v6571_v37 = vpop.f32.mrf.mxu0  ;;  %5820 = vmatmul.mubr.msk.bf16.gmra.mxu0 %vm1097_vm1, %v6561_v30 }
  0xef   : > { %v6575_v38 = vpop.f32.mrf.mxu1  ;;  %5780 = vmatmul.mubr.msk.bf16.gmra.mxu1 %vm1097_vm1, %v6050_v32  ;;  %5823 = vmatprep.mubr.msk.bf16.mxu0 %vm1097_vm1, %v6565_v33  ;;  %v6062_v32 = vld [vmem:[#allocation2 + $0x28] sm:$0xff]  }
  0xf0   : > { %v6580_v39 = vpop.f32.mrf.mxu0  ;;  %5783 = vmatprep.mubr.msk.bf16.mxu1 %vm1097_vm1, %v6054_v35  ;;  %v6063_v35 = vld [vmem:[#allocation2 + $0x30] sm:$0xff]  }
  0xf1   : > { %v6583_v40 = vpop.f32.mrf.mxu1 }
  0xf2   : > { %v6585_v41 = vpop.f32.mrf.mxu0 }
  0xf3   : > { %v6587_v43 = vpop.f32.mrf.mxu1 }
  0xf4   : > { %v6589_v46 = vpop.f32.mrf.mxu0 }
  0xf5   : > { %v6591_v48 = vpop.f32.mrf.mxu1 }
  0xf6   : > { %v6593_v50 = vpop.f32.mrf.mxu0  ;;  %5824 = vmatmul.mubr.msk.bf16.gmra.mxu0 %vm1097_vm1, %v6057_v42 }
  0xf7   : > { %v6596_v52 = vpop.f32.mrf.mxu1  ;;  %5784 = vmatmul.mubr.msk.bf16.gmra.mxu1 %vm1097_vm1, %v6056_v44  ;;  %5875 = vmatprep.mubr.msk.bf16.mxu0 %vm1097_vm1, %v6059_v45 }
  0xf8   : > { %v6600_v53 = vpop.f32.mrf.mxu0  ;;  %5835 = vmatprep.mubr.msk.bf16.mxu1 %vm1097_vm1, %v6058_v47 }
  0xf9   : > { %v6603_v55 = vpop.f32.mrf.mxu1 }
  0xfa   : > { %v6605_v56 = vpop.f32.mrf.mxu0 }
  0xfb   : > { %v6607_v58 = vpop.f32.mrf.mxu1 }
  0xfc   : > { %v6609_v62 = vpop.f32.mrf.mxu0 }
  0xfd   : > { %v6611_v63 = vpop.f32.mrf.mxu1 }
  0xfe   : > { %v5637_v0 = vpop.f32.mrf.mxu0  ;;  %5876 = vmatmul.mubr.msk.bf16.vlgmr.msra.gmra.mxu0 %vm1097_vm1, %v6060_v57 }
  0xff   : > { %v5597_v2 = vpop.f32.mrf.mxu1  ;;  %5836 = vmatmul.mubr.msk.bf16.vlgmr.msra.gmra.mxu1 %vm1097_vm1, %v6450_v49  ;;  %5879 = vmatprep.mubr.msk.bf16.mxu0 %vm1097_vm1, %v6061_v60 }
 0x100   : > { %v1382_v4 = vadd.f32 %v5597_v2, %v6519_v13  ;;  %v1727_v6 = vpop.f32.mrf.mxu0  ;;  %5839 = vmatprep.mubr.msk.bf16.mxu1 %vm1097_vm1, %v6457_v51 }
 0x101   : > { %v1373_v10 = vpop.f32.mrf.mxu1 }
 0x102   : > { %v1856_v12 = vadd.f32 %v5637_v0, %v1382_v4  ;;  %v1374_v20 = vadd.f32 %v1373_v10, %v6528_v15  ;;  %v5638_v23 = vpop.f32.mrf.mxu0 }
 0x103   : > { %v5598_v49 = vpop.f32.mrf.mxu1 }
 0x104   : > { %v1895_v42 = vadd.f32 %v6623_v8, %v1856_v12  ;;  %v1854_v13 = vadd.f32 %v1727_v6, %v1374_v20  ;;  %v1385_v44 = vadd.f32 %v5598_v49, %v6533_v17  ;;  %v1730_v45 = vpop.f32.mrf.mxu0  ;;  %v6065_v49 = vld [vmem:[#allocation2 + $0x40] sm:$0xff]  }
 0x105   : > { %v1376_v51 = vpop.f32.mrf.mxu1 }
 0x106   : > { %1927 = vst.msk [vmem:[#allocation3 + $0x10] sm:$0xff] %vm1097_vm1, %v1895_v42  ;;  %v1893_v47 = vadd.f32 %v6623_v8, %v1854_v13  ;;  %v1857_v57 = vadd.f32 %v5638_v23, %v1385_v44  ;;  %v1377_v60 = vadd.f32 %v1376_v51, %v6541_v22  ;;  %v5641_v0 = vpop.f32.mrf.mxu0  ;;  %5880 = vmatmul.mubr.msk.bf16.gmra.mxu0 %vm1097_vm1, %v6062_v32  ;;  %v6064_v23 = vld [vmem:[#allocation2 + $0x38] sm:$0xff]  }
 0x107   : > { %v5601_v15 = vpop.f32.mrf.mxu1  ;;  %5840 = vmatmul.mubr.msk.bf16.gmra.mxu1 %vm1097_vm1, %v6459_v54  ;;  %5883 = vmatprep.mubr.msk.bf16.mxu0 %vm1097_vm1, %v6063_v35 }
 0x108   : > { %1925 = vst.msk [vmem:[#allocation3] sm:$0xff] %vm1097_vm1, %v1893_v47  ;;  %v1896_v17 = vadd.f32 %v6623_v8, %v1857_v57  ;;  %v1855_v2 = vadd.f32 %v1730_v45, %v1377_v60  ;;  %v1398_v4 = vadd.f32 %v5601_v15, %v6545_v25  ;;  %v1743_v6 = vpop.f32.mrf.mxu0  ;;  %5843 = vmatprep.mubr.msk.bf16.mxu1 %vm1097_vm1, %v6479_v59 }
 0x109   : > { %v1389_v22 = vpop.f32.mrf.mxu1 }
 0x10a   : > { %1928 = vst.msk [vmem:[#allocation3 + $0x18] sm:$0xff] %vm1097_vm1, %v1896_v17  ;;  %v1894_v10 = vadd.f32 %v6623_v8, %v1855_v2  ;;  %v1860_v12 = vadd.f32 %v5641_v0, %v1398_v4  ;;  %v1390_v54 = vadd.f32 %v1389_v22, %v6554_v27  ;;  %v5642_v20 = vpop.f32.mrf.mxu0  ;;  %v6066_v4 = vld [vmem:[#allocation2 + $0x48] sm:$0xff]   ;;  %v6067_v22 = vld [vmem:[#allocation2 + $0x50] sm:$0xff]  }
 0x10b   : > { %v5602_v32 = vpop.f32.mrf.mxu1 }
 0x10c   : > { %1926 = vst.msk [vmem:[#allocation3 + $0x8] sm:$0xff] %vm1097_vm1, %v1894_v10  ;;  %v1899_v25 = vadd.f32 %v6623_v8, %v1860_v12  ;;  %v1858_v35 = vadd.f32 %v1743_v6, %v1390_v54  ;;  %v1401_v42 = vadd.f32 %v5602_v32, %v6559_v29  ;;  %v1746_v59 = vpop.f32.mrf.mxu0 }
 0x10d   : > { %v1392_v13 = vpop.f32.mrf.mxu1 }
 0x10e   : > { %1931 = vst.msk [vmem:[#allocation3 + $0x30] sm:$0xff] %vm1097_vm1, %v1899_v25  ;;  %v1897_v44 = vadd.f32 %v6623_v8, %v1858_v35  ;;  %v1861_v45 = vadd.f32 %v5642_v20, %v1401_v42  ;;  %v1393_v27 = vadd.f32 %v1392_v13, %v6567_v34  ;;  %v5645_v51 = vpop.f32.mrf.mxu0  ;;  %5884 = vmatmul.mubr.msk.bf16.gmra.mxu0 %vm1097_vm1, %v6064_v23 }
 0x10f   : > { %v5605_v47 = vpop.f32.mrf.mxu1  ;;  %5844 = vmatmul.mubr.msk.bf16.gmra.mxu1 %vm1097_vm1, %v6481_v61  ;;  %5887 = vmatprep.mubr.msk.bf16.mxu0 %vm1097_vm1, %v6065_v49 }
 0x110   : > { %1929 = vst.msk [vmem:[#allocation3 + $0x20] sm:$0xff] %vm1097_vm1, %v1897_v44  ;;  %v1900_v29 = vadd.f32 %v6623_v8, %v1861_v45  ;;  %v1859_v57 = vadd.f32 %v1746_v59, %v1393_v27  ;;  %v1414_v60 = vadd.f32 %v5605_v47, %v6571_v37  ;;  %v1759_v0 = vpop.f32.mrf.mxu0  ;;  %5847 = vmatprep.mubr.msk.bf16.mxu1 %vm1097_vm1, %v6495_v1  ;;  %v6068_v45 = vld [vmem:[#allocation2 + $0x58] sm:$0xff]  }
 0x111   : > { %v1405_v34 = vpop.f32.mrf.mxu1 }
 0x112   : > { %1932 = vst.msk [vmem:[#allocation3 + $0x38] sm:$0xff] %vm1097_vm1, %v1900_v29  ;;  %v1898_v15 = vadd.f32 %v6623_v8, %v1859_v57  ;;  %v1864_v17 = vadd.f32 %v5645_v51, %v1414_v60  ;;  %v1406_v61 = vadd.f32 %v1405_v34, %v6580_v39  ;;  %v5646_v2 = vpop.f32.mrf.mxu0  ;;  %v6069_v51 = vld [vmem:[#allocation2 + $0x60] sm:$0xff]  }
 0x113   : > { %v5606_v6 = vpop.f32.mrf.mxu1 }
 0x114   : > { %1930 = vst.msk [vmem:[#allocation3 + $0x28] sm:$0xff] %vm1097_vm1, %v1898_v15  ;;  %v1903_v37 = vadd.f32 %v6623_v8, %v1864_v17  ;;  %v1862_v10 = vadd.f32 %v1759_v0, %v1406_v61  ;;  %v1417_v12 = vadd.f32 %v5606_v6, %v6585_v41  ;;  %v1762_v1 = vpop.f32.mrf.mxu0 }
 0x115   : > { %v1408_v54 = vpop.f32.mrf.mxu1 }
 0x116   : > { %1935 = vst.msk [vmem:[#allocation3 + $0x50] sm:$0xff] %vm1097_vm1, %v1903_v37  ;;  %v1901_v20 = vadd.f32 %v6623_v8, %v1862_v10  ;;  %v1865_v23 = vadd.f32 %v5646_v2, %v1417_v12  ;;  %v1409_v39 = vadd.f32 %v1408_v54, %v6589_v46  ;;  %v5649_v32 = vpop.f32.mrf.mxu0  ;;  %5888 = vmatmul.mubr.msk.bf16.gmra.mxu0 %vm1097_vm1, %v6066_v4  ;;  %v6070_v37 = vld [vmem:[#allocation2 + $0x68] sm:$0xff]   ;;  %v6071_v12 = vld [vmem:[#allocation2 + $0x70] sm:$0xff]  }
 0x117   : > { %v5609_v49 = vpop.f32.mrf.mxu1  ;;  %5848 = vmatmul.mubr.msk.bf16.gmra.mxu1 %vm1097_vm1, %v6497_v3  ;;  %5891 = vmatprep.mubr.msk.bf16.mxu0 %vm1097_vm1, %v6067_v22 }
 0x118   : > { %1933 = vst.msk [vmem:[#allocation3 + $0x40] sm:$0xff] %vm1097_vm1, %v1901_v20  ;;  %v1904_v41 = vadd.f32 %v6623_v8, %v1865_v23  ;;  %v1863_v25 = vadd.f32 %v1762_v1, %v1409_v39  ;;  %v1430_v35 = vadd.f32 %v5609_v49, %v6593_v50  ;;  %v1775_v42 = vpop.f32.mrf.mxu0  ;;  %5851 = vmatprep.mubr.msk.bf16.mxu1 %vm1097_vm1, %v6505_v5 }
 0x119   : > { %v1421_v46 = vpop.f32.mrf.mxu1 }
 0x11a   : > { %1936 = vst.msk [vmem:[#allocation3 + $0x58] sm:$0xff] %vm1097_vm1, %v1904_v41  ;;  %v1902_v59 = vadd.f32 %v6623_v8, %v1863_v25  ;;  %v1868_v13 = vadd.f32 %v5649_v32, %v1430_v35  ;;  %v1422_v3 = vadd.f32 %v1421_v46, %v6600_v53  ;;  %v5650_v44 = vpop.f32.mrf.mxu0 }
 0x11b   : > { %v5610_v27 = vpop.f32.mrf.mxu1 }
 0x11c   : > { %1934 = vst.msk [vmem:[#allocation3 + $0x48] sm:$0xff] %vm1097_vm1, %v1902_v59  ;;  %v1907_v50 = vadd.f32 %v6623_v8, %v1868_v13  ;;  %v1866_v47 = vadd.f32 %v1775_v42, %v1422_v3  ;;  %v1433_v29 = vadd.f32 %v5610_v27, %v6605_v56  ;;  %v1778_v5 = vpop.f32.mrf.mxu0  ;;  %v6072_v13 = vld [vmem:[#allocation2 + $0x78] sm:$0xff]  }
 0x11d   : > { %v1424_v57 = vpop.f32.mrf.mxu1 }
 0x11e   : > { %1939 = vst.msk [vmem:[#allocation3 + $0x70] sm:$0xff] %vm1097_vm1, %v1907_v50  ;;  %v1905_v60 = vadd.f32 %v6623_v8, %v1866_v47  ;;  %v1869_v0 = vadd.f32 %v5650_v44, %v1433_v29  ;;  %v1425_v53 = vadd.f32 %v1424_v57, %v6609_v62  ;;  %v5653_v34 = vpop.f32.mrf.mxu0  ;;  %5892 = vmatmul.mubr.msk.bf16.gmra.mxu0 %vm1097_vm1, %v6068_v45  ;;  %v6073_v44 = vld [vmem:[#allocation2 + $0x80] sm:$0xff]  }
 0x11f   : > { %v5613_v15 = vpop.f32.mrf.mxu1  ;;  %5852 = vmatmul.mubr.msk.bf16.gmra.mxu1 %vm1097_vm1, %v6507_v7  ;;  %5895 = vmatprep.mubr.msk.bf16.mxu0 %vm1097_vm1, %v6069_v51 }
 0x120   : > { %1937 = vst.msk [vmem:[#allocation3 + $0x60] sm:$0xff] %vm1097_vm1, %v1905_v60  ;;  %v1908_v56 = vadd.f32 %v6623_v8, %v1869_v0  ;;  %v1867_v17 = vadd.f32 %v1778_v5, %v1425_v53  ;;  %v1446_v61 = vadd.f32 %v5613_v15, %v6523_v14  ;;  %v1791_v2 = vpop.f32.mrf.mxu0  ;;  %5855 = vmatprep.mubr.msk.bf16.mxu1 %vm1097_vm1, %v6515_v9 }
 0x121   : > { %v1437_v62 = vpop.f32.mrf.mxu1 }
 0x122   : > { %1940 = vst.msk [vmem:[#allocation3 + $0x78] sm:$0xff] %vm1097_vm1, %v1908_v56  ;;  %v1906_v4 = vadd.f32 %v6623_v8, %v1867_v17  ;;  %v1872_v6 = vadd.f32 %v5653_v34, %v1446_v61  ;;  %v1438_v7 = vadd.f32 %v1437_v62, %v6531_v16  ;;  %v5654_v22 = vpop.f32.mrf.mxu0  ;;  %v6074_v56 = vld [vmem:[#allocation2 + $0x88] sm:$0xff]  }
 0x123   : > { %v5614_v10 = vpop.f32.mrf.mxu1 }
 0x124   : > { %1938 = vst.msk [vmem:[#allocation3 + $0x68] sm:$0xff] %vm1097_vm1, %v1906_v4  ;;  %v1911_v14 = vadd.f32 %v6623_v8, %v1872_v6  ;;  %v1870_v1 = vadd.f32 %v1791_v2, %v1438_v7  ;;  %v1449_v54 = vadd.f32 %v5614_v10, %v6537_v19  ;;  %v1794_v9 = vpop.f32.mrf.mxu0 }
 0x125   : > { %v1440_v20 = vpop.f32.mrf.mxu1 }
 0x126   : > { %1943 = vst.msk [vmem:[#allocation3 + $0x90] sm:$0xff] %vm1097_vm1, %v1911_v14  ;;  %v1909_v23 = vadd.f32 %v6623_v8, %v1870_v1  ;;  %v1873_v39 = vadd.f32 %v5654_v22, %v1449_v54  ;;  %v1441_v16 = vadd.f32 %v1440_v20, %v6543_v24  ;;  %v5657_v32 = vpop.f32.mrf.mxu0  ;;  %5896 = vmatmul.mubr.msk.bf16.gmra.mxu0 %vm1097_vm1, %v6070_v37 }
 0x127   : > { %v5617_v49 = vpop.f32.mrf.mxu1  ;;  %5856 = vmatmul.mubr.msk.bf16.gmra.mxu1 %vm1097_vm1, %v6517_v11  ;;  %5899 = vmatprep.mubr.msk.bf16.mxu0 %vm1097_vm1, %v6071_v12 }
 0x128   : > { %1941 = vst.msk [vmem:[#allocation3 + $0x80] sm:$0xff] %vm1097_vm1, %v1909_v23  ;;  %v1912_v19 = vadd.f32 %v6623_v8, %v1873_v39  ;;  %v1871_v41 = vadd.f32 %v1794_v9, %v1441_v16  ;;  %v1462_v25 = vadd.f32 %v5617_v49, %v6549_v26  ;;  %v1807_v35 = vpop.f32.mrf.mxu0  ;;  %5859 = vmatprep.mubr.msk.bf16.mxu1 %vm1097_vm1, %v6535_v18 }
 0x129   : > { %v1453_v24 = vpop.f32.mrf.mxu1 }
 0x12a   : > { %1944 = vst.msk [vmem:[#allocation3 + $0x98] sm:$0xff] %vm1097_vm1, %v1912_v19  ;;  %v1910_v42 = vadd.f32 %v6623_v8, %v1871_v41  ;;  %v1876_v46 = vadd.f32 %v5657_v32, %v1462_v25  ;;  %v1454_v11 = vadd.f32 %v1453_v24, %v6557_v28  ;;  %v5658_v59 = vpop.f32.mrf.mxu0 }
 0x12b   : > { %v5618_v3 = vpop.f32.mrf.mxu1 }
 0x12c   : > { %1942 = vst.msk [vmem:[#allocation3 + $0x88] sm:$0xff] %vm1097_vm1, %v1910_v42  ;;  %v1915_v26 = vadd.f32 %v6623_v8, %v1876_v46  ;;  %v1874_v45 = vadd.f32 %v1807_v35, %v1454_v11  ;;  %v1465_v27 = vadd.f32 %v5618_v3, %v6563_v31  ;;  %v1810_v18 = vpop.f32.mrf.mxu0 }
 0x12d   : > { %v1456_v51 = vpop.f32.mrf.mxu1 }
 0x12e   : > { %1947 = vst.msk [vmem:[#allocation3 + $0xb0] sm:$0xff] %vm1097_vm1, %v1915_v26  ;;  %v1913_v50 = vadd.f32 %v6623_v8, %v1874_v45  ;;  %v1877_v47 = vadd.f32 %v5658_v59, %v1465_v27  ;;  %v1457_v28 = vadd.f32 %v1456_v51, %v6569_v36  ;;  %v5661_v29 = vpop.f32.mrf.mxu0  ;;  %5900 = vmatmul.mubr.msk.bf16.gmra.mxu0 %vm1097_vm1, %v6072_v13 }
 0x12f   : > { %v5621_v5 = vpop.f32.mrf.mxu1  ;;  %5860 = vmatmul.mubr.msk.bf16.gmra.mxu1 %vm1097_vm1, %v6539_v21  ;;  %5903 = vmatprep.mubr.msk.bf16.mxu0 %vm1097_vm1, %v6073_v44 }
 0x130   : > { %1945 = vst.msk [vmem:[#allocation3 + $0xa0] sm:$0xff] %vm1097_vm1, %v1913_v50  ;;  %v1916_v31 = vadd.f32 %v6623_v8, %v1877_v47  ;;  %v1875_v57 = vadd.f32 %v1810_v18, %v1457_v28  ;;  %v1478_v60 = vadd.f32 %v5621_v5, %v6575_v38  ;;  %v1823_v0 = vpop.f32.mrf.mxu0  ;;  %5863 = vmatprep.mubr.msk.bf16.mxu1 %vm1097_vm1, %v6561_v30 }
 0x131   : > { %v1469_v36 = vpop.f32.mrf.mxu1 }
 0x132   : > { %1948 = vst.msk [vmem:[#allocation3 + $0xb8] sm:$0xff] %vm1097_vm1, %v1916_v31  ;;  %v1914_v53 = vadd.f32 %v6623_v8, %v1875_v57  ;;  %v1880_v34 = vadd.f32 %v5661_v29, %v1478_v60  ;;  %v1470_v21 = vadd.f32 %v1469_v36, %v6583_v40  ;;  %v5662_v15 = vpop.f32.mrf.mxu0 }
 0x133   : > { %v5622_v17 = vpop.f32.mrf.mxu1 }
 0x134   : > { %1946 = vst.msk [vmem:[#allocation3 + $0xa8] sm:$0xff] %vm1097_vm1, %v1914_v53  ;;  %v1919_v61 = vadd.f32 %v6623_v8, %v1880_v34  ;;  %v1878_v38 = vadd.f32 %v1823_v0, %v1470_v21  ;;  %v1481_v2 = vadd.f32 %v5622_v17, %v6587_v43  ;;  %v1826_v62 = vpop.f32.mrf.mxu0 }
 0x135   : > { %v1472_v30 = vpop.f32.mrf.mxu1 }
 0x136   : > { %1951 = vst.msk [vmem:[#allocation3 + $0xd0] sm:$0xff] %vm1097_vm1, %v1919_v61  ;;  %v1917_v4 = vadd.f32 %v6623_v8, %v1878_v38  ;;  %v1881_v6 = vadd.f32 %v5662_v15, %v1481_v2  ;;  %v1473_v7 = vadd.f32 %v1472_v30, %v6591_v48  ;;  %v5665_v40 = vpop.f32.mrf.mxu0  ;;  %5904 = vmatmul.mubr.msk.bf16.gmra.mxu0 %vm1097_vm1, %v6074_v56 }
 0x137   : > { %v5625_v22 = vpop.f32.mrf.mxu1  ;;  %5864 = vmatmul.mubr.msk.bf16.gmra.mxu1 %vm1097_vm1, %v6565_v33 }
 0x138   : > { %1949 = vst.msk [vmem:[#allocation3 + $0xc0] sm:$0xff] %vm1097_vm1, %v1917_v4  ;;  %v1920_v43 = vadd.f32 %v6623_v8, %v1881_v6  ;;  %v1879_v37 = vadd.f32 %v1826_v62, %v1473_v7  ;;  %v1494_v10 = vadd.f32 %v5625_v22, %v6596_v52  ;;  %v1839_v12 = vpop.f32.mrf.mxu0 }
 0x139   : > { %v1485_v14 = vpop.f32.mrf.mxu1 }
 0x13a   : > { %1952 = vst.msk [vmem:[#allocation3 + $0xd8] sm:$0xff] %vm1097_vm1, %v1920_v43  ;;  %v1918_v48 = vadd.f32 %v6623_v8, %v1879_v37  ;;  %v1884_v1 = vadd.f32 %v5665_v40, %v1494_v10  ;;  %v1486_v54 = vadd.f32 %v1485_v14, %v6603_v55  ;;  %v5666_v9 = vpop.f32.mrf.mxu0 }
 0x13b   : > { %v5626_v20 = vpop.f32.mrf.mxu1 }
 0x13c   : > { %1950 = vst.msk [vmem:[#allocation3 + $0xc8] sm:$0xff] %vm1097_vm1, %v1918_v48  ;;  %v1923_v33 = vadd.f32 %v6623_v8, %v1884_v1  ;;  %v1882_v23 = vadd.f32 %v1839_v12, %v1486_v54  ;;  %v1497_v39 = vadd.f32 %v5626_v20, %v6607_v58  ;;  %v1842_v16 = vpop.f32.mrf.mxu0 }
 0x13d   : > { %v1488_v52 = vpop.f32.mrf.mxu1 }
 0x13e   : > { %1955 = vst.msk [vmem:[#allocation3 + $0xf0] sm:$0xff] %vm1097_vm1, %v1923_v33  ;;  %v1921_v32 = vadd.f32 %v6623_v8, %v1882_v23  ;;  %v1885_v49 = vadd.f32 %v5666_v9, %v1497_v39  ;;  %v1489_v19 = vadd.f32 %v1488_v52, %v6611_v63  ;;  %v5717_v41 = vpop.f32.mrf.mxu0 }
 0x13f   : > { %v5677_v55 = vpop.f32.mrf.mxu1 }
 0x140   : > { %1953 = vst.msk [vmem:[#allocation3 + $0xe0] sm:$0xff] %vm1097_vm1, %v1921_v32  ;;  %v1924_v25 = vadd.f32 %v6623_v8, %v1885_v49  ;;  %v1883_v35 = vadd.f32 %v1842_v16, %v1489_v19  ;;  %v6756_v24 = vadd.f32 %v5717_v41, %v5677_v55  ;;  %v6758_v42 = vpop.f32.mrf.mxu0 }
 0x141   : > { %v6760_v58 = vpop.f32.mrf.mxu1 }
 0x142   : > { %1956 = vst.msk [vmem:[#allocation3 + $0xf8] sm:$0xff] %vm1097_vm1, %v1924_v25  ;;  %v1922_v46 = vadd.f32 %v6623_v8, %v1883_v35  ;;  %v6764_v11 = vpop.f32.mrf.mxu0 }
 0x143   : > { %v6766_v63 = vpop.f32.mrf.mxu1 }
 0x144   : > { %1954 = vst.msk [vmem:[#allocation3 + $0xe8] sm:$0xff] %vm1097_vm1, %v1922_v46  ;;  %v6769_v59 = vpop.f32.mrf.mxu0 }
 0x145   : > { %v6771_v13 = vpop.f32.mrf.mxu1 }
 0x146   : > { %v5721_v3 = vpop.f32.mrf.mxu0 }
 0x147   : > { %v5681_v44 = vpop.f32.mrf.mxu1 }
 0x148   : > { %v6773_v26 = vadd.f32 %v5721_v3, %v5681_v44  ;;  %v6775_v45 = vpop.f32.mrf.mxu0  ;;  %v524_v44 = vlaneseq }
 0x149   : > { %v6777_v27 = vpop.f32.mrf.mxu1 }
 0x14a   : > { %v6779_v18 = vpop.f32.mrf.mxu0 }
 0x14b   : > { %v6781_v8 = vpop.f32.mrf.mxu1 }
 0x14c   : > { %v6783_v51 = vpop.f32.mrf.mxu0 }
 0x14d   : > { %v6785_v50 = vpop.f32.mrf.mxu1 }
 0x14e   : > { %v5725_v47 = vpop.f32.mrf.mxu0 }
 0x14f   : > { %v5685_v28 = vpop.f32.mrf.mxu1 }
 0x150   : > { %v6787_v29 = vadd.f32 %v5725_v47, %v5685_v28  ;;  %v6789_v5 = vpop.f32.mrf.mxu0 }
 0x151   : > { %v6791_v31 = vpop.f32.mrf.mxu1 }
 0x152   : > { %v6793_v57 = vpop.f32.mrf.mxu0 }
 0x153   : > { %v6795_v60 = vpop.f32.mrf.mxu1 }
 0x154   : > { %v6797_v0 = vpop.f32.mrf.mxu0 }
 0x155   : > { %v6799_v36 = vpop.f32.mrf.mxu1 }
 0x156   : > { %v5729_v53 = vpop.f32.mrf.mxu0 }
 0x157   : > { %v5689_v34 = vpop.f32.mrf.mxu1 }
 0x158   : > { %v6801_v21 = vadd.f32 %v5729_v53, %v5689_v34  ;;  %v6803_v15 = vpop.f32.mrf.mxu0 }
 0x159   : > { %v6805_v56 = vpop.f32.mrf.mxu1 }
 0x15a   : > { %v6807_v17 = vpop.f32.mrf.mxu0 }
 0x15b   : > { %v6809_v61 = vpop.f32.mrf.mxu1 }
 0x15c   : > { %v6811_v38 = vpop.f32.mrf.mxu0 }
 0x15d   : > { %v6813_v2 = vpop.f32.mrf.mxu1 }
 0x15e   : > { %v5733_v62 = vpop.f32.mrf.mxu0 }
 0x15f   : > { %v5693_v30 = vpop.f32.mrf.mxu1 }
 0x160   : > { %v6815_v4 = vadd.f32 %v5733_v62, %v5693_v30  ;;  %v6817_v6 = vpop.f32.mrf.mxu0  ;;  %v6869_v62 = vshrl.u32 %v524_v44, 7 }
 0x161   : > { %v6819_v7 = vpop.f32.mrf.mxu1 }
 0x162   : > { %v6821_v40 = vpop.f32.mrf.mxu0 }
 0x163   : > { %v6823_v22 = vpop.f32.mrf.mxu1 }
 0x164   : > { %v6825_v43 = vpop.f32.mrf.mxu0 }
 0x165   : > { %v6827_v37 = vpop.f32.mrf.mxu1 }
 0x166   : > { %v5737_v10 = vpop.f32.mrf.mxu0 }
 0x167   : > { %v5697_v12 = vpop.f32.mrf.mxu1 }
 0x168   : > { %v6829_v14 = vadd.f32 %v5737_v10, %v5697_v12  ;;  %v6831_v48 = vpop.f32.mrf.mxu0 }
 0x169   : > { %v6833_v1 = vpop.f32.mrf.mxu1 }
 0x16a   : > { %v6835_v54 = vpop.f32.mrf.mxu0 }
 0x16b   : > { %v6837_v9 = vpop.f32.mrf.mxu1 }
 0x16c   : > { %v6839_v20 = vpop.f32.mrf.mxu0 }
 0x16d   : > { %v6841_v33 = vpop.f32.mrf.mxu1 }
 0x16e   : > { %v5741_v23 = vpop.f32.mrf.mxu0 }
 0x16f   : > { %v5701_v39 = vpop.f32.mrf.mxu1 }
 0x170   : > { %v6843_v16 = vadd.f32 %v5741_v23, %v5701_v39  ;;  %v6845_v52 = vpop.f32.mrf.mxu0  ;;  %v527_v23 = vadd.s32 16, %v6869_v62  ;;  %v2388_v39 = vadd.f32 %v6758_v42, %v6760_v58  ;;  %v2391_v42 = vadd.f32 %v6769_v59, %v6771_v13 }
 0x171   : > { %v6847_v32 = vpop.f32.mrf.mxu1 }
 0x172   : > { %v6849_v49 = vpop.f32.mrf.mxu0 }
 0x173   : > { %v6851_v19 = vpop.f32.mrf.mxu1 }
 0x174   : > { %v6853_v41 = vpop.f32.mrf.mxu0 }
 0x175   : > { %7546 = vst [vmem:[#allocation4_spill] sm:$0xff] %v6853_v41  ;;  %v6855_v55 = vpop.f32.mrf.mxu1 }
 0x176   : > { %v5745_v25 = vpop.f32.mrf.mxu0 }
 0x177   : > { %v5705_v35 = vpop.f32.mrf.mxu1 }
 0x178   : > { %v6857_v46 = vadd.f32 %v5745_v25, %v5705_v35  ;;  %v6859_v3 = vpop.f32.mrf.mxu0  ;;  %v561_v25 = vand.u32 15, %v6869_v62 }
 0x179   : > { %7548 = vst [vmem:[#allocation6_spill] sm:$0xff] %v6859_v3  ;;  %v6861_v47 = vpop.f32.mrf.mxu1  ;;  %v529_v3 = vadd.s32 32, %v6869_v62 }
 0x17a   : > { %7547 = vst [vmem:[#allocation5_spill] sm:$0xff] %v6857_v46  ;;  %7549 = vst [vmem:[#allocation7_spill] sm:$0xff] %v6861_v47  ;;  %v6863_v28 = vpop.f32.mrf.mxu0  ;;  %vm6889_vm3 = vcmp.ne.s32.totalorder %v561_v25, 0  ;;  %v2404_v25 = vadd.f32 %v6775_v45, %v6777_v27 }
 0x17b   : > { %7550 = vst [vmem:[#allocation8_spill] sm:$0xff] %v6863_v28  ;;  %v6865_v53 = vpop.f32.mrf.mxu1 }
 0x17c   : > { %7551 = vst [vmem:[#allocation9_spill] sm:$0xff] %v6865_v53  ;;  %v6867_v34 = vpop.f32.mrf.mxu0  ;;  %v575_v53 = vand.u32 15, %v527_v23 }
 0x17d   : > { %7552 = vst [vmem:[#allocation10_spill] sm:$0xff] %v6867_v34  ;;  %v6871_v30 = vpop.f32.mrf.mxu1  ;;  %v2399_v34 = vadd.f32 %v6764_v11, %v6766_v63 }
 0x17e   : > { %7553 = vst [vmem:[#allocation11_spill] sm:$0xff] %v6871_v30  ;;  %v6873_v10 = vpop.f32.mrf.mxu0  ;;  %vm6900_vm4 = vcmp.ne.s32.totalorder %v575_v53, 0  ;;  %v2415_v53 = vadd.f32 %v6779_v18, %v6781_v8 }
 0x17f   : > { %7554 = vst [vmem:[#allocation12_spill] sm:$0xff] %v6873_v10  ;;  %v5757_v12 = vpop.f32.mrf.mxu1 }
 0x180   : > { %v6879_v35 = vpop.f32.mrf.mxu0  ;;  %v2870_v44 = vadd.f32 %v5757_v12, %v6756_v24 }
 0x181   : > { %7555 = vst [vmem:[#allocation13_spill] sm:$0xff] %v6879_v35  ;;  %v2741_v46 = vpop.f32.mrf.mxu1 }
 0x182   : > { %v2868_v28 = vadd.f32 %v2741_v46, %v2388_v39  ;;  %v6884_v30 = vpop.f32.mrf.mxu0  ;;  %v3000_v63 = vrot.slane %v2870_v44, 7 }
 0x183   : > { %7556 = vst [vmem:[#allocation14_spill] sm:$0xff] %v6884_v30  ;;  %v5758_v10 = vpop.f32.mrf.mxu1  ;;  %v2900_v30 = vld [vmem:[#allocation3] sm:$0xff] }
 0x184   : > { %v2997_v35 = vrot.slane %v2868_v28, 7  ;;  %v2871_v47 = vadd.f32 %v5758_v10, %v2399_v34  ;;  %v6893_v11 = vpop.f32.mrf.mxu0  ;;  %v589_v34 = vand.u32 15, %v529_v3  ;;  %v531_v10 = vadd.s32 48, %v6869_v62  ;;  %v2901_v3 = vld [vmem:[#allocation3 + $0x8] sm:$0xff] }
 0x185   : > { %7559 = vst [vmem:[#allocation15_spill] sm:$0xff] %v6893_v11  ;;  %v2744_v24 = vpop.f32.mrf.mxu1  ;;  %v533_v11 = vadd.s32 64, %v6869_v62 }
 0x186   : > { %v3092_v46 = vsel %vm2996_vm2, 0.0, %v2997_v35  ;;  %v3002_v12 = vrot.slane %v2871_v47, 7  ;;  %v2869_v39 = vadd.f32 %v2744_v24, %v2391_v42  ;;  %v6896_v23 = vpop.f32.mrf.mxu0  ;;  %v2903_v47 = vld [vmem:[#allocation3 + $0x18] sm:$0xff]  ;;  %vm6922_vm5 = vcmp.ne.s32.totalorder %v589_v34, 0 }
 0x187   : > { %7560 = vst [vmem:[#allocation16_spill] sm:$0xff] %v6896_v23  ;;  %v3157_v59 = vsel %vm6889_vm3, %v3092_v46, 0.0  ;;  %v5761_v28 = vpop.f32.mrf.mxu1  ;;  %v617_v13 = vand.u32 15, %v533_v11  ;;  %v535_v11 = vadd.s32 80, %v6869_v62 }
 0x188   : > { %v3189_v44 = vadd.f32 %v3157_v59, %v2900_v30  ;;  %v3003_v42 = vsel %vm2996_vm2, %v3000_v63, %v3002_v12  ;;  %v2998_v24 = vrot.slane %v2869_v39, 7  ;;  %v6908_v23 = vpop.f32.mrf.mxu0  ;;  %v2874_v27 = vadd.f32 %v5761_v28, %v6773_v26  ;;  %v2902_v59 = vld [vmem:[#allocation3 + $0x10] sm:$0xff] }
 0x189   : > { %v3192_v58 = vadd.f32 %v3003_v42, %v2903_v47  ;;  %v2757_v46 = vpop.f32.mrf.mxu1  ;;  %vm6949_vm7 = vcmp.ne.s32.totalorder %v617_v13, 0 }
 0x18a   : > { %3221 = vst.msk [vmem:[#allocation3] sm:$0xff] %vm1097_vm1, %v3189_v44  ;;  %v2999_v41 = vsel %vm2996_vm2, %v2997_v35, %v2998_v24  ;;  %v3001_v45 = vsel %vm2996_vm2, %v2998_v24, %v3000_v63  ;;  %v2872_v30 = vadd.f32 %v2757_v46, %v2404_v25  ;;  %v6917_v39 = vpop.f32.mrf.mxu0  ;;  %v603_v35 = vand.u32 15, %v531_v10 }
 0x18b   : > { %3224 = vst.msk [vmem:[#allocation3 + $0x18] sm:$0xff] %vm1097_vm1, %v3192_v58  ;;  %v3159_v18 = vsel %vm6900_vm4, %v3001_v45, 0.0  ;;  %v3190_v8 = vadd.f32 %v2999_v41, %v2901_v3  ;;  %v5762_v44 = vpop.f32.mrf.mxu1  ;;  %v2407_v63 = vadd.f32 %v6783_v51, %v6785_v50  ;;  %v3008_v41 = vrot.slane %v2874_v27, 7  ;;  %v2904_v3 = vld [vmem:[#allocation3 + $0x20] sm:$0xff] }
 0x18c   : > { %v3191_v26 = vadd.f32 %v3159_v18, %v2902_v59  ;;  %v3004_v28 = vrot.slane %v2872_v30, 7  ;;  %v2875_v25 = vadd.f32 %v5762_v44, %v2415_v53  ;;  %v6928_v42 = vpop.f32.mrf.mxu0  ;;  %vm6937_vm6 = vcmp.ne.s32.totalorder %v603_v35, 0 }
 0x18d   : > { %3222 = vst.msk [vmem:[#allocation3 + $0x8] sm:$0xff] %vm1097_vm1, %v3190_v8  ;;  %v2760_v24 = vpop.f32.mrf.mxu1  ;;  %v2420_v45 = vadd.f32 %v6789_v5, %v6791_v31  ;;  %v2431_v8 = vadd.f32 %v6793_v57, %v6795_v60  ;;  %v2906_v57 = vld [vmem:[#allocation3 + $0x30] sm:$0xff]  ;;  %v2447_v35 = vadd.f32 %v6807_v17, %v6809_v61 }
 0x18e   : > { %3223 = vst.msk [vmem:[#allocation3 + $0x10] sm:$0xff] %vm1097_vm1, %v3191_v26  ;;  %v3005_v34 = vsel %vm2996_vm2, %v3002_v12, %v3004_v28  ;;  %v3010_v58 = vrot.slane %v2875_v25, 7  ;;  %v2873_v46 = vadd.f32 %v2760_v24, %v2407_v63  ;;  %v6933_v10 = vpop.f32.mrf.mxu0  ;;  %v2907_v12 = vld [vmem:[#allocation3 + $0x38] sm:$0xff]  ;;  %v2905_v63 = vld [vmem:[#allocation3 + $0x28] sm:$0xff] }
 0x18f   : > { %v3161_v51 = vsel %vm6922_vm5, %v3005_v34, 0.0  ;;  %v5765_v53 = vpop.f32.mrf.mxu1 }
 0x190   : > { %v3193_v27 = vadd.f32 %v3161_v51, %v2904_v3  ;;  %v3011_v30 = vsel %vm2996_vm2, %v3008_v41, %v3010_v58  ;;  %v3006_v59 = vrot.slane %v2873_v46, 7  ;;  %v6945_v18 = vpop.f32.mrf.mxu0  ;;  %v2878_v26 = vadd.f32 %v5765_v53, %v6787_v29 }
 0x191   : > { %v3196_v47 = vadd.f32 %v3011_v30, %v2907_v12  ;;  %v2773_v44 = vpop.f32.mrf.mxu1  ;;  %v631_v46 = vand.u32 15, %v535_v11  ;;  %v537_v3 = vadd.s32 96, %v6869_v62 }
 0x192   : > { %3225 = vst.msk [vmem:[#allocation3 + $0x20] sm:$0xff] %vm1097_vm1, %v3193_v27  ;;  %v3007_v5 = vsel %vm2996_vm2, %v3004_v28, %v3006_v59  ;;  %v3009_v31 = vsel %vm2996_vm2, %v3006_v59, %v3008_v41  ;;  %v2876_v25 = vadd.f32 %v2773_v44, %v2420_v45  ;;  %v6957_v24 = vpop.f32.mrf.mxu0  ;;  %v2423_v28 = vadd.f32 %v6797_v0, %v6799_v36  ;;  %v2908_v59 = vld [vmem:[#allocation3 + $0x40] sm:$0xff] }
 0x193   : > { %3228 = vst.msk [vmem:[#allocation3 + $0x38] sm:$0xff] %vm1097_vm1, %v3196_v47  ;;  %v3163_v60 = vsel %vm6937_vm6, %v3009_v31, 0.0  ;;  %v3194_v13 = vadd.f32 %v3007_v5, %v2905_v63  ;;  %v5766_v34 = vpop.f32.mrf.mxu1  ;;  %v3016_v50 = vrot.slane %v2878_v26, 7  ;;  %vm6974_vm8 = vcmp.ne.s32.totalorder %v631_v46, 0  ;;  %v2911_v5 = vld [vmem:[#allocation3 + $0x58] sm:$0xff] }
 0x194   : > { %v3195_v41 = vadd.f32 %v3163_v60, %v2906_v57  ;;  %v3012_v51 = vrot.slane %v2876_v25, 7  ;;  %v2879_v29 = vadd.f32 %v5766_v34, %v2431_v8  ;;  %v6965_v53 = vpop.f32.mrf.mxu0  ;;  %v645_v47 = vand.u32 15, %v537_v3  ;;  %v2909_v34 = vld [vmem:[#allocation3 + $0x48] sm:$0xff] }
 0x195   : > { %3226 = vst.msk [vmem:[#allocation3 + $0x28] sm:$0xff] %vm1097_vm1, %v3194_v13  ;;  %v2776_v45 = vpop.f32.mrf.mxu1  ;;  %v539_v44 = vadd.s32 112, %v6869_v62  ;;  %v2436_v63 = vadd.f32 %v6803_v15, %v6805_v56  ;;  %v541_v13 = vadd.s32 128, %v6869_v62 }
 0x196   : > { %3227 = vst.msk [vmem:[#allocation3 + $0x30] sm:$0xff] %vm1097_vm1, %v3195_v41  ;;  %v3013_v27 = vsel %vm2996_vm2, %v3010_v58, %v3012_v51  ;;  %v3018_v12 = vrot.slane %v2879_v29, 7  ;;  %v2877_v11 = vadd.f32 %v2776_v45, %v2423_v28  ;;  %v6970_v30 = vpop.f32.mrf.mxu0  ;;  %v2910_v41 = vld [vmem:[#allocation3 + $0x50] sm:$0xff]  ;;  %vm6996_vm9 = vcmp.ne.s32.totalorder %v645_v47, 0 }
 0x197   : > { %v3165_v0 = vsel %vm6949_vm7, %v3013_v27, 0.0  ;;  %v5769_v8 = vpop.f32.mrf.mxu1  ;;  %v673_v36 = vand.u32 15, %v541_v13 }
 0x198   : > { %v3197_v58 = vadd.f32 %v3165_v0, %v2908_v59  ;;  %v3019_v31 = vsel %vm2996_vm2, %v3016_v50, %v3018_v12  ;;  %v3014_v26 = vrot.slane %v2877_v11, 7  ;;  %v6982_v25 = vpop.f32.mrf.mxu0  ;;  %v2882_v56 = vadd.f32 %v5769_v8, %v6801_v21 }
 0x199   : > { %v3200_v57 = vadd.f32 %v3019_v31, %v2911_v5  ;;  %v2789_v60 = vpop.f32.mrf.mxu1  ;;  %v2912_v5 = vld [vmem:[#allocation3 + $0x60] sm:$0xff]  ;;  %vm7023_vm11 = vcmp.ne.s32.totalorder %v673_v36, 0 }
 0x19a   : > { %3229 = vst.msk [vmem:[#allocation3 + $0x40] sm:$0xff] %vm1097_vm1, %v3197_v58  ;;  %v3015_v46 = vsel %vm2996_vm2, %v3012_v51, %v3014_v26  ;;  %v3017_v15 = vsel %vm2996_vm2, %v3014_v26, %v3016_v50  ;;  %v2880_v3 = vadd.f32 %v2789_v60, %v2436_v63  ;;  %v6991_v28 = vpop.f32.mrf.mxu0  ;;  %v659_v51 = vand.u32 15, %v539_v44 }
 0x19b   : > { %3232 = vst.msk [vmem:[#allocation3 + $0x58] sm:$0xff] %vm1097_vm1, %v3200_v57  ;;  %v3167_v17 = vsel %vm6974_vm8, %v3017_v15, 0.0  ;;  %v3198_v61 = vadd.f32 %v3015_v46, %v2909_v34  ;;  %v5770_v45 = vpop.f32.mrf.mxu1  ;;  %v2439_v50 = vadd.f32 %v6811_v38, %v6813_v2  ;;  %v3024_v8 = vrot.slane %v2882_v56, 7 }
 0x19c   : > { %v3199_v21 = vadd.f32 %v3167_v17, %v2910_v41  ;;  %v3020_v27 = vrot.slane %v2880_v3, 7  ;;  %v2883_v11 = vadd.f32 %v5770_v45, %v2447_v35  ;;  %v7002_v59 = vpop.f32.mrf.mxu0  ;;  %vm7011_vm10 = vcmp.ne.s32.totalorder %v659_v51, 0  ;;  %v2913_v41 = vld [vmem:[#allocation3 + $0x68] sm:$0xff] }
 0x19d   : > { %3230 = vst.msk [vmem:[#allocation3 + $0x48] sm:$0xff] %vm1097_vm1, %v3198_v61  ;;  %v2792_v0 = vpop.f32.mrf.mxu1  ;;  %v543_v26 = vadd.s32 144, %v6869_v62  ;;  %v2452_v35 = vadd.f32 %v6817_v6, %v6819_v7  ;;  %v2463_v46 = vadd.f32 %v6821_v40, %v6823_v22  ;;  %v2914_v40 = vld [vmem:[#allocation3 + $0x70] sm:$0xff] }
 0x19e   : > { %3231 = vst.msk [vmem:[#allocation3 + $0x50] sm:$0xff] %vm1097_vm1, %v3199_v21  ;;  %v3021_v47 = vsel %vm2996_vm2, %v3018_v12, %v3020_v27  ;;  %v3026_v63 = vrot.slane %v2883_v11, 7  ;;  %v2881_v58 = vadd.f32 %v2792_v0, %v2439_v50  ;;  %v7007_v44 = vpop.f32.mrf.mxu0  ;;  %v2915_v12 = vld [vmem:[#allocation3 + $0x78] sm:$0xff]  ;;  %v545_v21 = vadd.s32 160, %v6869_v62 }
 0x19f   : > { %v3169_v38 = vsel %vm6996_vm9, %v3021_v47, 0.0  ;;  %v5773_v31 = vpop.f32.mrf.mxu1  ;;  %v687_v50 = vand.u32 15, %v543_v26 }
 0x1a0   : > { %v3201_v57 = vadd.f32 %v3169_v38, %v2912_v5  ;;  %v3027_v60 = vsel %vm2996_vm2, %v3024_v8, %v3026_v63  ;;  %v3022_v13 = vrot.slane %v2881_v58, 7  ;;  %v7019_v34 = vpop.f32.mrf.mxu0  ;;  %v2886_v17 = vadd.f32 %v5773_v31, %v6815_v4  ;;  %v2916_v31 = vld [vmem:[#allocation3 + $0x80] sm:$0xff] }
 0x1a1   : > { %v3204_v15 = vadd.f32 %v3027_v60, %v2915_v12  ;;  %v2805_v56 = vpop.f32.mrf.mxu1  ;;  %vm7048_vm12 = vcmp.ne.s32.totalorder %v687_v50, 0  ;;  %v2468_v12 = vadd.f32 %v6831_v48, %v6833_v1  ;;  %v2919_v60 = vld [vmem:[#allocation3 + $0x98] sm:$0xff] }
 0x1a2   : > { %3233 = vst.msk [vmem:[#allocation3 + $0x60] sm:$0xff] %vm1097_vm1, %v3201_v57  ;;  %v3023_v6 = vsel %vm2996_vm2, %v3020_v27, %v3022_v13  ;;  %v3025_v7 = vsel %vm2996_vm2, %v3022_v13, %v3024_v8  ;;  %v2884_v61 = vadd.f32 %v2805_v56, %v2452_v35  ;;  %v7031_v29 = vpop.f32.mrf.mxu0  ;;  %v2455_v27 = vadd.f32 %v6825_v43, %v6827_v37  ;;  %v2920_v37 = vld [vmem:[#allocation3 + $0xa0] sm:$0xff] }
 0x1a3   : > { %3236 = vst.msk [vmem:[#allocation3 + $0x78] sm:$0xff] %vm1097_vm1, %v3204_v15  ;;  %v3171_v22 = vsel %vm7011_vm10, %v3025_v7, 0.0  ;;  %v3202_v45 = vadd.f32 %v3023_v6, %v2913_v41  ;;  %v5774_v51 = vpop.f32.mrf.mxu1  ;;  %v3032_v47 = vrot.slane %v2886_v17, 7  ;;  %v701_v35 = vand.u32 15, %v545_v21  ;;  %v2917_v7 = vld [vmem:[#allocation3 + $0x88] sm:$0xff] }
 0x1a4   : > { %v3203_v11 = vadd.f32 %v3171_v22, %v2914_v40  ;;  %v3028_v0 = vrot.slane %v2884_v61, 7  ;;  %v2887_v4 = vadd.f32 %v5774_v51, %v2463_v46  ;;  %v7039_v36 = vpop.f32.mrf.mxu0  ;;  %v547_v57 = vadd.s32 176, %v6869_v62  ;;  %v2918_v22 = vld [vmem:[#allocation3 + $0x90] sm:$0xff] }
 0x1a5   : > { %3234 = vst.msk [vmem:[#allocation3 + $0x68] sm:$0xff] %vm1097_vm1, %v3202_v45  ;;  %v2808_v8 = vpop.f32.mrf.mxu1  ;;  %v2479_v56 = vadd.f32 %v6835_v54, %v6837_v9  ;;  %v549_v6 = vadd.s32 192, %v6869_v62  ;;  %vm7070_vm13 = vcmp.ne.s32.totalorder %v701_v35, 0  ;;  %v2471_v21 = vadd.f32 %v6839_v20, %v6841_v33 }
 0x1a6   : > { %3235 = vst.msk [vmem:[#allocation3 + $0x70] sm:$0xff] %vm1097_vm1, %v3203_v11  ;;  %v3029_v58 = vsel %vm2996_vm2, %v3026_v63, %v3028_v0  ;;  %v3034_v5 = vrot.slane %v2887_v4, 7  ;;  %v2885_v38 = vadd.f32 %v2808_v8, %v2455_v27  ;;  %v7044_v2 = vpop.f32.mrf.mxu0  ;;  %v715_v50 = vand.u32 15, %v547_v57 }
 0x1a7   : > { %v3173_v43 = vsel %vm7023_vm11, %v3029_v58, 0.0  ;;  %v5777_v26 = vpop.f32.mrf.mxu1  ;;  %v729_v8 = vand.u32 15, %v549_v6  ;;  %v551_v35 = vadd.s32 208, %v6869_v62  ;;  %v2484_v57 = vadd.f32 %v6845_v52, %v6847_v32  ;;  %v2921_v6 = vld [vmem:[#allocation3 + $0xa8] sm:$0xff] }
 0x1a8   : > { %v3205_v63 = vadd.f32 %v3173_v43, %v2916_v31  ;;  %v3035_v13 = vsel %vm2996_vm2, %v3032_v47, %v3034_v5  ;;  %v3030_v46 = vrot.slane %v2885_v38, 7  ;;  %v7056_v15 = vpop.f32.mrf.mxu0  ;;  %v2890_v1 = vadd.f32 %v5777_v26, %v6829_v14 }
 0x1a9   : > { %v3208_v3 = vadd.f32 %v3035_v13, %v2919_v60  ;;  %v2821_v41 = vpop.f32.mrf.mxu1  ;;  %vm7085_vm14 = vcmp.ne.s32.totalorder %v715_v50, 0  ;;  %vm7097_vm15 = vcmp.ne.s32.totalorder %v729_v8, 0  ;;  %v555_v33 = vadd.s32 240, %v6869_v62 }
 0x1aa   : > { %3237 = vst.msk [vmem:[#allocation3 + $0x80] sm:$0xff] %vm1097_vm1, %v3205_v63  ;;  %v3031_v17 = vsel %vm2996_vm2, %v3028_v0, %v3030_v46  ;;  %v3033_v48 = vsel %vm2996_vm2, %v3030_v46, %v3032_v47  ;;  %v2888_v61 = vadd.f32 %v2821_v41, %v2468_v12  ;;  %v7065_v40 = vpop.f32.mrf.mxu0  ;;  %v3040_v47 = vrot.slane %v2890_v1, 7 }
 0x1ab   : > { %3240 = vst.msk [vmem:[#allocation3 + $0x98] sm:$0xff] %vm1097_vm1, %v3208_v3  ;;  %v3175_v54 = vsel %vm7048_vm12, %v3033_v48, 0.0  ;;  %v3206_v9 = vadd.f32 %v3031_v17, %v2917_v7  ;;  %v5778_v51 = vpop.f32.mrf.mxu1  ;;  %v2495_v46 = vadd.f32 %v6849_v49, %v6851_v19  ;;  %v2922_v49 = vld [vmem:[#allocation3 + $0xb0] sm:$0xff] }
 0x1ac   : > { %v3207_v14 = vadd.f32 %v3175_v54, %v2918_v22  ;;  %v3036_v27 = vrot.slane %v2888_v61, 7  ;;  %v2891_v11 = vadd.f32 %v5778_v51, %v2479_v56  ;;  %v7076_v0 = vpop.f32.mrf.mxu0  ;;  %v743_v22 = vand.u32 15, %v551_v35  ;;  %v7589_v35 = vld [vmem:[#allocation6_spill] sm:$0xff] }
 0x1ad   : > { %3238 = vst.msk [vmem:[#allocation3 + $0x88] sm:$0xff] %vm1097_vm1, %v3206_v9  ;;  %v2824_v4 = vpop.f32.mrf.mxu1  ;;  %v553_v54 = vadd.s32 224, %v6869_v62  ;;  %v7585_v9 = vld [vmem:[#allocation4_spill] sm:$0xff] }
 0x1ae   : > { %3239 = vst.msk [vmem:[#allocation3 + $0x90] sm:$0xff] %vm1097_vm1, %v3207_v14  ;;  %v3037_v58 = vsel %vm2996_vm2, %v3034_v5, %v3036_v27  ;;  %v3042_v38 = vrot.slane %v2891_v11, 7  ;;  %v2889_v31 = vadd.f32 %v2824_v4, %v2471_v21  ;;  %v7081_v43 = vpop.f32.mrf.mxu0  ;;  %v2923_v5 = vld [vmem:[#allocation3 + $0xb8] sm:$0xff]  ;;  %v2487_v45 = vadd.f32 %v7585_v9, %v6855_v55  ;;  %v2930_v9 = vld [vmem:[#allocation3 + $0xf0] sm:$0xff] }
 0x1af   : > { %v3177_v20 = vsel %vm7070_vm13, %v3037_v58, 0.0  ;;  %v5781_v26 = vpop.f32.mrf.mxu1  ;;  %v2924_v58 = vld [vmem:[#allocation3 + $0xc0] sm:$0xff]  ;;  %vm7122_vm3 = vcmp.ne.s32.totalorder %v743_v22, 0 }
 0x1b0   : > { %v3209_v12 = vadd.f32 %v3177_v20, %v2920_v37  ;;  %v3043_v63 = vsel %vm2996_vm2, %v3040_v47, %v3042_v38  ;;  %v3038_v60 = vrot.slane %v2889_v31, 7  ;;  %v7093_v13 = vpop.f32.mrf.mxu0  ;;  %v2894_v7 = vadd.f32 %v5781_v26, %v6843_v16  ;;  %v7588_v26 = vld [vmem:[#allocation7_spill] sm:$0xff] }
 0x1b1   : > { %v3212_v56 = vadd.f32 %v3043_v63, %v2923_v5  ;;  %v2837_v3 = vpop.f32.mrf.mxu1  ;;  %v757_v20 = vand.u32 15, %v553_v54 }
 0x1b2   : > { %3241 = vst.msk [vmem:[#allocation3 + $0xa0] sm:$0xff] %vm1097_vm1, %v3209_v12  ;;  %v3039_v52 = vsel %vm2996_vm2, %v3036_v27, %v3038_v60  ;;  %v3041_v32 = vsel %vm2996_vm2, %v3038_v60, %v3040_v47  ;;  %v2892_v17 = vadd.f32 %v2837_v3, %v2484_v57  ;;  %v7105_v48 = vpop.f32.mrf.mxu0  ;;  %v3048_v27 = vrot.slane %v2894_v7, 7  ;;  %v2927_v12 = vld [vmem:[#allocation3 + $0xd8] sm:$0xff] }
 0x1b3   : > { %3244 = vst.msk [vmem:[#allocation3 + $0xb8] sm:$0xff] %vm1097_vm1, %v3212_v56  ;;  %v3179_v19 = vsel %vm7085_vm14, %v3041_v32, 0.0  ;;  %v3210_v1 = vadd.f32 %v3039_v52, %v2921_v6  ;;  %v5782_v61 = vpop.f32.mrf.mxu1  ;;  %v2500_v57 = vadd.f32 %v7589_v35, %v7588_v26  ;;  %v7591_v56 = vld [vmem:[#allocation8_spill] sm:$0xff]  ;;  %v2925_v52 = vld [vmem:[#allocation3 + $0xc8] sm:$0xff]  ;;  %vm7143_vm4 = vcmp.ne.s32.totalorder %v757_v20, 0 }
 0x1b4   : > { %v3211_v51 = vadd.f32 %v3179_v19, %v2922_v49  ;;  %v3044_v50 = vrot.slane %v2892_v17, 7  ;;  %v2895_v16 = vadd.f32 %v5782_v61, %v2495_v46  ;;  %v7113_v21 = vpop.f32.mrf.mxu0  ;;  %v7590_v46 = vld [vmem:[#allocation9_spill] sm:$0xff]  ;;  %v2926_v61 = vld [vmem:[#allocation3 + $0xd0] sm:$0xff] }
 0x1b5   : > { %3242 = vst.msk [vmem:[#allocation3 + $0xa8] sm:$0xff] %vm1097_vm1, %v3210_v1  ;;  %v2840_v14 = vpop.f32.mrf.mxu1  ;;  %v2511_v3 = vadd.f32 %v7591_v56, %v7590_v46  ;;  %v7592_v17 = vld [vmem:[#allocation5_spill] sm:$0xff] }
 0x1b6   : > { %3243 = vst.msk [vmem:[#allocation3 + $0xb0] sm:$0xff] %vm1097_vm1, %v3211_v51  ;;  %v3045_v11 = vsel %vm2996_vm2, %v3042_v38, %v3044_v50  ;;  %v3050_v4 = vrot.slane %v2895_v16, 7  ;;  %v2893_v8 = vadd.f32 %v2840_v14, %v2487_v45  ;;  %v7118_v47 = vpop.f32.mrf.mxu0  ;;  %v771_v51 = vand.u32 15, %v555_v33  ;;  %v7596_v16 = vld [vmem:[#allocation10_spill] sm:$0xff]  ;;  %v2928_v33 = vld [vmem:[#allocation3 + $0xe0] sm:$0xff] }
 0x1b7   : > { %v3181_v55 = vsel %vm7097_vm15, %v3045_v11, 0.0  ;;  %v5785_v37 = vpop.f32.mrf.mxu1 }
 0x1b8   : > { %v3213_v38 = vadd.f32 %v3181_v55, %v2924_v58  ;;  %v3051_v5 = vsel %vm2996_vm2, %v3048_v27, %v3050_v4  ;;  %v3046_v63 = vrot.slane %v2893_v8, 7  ;;  %v7130_v60 = vpop.f32.mrf.mxu0  ;;  %v2898_v49 = vadd.f32 %v5785_v37, %v7592_v17  ;;  %v2929_v17 = vld [vmem:[#allocation3 + $0xe8] sm:$0xff] }
 0x1b9   : > { %v3216_v41 = vadd.f32 %v3051_v5, %v2927_v12  ;;  %v2853_v6 = vpop.f32.mrf.mxu1  ;;  %vm7156_vm5 = vcmp.ne.s32.totalorder %v771_v51, 0 }
 0x1ba   : > { %3245 = vst.msk [vmem:[#allocation3 + $0xc0] sm:$0xff] %vm1097_vm1, %v3213_v38  ;;  %v3047_v32 = vsel %vm2996_vm2, %v3044_v50, %v3046_v63  ;;  %v3049_v7 = vsel %vm2996_vm2, %v3046_v63, %v3048_v27  ;;  %v2896_v19 = vadd.f32 %v2853_v6, %v2500_v57  ;;  %v7138_v1 = vpop.f32.mrf.mxu0  ;;  %v7595_v50 = vld [vmem:[#allocation11_spill] sm:$0xff]  ;;  %v3056_v31 = vrot.slane %v2898_v49, 7 }
 0x1bb   : > { %3248 = vst.msk [vmem:[#allocation3 + $0xd8] sm:$0xff] %vm1097_vm1, %v3216_v41  ;;  %v3183_v22 = vsel %vm7122_vm3, %v3049_v7, 0.0  ;;  %v3214_v54 = vadd.f32 %v3047_v32, %v2925_v52  ;;  %v5786_v45 = vpop.f32.mrf.mxu1  ;;  %v2503_v14 = vadd.f32 %v7596_v16, %v7595_v50  ;;  %v2931_v63 = vld [vmem:[#allocation3 + $0xf8] sm:$0xff]  ;;  %v526_v32 = vadd.s32 8, %v6869_v62 }
 0x1bc   : > { %v3215_v27 = vadd.f32 %v3183_v22, %v2926_v61  ;;  %v3052_v11 = vrot.slane %v2896_v19, 7  ;;  %v2899_v8 = vadd.f32 %v5786_v45, %v2511_v3  ;;  %v7149_v58 = vpop.f32.mrf.mxu0  ;;  %v7599_v3 = vld [vmem:[#allocation12_spill] sm:$0xff]  ;;  %v528_v7 = vadd.s32 24, %v6869_v62  ;;  %v7600_v61 = vld [vmem:[#allocation13_spill] sm:$0xff] }
 0x1bd   : > { %3246 = vst.msk [vmem:[#allocation3 + $0xc8] sm:$0xff] %vm1097_vm1, %v3214_v54  ;;  %v2856_v55 = vpop.f32.mrf.mxu1 }
 0x1be   : > { %3247 = vst.msk [vmem:[#allocation3 + $0xd0] sm:$0xff] %vm1097_vm1, %v3215_v27  ;;  %v3053_v37 = vsel %vm2996_vm2, %v3050_v4, %v3052_v11  ;;  %v3058_v20 = vrot.slane %v2899_v8, 7  ;;  %v2897_v26 = vadd.f32 %v2856_v55, %v2503_v14  ;;  %v5877_v35 = vpop.f32.mrf.mxu0  ;;  %v7601_v27 = vld [vmem:[#allocation14_spill] sm:$0xff] }
 0x1bf   : > { %v3185_v57 = vsel %vm7143_vm4, %v3053_v37, 0.0  ;;  %v5837_v12 = vpop.f32.mrf.mxu1  ;;  %v582_v37 = vand.u32 15, %v528_v7  ;;  %v534_v7 = vadd.s32 72, %v6869_v62 }
 0x1c0   : > { %v3217_v5 = vadd.f32 %v3185_v57, %v2928_v33  ;;  %v3059_v46 = vsel %vm2996_vm2, %v3056_v31, %v3058_v20  ;;  %v3054_v56 = vrot.slane %v2897_v26, 7  ;;  %v3693_v41 = vadd.f32 %v5837_v12, %v7599_v3  ;;  %v4038_v4 = vpop.f32.mrf.mxu0  ;;  %v7602_v33 = vld [vmem:[#allocation15_spill] sm:$0xff] }
 0x1c1   : > { %v3220_v6 = vadd.f32 %v3059_v46, %v2931_v63  ;;  %v3684_v52 = vpop.f32.mrf.mxu1  ;;  %vm7182_vm7 = vcmp.ne.s32.totalorder %v582_v37, 15 }
 0x1c2   : > { %3249 = vst.msk [vmem:[#allocation3 + $0xe0] sm:$0xff] %vm1097_vm1, %v3217_v5  ;;  %v3055_v49 = vsel %vm2996_vm2, %v3052_v11, %v3054_v56  ;;  %v3057_v19 = vsel %vm2996_vm2, %v3054_v56, %v3056_v31  ;;  %v3685_v22 = vadd.f32 %v3684_v52, %v7600_v61  ;;  %v5878_v54 = vpop.f32.mrf.mxu0  ;;  %v4167_v14 = vadd.f32 %v5877_v35, %v3693_v41 }
 0x1c3   : > { %3252 = vst.msk [vmem:[#allocation3 + $0xf8] sm:$0xff] %vm1097_vm1, %v3220_v6  ;;  %v3187_v45 = vsel %vm7156_vm5, %v3057_v19, 0.0  ;;  %v3218_v51 = vadd.f32 %v3055_v49, %v2929_v17  ;;  %v5838_v50 = vpop.f32.mrf.mxu1  ;;  %v568_v31 = vand.u32 15, %v526_v32  ;;  %vm4293_vm2 = vcmask 1046528   ;;  %v7605_v6 = vld [vmem:[#allocation16_spill] sm:$0xff]  ;;  %v4199_v49 = vld [vmem:[#allocation3 + $0x10] sm:$0xff] }
 0x1c4   : > { %v3219_v16 = vadd.f32 %v3187_v45, %v2930_v9  ;;  %v3696_v8 = vadd.f32 %v5838_v50, %v7601_v27  ;;  %v4041_v55 = vpop.f32.mrf.mxu0  ;;  %v4165_v20 = vadd.f32 %v4038_v4, %v3685_v22  ;;  %v530_v5 = vadd.s32 40, %v6869_v62 }
 0x1c5   : > { %3250 = vst.msk [vmem:[#allocation3 + $0xe8] sm:$0xff] %vm1097_vm1, %v3218_v51  ;;  %v3687_v11 = vpop.f32.mrf.mxu1  ;;  %v532_v35 = vadd.s32 56, %v6869_v62  ;;  %v4297_v63 = vrot.slane %v4167_v14, 1  ;;  %vm7177_vm6 = vcmp.ne.s32.totalorder %v568_v31, 15  ;;  %v4197_v14 = vld [vmem:[#allocation3] sm:$0xff]  ;;  %v7195_v31 = vadd.s32 104, %v6869_v62 }
 0x1c6   : > { %3251 = vst.msk [vmem:[#allocation3 + $0xf0] sm:$0xff] %vm1097_vm1, %v3219_v16  ;;  %v4168_v26 = vadd.f32 %v5878_v54, %v3696_v8  ;;  %v3688_v57 = vadd.f32 %v3687_v11, %v7602_v33  ;;  %v5881_v38 = vpop.f32.mrf.mxu0  ;;  %v4294_v17 = vrot.slane %v4165_v20, 1  ;;  %v596_v51 = vand.u32 15, %v530_v5 }
 0x1c7   : > { %v5841_v12 = vpop.f32.mrf.mxu1  ;;  %v610_v50 = vand.u32 15, %v532_v35  ;;  %v7190_v16 = vadd.s32 88, %v6869_v62 }
 0x1c8   : > { %v4299_v46 = vrot.slane %v4168_v26, 1  ;;  %v4166_v56 = vadd.f32 %v4041_v55, %v3688_v57  ;;  %v4054_v3 = vpop.f32.mrf.mxu0  ;;  %v3709_v4 = vadd.f32 %v5841_v12, %v7605_v6  ;;  %vm7205_vm8 = vcmp.ne.s32.totalorder %v596_v51, 15 }
 0x1c9   : > { %v3700_v52 = vpop.f32.mrf.mxu1  ;;  %vm7209_vm9 = vcmp.ne.s32.totalorder %v610_v50, 15  ;;  %v7227_v50 = vadd.s32 120, %v6869_v62 }
 0x1ca   : > { %v4300_v19 = vsel %vm4293_vm2, %v4297_v63, %v4299_v46  ;;  %v4295_v61 = vrot.slane %v4166_v56, 1  ;;  %v3701_v22 = vadd.f32 %v3700_v52, %v6908_v23  ;;  %v5882_v54 = vpop.f32.mrf.mxu0  ;;  %v4198_v23 = vld [vmem:[#allocation3 + $0x8] sm:$0xff]  ;;  %v4171_v26 = vadd.f32 %v5881_v38, %v3709_v4 }
 0x1cb   : > { %v4488_v9 = vadd.f32 %v4300_v19, %v4199_v49  ;;  %v5842_v45 = vpop.f32.mrf.mxu1  ;;  %v624_v56 = vand.u32 15, %v534_v7  ;;  %v638_v7 = vand.u32 15, %v7190_v16  ;;  %v4200_v49 = vld [vmem:[#allocation3 + $0x18] sm:$0xff]  ;;  %v4203_v16 = vld [vmem:[#allocation3 + $0x30] sm:$0xff]  ;;  %v666_v6 = vand.u32 15, %v7227_v50 }
 0x1cc   : > { %v4296_v27 = vsel %vm4293_vm2, %v4294_v17, %v4295_v61  ;;  %v4298_v8 = vsel %vm4293_vm2, %v4295_v61, %v4297_v63  ;;  %v4169_v55 = vadd.f32 %v4054_v3, %v3701_v22  ;;  %v4057_v11 = vpop.f32.mrf.mxu0  ;;  %v3712_v33 = vadd.f32 %v5842_v45, %v6917_v39 }
 0x1cd   : > { %4520 = vst.msk [vmem:[#allocation3 + $0x10] sm:$0xff] %vm1097_vm1, %v4488_v9  ;;  %v4455_v37 = vsel %vm7177_vm6, %v4298_v8, 0.0  ;;  %v4486_v20 = vadd.f32 %v4296_v27, %v4197_v14  ;;  %v3703_v57 = vpop.f32.mrf.mxu1  ;;  %v4305_v17 = vrot.slane %v4171_v26, 1  ;;  %vm7222_vm10 = vcmp.ne.s32.totalorder %v624_v56, 15 }
 0x1ce   : > { %v4487_v12 = vadd.f32 %v4455_v37, %v4198_v23  ;;  %v4301_v5 = vrot.slane %v4169_v55, 1  ;;  %v3704_v35 = vadd.f32 %v3703_v57, %v6928_v42  ;;  %v5885_v63 = vpop.f32.mrf.mxu0  ;;  %v7203_v3 = vadd.f32 %v5882_v54, %v3712_v33  ;;  %v4201_v23 = vld [vmem:[#allocation3 + $0x20] sm:$0xff] }
 0x1cf   : > { %4518 = vst.msk [vmem:[#allocation3] sm:$0xff] %vm1097_vm1, %v4486_v20  ;;  %v5845_v41 = vpop.f32.mrf.mxu1  ;;  %v652_v54 = vand.u32 15, %v7195_v31  ;;  %v7231_v27 = vadd.s32 136, %v6869_v62  ;;  %v7234_v8 = vadd.s32 152, %v6869_v62  ;;  %vm7262_vm11 = vcmp.ne.s32.totalorder %v638_v7, 15 }
 0x1d0   : > { %4519 = vst.msk [vmem:[#allocation3 + $0x8] sm:$0xff] %vm1097_vm1, %v4487_v12  ;;  %v4302_v39 = vsel %vm4293_vm2, %v4299_v46, %v4301_v5  ;;  %v4170_v42 = vadd.f32 %v4057_v11, %v3704_v35  ;;  %v3725_v4 = vadd.f32 %v5845_v41, %v6933_v10  ;;  %v4070_v52 = vpop.f32.mrf.mxu0  ;;  %v4307_v61 = vrot.slane %v7203_v3, 1  ;;  %v4202_v12 = vld [vmem:[#allocation3 + $0x28] sm:$0xff] }
 0x1d1   : > { %v4457_v19 = vsel %vm7182_vm7, %v4302_v39, 0.0  ;;  %v3716_v22 = vpop.f32.mrf.mxu1  ;;  %v694_v50 = vand.u32 15, %v7234_v8  ;;  %vm7280_vm12 = vcmp.ne.s32.totalorder %v652_v54, 15  ;;  %v7285_v38 = vadd.s32 184, %v6869_v62 }
 0x1d2   : > { %v4489_v9 = vadd.f32 %v4457_v19, %v4200_v49  ;;  %v4303_v45 = vrot.slane %v4170_v42, 1  ;;  %v3717_v46 = vadd.f32 %v3716_v22, %v6945_v18  ;;  %v5886_v51 = vpop.f32.mrf.mxu0  ;;  %v4308_v32 = vsel %vm4293_vm2, %v4305_v17, %v4307_v61 }
 0x1d3   : > { %v5846_v14 = vpop.f32.mrf.mxu1  ;;  %v7237_v18 = vadd.s32 168, %v6869_v62  ;;  %v4492_v11 = vadd.f32 %v4308_v32, %v4203_v16  ;;  %v4175_v26 = vadd.f32 %v5885_v63, %v3725_v4  ;;  %vm7298_vm13 = vcmp.ne.s32.totalorder %v666_v6, 15 }
 0x1d4   : > { %v4552_v55 = vld [vmem:[#allocation3 + $0x10] sm:$0xff]  ;;  %4521 = vst.msk [vmem:[#allocation3 + $0x18] sm:$0xff] %vm1097_vm1, %v4489_v9  ;;  %v4304_v37 = vsel %vm4293_vm2, %v4301_v5, %v4303_v45  ;;  %v4306_v20 = vsel %vm4293_vm2, %v4303_v45, %v4305_v17  ;;  %v4073_v33 = vpop.f32.mrf.mxu0  ;;  %v4173_v3 = vadd.f32 %v4070_v52, %v3717_v46  ;;  %v3728_v63 = vadd.f32 %v5846_v14, %v6957_v24 }
 0x1d5   : > { %v4584_v57 = vmax.f32 %v4552_v55, 0.0  ;;  %v4459_v35 = vsel %vm7205_vm8, %v4306_v20, 0.0  ;;  %v4490_v56 = vadd.f32 %v4304_v37, %v4201_v23  ;;  %v3719_v41 = vpop.f32.mrf.mxu1  ;;  %4524 = vst.msk [vmem:[#allocation3 + $0x30] sm:$0xff] %vm1097_vm1, %v4492_v11  ;;  %v680_v9 = vand.u32 15, %v7231_v27  ;;  %v4204_v37 = vld [vmem:[#allocation3 + $0x38] sm:$0xff]  ;;  %v4210_v27 = vld [vmem:[#allocation3 + $0x68] sm:$0xff] }
 0x1d6   : > { %v4550_v39 = vld [vmem:[#allocation3] sm:$0xff]  ;;  %v4491_v5 = vadd.f32 %v4459_v35, %v4202_v12  ;;  %v3720_v42 = vadd.f32 %v3719_v41, %v6965_v53  ;;  %v7254_v4 = vpop.f32.mrf.mxu0  ;;  %v4309_v19 = vrot.slane %v4173_v3, 1  ;;  %v7260_v24 = vadd.f32 %v5886_v51, %v3728_v63 }
 0x1d7   : > { %v5337_v52 = vpack.c.bf16 %v4584_v57, %v4584_v57  ;;  %v4551_v17 = vld [vmem:[#allocation3 + $0x8] sm:$0xff]  ;;  %v4582_v49 = vmax.f32 %v4550_v39, 0.0  ;;  %4522 = vst.msk [vmem:[#allocation3 + $0x20] sm:$0xff] %vm1097_vm1, %v4490_v56  ;;  %v5849_v22 = vpop.f32.mrf.mxu1  ;;  %v4313_v14 = vrot.slane %v4175_v26, 1  ;;  %v708_v51 = vand.u32 15, %v7237_v18  ;;  %v4207_v39 = vld [vmem:[#allocation3 + $0x50] sm:$0xff] }
 0x1d8   : > { %v4583_v45 = vmax.f32 %v4551_v17, 0.0  ;;  %4523 = vst.msk [vmem:[#allocation3 + $0x28] sm:$0xff] %vm1097_vm1, %v4491_v5  ;;  %v4174_v53 = vadd.f32 %v4073_v33, %v3720_v42  ;;  %v4086_v46 = vpop.f32.mrf.mxu0  ;;  %v4310_v55 = vsel %vm4293_vm2, %v4307_v61, %v4309_v19  ;;  %v4315_v20 = vrot.slane %v7260_v24, 1  ;;  %v4205_v63 = vld [vmem:[#allocation3 + $0x40] sm:$0xff] }
 0x1d9   : > { %4744 = vst.msk [vmem:[%s7249_s9 + $0x8] sm:$0xf] %vm455_vm0, %v5337_v52  ;;  %v5335_v32 = vpack.c.bf16 %v4582_v49, %v4582_v49  ;;  %v3732_v11 = vpop.f32.mrf.mxu1  ;;  %v4461_v7 = vsel %vm7209_vm9, %v4310_v55, 0.0  ;;  %v3741_v26 = vadd.f32 %v5849_v22, %v6970_v30  ;;  %v4206_v52 = vld [vmem:[#allocation3 + $0x48] sm:$0xff]  ;;  %vm7332_vm14 = vcmp.ne.s32.totalorder %v680_v9, 15 }
 0x1da   : > { %v5336_v23 = vpack.c.bf16 %v4583_v45, %v4583_v45  ;;  %v4311_v33 = vrot.slane %v4174_v53, 1  ;;  %v5890_v57 = vpop.f32.mrf.mxu0  ;;  %v4493_v35 = vadd.f32 %v4461_v7, %v4204_v37  ;;  %v3733_v61 = vadd.f32 %v3732_v11, %v6982_v25 }
 0x1db   : > { %4742 = vst.msk [vmem:[%s7249_s9] sm:$0xf] %vm455_vm0, %v5335_v32  ;;  %v4553_v12 = vld [vmem:[#allocation3 + $0x18] sm:$0xff]  ;;  %v5850_v56 = vpop.f32.mrf.mxu1  ;;  %v4316_v5 = vsel %vm4293_vm2, %v4313_v14, %v4315_v20  ;;  %v7296_v45 = vadd.s32 200, %v6869_v62  ;;  %v4179_v10 = vadd.f32 %v7254_v4, %v3741_v26  ;;  %vm7345_vm15 = vcmp.ne.s32.totalorder %v694_v50, 15 }
 0x1dc   : > { %4743 = vst.msk [vmem:[%s7249_s9 + $0x4] sm:$0xf] %vm455_vm0, %v5336_v23  ;;  %v4585_v41 = vmax.f32 %v4553_v12, 0.0  ;;  %v4312_v30 = vsel %vm4293_vm2, %v4309_v19, %v4311_v33  ;;  %v4314_v25 = vsel %vm4293_vm2, %v4311_v33, %v4313_v14  ;;  %v4089_v42 = vpop.f32.mrf.mxu0  ;;  %v4556_v31 = vld [vmem:[#allocation3 + $0x30] sm:$0xff]  ;;  %v4496_v54 = vadd.f32 %v4316_v5, %v4207_v39 }
 0x1dd   : > { %4525 = vst.msk [vmem:[#allocation3 + $0x38] sm:$0xff] %vm1097_vm1, %v4493_v35  ;;  %v4463_v17 = vsel %vm7222_vm10, %v4314_v25, 0.0  ;;  %v4494_v49 = vadd.f32 %v4312_v30, %v4205_v63  ;;  %v3735_v22 = vpop.f32.mrf.mxu1  ;;  %v4588_v53 = vmax.f32 %v4556_v31, 0.0  ;;  %v4177_v14 = vadd.f32 %v4086_v46, %v3733_v61 }
 0x1de   : > { %v5338_v24 = vpack.c.bf16 %v4585_v41, %v4585_v41  ;;  %v4554_v19 = vld [vmem:[#allocation3 + $0x20] sm:$0xff]  ;;  %v4495_v32 = vadd.f32 %v4463_v17, %v4206_v52  ;;  %v5893_v55 = vpop.f32.mrf.mxu0  ;;  %4528 = vst.msk [vmem:[#allocation3 + $0x50] sm:$0xff] %vm1097_vm1, %v4496_v54  ;;  %v3744_v7 = vadd.f32 %v5850_v56, %v6991_v28  ;;  %v3736_v33 = vadd.f32 %v3735_v22, %v7002_v59 }
 0x1df   : > { %v4555_v23 = vld [vmem:[#allocation3 + $0x28] sm:$0xff]  ;;  %v4586_v37 = vmax.f32 %v4554_v19, 0.0  ;;  %4526 = vst.msk [vmem:[#allocation3 + $0x40] sm:$0xff] %vm1097_vm1, %v4494_v49  ;;  %v5853_v12 = vpop.f32.mrf.mxu1  ;;  %v5341_v6 = vpack.c.bf16 %v4588_v53, %v4588_v53  ;;  %v4317_v35 = vrot.slane %v4177_v14, 1  ;;  %v7312_v28 = vadd.s32 216, %v6869_v62  ;;  %v4211_v19 = vld [vmem:[#allocation3 + $0x70] sm:$0xff] }
 0x1e0   : > { %4745 = vst.msk [vmem:[%s7249_s9 + $0xc] sm:$0xf] %vm455_vm0, %v5338_v24  ;;  %v4587_v46 = vmax.f32 %v4555_v23, 0.0  ;;  %v3757_v61 = vadd.f32 %v5853_v12, %v7007_v44  ;;  %v4102_v41 = vpop.f32.mrf.mxu0  ;;  %v4180_v5 = vadd.f32 %v5890_v57, %v3744_v7  ;;  %v4178_v4 = vadd.f32 %v4089_v42, %v3736_v33  ;;  %v4208_v57 = vld [vmem:[#allocation3 + $0x58] sm:$0xff]  ;;  %v4209_v14 = vld [vmem:[#allocation3 + $0x60] sm:$0xff] }
 0x1e1   : > { %4527 = vst.msk [vmem:[#allocation3 + $0x48] sm:$0xff] %vm1097_vm1, %v4495_v32  ;;  %v5339_v39 = vpack.c.bf16 %v4586_v37, %v4586_v37  ;;  %v3748_v26 = vpop.f32.mrf.mxu1  ;;  %v4318_v56 = vsel %vm4293_vm2, %v4315_v20, %v4317_v35  ;;  %v4321_v44 = vrot.slane %v4179_v10, 1  ;;  %vm7371_vm3 = vcmp.ne.s32.totalorder %v708_v51, 15 }
 0x1e2   : > { %4748 = vst.msk [vmem:[%s7249_s9 + $0x18] sm:$0xf] %vm455_vm0, %v5341_v6  ;;  %v5340_v59 = vpack.c.bf16 %v4587_v46, %v4587_v46  ;;  %v7317_v63 = vadd.f32 %v5893_v55, %v3757_v61  ;;  %v3749_v30 = vadd.f32 %v3748_v26, %v7019_v34  ;;  %v5894_v25 = vpop.f32.mrf.mxu0  ;;  %v4465_v42 = vsel %vm7262_vm11, %v4318_v56, 0.0 }
 0x1e3   : > { %4746 = vst.msk [vmem:[%s7249_s9 + $0x10] sm:$0xf] %vm455_vm0, %v5339_v39  ;;  %v4323_v31 = vrot.slane %v4180_v5, 1  ;;  %v4319_v54 = vrot.slane %v4178_v4, 1  ;;  %v5854_v52 = vpop.f32.mrf.mxu1  ;;  %v4497_v49 = vadd.f32 %v4465_v42, %v4208_v57 }
 0x1e4   : > { %4747 = vst.msk [vmem:[%s7249_s9 + $0x14] sm:$0xf] %vm455_vm0, %v5340_v59  ;;  %v4557_v17 = vld [vmem:[#allocation3 + $0x38] sm:$0xff]  ;;  %v4329_v20 = vrot.slane %v7317_v63, 1  ;;  %v7327_v22 = vadd.f32 %v4102_v41, %v3749_v30  ;;  %v3760_v34 = vadd.f32 %v5854_v52, %v7031_v29  ;;  %v4105_v24 = vpop.f32.mrf.mxu0 }
 0x1e5   : > { %v4589_v16 = vmax.f32 %v4557_v17, 0.0  ;;  %v4324_v32 = vsel %vm4293_vm2, %v4321_v44, %v4323_v31  ;;  %v4320_v55 = vsel %vm4293_vm2, %v4317_v35, %v4319_v54  ;;  %v4322_v23 = vsel %vm4293_vm2, %v4319_v54, %v4321_v44  ;;  %v3751_v37 = vpop.f32.mrf.mxu1  ;;  %v4560_v10 = vld [vmem:[#allocation3 + $0x50] sm:$0xff]  ;;  %4529 = vst.msk [vmem:[#allocation3 + $0x58] sm:$0xff] %vm1097_vm1, %v4497_v49  ;;  %v4212_v44 = vld [vmem:[#allocation3 + $0x78] sm:$0xff] }
 0x1e6   : > { %v4558_v7 = vld [vmem:[#allocation3 + $0x40] sm:$0xff]  ;;  %v4500_v29 = vadd.f32 %v4324_v32, %v4211_v19  ;;  %v4467_v9 = vsel %vm7280_vm12, %v4322_v23, 0.0  ;;  %v4498_v33 = vadd.f32 %v4320_v55, %v4209_v14  ;;  %v4325_v12 = vrot.slane %v7327_v22, 1  ;;  %v5897_v6 = vpop.f32.mrf.mxu0 }
 0x1e7   : > { %v5342_v46 = vpack.c.bf16 %v4589_v16, %v4589_v16  ;;  %v4592_v61 = vmax.f32 %v4560_v10, 0.0  ;;  %v4590_v41 = vmax.f32 %v4558_v7, 0.0  ;;  %v4499_v39 = vadd.f32 %v4467_v9, %v4210_v27  ;;  %v5857_v5 = vpop.f32.mrf.mxu1  ;;  %v4215_v16 = vld [vmem:[#allocation3 + $0x90] sm:$0xff] }
 0x1e8   : > { %v4559_v35 = vld [vmem:[#allocation3 + $0x48] sm:$0xff]  ;;  %4532 = vst.msk [vmem:[#allocation3 + $0x70] sm:$0xff] %vm1097_vm1, %v4500_v29  ;;  %4530 = vst.msk [vmem:[#allocation3 + $0x60] sm:$0xff] %vm1097_vm1, %v4498_v33  ;;  %v4326_v3 = vsel %vm4293_vm2, %v4323_v31, %v4325_v12  ;;  %v7352_v59 = vadd.f32 %v5894_v25, %v3760_v34  ;;  %v3752_v56 = vadd.f32 %v3751_v37, %v7039_v36  ;;  %v4118_v30 = vpop.f32.mrf.mxu0  ;;  %v722_v34 = vand.u32 15, %v7285_v38  ;;  %v4213_v29 = vld [vmem:[#allocation3 + $0x80] sm:$0xff] }
 0x1e9   : > { %v4591_v26 = vmax.f32 %v4559_v35, 0.0  ;;  %4749 = vst.msk [vmem:[%s7249_s9 + $0x1c] sm:$0xf] %vm455_vm0, %v5342_v46  ;;  %v5345_v8 = vpack.c.bf16 %v4592_v61, %v4592_v61  ;;  %v5343_v50 = vpack.c.bf16 %v4590_v41, %v4590_v41  ;;  %v4469_v57 = vsel %vm7298_vm13, %v4326_v3, 0.0  ;;  %v3764_v25 = vpop.f32.mrf.mxu1  ;;  %v4214_v61 = vld [vmem:[#allocation3 + $0x88] sm:$0xff] }
 0x1ea   : > { %4531 = vst.msk [vmem:[#allocation3 + $0x68] sm:$0xff] %vm1097_vm1, %v4499_v39  ;;  %v3773_v42 = vadd.f32 %v5857_v5, %v7044_v2  ;;  %v4501_v54 = vadd.f32 %v4469_v57, %v4212_v44  ;;  %v4331_v36 = vrot.slane %v7352_v59, 1  ;;  %v4182_v52 = vadd.f32 %v4105_v24, %v3752_v56  ;;  %v5898_v17 = vpop.f32.mrf.mxu0 }
 0x1eb   : > { %v5344_v31 = vpack.c.bf16 %v4591_v26, %v4591_v26  ;;  %4752 = vst.msk [vmem:[%s7249_s9 + $0x28] sm:$0xf] %vm455_vm0, %v5345_v8  ;;  %4750 = vst.msk [vmem:[%s7249_s9 + $0x20] sm:$0xf] %vm455_vm0, %v5343_v50  ;;  %v3765_v22 = vadd.f32 %v3764_v25, %v7056_v15  ;;  %v5858_v11 = vpop.f32.mrf.mxu1  ;;  %v736_v24 = vand.u32 15, %v7296_v45  ;;  %v750_v32 = vand.u32 15, %v7312_v28 }
 0x1ec   : > { %v7366_v49 = vadd.f32 %v5897_v6, %v3773_v42  ;;  %4533 = vst.msk [vmem:[#allocation3 + $0x78] sm:$0xff] %vm1097_vm1, %v4501_v54  ;;  %v4332_v15 = vsel %vm4293_vm2, %v4329_v20, %v4331_v36  ;;  %v4327_v19 = vrot.slane %v4182_v52, 1  ;;  %v3776_v18 = vadd.f32 %v5858_v11, %v7065_v40  ;;  %v4121_v51 = vpop.f32.mrf.mxu0  ;;  %v4561_v14 = vld [vmem:[#allocation3 + $0x58] sm:$0xff] }
 0x1ed   : > { %4751 = vst.msk [vmem:[%s7249_s9 + $0x24] sm:$0xf] %vm455_vm0, %v5344_v31  ;;  %v4504_v55 = vadd.f32 %v4332_v15, %v4215_v16  ;;  %v4185_v23 = vadd.f32 %v4118_v30, %v3765_v22  ;;  %v3767_v37 = vpop.f32.mrf.mxu1  ;;  %v7387_v10 = vadd.s32 248, %v6869_v62  ;;  %v4593_v7 = vmax.f32 %v4561_v14, 0.0  ;;  %v4216_v25 = vld [vmem:[#allocation3 + $0x98] sm:$0xff]  ;;  %v4219_v22 = vld [vmem:[#allocation3 + $0xb0] sm:$0xff] }
 0x1ee   : > { %v4337_v38 = vrot.slane %v7366_v49, 1  ;;  %v4328_v27 = vsel %vm4293_vm2, %v4325_v12, %v4327_v19  ;;  %v4330_v40 = vsel %vm4293_vm2, %v4327_v19, %v4329_v20  ;;  %v7393_v9 = vadd.f32 %v5898_v17, %v3776_v18  ;;  %v5901_v33 = vpop.f32.mrf.mxu0 }
 0x1ef   : > { %v4564_v6 = vld [vmem:[#allocation3 + $0x70] sm:$0xff]  ;;  %v4562_v46 = vld [vmem:[#allocation3 + $0x60] sm:$0xff]  ;;  %4536 = vst.msk [vmem:[#allocation3 + $0x90] sm:$0xff] %vm1097_vm1, %v4504_v55  ;;  %v4471_v35 = vsel %vm7332_vm14, %v4330_v40, 0.0  ;;  %v4502_v41 = vadd.f32 %v4328_v27, %v4213_v29  ;;  %v4333_v39 = vrot.slane %v4185_v23, 1  ;;  %v3768_v12 = vadd.f32 %v3767_v37, %v7076_v0  ;;  %v5861_v5 = vpop.f32.mrf.mxu1  ;;  %v4218_v27 = vld [vmem:[#allocation3 + $0xa8] sm:$0xff] }
 0x1f0   : > { %v5346_v63 = vpack.c.bf16 %v4593_v7, %v4593_v7  ;;  %v4596_v26 = vmax.f32 %v4564_v6, 0.0  ;;  %v4594_v3 = vmax.f32 %v4562_v46, 0.0  ;;  %v4503_v59 = vadd.f32 %v4471_v35, %v4214_v61  ;;  %v4134_v56 = vpop.f32.mrf.mxu0 }
 0x1f1   : > { %v4563_v20 = vld [vmem:[#allocation3 + $0x68] sm:$0xff]  ;;  %4534 = vst.msk [vmem:[#allocation3 + $0x80] sm:$0xff] %vm1097_vm1, %v4502_v41  ;;  %v4334_v8 = vsel %vm4293_vm2, %v4331_v36, %v4333_v39  ;;  %v4339_v53 = vrot.slane %v7393_v9, 1  ;;  %v4186_v50 = vadd.f32 %v4121_v51, %v3768_v12  ;;  %v3780_v44 = vpop.f32.mrf.mxu1  ;;  %vm7402_vm4 = vcmp.ne.s32.totalorder %v722_v34, 15  ;;  %v4217_v51 = vld [vmem:[#allocation3 + $0xa0] sm:$0xff] }
 0x1f2   : > { %v4595_v30 = vmax.f32 %v4563_v20, 0.0  ;;  %4753 = vst.msk [vmem:[%s7249_s9 + $0x2c] sm:$0xf] %vm455_vm0, %v5346_v63  ;;  %v5349_v0 = vpack.c.bf16 %v4596_v26, %v4596_v26  ;;  %v5347_v42 = vpack.c.bf16 %v4594_v3, %v4594_v3  ;;  %v4473_v31 = vsel %vm7345_vm15, %v4334_v8, 0.0  ;;  %v5902_v36 = vpop.f32.mrf.mxu0  ;;  %v4223_v8 = vld [vmem:[#allocation3 + $0xd0] sm:$0xff] }
 0x1f3   : > { %4535 = vst.msk [vmem:[#allocation3 + $0x88] sm:$0xff] %vm1097_vm1, %v4503_v59  ;;  %v3789_v54 = vadd.f32 %v5861_v5, %v7081_v43  ;;  %v4565_v17 = vld [vmem:[#allocation3 + $0x78] sm:$0xff]  ;;  %v4505_v49 = vadd.f32 %v4473_v31, %v4216_v25  ;;  %v4340_v11 = vsel %vm4293_vm2, %v4337_v38, %v4339_v53  ;;  %v4335_v34 = vrot.slane %v4186_v50, 1  ;;  %v5862_v16 = vpop.f32.mrf.mxu1 }
 0x1f4   : > { %v5348_v52 = vpack.c.bf16 %v4595_v30, %v4595_v30  ;;  %4756 = vst.msk [vmem:[%s7249_s9 + $0x38] sm:$0xf] %vm455_vm0, %v5349_v0  ;;  %4754 = vst.msk [vmem:[%s7249_s9 + $0x30] sm:$0xf] %vm455_vm0, %v5347_v42  ;;  %v4597_v4 = vmax.f32 %v4565_v17, 0.0  ;;  %v4508_v15 = vadd.f32 %v4340_v11, %v4219_v22  ;;  %v3781_v43 = vadd.f32 %v3780_v44, %v7093_v13  ;;  %v4137_v18 = vpop.f32.mrf.mxu0  ;;  %v4221_v22 = vld [vmem:[#allocation3 + $0xc0] sm:$0xff] }
 0x1f5   : > { %v7419_v19 = vadd.f32 %v5901_v33, %v3789_v54  ;;  %4537 = vst.msk [vmem:[#allocation3 + $0x98] sm:$0xff] %vm1097_vm1, %v4505_v49  ;;  %v4336_v14 = vsel %vm4293_vm2, %v4333_v39, %v4335_v34  ;;  %v4338_v55 = vsel %vm4293_vm2, %v4335_v34, %v4337_v38  ;;  %v3792_v23 = vadd.f32 %v5862_v16, %v7105_v48  ;;  %v3783_v37 = vpop.f32.mrf.mxu1 }
 0x1f6   : > { %4755 = vst.msk [vmem:[%s7249_s9 + $0x34] sm:$0xf] %vm455_vm0, %v5348_v52  ;;  %vm7430_vm5 = vcmp.ne.s32.totalorder %v736_v24, 15  ;;  %v5350_v13 = vpack.c.bf16 %v4597_v4, %v4597_v4  ;;  %v4568_v29 = vld [vmem:[#allocation3 + $0x90] sm:$0xff]  ;;  %v4475_v40 = vsel %vm7371_vm3, %v4338_v55, 0.0  ;;  %v4506_v33 = vadd.f32 %v4336_v14, %v4217_v51  ;;  %v5905_v38 = vpop.f32.mrf.mxu0 }
 0x1f7   : > { %4540 = vst.msk [vmem:[#allocation3 + $0xb0] sm:$0xff] %vm1097_vm1, %v4508_v15  ;;  %v778_v48 = vand.u32 15, %v7387_v10  ;;  %v4600_v6 = vmax.f32 %v4568_v29, 0.0  ;;  %v4507_v46 = vadd.f32 %v4475_v40, %v4218_v27  ;;  %v4189_v61 = vadd.f32 %v4134_v56, %v3781_v43  ;;  %v5865_v24 = vpop.f32.mrf.mxu1  ;;  %v4222_v43 = vld [vmem:[#allocation3 + $0xc8] sm:$0xff] }
 0x1f8   : > { %v7438_v45 = vadd.f32 %v5902_v36, %v3792_v23  ;;  %4757 = vst.msk [vmem:[%s7249_s9 + $0x3c] sm:$0xf] %vm455_vm0, %v5350_v13  ;;  %v4566_v35 = vld [vmem:[#allocation3 + $0x80] sm:$0xff]  ;;  %v4345_v41 = vrot.slane %v7419_v19, 1  ;;  %v3784_v2 = vadd.f32 %v3783_v37, %v7113_v21  ;;  %v3805_v39 = vadd.f32 %v5865_v24, %v7118_v47  ;;  %v4150_v47 = vpop.f32.mrf.mxu0 }
 0x1f9   : > { %4538 = vst.msk [vmem:[#allocation3 + $0xa0] sm:$0xff] %vm1097_vm1, %v4506_v33  ;;  %vm7448_vm6 = vcmp.ne.s32.totalorder %v750_v32, 15  ;;  %v5353_v12 = vpack.c.bf16 %v4600_v6, %v4600_v6  ;;  %v4598_v63 = vmax.f32 %v4566_v35, 0.0  ;;  %4539 = vst.msk [vmem:[#allocation3 + $0xa8] sm:$0xff] %vm1097_vm1, %v4507_v46  ;;  %v4341_v26 = vrot.slane %v4189_v61, 1  ;;  %v3796_v3 = vpop.f32.mrf.mxu1 }
 0x1fa   : > { %v4567_v5 = vld [vmem:[#allocation3 + $0x88] sm:$0xff]  ;;  %v4347_v20 = vrot.slane %v7438_v45, 1  ;;  %v4190_v56 = vadd.f32 %v4137_v18, %v3784_v2  ;;  %v3797_v21 = vadd.f32 %v3796_v3, %v7130_v60  ;;  %v7456_v28 = vadd.s32 232, %v6869_v62  ;;  %v4220_v62 = vld [vmem:[#allocation3 + $0xb8] sm:$0xff]  ;;  %v5906_v16 = vpop.f32.mrf.mxu0 }
 0x1fb   : > { %v4599_v59 = vmax.f32 %v4567_v5, 0.0  ;;  %4760 = vst.msk [vmem:[%s7249_s9 + $0x48] sm:$0xf] %vm455_vm0, %v5353_v12  ;;  %v5351_v32 = vpack.c.bf16 %v4598_v63, %v4598_v63  ;;  %v4342_v30 = vsel %vm4293_vm2, %v4339_v53, %v4341_v26  ;;  %v5866_v44 = vpop.f32.mrf.mxu1  ;;  %vm7464_vm7 = vcmp.ne.s32.totalorder %v778_v48, 15  ;;  %v4224_v48 = vld [vmem:[#allocation3 + $0xd8] sm:$0xff] }
 0x1fc   : > { %v4348_v50 = vsel %vm4293_vm2, %v4345_v41, %v4347_v20  ;;  %v4569_v42 = vld [vmem:[#allocation3 + $0x98] sm:$0xff]  ;;  %v4477_v25 = vsel %vm7402_vm4, %v4342_v30, 0.0  ;;  %v4343_v54 = vrot.slane %v4190_v56, 1  ;;  %v4195_v52 = vadd.f32 %v5905_v38, %v3805_v39  ;;  %v4153_v61 = vpop.f32.mrf.mxu0 }
 0x1fd   : > { %v5352_v60 = vpack.c.bf16 %v4599_v59, %v4599_v59  ;;  %v4512_v31 = vadd.f32 %v4348_v50, %v4223_v8  ;;  %4758 = vst.msk [vmem:[%s7249_s9 + $0x40] sm:$0xf] %vm455_vm0, %v5351_v32  ;;  %v4601_v9 = vmax.f32 %v4569_v42, 0.0  ;;  %v4509_v36 = vadd.f32 %v4477_v25, %v4220_v62  ;;  %v3799_v4 = vpop.f32.mrf.mxu1  ;;  %v4228_v12 = vld [vmem:[#allocation3 + $0xf8] sm:$0xff]  ;;  %v4226_v8 = vld [vmem:[#allocation3 + $0xe8] sm:$0xff] }
 0x1fe   : > { %v4572_v53 = vld [vmem:[#allocation3 + $0xb0] sm:$0xff]  ;;  %v4193_v17 = vadd.f32 %v4150_v47, %v3797_v21  ;;  %v4344_v11 = vsel %vm4293_vm2, %v4341_v26, %v4343_v54  ;;  %v4346_v57 = vsel %vm4293_vm2, %v4343_v54, %v4345_v41  ;;  %v3808_v34 = vadd.f32 %v5866_v44, %v7138_v1  ;;  %v4225_v21 = vld [vmem:[#allocation3 + $0xe0] sm:$0xff] }
 0x1ff   : > { %4759 = vst.msk [vmem:[%s7249_s9 + $0x44] sm:$0xf] %vm455_vm0, %v5352_v60  ;;  %v4604_v49 = vmax.f32 %v4572_v53, 0.0  ;;  %v5354_v15 = vpack.c.bf16 %v4601_v9, %v4601_v9  ;;  %v4479_v18 = vsel %vm7430_vm5, %v4346_v57, 0.0  ;;  %v4510_v51 = vadd.f32 %v4344_v11, %v4221_v22 }
 0x200   : > { %4544 = vst.msk [vmem:[#allocation3 + $0xd0] sm:$0xff] %vm1097_vm1, %v4512_v31  ;;  %v4570_v19 = vld [vmem:[#allocation3 + $0xa0] sm:$0xff]  ;;  %4541 = vst.msk [vmem:[#allocation3 + $0xb8] sm:$0xff] %vm1097_vm1, %v4509_v36  ;;  %v4349_v14 = vrot.slane %v4193_v17, 1  ;;  %v4571_v23 = vld [vmem:[#allocation3 + $0xa8] sm:$0xff]  ;;  %v4511_v13 = vadd.f32 %v4479_v18, %v4222_v43  ;;  %v4196_v29 = vadd.f32 %v5906_v16, %v3808_v34  ;;  %v3800_v40 = vadd.f32 %v3799_v4, %v7149_v58 }
 0x201   : > { %v5357_v55 = vpack.c.bf16 %v4604_v49, %v4604_v49  ;;  %v4602_v37 = vmax.f32 %v4570_v19, 0.0  ;;  %4761 = vst.msk [vmem:[%s7249_s9 + $0x4c] sm:$0xf] %vm455_vm0, %v5354_v15  ;;  %v4603_v1 = vmax.f32 %v4571_v23, 0.0  ;;  %v764_v7 = vand.u32 15, %v7456_v28  ;;  %v4227_v58 = vld [vmem:[#allocation3 + $0xf0] sm:$0xff] }
 0x202   : > { %4542 = vst.msk [vmem:[#allocation3 + $0xc0] sm:$0xff] %vm1097_vm1, %v4510_v51  ;;  %v4350_v27 = vsel %vm4293_vm2, %v4347_v20, %v4349_v14  ;;  %4543 = vst.msk [vmem:[#allocation3 + $0xc8] sm:$0xff] %vm1097_vm1, %v4511_v13  ;;  %v4353_v38 = vrot.slane %v4195_v52, 1  ;;  %v4355_v46 = vrot.slane %v4196_v29, 1  ;;  %v4194_v35 = vadd.f32 %v4153_v61, %v3800_v40 }
 0x203   : > { %4764 = vst.msk [vmem:[%s7249_s9 + $0x58] sm:$0xf] %vm455_vm0, %v5357_v55  ;;  %v5355_v33 = vpack.c.bf16 %v4602_v37, %v4602_v37  ;;  %v4481_v6 = vsel %vm7448_vm6, %v4350_v27, 0.0  ;;  %v5356_v45 = vpack.c.bf16 %v4603_v1, %v4603_v1  ;;  %vm7501_vm8 = vcmp.ne.s32.totalorder %v764_v7, 15 }
 0x204   : > { %v4513_v24 = vadd.f32 %v4481_v6, %v4224_v48  ;;  %v4356_v41 = vsel %vm4293_vm2, %v4353_v38, %v4355_v46  ;;  %v4389_v2 = vsel %vm4293_vm2, %v4355_v46, 0.0  ;;  %v4351_v26 = vrot.slane %v4194_v35, 1 }
 0x205   : > { %4762 = vst.msk [vmem:[%s7249_s9 + $0x50] sm:$0xf] %vm455_vm0, %v5355_v33  ;;  %4763 = vst.msk [vmem:[%s7249_s9 + $0x54] sm:$0xf] %vm455_vm0, %v5356_v45  ;;  %v4485_v10 = vsel %vm7464_vm7, %v4389_v2, 0.0  ;;  %v4516_v5 = vadd.f32 %v4356_v41, %v4227_v58 }
 0x206   : > { %4545 = vst.msk [vmem:[#allocation3 + $0xd8] sm:$0xff] %vm1097_vm1, %v4513_v24  ;;  %v4517_v59 = vadd.f32 %v4485_v10, %v4228_v12  ;;  %v4352_v47 = vsel %vm4293_vm2, %v4349_v14, %v4351_v26  ;;  %v4354_v28 = vsel %vm4293_vm2, %v4351_v26, %v4353_v38 }
 0x207   : > { %v4576_v39 = vld [vmem:[#allocation3 + $0xd0] sm:$0xff]  ;;  %v4573_v20 = vld [vmem:[#allocation3 + $0xb8] sm:$0xff]  ;;  %4548 = vst.msk [vmem:[#allocation3 + $0xf0] sm:$0xff] %vm1097_vm1, %v4516_v5  ;;  %v4483_v50 = vsel %vm7501_vm8, %v4354_v28, 0.0  ;;  %v4514_v44 = vadd.f32 %v4352_v47, %v4225_v21 }
 0x208   : > { %v4608_v3 = vmax.f32 %v4576_v39, 0.0  ;;  %v4605_v56 = vmax.f32 %v4573_v20, 0.0  ;;  %4549 = vst.msk [vmem:[#allocation3 + $0xf8] sm:$0xff] %vm1097_vm1, %v4517_v59  ;;  %v4515_v62 = vadd.f32 %v4483_v50, %v4226_v8 }
 0x209   : > { %v4574_v30 = vld [vmem:[#allocation3 + $0xc0] sm:$0xff]  ;;  %v4575_v60 = vld [vmem:[#allocation3 + $0xc8] sm:$0xff]  ;;  %4546 = vst.msk [vmem:[#allocation3 + $0xe0] sm:$0xff] %vm1097_vm1, %v4514_v44 }
 0x20a   : > { %v5361_v32 = vpack.c.bf16 %v4608_v3, %v4608_v3  ;;  %v5358_v0 = vpack.c.bf16 %v4605_v56, %v4605_v56  ;;  %v4606_v42 = vmax.f32 %v4574_v30, 0.0  ;;  %v4607_v25 = vmax.f32 %v4575_v60, 0.0  ;;  %4547 = vst.msk [vmem:[#allocation3 + $0xe8] sm:$0xff] %vm1097_vm1, %v4515_v62 }
 0x20c   : > { %4768 = vst.msk [vmem:[%s7249_s9 + $0x68] sm:$0xf] %vm455_vm0, %v5361_v32  ;;  %4765 = vst.msk [vmem:[%s7249_s9 + $0x5c] sm:$0xf] %vm455_vm0, %v5358_v0  ;;  %v5359_v31 = vpack.c.bf16 %v4606_v42, %v4606_v42  ;;  %v5360_v54 = vpack.c.bf16 %v4607_v25, %v4607_v25 }
 0x20d   : > { %v4577_v9 = vld [vmem:[#allocation3 + $0xd8] sm:$0xff] }
 0x20e   : > { %4766 = vst.msk [vmem:[%s7249_s9 + $0x60] sm:$0xf] %vm455_vm0, %v5359_v31  ;;  %v4609_v53 = vmax.f32 %v4577_v9, 0.0  ;;  %4767 = vst.msk [vmem:[%s7249_s9 + $0x64] sm:$0xf] %vm455_vm0, %v5360_v54  ;;  %v4580_v36 = vld [vmem:[#allocation3 + $0xf0] sm:$0xff] }
 0x20f   : > { %v4581_v17 = vld [vmem:[#allocation3 + $0xf8] sm:$0xff]  ;;  %v4612_v49 = vmax.f32 %v4580_v36, 0.0 }
 0x210   : > { %v5362_v52 = vpack.c.bf16 %v4609_v53, %v4609_v53  ;;  %v4613_v22 = vmax.f32 %v4581_v17, 0.0  ;;  %v4578_v57 = vld [vmem:[#allocation3 + $0xe0] sm:$0xff] }
 0x211   : > { %v5365_v11 = vpack.c.bf16 %v4612_v49, %v4612_v49  ;;  %v4579_v16 = vld [vmem:[#allocation3 + $0xe8] sm:$0xff]  ;;  %v4610_v4 = vmax.f32 %v4578_v57, 0.0 }
 0x212   : > { %4769 = vst.msk [vmem:[%s7249_s9 + $0x6c] sm:$0xf] %vm455_vm0, %v5362_v52  ;;  %v5366_v34 = vpack.c.bf16 %v4613_v22, %v4613_v22  ;;  %v4611_v15 = vmax.f32 %v4579_v16, 0.0 }
 0x213   : > { %4772 = vst.msk [vmem:[%s7249_s9 + $0x78] sm:$0xf] %vm455_vm0, %v5365_v11  ;;  %v5363_v19 = vpack.c.bf16 %v4610_v4, %v4610_v4 }
 0x214   : > { %4773 = vst.msk [vmem:[%s7249_s9 + $0x7c] sm:$0xf] %vm455_vm0, %v5366_v34  ;;  %v5364_v43 = vpack.c.bf16 %v4611_v15, %v4611_v15 }
 0x215   : > { %4770 = vst.msk [vmem:[%s7249_s9 + $0x70] sm:$0xf] %vm455_vm0, %v5363_v19 }
 0x216   : > { %4771 = vst.msk [vmem:[%s7249_s9 + $0x74] sm:$0xf] %vm455_vm0, %v5364_v43 }
 0x217 PF: > { %s15_s0 = sadd.s32 1, %s6097_s0   ;;  %s7636_s18 = smov %s6093_s19 }
 0x218   : > { %p12_p5 = scmp.ge.s32.totalorder %s15_s0, 4   ;;  %s7637_s19 = smov %s7639_s2 }
 0x21a   :  { %14 = sbr.rel (!%p12_p5) target bundleno = 2 (0x2), region = 90 }

</bundles_post_ra>
